<compile_context>
chip_gen: v7x
topology: tpu7x:2x2x1
jax: 0.10.0
libtpu: 0.0.40
codegen_flags: <defaults>
</compile_context>

<pallas_src>
import numpy as np
import jax
import jax.numpy as jnp
from jax.experimental import pallas as pl
from jax.experimental.pallas import tpu as pltpu


# ----------------------------- fixed geometry ------------------------------
# The Linear(32*7*7, 10) in the PyTorch module pins the input to 1x28x28.
H_IN = 28
C1, C2 = 16, 32
KS, PAD = 5, 2
H1 = H_IN // 2                 # 14 : conv1 pooled output
H2 = H1 // 2                   # 7  : conv2 pooled output
HP = H1 + 2 * PAD              # 18 : conv1 output padded with conv2's halo
NP = HP * HP                   # 324 rows of the padded (18,18) layout
GUARD = PAD * HP + PAD         # 38 zero guard rows for shifted conv2 reads
K1 = KS * KS                   # 25 (Cin = 1)
K1P = 32                       # conv1 contraction padded for clean sublanes
NPOOL = NP - (HP + 1)          # 305 rows covered by the 2x2-pool shift-max
NP2 = H2 * H2                  # 49 pooled conv2 pixels per image
NFEAT = C2 * NP2               # 1568
NCLS = 10
NCLS_PAD = 128                 # lane-dense linear output


def _round_up(x, m):
    return ((x + m - 1) // m) * m


def _pick_tile_m(M, cap):
    """>=2 grid steps whenever rows can be split on 8-row boundaries, so
    dimension_semantics=("parallel",) can shard across v7x's 2 TensorCores;
    cap keeps per-step VMEM inside v5e's 16 MiB / v7x's 64 MiB limits."""
    if M <= 8:
        return M
    if M <= cap:
        return min(cap, max(8, _round_up(-(-M // 2), 8)))
    return cap


# ------------------------------ Pallas kernels ------------------------------

def _fused_conv_kernel(a1_ref, w1_ref, b1_ref, mask1_ref, w2_ref, b2_ref,
                       sel2_ref, o_ref, s1_ref, p2_ref):
    """conv1(5x5,p=2)+ReLU+pool2 -> conv2(5x5,p=2)+ReLU+pool2, one image.

    a1_ref   : (4, NP, K1P) bf16  conv1 im2col at the 4 pool taps, laid out
               on the zero-padded (18,18) grid (zero rows at the padding).
    w1_ref   : (K1P, C1) bf16,  b1_ref: (1, C1) f32.
    mask1_ref: (NP, 1) f32  1 at interior rows, 0 at padding rows.
    w2_ref   : (25, C1, C2) f32 conv2 weight per (kh,kw) tap, b2_ref (1,C2).
    sel2_ref : (NP2, NPOOL) f32 0/1 selection (stride-2 subsample to 7x7).
    o_ref    : (NP2, C2) f32 pooled conv2 activations, row = ho*7+wo.
    s1_ref   : (NP + 2*GUARD, C1) f32 scratch (guard-banded conv1 output).
    p2_ref   : (NP, C2) f32 scratch (conv2 pre-pool output).
    """
    # ---- conv1 as 4 pooling-tap matmuls, max, bias, ReLU, pad-row mask ----
    w1 = w1_ref[...]
    z = jnp.dot(a1_ref[0], w1, preferred_element_type=jnp.float32)
    z = jnp.maximum(z, jnp.dot(a1_ref[1], w1,
                               preferred_element_type=jnp.float32))
    z = jnp.maximum(z, jnp.dot(a1_ref[2], w1,
                               preferred_element_type=jnp.float32))
    z = jnp.maximum(z, jnp.dot(a1_ref[3], w1,
                               preferred_element_type=jnp.float32))
    act1 = jnp.maximum(z + b1_ref[...], 0.0) * mask1_ref[...]      # (NP, C1)

    # Stage in VMEM with zero guard bands so the shifted conv2 reads see the
    # conv2 zero padding (guards are rewritten every step: no carried state).
    s1_ref[0:GUARD, :] = jnp.zeros((GUARD, C1), jnp.float32)
    s1_ref[GUARD:GUARD + NP, :] = act1
    s1_ref[GUARD + NP:, :] = jnp.zeros((GUARD, C1), jnp.float32)

    # ---- conv2 as 25 statically row-shifted matmuls (no HBM im2col) -------
    acc = jnp.zeros((NP, C2), jnp.float32)
    for kh in range(KS):
        for kw in range(KS):
            d = (kh - PAD) * HP + (kw - PAD)
            tap = s1_ref[GUARD + d:GUARD + d + NP, :]               # (NP, C1)
            acc = acc + jnp.dot(tap, w2_ref[kh * KS + kw],
                                preferred_element_type=jnp.float32)
    p2_ref[...] = acc

    # ---- 2x2 max-pool via 4 shifted reads, then bias + ReLU ---------------
    m = jnp.maximum(
        jnp.maximum(p2_ref[0:NPOOL, :], p2_ref[1:1 + NPOOL, :]),
        jnp.maximum(p2_ref[HP:HP + NPOOL, :],
                    p2_ref[HP + 1:HP + 1 + NPOOL, :]))
    r2 = jnp.maximum(m + b2_ref[...], 0.0)                       # (NPOOL, C2)

    # Stride-2 subsample to the 7x7 pooled grid via a 0/1 selection matmul.
    o_ref[...] = jnp.dot(sel2_ref[...], r2,
                         preferred_element_type=jnp.float32)


def _linear_kernel(a_ref, w_ref, b_ref, o_ref):
    acc = jnp.dot(a_ref[...].astype(jnp.bfloat16), w_ref[...],
                  preferred_element_type=jnp.float32)
    o_ref[...] = (acc + b_ref[...]).astype(o_ref.dtype)


# ----------------------------- kernel wrappers ------------------------------

def conv_stack(a1, w1, b1, mask1, w2, b2, sel2):
    """Fused conv1+pool+conv2+pool over a batch; one image per grid step."""
    B = a1.shape[0]
    cost = pl.CostEstimate(
        flops=int(B * 2 * (4 * NP * K1P * C1 + KS * KS * NP * C1 * C2
                           + NP2 * NPOOL * C2)),
        transcendentals=0,
        bytes_accessed=int(B * (2 * 4 * NP * K1P + 4 * NP2 * C2)
                           + 4 * (KS * KS * C1 * C2 + NP2 * NPOOL + NP)),
    )
    return pl.pallas_call(
        _fused_conv_kernel,
        out_shape=jax.ShapeDtypeStruct((B, NP2, C2), jnp.float32),
        grid=(B,),
        in_specs=[
            pl.BlockSpec((None, 4, NP, K1P), lambda b: (b, 0, 0, 0)),
            pl.BlockSpec((K1P, C1), lambda b: (0, 0)),
            pl.BlockSpec((1, C1), lambda b: (0, 0)),
            pl.BlockSpec((NP, 1), lambda b: (0, 0)),
            pl.BlockSpec((KS * KS, C1, C2), lambda b: (0, 0, 0)),
            pl.BlockSpec((1, C2), lambda b: (0, 0)),
            pl.BlockSpec((NP2, NPOOL), lambda b: (0, 0)),
        ],
        out_specs=pl.BlockSpec((None, NP2, C2), lambda b: (b, 0, 0)),
        scratch_shapes=[
            pltpu.VMEM((NP + 2 * GUARD, C1), jnp.float32),
            pltpu.VMEM((NP, C2), jnp.float32),
        ],
        compiler_params=pltpu.CompilerParams(
            dimension_semantics=("parallel",)),
        cost_estimate=cost,
    )(a1, w1, b1, mask1, w2, b2, sel2)


def linear(a, w, b, *, tile_m=256):
    """(M,K) f32 @ (K,N) bf16 + (1,N) f32 -> (M,N) f32, N lane-padded."""
    M, K = a.shape
    N = w.shape[1]
    tm = _pick_tile_m(M, tile_m)
    grid = (pl.cdiv(M, tm),)
    cost = pl.CostEstimate(
        flops=int(2 * M * K * N), transcendentals=0,
        bytes_accessed=int(4 * M * K + 2 * K * N + 4 * N + 4 * M * N))
    return pl.pallas_call(
        _linear_kernel,
        out_shape=jax.ShapeDtypeStruct((M, N), jnp.float32),
        grid=grid,
        in_specs=[pl.BlockSpec((tm, K), lambda i: (i, 0)),
                  pl.BlockSpec((K, N), lambda i: (0, 0)),
                  pl.BlockSpec((1, N), lambda i: (0, 0))],
        out_specs=pl.BlockSpec((tm, N), lambda i: (i, 0)),
        compiler_params=pltpu.CompilerParams(
            dimension_semantics=("parallel",)),
        cost_estimate=cost,
    )(a, w, b)


# --------------------------- host-side preparation --------------------------

def _conv1_pool_taps(x_nhw):
    """conv1 im2col evaluated at the 4 max-pool taps, on the zero-padded
    (18,18) output grid conv2 consumes.  Returns (B, 4, NP, K1P) bf16."""
    B = x_nhw.shape[0]
    xp = jnp.pad(x_nhw, ((0, 0), (PAD, PAD), (PAD, PAD)))      # (B, 32, 32)
    taps = []
    for dh in range(2):
        for dw in range(2):
            cols = []
            for kh in range(KS):
                for kw in range(KS):
                    h0, w0 = dh + kh, dw + kw
                    cols.append(xp[:, h0:h0 + 2 * H1 - 1:2,
                                   w0:w0 + 2 * H1 - 1:2])       # (B, 14, 14)
            col = jnp.stack(cols, axis=-1)                      # (B,14,14,25)
            col = jnp.pad(col, ((0, 0), (PAD, PAD), (PAD, PAD),
                                (0, K1P - K1)))                 # (B,18,18,32)
            taps.append(col.reshape(B, NP, K1P))
    return jnp.stack(taps, axis=1).astype(jnp.bfloat16)


def _pad_row_mask():
    m = np.zeros((HP, HP), np.float32)
    m[PAD:PAD + H1, PAD:PAD + H1] = 1.0
    return jnp.asarray(m.reshape(NP, 1))


def _pool2_select():
    s = np.zeros((NP2, NPOOL), np.float32)
    for ho in range(H2):
        for wo in range(H2):
            s[ho * H2 + wo, (2 * ho + PAD) * HP + (2 * wo + PAD)] = 1.0
    return jnp.asarray(s)


def _prep_conv1_weight(w_oihw):                                  # (16,1,5,5)
    w = jnp.transpose(w_oihw, (2, 3, 1, 0)).reshape(K1, C1)
    return jnp.pad(w, ((0, K1P - K1), (0, 0))).astype(jnp.bfloat16)


def _prep_conv2_weight(w_oihw):                                  # (32,16,5,5)
    return jnp.transpose(w_oihw, (2, 3, 1, 0)).reshape(KS * KS, C1, C2)


def init_params(key):
    """Deterministic PyTorch-style uniform(-1/sqrt(fan_in), +) init."""
    k1, k2, k3, k4, k5, k6 = jax.random.split(key, 6)

    def u(k, shape, fan_in):
        bound = 1.0 / (fan_in ** 0.5)
        return jax.random.uniform(k, shape, jnp.float32, -bound, bound)

    return {
        "w1": u(k1, (C1, 1, KS, KS), 1 * KS * KS),
        "b1": u(k2, (C1,), 1 * KS * KS),
        "w2": u(k3, (C2, C1, KS, KS), C1 * KS * KS),
        "b2": u(k4, (C2,), C1 * KS * KS),
        "wl": u(k5, (NCLS, NFEAT), NFEAT),
        "bl": u(k6, (NCLS,), NFEAT),
    }


def convnet_forward(params, x_nchw):
    """Mirrors ConvNet.forward: returns (logits, flattened conv features)."""
    B = x_nchw.shape[0]
    assert x_nchw.shape[1:] == (1, H_IN, H_IN), "ConvNet expects 1x28x28"

    a1 = _conv1_pool_taps(x_nchw[:, 0, :, :])                 # (B,4,324,32)
    w1 = _prep_conv1_weight(params["w1"])
    b1 = params["b1"].reshape(1, C1)
    w2 = _prep_conv2_weight(params["w2"])
    b2 = params["b2"].reshape(1, C2)

    act2 = conv_stack(a1, w1, b1, _pad_row_mask(), w2, b2,
                      _pool2_select())                        # (B, 49, 32) f32

    # Linear consumes the natural (hw, c) flatten; PyTorch's NCHW .view(B,-1)
    # permutation is folded into the (static) weight.  N padded 10 -> 128 so
    # the output store is a full-lane vst; real logits sliced out after.
    feat_hwc = act2.reshape(B, NFEAT)
    wl_fold = (params["wl"].reshape(NCLS, C2, H2, H2)
               .transpose(2, 3, 1, 0).reshape(NFEAT, NCLS))
    wl_p = jnp.pad(wl_fold, ((0, 0), (0, NCLS_PAD - NCLS))).astype(jnp.bfloat16)
    bl_p = jnp.pad(params["bl"], (0, NCLS_PAD - NCLS)).reshape(1, NCLS_PAD)
    logits = linear(feat_hwc, wl_p, bl_p)[:, :NCLS]

    # Returned features must match PyTorch x.view(B,-1) on the NCHW tensor.
    feat = jnp.transpose(act2, (0, 2, 1)).reshape(B, NFEAT)
    return logits, feat


# ------------------------------ reference check -----------------------------

def _reference_forward(params, x_nchw):
    def conv_block(x, w, b):
        y = jax.lax.conv_general_dilated(
            x, w, (1, 1), ((PAD, PAD), (PAD, PAD)),
            dimension_numbers=("NCHW", "OIHW", "NCHW"),
            precision=jax.lax.Precision.HIGHEST)
        y = jax.nn.relu(y + b[None, :, None, None])
        return jax.lax.reduce_window(y, -jnp.inf, jax.lax.max,
                                     (1, 1, 2, 2), (1, 1, 2, 2), "VALID")

    x = conv_block(x_nchw, params["w1"], params["b1"])
    x = conv_block(x, params["w2"], params["b2"])
    feat = x.reshape(x.shape[0], -1)
    logits = jnp.dot(feat, params["wl"].T,
                     precision=jax.lax.Precision.HIGHEST) + params["bl"]
    return logits, feat


if __name__ == "__main__":
    key = jax.random.PRNGKey(0)
    pkey, xkey = jax.random.split(key)
    params = init_params(pkey)

    x = jax.random.normal(xkey, (2, 1, H_IN, H_IN), dtype=jnp.float32)

    out, feat = jax.jit(convnet_forward)(params, x)
    jax.block_until_ready((out, feat))

    assert out.shape == (2, NCLS) and out.dtype == jnp.float32
    assert feat.shape == (2, NFEAT) and feat.dtype == jnp.float32

    # bf16 operands (f32 accumulation) -> small, documented deviation.
    ref_out, ref_feat = jax.jit(_reference_forward)(params, x)
    assert bool(jnp.allclose(out, ref_out, atol=5e-2, rtol=5e-2))
    assert bool(jnp.allclose(feat, ref_feat, atol=5e-2, rtol=5e-2))

    print("KERNEL_OK")
</pallas_src>

<mosaic_0001>
module attributes {stable_mosaic.version = 11 : i64} {
  func.func @_fused_conv_kernel(%arg0: i32, %arg1: memref<1x4x324x32xbf16, #tpu.memory_space<vmem>>, %arg2: memref<32x16xbf16, #tpu.memory_space<vmem>>, %arg3: memref<1x16xf32, #tpu.memory_space<vmem>>, %arg4: memref<324x1xf32, #tpu.memory_space<vmem>>, %arg5: memref<25x16x32xf32, #tpu.memory_space<vmem>>, %arg6: memref<1x32xf32, #tpu.memory_space<vmem>>, %arg7: memref<49x305xf32, #tpu.memory_space<vmem>>, %arg8: memref<1x49x32xf32, #tpu.memory_space<vmem>>, %arg9: memref<400x16xf32, #tpu.memory_space<vmem>>, %arg10: memref<324x32xf32, #tpu.memory_space<vmem>>) attributes {dimension_semantics = [#tpu.dimension_semantics<parallel>], iteration_bounds = array<i64: 2>, scalar_prefetch = 0 : i64, scratch_operands = 2 : i64, tpu.core_type = #tpu.core_type<tc>, window_params = [{transform_indices = @transform_0, window_bounds = array<i64: 1, 4, 324, 32>}, {pipeline_mode = #tpu.pipeline_mode<synchronous>, transform_indices = @transform_1, window_bounds = array<i64: 32, 16>}, {pipeline_mode = #tpu.pipeline_mode<synchronous>, transform_indices = @transform_2, window_bounds = array<i64: 1, 16>}, {pipeline_mode = #tpu.pipeline_mode<synchronous>, transform_indices = @transform_3, window_bounds = array<i64: 324, 1>}, {pipeline_mode = #tpu.pipeline_mode<synchronous>, transform_indices = @transform_4, window_bounds = array<i64: 25, 16, 32>}, {pipeline_mode = #tpu.pipeline_mode<synchronous>, transform_indices = @transform_5, window_bounds = array<i64: 1, 32>}, {pipeline_mode = #tpu.pipeline_mode<synchronous>, transform_indices = @transform_6, window_bounds = array<i64: 49, 305>}, {transform_indices = @transform_7, window_bounds = array<i64: 1, 49, 32>}]} {
    %c0 = arith.constant 0 : index
    %c0_0 = arith.constant 0 : index
    %0 = vector.load %arg2[%c0, %c0_0] : memref<32x16xbf16, #tpu.memory_space<vmem>>, vector<32x16xbf16>
    %c0_1 = arith.constant 0 : index
    %c0_2 = arith.constant 0 : index
    %c0_3 = arith.constant 0 : index
    %c0_4 = arith.constant 0 : index
    %1 = vector.load %arg1[%c0_1, %c0_2, %c0_3, %c0_4] : memref<1x4x324x32xbf16, #tpu.memory_space<vmem>>, vector<1x1x324x32xbf16>
    %2 = vector.shape_cast %1 : vector<1x1x324x32xbf16> to vector<324x32xbf16>
    %cst = arith.constant dense<0.000000e+00> : vector<324x16xf32>
    %3 = tpu.matmul %2, %0, %cst {dimension_numbers = #tpu.dot_dimension_numbers<[1], [0], [0], [1], [0, 0, 1, 1], [], []>} : vector<324x32xbf16>, vector<32x16xbf16>, vector<324x16xf32> -> vector<324x16xf32>
    %c0_5 = arith.constant 0 : index
    %c1 = arith.constant 1 : index
    %c0_6 = arith.constant 0 : index
    %c0_7 = arith.constant 0 : index
    %4 = vector.load %arg1[%c0_5, %c1, %c0_6, %c0_7] : memref<1x4x324x32xbf16, #tpu.memory_space<vmem>>, vector<1x1x324x32xbf16>
    %5 = vector.shape_cast %4 : vector<1x1x324x32xbf16> to vector<324x32xbf16>
    %cst_8 = arith.constant dense<0.000000e+00> : vector<324x16xf32>
    %6 = tpu.matmul %5, %0, %cst_8 {dimension_numbers = #tpu.dot_dimension_numbers<[1], [0], [0], [1], [0, 0, 1, 1], [], []>} : vector<324x32xbf16>, vector<32x16xbf16>, vector<324x16xf32> -> vector<324x16xf32>
    %7 = arith.maximumf %3, %6 : vector<324x16xf32>
    %c0_9 = arith.constant 0 : index
    %c2 = arith.constant 2 : index
    %c0_10 = arith.constant 0 : index
    %c0_11 = arith.constant 0 : index
    %8 = vector.load %arg1[%c0_9, %c2, %c0_10, %c0_11] : memref<1x4x324x32xbf16, #tpu.memory_space<vmem>>, vector<1x1x324x32xbf16>
    %9 = vector.shape_cast %8 : vector<1x1x324x32xbf16> to vector<324x32xbf16>
    %cst_12 = arith.constant dense<0.000000e+00> : vector<324x16xf32>
    %10 = tpu.matmul %9, %0, %cst_12 {dimension_numbers = #tpu.dot_dimension_numbers<[1], [0], [0], [1], [0, 0, 1, 1], [], []>} : vector<324x32xbf16>, vector<32x16xbf16>, vector<324x16xf32> -> vector<324x16xf32>
    %11 = arith.maximumf %7, %10 : vector<324x16xf32>
    %c0_13 = arith.constant 0 : index
    %c3 = arith.constant 3 : index
    %c0_14 = arith.constant 0 : index
    %c0_15 = arith.constant 0 : index
    %12 = vector.load %arg1[%c0_13, %c3, %c0_14, %c0_15] : memref<1x4x324x32xbf16, #tpu.memory_space<vmem>>, vector<1x1x324x32xbf16>
    %13 = vector.shape_cast %12 : vector<1x1x324x32xbf16> to vector<324x32xbf16>
    %cst_16 = arith.constant dense<0.000000e+00> : vector<324x16xf32>
    %14 = tpu.matmul %13, %0, %cst_16 {dimension_numbers = #tpu.dot_dimension_numbers<[1], [0], [0], [1], [0, 0, 1, 1], [], []>} : vector<324x32xbf16>, vector<32x16xbf16>, vector<324x16xf32> -> vector<324x16xf32>
    %15 = arith.maximumf %11, %14 : vector<324x16xf32>
    %c0_17 = arith.constant 0 : index
    %c0_18 = arith.constant 0 : index
    %16 = vector.load %arg3[%c0_17, %c0_18] : memref<1x16xf32, #tpu.memory_space<vmem>>, vector<1x16xf32>
    %17 = vector.broadcast %16 : vector<1x16xf32> to vector<324x16xf32>
    %18 = arith.addf %15, %17 : vector<324x16xf32>
    %cst_19 = arith.constant 0.000000e+00 : f32
    %19 = vector.broadcast %cst_19 : f32 to vector<324x16xf32>
    %20 = arith.maximumf %18, %19 : vector<324x16xf32>
    %c0_20 = arith.constant 0 : index
    %c0_21 = arith.constant 0 : index
    %21 = vector.load %arg4[%c0_20, %c0_21] : memref<324x1xf32, #tpu.memory_space<vmem>>, vector<324x1xf32>
    %22 = vector.broadcast %21 : vector<324x1xf32> to vector<324x16xf32>
    %23 = arith.mulf %20, %22 : vector<324x16xf32>
    %cst_22 = arith.constant 0.000000e+00 : f32
    %24 = vector.broadcast %cst_22 : f32 to vector<38x16xf32>
    %c0_23 = arith.constant 0 : index
    %c0_24 = arith.constant 0 : index
    %25 = vector.load %arg9[%c0_23, %c0_24] : memref<400x16xf32, #tpu.memory_space<vmem>>, vector<38x16xf32>
    tpu.vector_store %arg9[%c0_23, %c0_24], %24 {strides = array<i32>} : memref<400x16xf32, #tpu.memory_space<vmem>>, vector<38x16xf32>,
    %c38 = arith.constant 38 : index
    %c0_25 = arith.constant 0 : index
    %26 = vector.load %arg9[%c38, %c0_25] : memref<400x16xf32, #tpu.memory_space<vmem>>, vector<324x16xf32>
    tpu.vector_store %arg9[%c38, %c0_25], %23 {strides = array<i32>} : memref<400x16xf32, #tpu.memory_space<vmem>>, vector<324x16xf32>,
    %cst_26 = arith.constant 0.000000e+00 : f32
    %27 = vector.broadcast %cst_26 : f32 to vector<38x16xf32>
    %c362 = arith.constant 362 : index
    %c0_27 = arith.constant 0 : index
    %28 = vector.load %arg9[%c362, %c0_27] : memref<400x16xf32, #tpu.memory_space<vmem>>, vector<38x16xf32>
    tpu.vector_store %arg9[%c362, %c0_27], %27 {strides = array<i32>} : memref<400x16xf32, #tpu.memory_space<vmem>>, vector<38x16xf32>,
    %cst_28 = arith.constant 0.000000e+00 : f32
    %29 = vector.broadcast %cst_28 : f32 to vector<324x32xf32>
    %c0_29 = arith.constant 0 : index
    %c0_30 = arith.constant 0 : index
    %30 = vector.load %arg9[%c0_29, %c0_30] : memref<400x16xf32, #tpu.memory_space<vmem>>, vector<324x16xf32>
    %c0_31 = arith.constant 0 : index
    %c0_32 = arith.constant 0 : index
    %c0_33 = arith.constant 0 : index
    %31 = vector.load %arg5[%c0_31, %c0_32, %c0_33] : memref<25x16x32xf32, #tpu.memory_space<vmem>>, vector<1x16x32xf32>
    %32 = vector.shape_cast %31 : vector<1x16x32xf32> to vector<16x32xf32>
    %cst_34 = arith.constant dense<0.000000e+00> : vector<324x32xf32>
    %33 = tpu.matmul %30, %32, %cst_34 {dimension_numbers = #tpu.dot_dimension_numbers<[1], [0], [0], [1], [0, 0, 1, 1], [], []>} : vector<324x16xf32>, vector<16x32xf32>, vector<324x32xf32> -> vector<324x32xf32>
    %34 = arith.addf %29, %33 : vector<324x32xf32>
    %c1_35 = arith.constant 1 : index
    %c0_36 = arith.constant 0 : index
    %35 = vector.load %arg9[%c1_35, %c0_36] : memref<400x16xf32, #tpu.memory_space<vmem>>, vector<324x16xf32>
    %c1_37 = arith.constant 1 : index
    %c0_38 = arith.constant 0 : index
    %c0_39 = arith.constant 0 : index
    %36 = vector.load %arg5[%c1_37, %c0_38, %c0_39] : memref<25x16x32xf32, #tpu.memory_space<vmem>>, vector<1x16x32xf32>
    %37 = vector.shape_cast %36 : vector<1x16x32xf32> to vector<16x32xf32>
    %cst_40 = arith.constant dense<0.000000e+00> : vector<324x32xf32>
    %38 = tpu.matmul %35, %37, %cst_40 {dimension_numbers = #tpu.dot_dimension_numbers<[1], [0], [0], [1], [0, 0, 1, 1], [], []>} : vector<324x16xf32>, vector<16x32xf32>, vector<324x32xf32> -> vector<324x32xf32>
    %39 = arith.addf %34, %38 : vector<324x32xf32>
    %c2_41 = arith.constant 2 : index
    %c0_42 = arith.constant 0 : index
    %40 = vector.load %arg9[%c2_41, %c0_42] : memref<400x16xf32, #tpu.memory_space<vmem>>, vector<324x16xf32>
    %c2_43 = arith.constant 2 : index
    %c0_44 = arith.constant 0 : index
    %c0_45 = arith.constant 0 : index
    %41 = vector.load %arg5[%c2_43, %c0_44, %c0_45] : memref<25x16x32xf32, #tpu.memory_space<vmem>>, vector<1x16x32xf32>
    %42 = vector.shape_cast %41 : vector<1x16x32xf32> to vector<16x32xf32>
    %cst_46 = arith.constant dense<0.000000e+00> : vector<324x32xf32>
    %43 = tpu.matmul %40, %42, %cst_46 {dimension_numbers = #tpu.dot_dimension_numbers<[1], [0], [0], [1], [0, 0, 1, 1], [], []>} : vector<324x16xf32>, vector<16x32xf32>, vector<324x32xf32> -> vector<324x32xf32>
    %44 = arith.addf %39, %43 : vector<324x32xf32>
    %c3_47 = arith.constant 3 : index
    %c0_48 = arith.constant 0 : index
    %45 = vector.load %arg9[%c3_47, %c0_48] : memref<400x16xf32, #tpu.memory_space<vmem>>, vector<324x16xf32>
    %c3_49 = arith.constant 3 : index
    %c0_50 = arith.constant 0 : index
    %c0_51 = arith.constant 0 : index
    %46 = vector.load %arg5[%c3_49, %c0_50, %c0_51] : memref<25x16x32xf32, #tpu.memory_space<vmem>>, vector<1x16x32xf32>
    %47 = vector.shape_cast %46 : vector<1x16x32xf32> to vector<16x32xf32>
    %cst_52 = arith.constant dense<0.000000e+00> : vector<324x32xf32>
    %48 = tpu.matmul %45, %47, %cst_52 {dimension_numbers = #tpu.dot_dimension_numbers<[1], [0], [0], [1], [0, 0, 1, 1], [], []>} : vector<324x16xf32>, vector<16x32xf32>, vector<324x32xf32> -> vector<324x32xf32>
    %49 = arith.addf %44, %48 : vector<324x32xf32>
    %c4 = arith.constant 4 : index
    %c0_53 = arith.constant 0 : index
    %50 = vector.load %arg9[%c4, %c0_53] : memref<400x16xf32, #tpu.memory_space<vmem>>, vector<324x16xf32>
    %c4_54 = arith.constant 4 : index
    %c0_55 = arith.constant 0 : index
    %c0_56 = arith.constant 0 : index
    %51 = vector.load %arg5[%c4_54, %c0_55, %c0_56] : memref<25x16x32xf32, #tpu.memory_space<vmem>>, vector<1x16x32xf32>
    %52 = vector.shape_cast %51 : vector<1x16x32xf32> to vector<16x32xf32>
    %cst_57 = arith.constant dense<0.000000e+00> : vector<324x32xf32>
    %53 = tpu.matmul %50, %52, %cst_57 {dimension_numbers = #tpu.dot_dimension_numbers<[1], [0], [0], [1], [0, 0, 1, 1], [], []>} : vector<324x16xf32>, vector<16x32xf32>, vector<324x32xf32> -> vector<324x32xf32>
    %54 = arith.addf %49, %53 : vector<324x32xf32>
    %c18 = arith.constant 18 : index
    %c0_58 = arith.constant 0 : index
    %55 = vector.load %arg9[%c18, %c0_58] : memref<400x16xf32, #tpu.memory_space<vmem>>, vector<324x16xf32>
    %c5 = arith.constant 5 : index
    %c0_59 = arith.constant 0 : index
    %c0_60 = arith.constant 0 : index
    %56 = vector.load %arg5[%c5, %c0_59, %c0_60] : memref<25x16x32xf32, #tpu.memory_space<vmem>>, vector<1x16x32xf32>
    %57 = vector.shape_cast %56 : vector<1x16x32xf32> to vector<16x32xf32>
    %cst_61 = arith.constant dense<0.000000e+00> : vector<324x32xf32>
    %58 = tpu.matmul %55, %57, %cst_61 {dimension_numbers = #tpu.dot_dimension_numbers<[1], [0], [0], [1], [0, 0, 1, 1], [], []>} : vector<324x16xf32>, vector<16x32xf32>, vector<324x32xf32> -> vector<324x32xf32>
    %59 = arith.addf %54, %58 : vector<324x32xf32>
    %c19 = arith.constant 19 : index
    %c0_62 = arith.constant 0 : index
    %60 = vector.load %arg9[%c19, %c0_62] : memref<400x16xf32, #tpu.memory_space<vmem>>, vector<324x16xf32>
    %c6 = arith.constant 6 : index
    %c0_63 = arith.constant 0 : index
    %c0_64 = arith.constant 0 : index
    %61 = vector.load %arg5[%c6, %c0_63, %c0_64] : memref<25x16x32xf32, #tpu.memory_space<vmem>>, vector<1x16x32xf32>
    %62 = vector.shape_cast %61 : vector<1x16x32xf32> to vector<16x32xf32>
    %cst_65 = arith.constant dense<0.000000e+00> : vector<324x32xf32>
    %63 = tpu.matmul %60, %62, %cst_65 {dimension_numbers = #tpu.dot_dimension_numbers<[1], [0], [0], [1], [0, 0, 1, 1], [], []>} : vector<324x16xf32>, vector<16x32xf32>, vector<324x32xf32> -> vector<324x32xf32>
    %64 = arith.addf %59, %63 : vector<324x32xf32>
    %c20 = arith.constant 20 : index
    %c0_66 = arith.constant 0 : index
    %65 = vector.load %arg9[%c20, %c0_66] : memref<400x16xf32, #tpu.memory_space<vmem>>, vector<324x16xf32>
    %c7 = arith.constant 7 : index
    %c0_67 = arith.constant 0 : index
    %c0_68 = arith.constant 0 : index
    %66 = vector.load %arg5[%c7, %c0_67, %c0_68] : memref<25x16x32xf32, #tpu.memory_space<vmem>>, vector<1x16x32xf32>
    %67 = vector.shape_cast %66 : vector<1x16x32xf32> to vector<16x32xf32>
    %cst_69 = arith.constant dense<0.000000e+00> : vector<324x32xf32>
    %68 = tpu.matmul %65, %67, %cst_69 {dimension_numbers = #tpu.dot_dimension_numbers<[1], [0], [0], [1], [0, 0, 1, 1], [], []>} : vector<324x16xf32>, vector<16x32xf32>, vector<324x32xf32> -> vector<324x32xf32>
    %69 = arith.addf %64, %68 : vector<324x32xf32>
    %c21 = arith.constant 21 : index
    %c0_70 = arith.constant 0 : index
    %70 = vector.load %arg9[%c21, %c0_70] : memref<400x16xf32, #tpu.memory_space<vmem>>, vector<324x16xf32>
    %c8 = arith.constant 8 : index
    %c0_71 = arith.constant 0 : index
    %c0_72 = arith.constant 0 : index
    %71 = vector.load %arg5[%c8, %c0_71, %c0_72] : memref<25x16x32xf32, #tpu.memory_space<vmem>>, vector<1x16x32xf32>
    %72 = vector.shape_cast %71 : vector<1x16x32xf32> to vector<16x32xf32>
    %cst_73 = arith.constant dense<0.000000e+00> : vector<324x32xf32>
    %73 = tpu.matmul %70, %72, %cst_73 {dimension_numbers = #tpu.dot_dimension_numbers<[1], [0], [0], [1], [0, 0, 1, 1], [], []>} : vector<324x16xf32>, vector<16x32xf32>, vector<324x32xf32> -> vector<324x32xf32>
    %74 = arith.addf %69, %73 : vector<324x32xf32>
    %c22 = arith.constant 22 : index
    %c0_74 = arith.constant 0 : index
    %75 = vector.load %arg9[%c22, %c0_74] : memref<400x16xf32, #tpu.memory_space<vmem>>, vector<324x16xf32>
    %c9 = arith.constant 9 : index
    %c0_75 = arith.constant 0 : index
    %c0_76 = arith.constant 0 : index
    %76 = vector.load %arg5[%c9, %c0_75, %c0_76] : memref<25x16x32xf32, #tpu.memory_space<vmem>>, vector<1x16x32xf32>
    %77 = vector.shape_cast %76 : vector<1x16x32xf32> to vector<16x32xf32>
    %cst_77 = arith.constant dense<0.000000e+00> : vector<324x32xf32>
    %78 = tpu.matmul %75, %77, %cst_77 {dimension_numbers = #tpu.dot_dimension_numbers<[1], [0], [0], [1], [0, 0, 1, 1], [], []>} : vector<324x16xf32>, vector<16x32xf32>, vector<324x32xf32> -> vector<324x32xf32>
    %79 = arith.addf %74, %78 : vector<324x32xf32>
    %c36 = arith.constant 36 : index
    %c0_78 = arith.constant 0 : index
    %80 = vector.load %arg9[%c36, %c0_78] : memref<400x16xf32, #tpu.memory_space<vmem>>, vector<324x16xf32>
    %c10 = arith.constant 10 : index
    %c0_79 = arith.constant 0 : index
    %c0_80 = arith.constant 0 : index
    %81 = vector.load %arg5[%c10, %c0_79, %c0_80] : memref<25x16x32xf32, #tpu.memory_space<vmem>>, vector<1x16x32xf32>
    %82 = vector.shape_cast %81 : vector<1x16x32xf32> to vector<16x32xf32>
    %cst_81 = arith.constant dense<0.000000e+00> : vector<324x32xf32>
    %83 = tpu.matmul %80, %82, %cst_81 {dimension_numbers = #tpu.dot_dimension_numbers<[1], [0], [0], [1], [0, 0, 1, 1], [], []>} : vector<324x16xf32>, vector<16x32xf32>, vector<324x32xf32> -> vector<324x32xf32>
    %84 = arith.addf %79, %83 : vector<324x32xf32>
    %c37 = arith.constant 37 : index
    %c0_82 = arith.constant 0 : index
    %85 = vector.load %arg9[%c37, %c0_82] : memref<400x16xf32, #tpu.memory_space<vmem>>, vector<324x16xf32>
    %c11 = arith.constant 11 : index
    %c0_83 = arith.constant 0 : index
    %c0_84 = arith.constant 0 : index
    %86 = vector.load %arg5[%c11, %c0_83, %c0_84] : memref<25x16x32xf32, #tpu.memory_space<vmem>>, vector<1x16x32xf32>
    %87 = vector.shape_cast %86 : vector<1x16x32xf32> to vector<16x32xf32>
    %cst_85 = arith.constant dense<0.000000e+00> : vector<324x32xf32>
    %88 = tpu.matmul %85, %87, %cst_85 {dimension_numbers = #tpu.dot_dimension_numbers<[1], [0], [0], [1], [0, 0, 1, 1], [], []>} : vector<324x16xf32>, vector<16x32xf32>, vector<324x32xf32> -> vector<324x32xf32>
    %89 = arith.addf %84, %88 : vector<324x32xf32>
    %c38_86 = arith.constant 38 : index
    %c0_87 = arith.constant 0 : index
    %90 = vector.load %arg9[%c38_86, %c0_87] : memref<400x16xf32, #tpu.memory_space<vmem>>, vector<324x16xf32>
    %c12 = arith.constant 12 : index
    %c0_88 = arith.constant 0 : index
    %c0_89 = arith.constant 0 : index
    %91 = vector.load %arg5[%c12, %c0_88, %c0_89] : memref<25x16x32xf32, #tpu.memory_space<vmem>>, vector<1x16x32xf32>
    %92 = vector.shape_cast %91 : vector<1x16x32xf32> to vector<16x32xf32>
    %cst_90 = arith.constant dense<0.000000e+00> : vector<324x32xf32>
    %93 = tpu.matmul %90, %92, %cst_90 {dimension_numbers = #tpu.dot_dimension_numbers<[1], [0], [0], [1], [0, 0, 1, 1], [], []>} : vector<324x16xf32>, vector<16x32xf32>, vector<324x32xf32> -> vector<324x32xf32>
    %94 = arith.addf %89, %93 : vector<324x32xf32>
    %c39 = arith.constant 39 : index
    %c0_91 = arith.constant 0 : index
    %95 = vector.load %arg9[%c39, %c0_91] : memref<400x16xf32, #tpu.memory_space<vmem>>, vector<324x16xf32>
    %c13 = arith.constant 13 : index
    %c0_92 = arith.constant 0 : index
    %c0_93 = arith.constant 0 : index
    %96 = vector.load %arg5[%c13, %c0_92, %c0_93] : memref<25x16x32xf32, #tpu.memory_space<vmem>>, vector<1x16x32xf32>
    %97 = vector.shape_cast %96 : vector<1x16x32xf32> to vector<16x32xf32>
    %cst_94 = arith.constant dense<0.000000e+00> : vector<324x32xf32>
    %98 = tpu.matmul %95, %97, %cst_94 {dimension_numbers = #tpu.dot_dimension_numbers<[1], [0], [0], [1], [0, 0, 1, 1], [], []>} : vector<324x16xf32>, vector<16x32xf32>, vector<324x32xf32> -> vector<324x32xf32>
    %99 = arith.addf %94, %98 : vector<324x32xf32>
    %c40 = arith.constant 40 : index
    %c0_95 = arith.constant 0 : index
    %100 = vector.load %arg9[%c40, %c0_95] : memref<400x16xf32, #tpu.memory_space<vmem>>, vector<324x16xf32>
    %c14 = arith.constant 14 : index
    %c0_96 = arith.constant 0 : index
    %c0_97 = arith.constant 0 : index
    %101 = vector.load %arg5[%c14, %c0_96, %c0_97] : memref<25x16x32xf32, #tpu.memory_space<vmem>>, vector<1x16x32xf32>
    %102 = vector.shape_cast %101 : vector<1x16x32xf32> to vector<16x32xf32>
    %cst_98 = arith.constant dense<0.000000e+00> : vector<324x32xf32>
    %103 = tpu.matmul %100, %102, %cst_98 {dimension_numbers = #tpu.dot_dimension_numbers<[1], [0], [0], [1], [0, 0, 1, 1], [], []>} : vector<324x16xf32>, vector<16x32xf32>, vector<324x32xf32> -> vector<324x32xf32>
    %104 = arith.addf %99, %103 : vector<324x32xf32>
    %c54 = arith.constant 54 : index
    %c0_99 = arith.constant 0 : index
    %105 = vector.load %arg9[%c54, %c0_99] : memref<400x16xf32, #tpu.memory_space<vmem>>, vector<324x16xf32>
    %c15 = arith.constant 15 : index
    %c0_100 = arith.constant 0 : index
    %c0_101 = arith.constant 0 : index
    %106 = vector.load %arg5[%c15, %c0_100, %c0_101] : memref<25x16x32xf32, #tpu.memory_space<vmem>>, vector<1x16x32xf32>
    %107 = vector.shape_cast %106 : vector<1x16x32xf32> to vector<16x32xf32>
    %cst_102 = arith.constant dense<0.000000e+00> : vector<324x32xf32>
    %108 = tpu.matmul %105, %107, %cst_102 {dimension_numbers = #tpu.dot_dimension_numbers<[1], [0], [0], [1], [0, 0, 1, 1], [], []>} : vector<324x16xf32>, vector<16x32xf32>, vector<324x32xf32> -> vector<324x32xf32>
    %109 = arith.addf %104, %108 : vector<324x32xf32>
    %c55 = arith.constant 55 : index
    %c0_103 = arith.constant 0 : index
    %110 = vector.load %arg9[%c55, %c0_103] : memref<400x16xf32, #tpu.memory_space<vmem>>, vector<324x16xf32>
    %c16 = arith.constant 16 : index
    %c0_104 = arith.constant 0 : index
    %c0_105 = arith.constant 0 : index
    %111 = vector.load %arg5[%c16, %c0_104, %c0_105] : memref<25x16x32xf32, #tpu.memory_space<vmem>>, vector<1x16x32xf32>
    %112 = vector.shape_cast %111 : vector<1x16x32xf32> to vector<16x32xf32>
    %cst_106 = arith.constant dense<0.000000e+00> : vector<324x32xf32>
    %113 = tpu.matmul %110, %112, %cst_106 {dimension_numbers = #tpu.dot_dimension_numbers<[1], [0], [0], [1], [0, 0, 1, 1], [], []>} : vector<324x16xf32>, vector<16x32xf32>, vector<324x32xf32> -> vector<324x32xf32>
    %114 = arith.addf %109, %113 : vector<324x32xf32>
    %c56 = arith.constant 56 : index
    %c0_107 = arith.constant 0 : index
    %115 = vector.load %arg9[%c56, %c0_107] : memref<400x16xf32, #tpu.memory_space<vmem>>, vector<324x16xf32>
    %c17 = arith.constant 17 : index
    %c0_108 = arith.constant 0 : index
    %c0_109 = arith.constant 0 : index
    %116 = vector.load %arg5[%c17, %c0_108, %c0_109] : memref<25x16x32xf32, #tpu.memory_space<vmem>>, vector<1x16x32xf32>
    %117 = vector.shape_cast %116 : vector<1x16x32xf32> to vector<16x32xf32>
    %cst_110 = arith.constant dense<0.000000e+00> : vector<324x32xf32>
    %118 = tpu.matmul %115, %117, %cst_110 {dimension_numbers = #tpu.dot_dimension_numbers<[1], [0], [0], [1], [0, 0, 1, 1], [], []>} : vector<324x16xf32>, vector<16x32xf32>, vector<324x32xf32> -> vector<324x32xf32>
    %119 = arith.addf %114, %118 : vector<324x32xf32>
    %c57 = arith.constant 57 : index
    %c0_111 = arith.constant 0 : index
    %120 = vector.load %arg9[%c57, %c0_111] : memref<400x16xf32, #tpu.memory_space<vmem>>, vector<324x16xf32>
    %c18_112 = arith.constant 18 : index
    %c0_113 = arith.constant 0 : index
    %c0_114 = arith.constant 0 : index
    %121 = vector.load %arg5[%c18_112, %c0_113, %c0_114] : memref<25x16x32xf32, #tpu.memory_space<vmem>>, vector<1x16x32xf32>
    %122 = vector.shape_cast %121 : vector<1x16x32xf32> to vector<16x32xf32>
    %cst_115 = arith.constant dense<0.000000e+00> : vector<324x32xf32>
    %123 = tpu.matmul %120, %122, %cst_115 {dimension_numbers = #tpu.dot_dimension_numbers<[1], [0], [0], [1], [0, 0, 1, 1], [], []>} : vector<324x16xf32>, vector<16x32xf32>, vector<324x32xf32> -> vector<324x32xf32>
    %124 = arith.addf %119, %123 : vector<324x32xf32>
    %c58 = arith.constant 58 : index
    %c0_116 = arith.constant 0 : index
    %125 = vector.load %arg9[%c58, %c0_116] : memref<400x16xf32, #tpu.memory_space<vmem>>, vector<324x16xf32>
    %c19_117 = arith.constant 19 : index
    %c0_118 = arith.constant 0 : index
    %c0_119 = arith.constant 0 : index
    %126 = vector.load %arg5[%c19_117, %c0_118, %c0_119] : memref<25x16x32xf32, #tpu.memory_space<vmem>>, vector<1x16x32xf32>
    %127 = vector.shape_cast %126 : vector<1x16x32xf32> to vector<16x32xf32>
    %cst_120 = arith.constant dense<0.000000e+00> : vector<324x32xf32>
    %128 = tpu.matmul %125, %127, %cst_120 {dimension_numbers = #tpu.dot_dimension_numbers<[1], [0], [0], [1], [0, 0, 1, 1], [], []>} : vector<324x16xf32>, vector<16x32xf32>, vector<324x32xf32> -> vector<324x32xf32>
    %129 = arith.addf %124, %128 : vector<324x32xf32>
    %c72 = arith.constant 72 : index
    %c0_121 = arith.constant 0 : index
    %130 = vector.load %arg9[%c72, %c0_121] : memref<400x16xf32, #tpu.memory_space<vmem>>, vector<324x16xf32>
    %c20_122 = arith.constant 20 : index
    %c0_123 = arith.constant 0 : index
    %c0_124 = arith.constant 0 : index
    %131 = vector.load %arg5[%c20_122, %c0_123, %c0_124] : memref<25x16x32xf32, #tpu.memory_space<vmem>>, vector<1x16x32xf32>
    %132 = vector.shape_cast %131 : vector<1x16x32xf32> to vector<16x32xf32>
    %cst_125 = arith.constant dense<0.000000e+00> : vector<324x32xf32>
    %133 = tpu.matmul %130, %132, %cst_125 {dimension_numbers = #tpu.dot_dimension_numbers<[1], [0], [0], [1], [0, 0, 1, 1], [], []>} : vector<324x16xf32>, vector<16x32xf32>, vector<324x32xf32> -> vector<324x32xf32>
    %134 = arith.addf %129, %133 : vector<324x32xf32>
    %c73 = arith.constant 73 : index
    %c0_126 = arith.constant 0 : index
    %135 = vector.load %arg9[%c73, %c0_126] : memref<400x16xf32, #tpu.memory_space<vmem>>, vector<324x16xf32>
    %c21_127 = arith.constant 21 : index
    %c0_128 = arith.constant 0 : index
    %c0_129 = arith.constant 0 : index
    %136 = vector.load %arg5[%c21_127, %c0_128, %c0_129] : memref<25x16x32xf32, #tpu.memory_space<vmem>>, vector<1x16x32xf32>
    %137 = vector.shape_cast %136 : vector<1x16x32xf32> to vector<16x32xf32>
    %cst_130 = arith.constant dense<0.000000e+00> : vector<324x32xf32>
    %138 = tpu.matmul %135, %137, %cst_130 {dimension_numbers = #tpu.dot_dimension_numbers<[1], [0], [0], [1], [0, 0, 1, 1], [], []>} : vector<324x16xf32>, vector<16x32xf32>, vector<324x32xf32> -> vector<324x32xf32>
    %139 = arith.addf %134, %138 : vector<324x32xf32>
    %c74 = arith.constant 74 : index
    %c0_131 = arith.constant 0 : index
    %140 = vector.load %arg9[%c74, %c0_131] : memref<400x16xf32, #tpu.memory_space<vmem>>, vector<324x16xf32>
    %c22_132 = arith.constant 22 : index
    %c0_133 = arith.constant 0 : index
    %c0_134 = arith.constant 0 : index
    %141 = vector.load %arg5[%c22_132, %c0_133, %c0_134] : memref<25x16x32xf32, #tpu.memory_space<vmem>>, vector<1x16x32xf32>
    %142 = vector.shape_cast %141 : vector<1x16x32xf32> to vector<16x32xf32>
    %cst_135 = arith.constant dense<0.000000e+00> : vector<324x32xf32>
    %143 = tpu.matmul %140, %142, %cst_135 {dimension_numbers = #tpu.dot_dimension_numbers<[1], [0], [0], [1], [0, 0, 1, 1], [], []>} : vector<324x16xf32>, vector<16x32xf32>, vector<324x32xf32> -> vector<324x32xf32>
    %144 = arith.addf %139, %143 : vector<324x32xf32>
    %c75 = arith.constant 75 : index
    %c0_136 = arith.constant 0 : index
    %145 = vector.load %arg9[%c75, %c0_136] : memref<400x16xf32, #tpu.memory_space<vmem>>, vector<324x16xf32>
    %c23 = arith.constant 23 : index
    %c0_137 = arith.constant 0 : index
    %c0_138 = arith.constant 0 : index
    %146 = vector.load %arg5[%c23, %c0_137, %c0_138] : memref<25x16x32xf32, #tpu.memory_space<vmem>>, vector<1x16x32xf32>
    %147 = vector.shape_cast %146 : vector<1x16x32xf32> to vector<16x32xf32>
    %cst_139 = arith.constant dense<0.000000e+00> : vector<324x32xf32>
    %148 = tpu.matmul %145, %147, %cst_139 {dimension_numbers = #tpu.dot_dimension_numbers<[1], [0], [0], [1], [0, 0, 1, 1], [], []>} : vector<324x16xf32>, vector<16x32xf32>, vector<324x32xf32> -> vector<324x32xf32>
    %149 = arith.addf %144, %148 : vector<324x32xf32>
    %c76 = arith.constant 76 : index
    %c0_140 = arith.constant 0 : index
    %150 = vector.load %arg9[%c76, %c0_140] : memref<400x16xf32, #tpu.memory_space<vmem>>, vector<324x16xf32>
    %c24 = arith.constant 24 : index
    %c0_141 = arith.constant 0 : index
    %c0_142 = arith.constant 0 : index
    %151 = vector.load %arg5[%c24, %c0_141, %c0_142] : memref<25x16x32xf32, #tpu.memory_space<vmem>>, vector<1x16x32xf32>
    %152 = vector.shape_cast %151 : vector<1x16x32xf32> to vector<16x32xf32>
    %cst_143 = arith.constant dense<0.000000e+00> : vector<324x32xf32>
    %153 = tpu.matmul %150, %152, %cst_143 {dimension_numbers = #tpu.dot_dimension_numbers<[1], [0], [0], [1], [0, 0, 1, 1], [], []>} : vector<324x16xf32>, vector<16x32xf32>, vector<324x32xf32> -> vector<324x32xf32>
    %154 = arith.addf %149, %153 : vector<324x32xf32>
    %c0_144 = arith.constant 0 : index
    %c0_145 = arith.constant 0 : index
    %155 = vector.load %arg10[%c0_144, %c0_145] : memref<324x32xf32, #tpu.memory_space<vmem>>, vector<324x32xf32>
    tpu.vector_store %arg10[%c0_144, %c0_145], %154 {strides = array<i32>} : memref<324x32xf32, #tpu.memory_space<vmem>>, vector<324x32xf32>,
    %c0_146 = arith.constant 0 : index
    %c0_147 = arith.constant 0 : index
    %156 = vector.load %arg10[%c0_146, %c0_147] : memref<324x32xf32, #tpu.memory_space<vmem>>, vector<305x32xf32>
    %c1_148 = arith.constant 1 : index
    %c0_149 = arith.constant 0 : index
    %157 = vector.load %arg10[%c1_148, %c0_149] : memref<324x32xf32, #tpu.memory_space<vmem>>, vector<305x32xf32>
    %158 = arith.maximumf %156, %157 : vector<305x32xf32>
    %c18_150 = arith.constant 18 : index
    %c0_151 = arith.constant 0 : index
    %159 = vector.load %arg10[%c18_150, %c0_151] : memref<324x32xf32, #tpu.memory_space<vmem>>, vector<305x32xf32>
    %c19_152 = arith.constant 19 : index
    %c0_153 = arith.constant 0 : index
    %160 = vector.load %arg10[%c19_152, %c0_153] : memref<324x32xf32, #tpu.memory_space<vmem>>, vector<305x32xf32>
    %161 = arith.maximumf %159, %160 : vector<305x32xf32>
    %162 = arith.maximumf %158, %161 : vector<305x32xf32>
    %c0_154 = arith.constant 0 : index
    %c0_155 = arith.constant 0 : index
    %163 = vector.load %arg6[%c0_154, %c0_155] : memref<1x32xf32, #tpu.memory_space<vmem>>, vector<1x32xf32>
    %164 = vector.broadcast %163 : vector<1x32xf32> to vector<305x32xf32>
    %165 = arith.addf %162, %164 : vector<305x32xf32>
    %cst_156 = arith.constant 0.000000e+00 : f32
    %166 = vector.broadcast %cst_156 : f32 to vector<305x32xf32>
    %167 = arith.maximumf %165, %166 : vector<305x32xf32>
    %c0_157 = arith.constant 0 : index
    %c0_158 = arith.constant 0 : index
    %168 = vector.load %arg7[%c0_157, %c0_158] : memref<49x305xf32, #tpu.memory_space<vmem>>, vector<49x305xf32>
    %cst_159 = arith.constant dense<0.000000e+00> : vector<49x32xf32>
    %169 = tpu.matmul %168, %167, %cst_159 {dimension_numbers = #tpu.dot_dimension_numbers<[1], [0], [0], [1], [0, 0, 1, 1], [], []>} : vector<49x305xf32>, vector<305x32xf32>, vector<49x32xf32> -> vector<49x32xf32>
    %c0_160 = arith.constant 0 : index
    %c0_161 = arith.constant 0 : index
    %c0_162 = arith.constant 0 : index
    %170 = vector.load %arg8[%c0_160, %c0_161, %c0_162] : memref<1x49x32xf32, #tpu.memory_space<vmem>>, vector<1x49x32xf32>
    %171 = vector.shape_cast %170 : vector<1x49x32xf32> to vector<49x32xf32>
    %172 = vector.shape_cast %169 : vector<49x32xf32> to vector<1x49x32xf32>
    tpu.vector_store %arg8[%c0_160, %c0_161, %c0_162], %172 {strides = array<i32>} : memref<1x49x32xf32, #tpu.memory_space<vmem>>, vector<1x49x32xf32>,
    return
  }
  func.func @transform_0(%arg0: i32) -> (i32, i32, i32, i32) {
    %c0_i32 = arith.constant 0 : i32
    %c0_i32_0 = arith.constant 0 : i32
    %c0_i32_1 = arith.constant 0 : i32
    %c0_i32_2 = arith.constant 0 : i32
    return %arg0, %c0_i32, %c0_i32_0, %c0_i32_1 : i32, i32, i32, i32
  }
  func.func @transform_1(%arg0: i32) -> (i32, i32) {
    %c0_i32 = arith.constant 0 : i32
    %c0_i32_0 = arith.constant 0 : i32
    %c0_i32_1 = arith.constant 0 : i32
    return %c0_i32, %c0_i32_0 : i32, i32
  }
  func.func @transform_2(%arg0: i32) -> (i32, i32) {
    %c0_i32 = arith.constant 0 : i32
    %c0_i32_0 = arith.constant 0 : i32
    %c0_i32_1 = arith.constant 0 : i32
    return %c0_i32, %c0_i32_0 : i32, i32
  }
  func.func @transform_3(%arg0: i32) -> (i32, i32) {
    %c0_i32 = arith.constant 0 : i32
    %c0_i32_0 = arith.constant 0 : i32
    %c0_i32_1 = arith.constant 0 : i32
    return %c0_i32, %c0_i32_0 : i32, i32
  }
  func.func @transform_4(%arg0: i32) -> (i32, i32, i32) {
    %c0_i32 = arith.constant 0 : i32
    %c0_i32_0 = arith.constant 0 : i32
    %c0_i32_1 = arith.constant 0 : i32
    %c0_i32_2 = arith.constant 0 : i32
    return %c0_i32, %c0_i32_0, %c0_i32_1 : i32, i32, i32
  }
  func.func @transform_5(%arg0: i32) -> (i32, i32) {
    %c0_i32 = arith.constant 0 : i32
    %c0_i32_0 = arith.constant 0 : i32
    %c0_i32_1 = arith.constant 0 : i32
    return %c0_i32, %c0_i32_0 : i32, i32
  }
  func.func @transform_6(%arg0: i32) -> (i32, i32) {
    %c0_i32 = arith.constant 0 : i32
    %c0_i32_0 = arith.constant 0 : i32
    %c0_i32_1 = arith.constant 0 : i32
    return %c0_i32, %c0_i32_0 : i32, i32
  }
  func.func @transform_7(%arg0: i32) -> (i32, i32, i32) {
    %c0_i32 = arith.constant 0 : i32
    %c0_i32_0 = arith.constant 0 : i32
    %c0_i32_1 = arith.constant 0 : i32
    return %arg0, %c0_i32, %c0_i32_0 : i32, i32, i32
  }
}

module attributes {stable_mosaic.version = 11 : i64} {
  func.func @_linear_kernel(%arg0: i32, %arg1: memref<2x1568xf32, #tpu.memory_space<vmem>>, %arg2: memref<1568x128xbf16, #tpu.memory_space<vmem>>, %arg3: memref<1x128xf32, #tpu.memory_space<vmem>>, %arg4: memref<2x128xf32, #tpu.memory_space<vmem>>) attributes {dimension_semantics = [#tpu.dimension_semantics<parallel>], iteration_bounds = array<i64: 1>, scalar_prefetch = 0 : i64, scratch_operands = 0 : i64, tpu.core_type = #tpu.core_type<tc>, window_params = [{transform_indices = @transform_0, window_bounds = array<i64: 2, 1568>}, {pipeline_mode = #tpu.pipeline_mode<synchronous>, transform_indices = @transform_1, window_bounds = array<i64: 1568, 128>}, {pipeline_mode = #tpu.pipeline_mode<synchronous>, transform_indices = @transform_2, window_bounds = array<i64: 1, 128>}, {transform_indices = @transform_3, window_bounds = array<i64: 2, 128>}]} {
    %c0 = arith.constant 0 : index
    %c0_0 = arith.constant 0 : index
    %0 = vector.load %arg1[%c0, %c0_0] : memref<2x1568xf32, #tpu.memory_space<vmem>>, vector<2x1568xf32>
    %1 = arith.truncf %0 : vector<2x1568xf32> to vector<2x1568xbf16>
    %c0_1 = arith.constant 0 : index
    %c0_2 = arith.constant 0 : index
    %2 = vector.load %arg2[%c0_1, %c0_2] : memref<1568x128xbf16, #tpu.memory_space<vmem>>, vector<1568x128xbf16>
    %cst = arith.constant dense<0.000000e+00> : vector<2x128xf32>
    %3 = tpu.matmul %1, %2, %cst {dimension_numbers = #tpu.dot_dimension_numbers<[1], [0], [0], [1], [0, 0, 1, 1], [], []>} : vector<2x1568xbf16>, vector<1568x128xbf16>, vector<2x128xf32> -> vector<2x128xf32>
    %c0_3 = arith.constant 0 : index
    %c0_4 = arith.constant 0 : index
    %4 = vector.load %arg3[%c0_3, %c0_4] : memref<1x128xf32, #tpu.memory_space<vmem>>, vector<1x128xf32>
    %5 = vector.broadcast %4 : vector<1x128xf32> to vector<2x128xf32>
    %6 = arith.addf %3, %5 : vector<2x128xf32>
    %c0_5 = arith.constant 0 : index
    %c0_6 = arith.constant 0 : index
    %7 = vector.load %arg4[%c0_5, %c0_6] : memref<2x128xf32, #tpu.memory_space<vmem>>, vector<2x128xf32>
    tpu.vector_store %arg4[%c0_5, %c0_6], %6 {strides = array<i32>} : memref<2x128xf32, #tpu.memory_space<vmem>>, vector<2x128xf32>,
    return
  }
  func.func @transform_0(%arg0: i32) -> (i32, i32) {
    %c0_i32 = arith.constant 0 : i32
    %c0_i32_0 = arith.constant 0 : i32
    return %arg0, %c0_i32 : i32, i32
  }
  func.func @transform_1(%arg0: i32) -> (i32, i32) {
    %c0_i32 = arith.constant 0 : i32
    %c0_i32_0 = arith.constant 0 : i32
    %c0_i32_1 = arith.constant 0 : i32
    return %c0_i32, %c0_i32_0 : i32, i32
  }
  func.func @transform_2(%arg0: i32) -> (i32, i32) {
    %c0_i32 = arith.constant 0 : i32
    %c0_i32_0 = arith.constant 0 : i32
    %c0_i32_1 = arith.constant 0 : i32
    return %c0_i32, %c0_i32_0 : i32, i32
  }
  func.func @transform_3(%arg0: i32) -> (i32, i32) {
    %c0_i32 = arith.constant 0 : i32
    %c0_i32_0 = arith.constant 0 : i32
    return %arg0, %c0_i32 : i32, i32
  }
}

</mosaic_0001>

<bundles_post_ra>
// kernel: convnet_forward.3
= control target key start
LH: loop header
LB: loop body
LE: loop exit
PB: predicated region body
PF: predicated region fallthrough
CT: control target
= control target key end

     0   :  { %v28_v28 = vlaneseq  ;;  %v1571_v36 = vmov 1983009808   ;;  %s1924_s0 = inlined_call_operand.vmem [shape: f32[2,1568], index: 0, kind: input, shape index: {}]   ;;  %s1925_s1 = inlined_call_operand.vmem [shape: bf16[1568,128], index: 1, kind: input, shape index: {}]   ;;  %s1926_s2 = inlined_call_operand.vmem [shape: f32[1,128], index: 2, kind: input, shape index: {}]   ;;  %s1927_s3 = inlined_call_operand.hbm [shape: f32[2,128], index: 3, kind: output, shape index: {}]  }
   0x1   :  { %v1446_v0 = vld [vmem:[%s1925_s1 + $0x40] sm:$0xff]   ;;  %v1450_v4 = vld [vmem:[%s1925_s1 + $0x48] sm:$0xff]   ;;  %v1454_v8 = vld [vmem:[%s1925_s1 + $0x50] sm:$0xff]   ;;  %v26_v37 = vunpack.c.l.s4 %v1571_v36 }
   0x2   :  { %v1447_v1 = vld [vmem:[%s1925_s1] sm:$0xff]   ;;  %1299 = vmatprep.subr.bf16.mxu0 %v1446_v0  ;;  %v1451_v5 = vld [vmem:[%s1925_s1 + $0x8] sm:$0xff]   ;;  %v1455_v9 = vld [vmem:[%s1925_s1 + $0x10] sm:$0xff]   ;;  %v29_v33 = vshrl.u32 %v28_v28, 7 }
   0x3   :  { %v1448_v2 = vld [vmem:[%s1925_s1 + $0xc0] sm:$0xff]   ;;  %1300 = vmatpush3.bf16.msra.mxu0 %v1447_v1  ;;  %v1452_v6 = vld [vmem:[%s1925_s1 + $0xc8] sm:$0xff]   ;;  %v1456_v10 = vld [vmem:[%s1925_s1 + $0xd0] sm:$0xff]   ;;  %v27_v38 = vunpack.c.0.s8 %v26_v37 }
   0x4   :  { %v1449_v3 = vld [vmem:[%s1925_s1 + $0x80] sm:$0xff]   ;;  %1321 = vmatprep.subr.bf16.mxu1 %v1448_v2  ;;  %1301 = vmatprep.subr.bf16.mxu0 %v1450_v4  ;;  %v1453_v7 = vld [vmem:[%s1925_s1 + $0x88] sm:$0xff]   ;;  %v1457_v11 = vld [vmem:[%s1925_s1 + $0x90] sm:$0xff]  }
   0x5   :  { %1322 = vmatpush3.bf16.msra.mxu1 %v1449_v3  ;;  %v1458_v12 = vld [vmem:[%s1925_s1 + $0x58] sm:$0xff]   ;;  %v1462_v16 = vld [vmem:[%s1925_s1 + $0x60] sm:$0xff]   ;;  %v1466_v20 = vld [vmem:[%s1925_s1 + $0x68] sm:$0xff]   ;;  %v1700_v41 = vsub.s32 %v27_v38, %v29_v33 }
   0x6   :  { %1323 = vmatprep.subr.bf16.mxu1 %v1452_v6  ;;  %v1459_v13 = vld [vmem:[%s1925_s1 + $0x18] sm:$0xff]   ;;  %v1463_v17 = vld [vmem:[%s1925_s1 + $0x20] sm:$0xff]   ;;  %v1467_v21 = vld [vmem:[%s1925_s1 + $0x28] sm:$0xff]  }
   0x7   :  { %1302 = vmatpush3.bf16.msra.mxu0 %v1451_v5  ;;  %v1460_v14 = vld [vmem:[%s1925_s1 + $0xd8] sm:$0xff]   ;;  %v1464_v18 = vld [vmem:[%s1925_s1 + $0xe0] sm:$0xff]   ;;  %v1468_v22 = vld [vmem:[%s1925_s1 + $0xe8] sm:$0xff]  }
   0x8   :  { %1303 = vmatprep.subr.bf16.mxu0 %v1454_v8  ;;  %v1461_v15 = vld [vmem:[%s1925_s1 + $0x98] sm:$0xff]   ;;  %v1465_v19 = vld [vmem:[%s1925_s1 + $0xa0] sm:$0xff]   ;;  %v1469_v23 = vld [vmem:[%s1925_s1 + $0xa8] sm:$0xff]  }
   0x9   :  { %1324 = vmatpush3.bf16.msra.mxu1 %v1453_v7  ;;  %v1470_v24 = vld [vmem:[%s1925_s1 + $0x70] sm:$0xff]   ;;  %v1474_v29 = vld [vmem:[%s1925_s1 + $0x78] sm:$0xff]   ;;  %v16_v34 = vld [vmem:[%s1924_s0] sm:$0xff] }
   0xa   :  { %1325 = vmatprep.subr.bf16.mxu1 %v1456_v10  ;;  %v1471_v25 = vld [vmem:[%s1925_s1 + $0x30] sm:$0xff]   ;;  %v1475_v30 = vld [vmem:[%s1925_s1 + $0x38] sm:$0xff]   ;;  %v1478_v35 = vld [vmem:[%s1925_s1 + $0x140] sm:$0xff]   ;;  %v24_v39 = vcombine.high %v16_v34, %v16_v34  ;;  %v31_v42 = vrot.slane %v16_v34, %v1700_v41 }
   0xb   :  { %1304 = vmatpush3.bf16.msra.mxu0 %v1455_v9  ;;  %v1472_v26 = vld [vmem:[%s1925_s1 + $0xf0] sm:$0xff]   ;;  %v1476_v31 = vld [vmem:[%s1925_s1 + $0xf8] sm:$0xff]   ;;  %v1481_v40 = vld [vmem:[%s1925_s1 + $0x1c0] sm:$0xff]  }
   0xc   :  { %1305 = vmatprep.subr.bf16.mxu0 %v1458_v12  ;;  %v1473_v27 = vld [vmem:[%s1925_s1 + $0xb0] sm:$0xff]   ;;  %v1477_v32 = vld [vmem:[%s1925_s1 + $0xb8] sm:$0xff]   ;;  %v38_v43 = vrot.slane %v24_v39, %v1700_v41  ;;  %v39_v44 = vcombine.high %v31_v42, %v31_v42  ;;  %v1480_v46 = vld [vmem:[%s1925_s1 + $0x100] sm:$0xff]   ;;  %v95_v47 = vpack.c.bf16 %v31_v42, %v31_v42 }
   0xd   :  { %1326 = vmatpush3.bf16.msra.mxu1 %v1457_v11  ;;  %v1482_v49 = vld [vmem:[%s1925_s1 + $0x180] sm:$0xff]   ;;  %v1483_v52 = vld [vmem:[%s1925_s1 + $0x148] sm:$0xff]   ;;  %v1487_v56 = vld [vmem:[%s1925_s1 + $0x150] sm:$0xff]  }
   0xe   :  { %1327 = vmatprep.subr.bf16.mxu1 %v1460_v14  ;;  %v40_v45 = vcombine.high %v38_v43, %v38_v43  ;;  %v97_v48 = vpack.c.bf16 %v38_v43, %v38_v43  ;;  %v96_v50 = vpack.c.bf16 %v39_v44, %v39_v44  ;;  %v1485_v53 = vld [vmem:[%s1925_s1 + $0x1c8] sm:$0xff]   ;;  %v1489_v57 = vld [vmem:[%s1925_s1 + $0x1d0] sm:$0xff]   ;;  %v1491_v60 = vld [vmem:[%s1925_s1 + $0x158] sm:$0xff]  }
   0xf   :  { %1306 = vmatpush3.bf16.msra.mxu0 %v1459_v13  ;;  %v1484_v54 = vld [vmem:[%s1925_s1 + $0x108] sm:$0xff]   ;;  %v1488_v58 = vld [vmem:[%s1925_s1 + $0x110] sm:$0xff]   ;;  %v1493_v61 = vld [vmem:[%s1925_s1 + $0x1d8] sm:$0xff]  }
  0x10   :  { %1307 = vmatprep.subr.bf16.mxu0 %v1462_v16  ;;  %v98_v51 = vpack.c.bf16 %v40_v45, %v40_v45  ;;  %935 = vmatprep.mubr.bf16.mxu0 %v96_v50  ;;  %v1486_v55 = vld [vmem:[%s1925_s1 + $0x188] sm:$0xff]   ;;  %v1490_v59 = vld [vmem:[%s1925_s1 + $0x190] sm:$0xff]   ;;  %v1492_v62 = vld [vmem:[%s1925_s1 + $0x118] sm:$0xff]  }
  0x11   :  { %1328 = vmatpush3.bf16.msra.mxu1 %v1461_v15  ;;  %v1494_v63 = vld [vmem:[%s1925_s1 + $0x198] sm:$0xff]   ;;  %v1495_v0 = vld [vmem:[%s1925_s1 + $0x160] sm:$0xff]   ;;  %v1499_v4 = vld [vmem:[%s1925_s1 + $0x168] sm:$0xff]  }
  0x12   :  { %1329 = vmatprep.subr.bf16.mxu1 %v1464_v18  ;;  %975 = vmatprep.mubr.bf16.mxu1 %v98_v51  ;;  %v1497_v1 = vld [vmem:[%s1925_s1 + $0x1e0] sm:$0xff]   ;;  %v1501_v5 = vld [vmem:[%s1925_s1 + $0x1e8] sm:$0xff]   ;;  %v1503_v8 = vld [vmem:[%s1925_s1 + $0x170] sm:$0xff]  }
  0x13   :  { %1308 = vmatpush3.bf16.msra.mxu0 %v1463_v17  ;;  %v1496_v2 = vld [vmem:[%s1925_s1 + $0x120] sm:$0xff]   ;;  %v1500_v6 = vld [vmem:[%s1925_s1 + $0x128] sm:$0xff]   ;;  %v1505_v9 = vld [vmem:[%s1925_s1 + $0x1f0] sm:$0xff]  }
  0x14   :  { %1309 = vmatprep.subr.bf16.mxu0 %v1466_v20  ;;  %v1498_v3 = vld [vmem:[%s1925_s1 + $0x1a0] sm:$0xff]   ;;  %v1502_v7 = vld [vmem:[%s1925_s1 + $0x1a8] sm:$0xff]   ;;  %v1504_v11 = vld [vmem:[%s1925_s1 + $0x130] sm:$0xff]  }
  0x15   :  { %1330 = vmatpush3.bf16.msra.mxu1 %v1465_v19  ;;  %v17_v10 = vld [vmem:[%s1924_s0 + $0x8] sm:$0xff]  ;;  %v1506_v14 = vld [vmem:[%s1925_s1 + $0x1b0] sm:$0xff]   ;;  %v1507_v15 = vld [vmem:[%s1925_s1 + $0x178] sm:$0xff]  }
  0x16   :  { %1331 = vmatprep.subr.bf16.mxu1 %v1468_v22  ;;  %v48_v12 = vrot.slane %v17_v10, %v1700_v41  ;;  %v41_v13 = vcombine.high %v17_v10, %v17_v10  ;;  %v1509_v18 = vld [vmem:[%s1925_s1 + $0x1f8] sm:$0xff]   ;;  %v1519_v33 = vld [vmem:[%s1925_s1 + $0x288] sm:$0xff]   ;;  %v1520_v34 = vld [vmem:[%s1925_s1 + $0x250] sm:$0xff]  }
  0x17   :  { %1310 = vmatpush3.bf16.msra.mxu0 %v1467_v21  ;;  %v1508_v19 = vld [vmem:[%s1925_s1 + $0x138] sm:$0xff]   ;;  %v1521_v36 = vld [vmem:[%s1925_s1 + $0x210] sm:$0xff]   ;;  %v1528_v43 = vld [vmem:[%s1925_s1 + $0x260] sm:$0xff]  }
  0x18   :  { %1311 = vmatprep.subr.bf16.mxu0 %v1470_v24  ;;  %v56_v16 = vcombine.high %v48_v12, %v48_v12  ;;  %v55_v17 = vrot.slane %v41_v13, %v1700_v41  ;;  %v1510_v22 = vld [vmem:[%s1925_s1 + $0x1b8] sm:$0xff]   ;;  %v1523_v37 = vld [vmem:[%s1925_s1 + $0x290] sm:$0xff]   ;;  %v1530_v44 = vld [vmem:[%s1925_s1 + $0x2e0] sm:$0xff]  }
  0x19   :  { %1332 = vmatpush3.bf16.msra.mxu1 %v1469_v23  ;;  %v1511_v23 = vld [vmem:[%s1925_s1 + $0x240] sm:$0xff]   ;;  %v1524_v38 = vld [vmem:[%s1925_s1 + $0x258] sm:$0xff]   ;;  %v1535_v50 = vld [vmem:[%s1925_s1 + $0x2a8] sm:$0xff]  }
  0x1a   :  { %1333 = vmatprep.subr.bf16.mxu1 %v1472_v26  ;;  %v100_v20 = vpack.c.bf16 %v56_v16, %v56_v16  ;;  %v57_v21 = vcombine.high %v55_v17, %v55_v17  ;;  %v1513_v26 = vld [vmem:[%s1925_s1 + $0x200] sm:$0xff]   ;;  %v101_v28 = vpack.c.bf16 %v55_v17, %v55_v17  ;;  %v1526_v39 = vld [vmem:[%s1925_s1 + $0x2d8] sm:$0xff]   ;;  %v1536_v51 = vld [vmem:[%s1925_s1 + $0x270] sm:$0xff]  }
  0x1b   :  { %1312 = vmatpush3.bf16.msra.mxu0 %v1471_v25  ;;  %v1514_v25 = vld [vmem:[%s1925_s1 + $0x2c0] sm:$0xff]   ;;  %v1527_v42 = vld [vmem:[%s1925_s1 + $0x298] sm:$0xff]  }
  0x1c   :  { %1313 = vmatprep.subr.bf16.mxu0 %v1474_v29  ;;  %v102_v24 = vpack.c.bf16 %v57_v21, %v57_v21  ;;  %v1515_v29 = vld [vmem:[%s1925_s1 + $0x280] sm:$0xff]  }
  0x1d   :  { %1334 = vmatpush3.bf16.msra.mxu1 %v1473_v27  ;;  %v99_v27 = vpack.c.bf16 %v48_v12, %v48_v12  ;;  %v1529_v45 = vld [vmem:[%s1925_s1 + $0x220] sm:$0xff]  }
  0x1e   :  { %1335 = vmatprep.subr.bf16.mxu1 %v1476_v31  ;;  %v1518_v31 = vld [vmem:[%s1925_s1 + $0x2c8] sm:$0xff]  }
  0x1f   :  { %1314 = vmatpush3.bf16.msra.mxu0 %v1475_v30  ;;  %v1516_v30 = vld [vmem:[%s1925_s1 + $0x248] sm:$0xff]  }
  0x20   :  { %1343 = vmatprep.subr.bf16.mxu0 %v1478_v35  ;;  %v1522_v35 = vld [vmem:[%s1925_s1 + $0x2d0] sm:$0xff]  }
  0x21   :  { %1336 = vmatpush3.bf16.msra.mxu1 %v1477_v32  ;;  %v1517_v32 = vld [vmem:[%s1925_s1 + $0x208] sm:$0xff]  }
  0x22   :  { %1365 = vmatprep.subr.bf16.mxu1 %v1481_v40  ;;  %936 = vmatmul.mubr.bf16.vlgmr.msra.gmra.mrb[0].mxu0 %v95_v47  ;;  %v1525_v40 = vld [vmem:[%s1925_s1 + $0x218] sm:$0xff]   ;;  %v1532_v47 = vld [vmem:[%s1925_s1 + $0x268] sm:$0xff]  }
  0x23   :  { %1344 = vmatpush3.bf16.msra.mxu0 %v1480_v46  ;;  %1015 = vmatprep.mubr.bf16.mxu0 %v100_v20  ;;  %v1531_v46 = vld [vmem:[%s1925_s1 + $0x2a0] sm:$0xff]  }
  0x24   :  { %976 = vmatmul.mubr.bf16.vlgmr.msra.gmra.mrb[0].mxu1 %v97_v48  ;;  %1345 = vmatprep.subr.bf16.mxu0 %v1483_v52  ;;  %v1534_v48 = vld [vmem:[%s1925_s1 + $0x2e8] sm:$0xff]   ;;  %v1538_v52 = vld [vmem:[%s1925_s1 + $0x2f0] sm:$0xff]  }
  0x25   :  { %1366 = vmatpush3.bf16.msra.mxu1 %v1482_v49  ;;  %1055 = vmatprep.mubr.bf16.mxu1 %v102_v24  ;;  %v1533_v49 = vld [vmem:[%s1925_s1 + $0x228] sm:$0xff]  }
  0x26   :  { %1367 = vmatprep.subr.bf16.mxu1 %v1485_v53  ;;  %v18_v53 = vld [vmem:[%s1924_s0 + $0x10] sm:$0xff] }
  0x27   :  { %1346 = vmatpush3.bf16.msra.mxu0 %v1484_v54  ;;  %v65_v54 = vrot.slane %v18_v53, %v1700_v41 }
  0x28   :  { %1347 = vmatprep.subr.bf16.mxu0 %v1487_v56  ;;  %v1537_v56 = vld [vmem:[%s1925_s1 + $0x230] sm:$0xff]  }
  0x29   :  { %1368 = vmatpush3.bf16.msra.mxu1 %v1486_v55  ;;  %v58_v55 = vcombine.high %v18_v53, %v18_v53 }
  0x2a   :  { %1369 = vmatprep.subr.bf16.mxu1 %v1489_v57  ;;  %v1539_v57 = vld [vmem:[%s1925_s1 + $0x2b0] sm:$0xff]  }
  0x2b   :  { %1348 = vmatpush3.bf16.msra.mxu0 %v1488_v58  ;;  %v73_v58 = vcombine.high %v65_v54, %v65_v54 }
  0x2c   :  { %1349 = vmatprep.subr.bf16.mxu0 %v1491_v60 }
  0x2d   :  { %1370 = vmatpush3.bf16.msra.mxu1 %v1490_v59  ;;  %v72_v59 = vrot.slane %v58_v55, %v1700_v41 }
  0x2e   :  { %1371 = vmatprep.subr.bf16.mxu1 %v1493_v61 }
  0x2f   :  { %1350 = vmatpush3.bf16.msra.mxu0 %v1492_v62 }
  0x30   :  { %1351 = vmatprep.subr.bf16.mxu0 %v1495_v0 }
  0x31   :  { %1372 = vmatpush3.bf16.msra.mxu1 %v1494_v63 }
  0x32   :  { %1373 = vmatprep.subr.bf16.mxu1 %v1497_v1 }
  0x33   :  { %1352 = vmatpush3.bf16.msra.mxu0 %v1496_v2 }
  0x34   :  { %1353 = vmatprep.subr.bf16.mxu0 %v1499_v4 }
  0x35   :  { %1374 = vmatpush3.bf16.msra.mxu1 %v1498_v3 }
  0x36   :  { %1375 = vmatprep.subr.bf16.mxu1 %v1501_v5 }
  0x37   :  { %1354 = vmatpush3.bf16.msra.mxu0 %v1500_v6 }
  0x38   :  { %1355 = vmatprep.subr.bf16.mxu0 %v1503_v8 }
  0x39   :  { %1376 = vmatpush3.bf16.msra.mxu1 %v1502_v7 }
  0x3a   :  { %1377 = vmatprep.subr.bf16.mxu1 %v1505_v9 }
  0x3b   :  { %1356 = vmatpush3.bf16.msra.mxu0 %v1504_v11 }
  0x3c   :  { %1357 = vmatprep.subr.bf16.mxu0 %v1507_v15 }
  0x3d   :  { %1378 = vmatpush3.bf16.msra.mxu1 %v1506_v14 }
  0x3e   :  { %1379 = vmatprep.subr.bf16.mxu1 %v1509_v18 }
  0x3f   :  { %1358 = vmatpush3.bf16.msra.mxu0 %v1508_v19 }
  0x40   :  { %1387 = vmatprep.subr.bf16.mxu0 %v1511_v23 }
  0x41   :  { %1380 = vmatpush3.bf16.msra.mxu1 %v1510_v22 }
  0x42   :  { %1409 = vmatprep.subr.bf16.mxu1 %v1514_v25  ;;  %1016 = vmatmul.mubr.bf16.vlgmr.msra.gmra.mrb[4].mxu0 %v99_v27 }
  0x43   :  { %1388 = vmatpush3.bf16.msra.mxu0 %v1513_v26 }
  0x44   :  { %1056 = vmatmul.mubr.bf16.vlgmr.msra.gmra.mrb[4].mxu1 %v101_v28  ;;  %1389 = vmatprep.subr.bf16.mxu0 %v1516_v30 }
  0x45   :  { %1410 = vmatpush3.bf16.msra.mxu1 %v1515_v29 }
  0x46   :  { %1411 = vmatprep.subr.bf16.mxu1 %v1518_v31 }
  0x47   :  { %1390 = vmatpush3.bf16.msra.mxu0 %v1517_v32 }
  0x48   :  { %1391 = vmatprep.subr.bf16.mxu0 %v1520_v34 }
  0x49   :  { %1412 = vmatpush3.bf16.msra.mxu1 %v1519_v33 }
  0x4a   :  { %1413 = vmatprep.subr.bf16.mxu1 %v1522_v35 }
  0x4b   :  { %1392 = vmatpush3.bf16.msra.mxu0 %v1521_v36 }
  0x4c   :  { %1393 = vmatprep.subr.bf16.mxu0 %v1524_v38 }
  0x4d   :  { %1414 = vmatpush3.bf16.msra.mxu1 %v1523_v37 }
  0x4e   :  { %1415 = vmatprep.subr.bf16.mxu1 %v1526_v39 }
  0x4f   :  { %1394 = vmatpush3.bf16.msra.mxu0 %v1525_v40 }
  0x50   :  { %1395 = vmatprep.subr.bf16.mxu0 %v1528_v43 }
  0x51   :  { %1416 = vmatpush3.bf16.msra.mxu1 %v1527_v42 }
  0x52   :  { %1417 = vmatprep.subr.bf16.mxu1 %v1530_v44 }
  0x53   :  { %1396 = vmatpush3.bf16.msra.mxu0 %v1529_v45 }
  0x54   :  { %1397 = vmatprep.subr.bf16.mxu0 %v1532_v47 }
  0x55   :  { %1418 = vmatpush3.bf16.msra.mxu1 %v1531_v46 }
  0x56   :  { %1419 = vmatprep.subr.bf16.mxu1 %v1534_v48 }
  0x57   :  { %1398 = vmatpush3.bf16.msra.mxu0 %v1533_v49 }
  0x59   :  { %1420 = vmatpush3.bf16.msra.mxu1 %v1535_v50 }
  0x5a   :  { %8 = vsyncpa [#allocation3], 0  ;;  %1399 = vmatprep.subr.bf16.mxu0 %v1536_v51  ;;  %1421 = vmatprep.subr.bf16.mxu1 %v1538_v52  ;;  %v1540_v60 = vld [vmem:[%s1925_s1 + $0x278] sm:$0xff]   ;;  %v104_v62 = vpack.c.bf16 %v73_v58, %v73_v58  ;;  %v74_v63 = vcombine.high %v72_v59, %v72_v59  ;;  %v103_v2 = vpack.c.bf16 %v65_v54, %v65_v54  ;;  %v1545_v4 = vld [vmem:[%s1925_s1 + $0x300] sm:$0xff]   ;;  %v1572_v5 = vmov 0.0  }
  0x5b   :  { %v1542_v61 = vld [vmem:[%s1925_s1 + $0x2f8] sm:$0xff]   ;;  %1400 = vmatpush3.bf16.msra.mxu0 %v1537_v56  ;;  %v105_v3 = vpack.c.bf16 %v72_v59, %v72_v59  ;;  %v1546_v6 = vld [vmem:[%s1925_s1 + $0x308] sm:$0xff]   ;;  %vm1573_vm0 = vmmov 0   ;;  %vm899_vm1 = vcmask 261120   ;;  %v1199_v11 = vld [vmem:[%s1926_s2] ss:$0 sm:$0xff] }
  0x5c   :  { %v1541_v0 = vld [vmem:[%s1925_s1 + $0x238] sm:$0xff]   ;;  %v106_v1 = vpack.c.bf16 %v74_v63, %v74_v63  ;;  %1401 = vmatprep.subr.bf16.mxu0 %v1540_v60  ;;  %1095 = vmatprep.mubr.bf16.mxu0 %v104_v62 }
  0x5d   :  { %1422 = vmatpush3.bf16.msra.mxu1 %v1539_v57  ;;  %v1543_v41 = vld [vmem:[%s1925_s1 + $0x2b8] sm:$0xff]  }
  0x5e   :  { %1423 = vmatprep.subr.bf16.mxu1 %v1542_v61  ;;  %1135 = vmatprep.mubr.bf16.mxu1 %v106_v1  ;;  %v1198_v7 = vld.sshfl [vmem:[%s1924_s0 + $0x18] sm:$0x3 pattern:$0x76325410]  ;;  %s1574_s0 = smov [#allocation2]  }
  0x5f   :  { %1402 = vmatpush3.bf16.msra.mxu0 %v1541_v0  ;;  %v107_v8 = vpack.c.bf16 %v1198_v7, %v1198_v7  ;;  %s1190_s1 = sshll.u32 %s1574_s0, 4  ;;  %s1191_s1 = int_to_ptr.vmem [resolvable:$true] %s1190_s1 }
  0x60   :  { %1434 = vmatprep.subr.bf16.mxu0 %v1572_v5  ;;  %s1547_s2 = scalar_lea.vmem %s1191_s1, 32  ;;  %p1552_p1 = scmp.lt.s32.totalorder %s1191_s1, %s1191_s1 }
  0x61   :  { %1424 = vmatpush3.bf16.msra.mxu1 %v1543_v41  ;;  %p1548_p0 = scmp.ne.s32.totalorder %s1191_s1, %s1547_s2  ;;  %p1553_p2 = scmp.lt.s32.totalorder %s1547_s2, %s1547_s2 }
  0x62   :  { %1096 = vmatmul.mubr.bf16.vlgmr.msra.gmra.mrb[8].mxu0 %v103_v2 }
  0x63   :  { %1435 = vmatpush3.bf16.msra.mxu0 %v1545_v4  ;;  %1438 = vmatprep.mubr.msk.bf16.mxu0 %vm1573_vm0, %v1572_v5  ;;  %p1554_p3 = por %p1553_p2, %p1552_p1 }
  0x64   :  { %1136 = vmatmul.mubr.bf16.vlgmr.msra.gmra.mrb[8].mxu1 %v105_v3  ;;  %1436 = vmatprep.subr.bf16.mxu0 %v1572_v5 }
  0x65   :  { %p1555_p4 = pnand %p1554_p3, %p1548_p0 }
  0x67   :  { %1437 = vmatpush3.bf16.msra.mxu0 %v1546_v6 }
  0x6a   :  { %1439 = vmatmul.mubr.msk.bf16.vlgmr.msra.gmra.mrb[12].mxu0 %vm899_vm1, %v107_v8 }
  0xf5   :  { %v1315_v9 = vpop.f32.mrb[0].mxu0 }
  0xf6   :  { %v1316_v12 = vpop.f32.mrb[1].mxu0 }
  0xf7   :  { %v1337_v10 = vpop.f32.mrb[0].mxu1  ;;  %v1317_v14 = vadd.f32 %v1316_v12, %v1315_v9  ;;  %v1318_v15 = vpop.f32.mrb[2].mxu0 }
  0xf8   :  { %v1338_v13 = vpop.f32.mrb[1].mxu1  ;;  %v1319_v18 = vpop.f32.mrb[3].mxu0 }
  0xf9   :  { %v1339_v16 = vadd.f32 %v1338_v13, %v1337_v10  ;;  %v1340_v17 = vpop.f32.mrb[2].mxu1  ;;  %v938_v20 = vadd.f32 %v1317_v14, %v1199_v11 }
  0xfa   :  { %v1341_v19 = vpop.f32.mrb[3].mxu1 }
  0xfb   :  { %v978_v21 = vadd.f32 %v1339_v16, %v938_v20 }
 0x115   :  { %v1359_v22 = vpop.f32.mrb[4].mxu0 }
 0x116   :  { %v1360_v24 = vpop.f32.mrb[5].mxu0 }
 0x117   :  { %v1381_v23 = vpop.f32.mrb[4].mxu1  ;;  %v1361_v26 = vadd.f32 %v1360_v24, %v1359_v22  ;;  %v1362_v27 = vpop.f32.mrb[6].mxu0 }
 0x118   :  { %v1382_v25 = vpop.f32.mrb[5].mxu1  ;;  %v1363_v30 = vpop.f32.mrb[7].mxu0 }
 0x119   :  { %v1383_v28 = vadd.f32 %v1382_v25, %v1381_v23  ;;  %v1384_v29 = vpop.f32.mrb[6].mxu1  ;;  %v1018_v32 = vadd.f32 %v1361_v26, %v978_v21 }
 0x11a   :  { %v1385_v31 = vpop.f32.mrb[7].mxu1 }
 0x11b   :  { %v1058_v33 = vadd.f32 %v1383_v28, %v1018_v32 }
 0x135   :  { %v1403_v34 = vpop.f32.mrb[8].mxu0 }
 0x136   :  { %v1404_v36 = vpop.f32.mrb[9].mxu0 }
 0x137   :  { %v1425_v35 = vpop.f32.mrb[8].mxu1  ;;  %v1405_v38 = vadd.f32 %v1404_v36, %v1403_v34  ;;  %v1406_v39 = vpop.f32.mrb[10].mxu0 }
 0x138   :  { %v1426_v37 = vpop.f32.mrb[9].mxu1  ;;  %v1407_v43 = vpop.f32.mrb[11].mxu0 }
 0x139   :  { %v1427_v40 = vadd.f32 %v1426_v37, %v1425_v35  ;;  %v1428_v42 = vpop.f32.mrb[10].mxu1  ;;  %v1098_v45 = vadd.f32 %v1405_v38, %v1058_v33 }
 0x13a   :  { %v1429_v44 = vpop.f32.mrb[11].mxu1 }
 0x13b   :  { %v1138_v46 = vadd.f32 %v1427_v40, %v1098_v45 }
 0x13d   :  { %v1177_v47 = vpop.f32.mrb[12].mxu0 }
 0x13e   :  { %v1178_v48 = vadd.f32 %v1177_v47, %v1138_v46  ;;  %v1440_v49 = vpop.f32.mrb[13].mxu0 }
 0x13f   :  { %v1180_v50 = vpop.f32.mrb[14].mxu0 }
 0x140   :  { %1183 = vst [vmem:[#allocation2] sm:$0x3] %v1178_v48  ;;  %v1441_v51 = vpop.f32.mrb[15].mxu0 }
 0x141   :  { %1558 = shalt.err (!%p1555_p4)
}
 0x142   :  { %s1559_s4 = scalar_lea.hbm %s1927_s3, 32 }
 0x143   :  { %p1560_p5 = scmp.ne.s32.totalorder %s1927_s3, %s1559_s4  ;;  %p1563_p6 = scmp.lt.u32.totalorder %s1559_s4, %s1927_s3 }
 0x145   :  { %p1565_p7 = pnand %p1563_p6, %p1560_p5 }
 0x147   :  { %1568 = shalt.err (!%p1565_p7)
}
 0x148   :  { %1193 = dma.vmem_to_hbm [thread:$0]  %s1191_s1, 32, %s1927_s3, [#allocation3]  }
 0x149   :  { %1569 = dma.done.wait [#allocation3], 32  }
 0x14a   :  { %1570 = vsyncadd [#allocation3], 4294967264 }
 0x14b   :  { %1197 = vsyncpa [#allocation3], 1 }

// kernel: convnet_forward.2
= control target key start
LH: loop header
LB: loop body
LE: loop exit
PB: predicated region body
PF: predicated region fallthrough
CT: control target
= control target key end

     0   :  { %s23439_s24 = smov 0   ;;  %s28099_s0 = inlined_call_operand.vmem [shape: bf16[2,4,324,32], index: 0, kind: input, shape index: {}]   ;;  %s28100_s1 = inlined_call_operand.vmem [shape: bf16[32,16], index: 1, kind: input, shape index: {}]   ;;  %s28101_s2 = inlined_call_operand.vmem [shape: f32[1,16], index: 2, kind: input, shape index: {}]   ;;  %s28102_s3 = inlined_call_operand.vmem [shape: f32[324,1], index: 3, kind: input, shape index: {}]   ;;  %s28103_s4 = inlined_call_operand.vmem [shape: f32[25,16,32], index: 4, kind: input, shape index: {}]   ;;  %s28104_s5 = inlined_call_operand.vmem [shape: f32[1,32], index: 5, kind: input, shape index: {}]   ;;  %s28105_s6 = inlined_call_operand.vmem [shape: f32[49,305], index: 6, kind: input, shape index: {}]   ;;  %s28106_s7 = inlined_call_operand.vmem [shape: f32[2,49,32], index: 7, kind: output, shape index: {}]  }
   0x1 LB: > { %s15058_s25 = sadd.s32 4294967295, %s23393_s24   ;;  %p15062_p0 = scmp.ge.s32.totalorder %s23393_s24, 1  ;;  %s23393_s24 = sphi %s23439_s24, %s17_s24  }
   0x2   : > { %p237_p1 = scmp.lt.s32.totalorder %s23393_s24, 3 }
   0x4   : > { %p238_p2 = pnand %p15062_p0, %p237_p1 }
   0x6   : > { %241 = sbr.rel (%p238_p2) target bundleno = 3647 (0xe3f), region = 48 }
   0xd   : > { %v23450_v0 = vld [vmem:[%s28100_s1] sm:$0xff]   ;;  %v28107_v1 = vmov 0.0   ;;  %v23457_v2 = vld [vmem:[%s28100_s1 + $0x8] sm:$0xff]   ;;  %vm23396_vm0 = vmmov 0   ;;  %p269_p3 = scmp.lt.s32.totalorder %s15058_s25, 1  ;;  %vm440_vm1 = vcmask 261120  }
   0xe   : > { %17677 = vmatprep.subr.bf16.mxu1 %v28107_v1  ;;  %17681 = vmatprep.mubr.msk.bf16.mxu1 %vm23396_vm0, %v28107_v1  ;;  %vm2427_vm2 = vcmask 130048   ;;  %vm2432_vm3 = vcmask 128000   ;;  %vm2474_vm4 = vcmask 125952   ;;  %vm14388_vm5 = vcmask 257024  }
   0xf   : > { %17678 = vmatpush3.bf16.msra.mxu1 %v23450_v0  ;;  %19303 = vmatprep.mubr.msk.f32.mxu0 %vm23396_vm0, %v28107_v1  ;;  %s28242_s25 = smov (!%p269_p3, %s15058_s25), 1  ;;  %vm14791_vm6 = vcmask 1040384   ;;  %vm14769_vm7 = vcmask 400384   ;;  %vm15001_vm8 = vcmask 253952  }
  0x10   : > { %17679 = vmatprep.subr.bf16.mxu1 %v28107_v1  ;;  %s23284_s30 = smul.u32 656, %s28242_s25 }
  0x11   : > { %s23285_s14 = smul.u32 56, %s28242_s25 }
  0x12   : > { %s23472_s10 = scalar_lea.vmem %s28099_s0, %s23284_s30 }
  0x13   : > { %17680 = vmatpush3.bf16.msra.mxu1 %v23457_v2  ;;  %v23302_v3 = vld [vmem:[%s23472_s10] sm:$0xff]   ;;  %v23303_v4 = vld [vmem:[%s23472_s10 + $0x8] sm:$0xff]   ;;  %v23304_v5 = vld [vmem:[%s23472_s10 + $0x10] sm:$0xff]   ;;  %s278_s17 = scalar_lea.vmem %s28106_s7, %s23285_s14 }
  0x14   : > { %17765 = vmatprep.subr.bf16.mxu1 %v28107_v1  ;;  %v23305_v6 = vld [vmem:[%s23472_s10 + $0x18] sm:$0xff]   ;;  %v23306_v7 = vld [vmem:[%s23472_s10 + $0x20] sm:$0xff]   ;;  %v23307_v8 = vld [vmem:[%s23472_s10 + $0x28] sm:$0xff]  }
  0x15   : > { %v23308_v9 = vld [vmem:[%s23472_s10 + $0x30] sm:$0xff]   ;;  %v23309_v10 = vld [vmem:[%s23472_s10 + $0x38] sm:$0xff]   ;;  %v23310_v11 = vld [vmem:[%s23472_s10 + $0x40] sm:$0xff]  }
  0x16   : > { %17682 = vmatmul.mubr.msk.bf16.vlgmr.msra.gmra.mrb[0].mxu1 %vm440_vm1, %v23302_v3  ;;  %v23311_v12 = vld [vmem:[%s23472_s10 + $0x48] sm:$0xff]   ;;  %v23312_v13 = vld [vmem:[%s23472_s10 + $0x50] sm:$0xff]   ;;  %v23313_v14 = vld [vmem:[%s23472_s10 + $0x58] sm:$0xff]  }
  0x17   : > { %17766 = vmatpush3.bf16.msra.mxu1 %v23450_v0  ;;  %17685 = vmatprep.mubr.msk.bf16.mxu1 %vm23396_vm0, %v28107_v1  ;;  %v23314_v15 = vld [vmem:[%s23472_s10 + $0x60] sm:$0xff]   ;;  %v23315_v16 = vld [vmem:[%s23472_s10 + $0x68] sm:$0xff]   ;;  %v23316_v17 = vld [vmem:[%s23472_s10 + $0x70] sm:$0xff]  }
  0x18   : > { %17767 = vmatprep.subr.bf16.mxu1 %v28107_v1  ;;  %v23317_v18 = vld [vmem:[%s23472_s10 + $0x78] sm:$0xff]   ;;  %v23318_v19 = vld [vmem:[%s23472_s10 + $0x80] sm:$0xff]   ;;  %v23319_v20 = vld [vmem:[%s23472_s10 + $0x88] sm:$0xff]  }
  0x19   : > { %v23320_v21 = vld [vmem:[%s23472_s10 + $0x90] sm:$0xff]   ;;  %v23321_v22 = vld [vmem:[%s23472_s10 + $0x98] sm:$0xff]   ;;  %v23322_v23 = vld [vmem:[%s23472_s10 + $0xa0] ss:$0 sps:$4 sm:$0x33]  }
  0x1a   : > { %v23323_v24 = vld [vmem:[%s23472_s10 + $0xa4] sm:$0xff]   ;;  %v23324_v25 = vld [vmem:[%s23472_s10 + $0xac] sm:$0xff]   ;;  %v23325_v26 = vld [vmem:[%s23472_s10 + $0xb4] sm:$0xff]  }
  0x1b   : > { %17768 = vmatpush3.bf16.msra.mxu1 %v23457_v2  ;;  %v23326_v27 = vld [vmem:[%s23472_s10 + $0xbc] sm:$0xff]   ;;  %v23327_v28 = vld [vmem:[%s23472_s10 + $0xc4] sm:$0xff]   ;;  %v23328_v29 = vld [vmem:[%s23472_s10 + $0xcc] sm:$0xff]  }
  0x1c   : > { %17853 = vmatprep.subr.bf16.mxu1 %v28107_v1  ;;  %v23329_v32 = vld [vmem:[%s23472_s10 + $0xd4] sm:$0xff]   ;;  %v23330_v37 = vld [vmem:[%s23472_s10 + $0xdc] sm:$0xff]   ;;  %v23331_v42 = vld [vmem:[%s23472_s10 + $0xe4] sm:$0xff]  }
  0x1d   : > { %v23332_v47 = vld [vmem:[%s23472_s10 + $0xec] sm:$0xff]   ;;  %v23333_v52 = vld [vmem:[%s23472_s10 + $0xf4] sm:$0xff]   ;;  %v23334_v57 = vld [vmem:[%s23472_s10 + $0xfc] sm:$0xff]  }
  0x1e   : > { %17686 = vmatmul.mubr.msk.bf16.gmra.mrb[4].mxu1 %vm440_vm1, %v23303_v4  ;;  %v23335_v62 = vld [vmem:[%s23472_s10 + $0x104] sm:$0xff]  }
  0x1f   : > { %17689 = vmatprep.mubr.msk.bf16.mxu1 %vm23396_vm0, %v28107_v1 }
  0x26   : > { %17690 = vmatmul.mubr.msk.bf16.gmra.mrb[8].mxu1 %vm440_vm1, %v23304_v5 }
  0x27   : > { %17693 = vmatprep.mubr.msk.bf16.mxu1 %vm23396_vm0, %v28107_v1 }
  0x2e   : > { %17694 = vmatmul.mubr.msk.bf16.gmra.mrb[12].mxu1 %vm440_vm1, %v23305_v6  ;;  %v23336_v6 = vld [vmem:[%s23472_s10 + $0x10c] sm:$0xff]  }
  0x2f   : > { %17697 = vmatprep.mubr.msk.bf16.mxu1 %vm23396_vm0, %v28107_v1 }
  0x36   : > { %17698 = vmatmul.mubr.msk.bf16.gmra.mrb[16].mxu1 %vm440_vm1, %v23306_v7 }
  0x37   : > { %17701 = vmatprep.mubr.msk.bf16.mxu1 %vm23396_vm0, %v28107_v1 }
  0x3e   : > { %17702 = vmatmul.mubr.msk.bf16.gmra.mrb[20].mxu1 %vm440_vm1, %v23307_v8 }
  0x3f   : > { %17705 = vmatprep.mubr.msk.bf16.mxu1 %vm23396_vm0, %v28107_v1 }
  0x46   : > { %17706 = vmatmul.mubr.msk.bf16.gmra.mrb[24].mxu1 %vm440_vm1, %v23308_v9 }
  0x47   : > { %17709 = vmatprep.mubr.msk.bf16.mxu1 %vm23396_vm0, %v28107_v1 }
  0x4e   : > { %17710 = vmatmul.mubr.msk.bf16.gmra.mrb[28].mxu1 %vm440_vm1, %v23309_v10 }
  0x4f   : > { %17713 = vmatprep.mubr.msk.bf16.mxu1 %vm23396_vm0, %v28107_v1 }
  0x56   : > { %17714 = vmatmul.mubr.msk.bf16.gmra.mrb[32].mxu1 %vm440_vm1, %v23310_v11  ;;  %v23337_v11 = vld [vmem:[%s23472_s10 + $0x114] sm:$0xff]  }
  0x57   : > { %17717 = vmatprep.mubr.msk.bf16.mxu1 %vm23396_vm0, %v28107_v1 }
  0x5e   : > { %17718 = vmatmul.mubr.msk.bf16.gmra.mrb[36].mxu1 %vm440_vm1, %v23311_v12 }
  0x5f   : > { %17721 = vmatprep.mubr.msk.bf16.mxu1 %vm23396_vm0, %v28107_v1 }
  0x66   : > { %17722 = vmatmul.mubr.msk.bf16.gmra.mrb[40].mxu1 %vm440_vm1, %v23312_v13 }
  0x67   : > { %17725 = vmatprep.mubr.msk.bf16.mxu1 %vm23396_vm0, %v28107_v1 }
  0x6e   : > { %17726 = vmatmul.mubr.msk.bf16.gmra.mrb[44].mxu1 %vm440_vm1, %v23313_v14 }
  0x6f   : > { %17729 = vmatprep.mubr.msk.bf16.mxu1 %vm23396_vm0, %v28107_v1 }
  0x76   : > { %17730 = vmatmul.mubr.msk.bf16.gmra.mrb[48].mxu1 %vm440_vm1, %v23314_v15 }
  0x77   : > { %17733 = vmatprep.mubr.msk.bf16.mxu1 %vm23396_vm0, %v28107_v1 }
  0x7e   : > { %17734 = vmatmul.mubr.msk.bf16.gmra.mrb[52].mxu1 %vm440_vm1, %v23315_v16  ;;  %v23338_v16 = vld [vmem:[%s23472_s10 + $0x11c] sm:$0xff]  }
  0x7f   : > { %17737 = vmatprep.mubr.msk.bf16.mxu1 %vm23396_vm0, %v28107_v1 }
  0x86   : > { %17738 = vmatmul.mubr.msk.bf16.gmra.mrb[56].mxu1 %vm440_vm1, %v23316_v17 }
  0x87   : > { %17741 = vmatprep.mubr.msk.bf16.mxu1 %vm23396_vm0, %v28107_v1 }
  0x8e   : > { %17742 = vmatmul.mubr.msk.bf16.gmra.mrb[60].mxu1 %vm440_vm1, %v23317_v18 }
  0x8f   : > { %17745 = vmatprep.mubr.msk.bf16.mxu1 %vm23396_vm0, %v28107_v1 }
  0x96   : > { %17746 = vmatmul.mubr.msk.bf16.gmra.mrb[64].mxu1 %vm440_vm1, %v23318_v19 }
  0x97   : > { %17749 = vmatprep.mubr.msk.bf16.mxu1 %vm23396_vm0, %v28107_v1 }
  0x9e   : > { %17750 = vmatmul.mubr.msk.bf16.gmra.mrb[68].mxu1 %vm440_vm1, %v23319_v20 }
  0x9f   : > { %17753 = vmatprep.mubr.msk.bf16.mxu1 %vm23396_vm0, %v28107_v1 }
  0xa6   : > { %17754 = vmatmul.mubr.msk.bf16.gmra.mrb[72].mxu1 %vm440_vm1, %v23320_v21  ;;  %v23339_v21 = vld [vmem:[%s23472_s10 + $0x124] sm:$0xff]  }
  0xa7   : > { %17757 = vmatprep.mubr.msk.bf16.mxu1 %vm23396_vm0, %v28107_v1 }
  0xae   : > { %17758 = vmatmul.mubr.msk.bf16.gmra.mrb[76].mxu1 %vm440_vm1, %v23321_v22 }
  0xaf   : > { %17761 = vmatprep.mubr.msk.bf16.mxu1 %vm23396_vm0, %v28107_v1 }
  0xb6   : > { %17762 = vmatmul.mubr.msk.bf16.gmra.mrb[80].mxu1 %vm440_vm1, %v23322_v23 }
  0xb7   : > { %17769 = vmatprep.mubr.msk.bf16.mxu1 %vm23396_vm0, %v28107_v1 }
  0xbe   : > { %17770 = vmatmul.mubr.msk.bf16.vlgmr.msra.gmra.mrb[84].mxu1 %vm440_vm1, %v23323_v24 }
  0xbf   : > { %17854 = vmatpush3.bf16.msra.mxu1 %v23450_v0  ;;  %17773 = vmatprep.mubr.msk.bf16.mxu1 %vm23396_vm0, %v28107_v1 }
  0xc0   : > { %17855 = vmatprep.subr.bf16.mxu1 %v28107_v1 }
  0xc3   : > { %17856 = vmatpush3.bf16.msra.mxu1 %v23457_v2 }
  0xc4   : > { %17941 = vmatprep.subr.bf16.mxu1 %v28107_v1 }
  0xc6   : > { %17774 = vmatmul.mubr.msk.bf16.gmra.mrb[88].mxu1 %vm440_vm1, %v23324_v25 }
  0xc7   : > { %17777 = vmatprep.mubr.msk.bf16.mxu1 %vm23396_vm0, %v28107_v1 }
  0xce   : > { %17778 = vmatmul.mubr.msk.bf16.gmra.mrb[92].mxu1 %vm440_vm1, %v23325_v26  ;;  %v23340_v26 = vld [vmem:[%s23472_s10 + $0x12c] sm:$0xff]  }
  0xcf   : > { %17781 = vmatprep.mubr.msk.bf16.mxu1 %vm23396_vm0, %v28107_v1 }
  0xd6   : > { %17782 = vmatmul.mubr.msk.bf16.gmra.mrb[96].mxu1 %vm440_vm1, %v23326_v27 }
  0xd7   : > { %17785 = vmatprep.mubr.msk.bf16.mxu1 %vm23396_vm0, %v28107_v1 }
  0xde   : > { %17786 = vmatmul.mubr.msk.bf16.gmra.mrb[100].mxu1 %vm440_vm1, %v23327_v28 }
  0xdf   : > { %17789 = vmatprep.mubr.msk.bf16.mxu1 %vm23396_vm0, %v28107_v1 }
  0xe6   : > { %17790 = vmatmul.mubr.msk.bf16.gmra.mrb[104].mxu1 %vm440_vm1, %v23328_v29 }
  0xe7   : > { %17793 = vmatprep.mubr.msk.bf16.mxu1 %vm23396_vm0, %v28107_v1 }
  0xe9   : > { %v23590_v30 = vpop.f32.mrb[0].mxu1 }
  0xea   : > { %v17683_v31 = vpop.f32.mrb[1].mxu1 }
  0xeb   : > { %v23593_v33 = vpop.f32.mrb[2].mxu1 }
  0xec   : > { %v17684_v34 = vpop.f32.mrb[3].mxu1 }
  0xee   : > { %17794 = vmatmul.mubr.msk.bf16.gmra.mrb[108].mxu1 %vm440_vm1, %v23329_v32  ;;  %v23341_v32 = vld [vmem:[%s23472_s10 + $0x134] sm:$0xff]  }
  0xef   : > { %17797 = vmatprep.mubr.msk.bf16.mxu1 %vm23396_vm0, %v28107_v1 }
  0xf1   : > { %v23598_v35 = vpop.f32.mrb[4].mxu1 }
  0xf2   : > { %v17687_v36 = vpop.f32.mrb[5].mxu1 }
  0xf3   : > { %v23601_v38 = vpop.f32.mrb[6].mxu1 }
  0xf4   : > { %v17688_v39 = vpop.f32.mrb[7].mxu1 }
  0xf6   : > { %17798 = vmatmul.mubr.msk.bf16.gmra.mrb[112].mxu1 %vm440_vm1, %v23330_v37 }
  0xf7   : > { %17801 = vmatprep.mubr.msk.bf16.mxu1 %vm23396_vm0, %v28107_v1 }
  0xf9   : > { %v23606_v40 = vpop.f32.mrb[8].mxu1 }
  0xfa   : > { %v17691_v41 = vpop.f32.mrb[9].mxu1 }
  0xfb   : > { %v23609_v43 = vpop.f32.mrb[10].mxu1  ;;  %v23342_v41 = vld [vmem:[%s23472_s10 + $0x13c] sm:$0xff]  }
  0xfc   : > { %v17692_v44 = vpop.f32.mrb[11].mxu1 }
  0xfe   : > { %17802 = vmatmul.mubr.msk.bf16.gmra.mrb[116].mxu1 %vm440_vm1, %v23331_v42 }
  0xff   : > { %17805 = vmatprep.mubr.msk.bf16.mxu1 %vm23396_vm0, %v28107_v1 }
 0x101   : > { %v23614_v45 = vpop.f32.mrb[12].mxu1 }
 0x102   : > { %v17695_v46 = vpop.f32.mrb[13].mxu1 }
 0x103   : > { %v23617_v48 = vpop.f32.mrb[14].mxu1 }
 0x104   : > { %v17696_v49 = vpop.f32.mrb[15].mxu1 }
 0x105   : > { %v23343_v49 = vld [vmem:[%s23472_s10 + $0x144] ss:$0 sps:$4 sm:$0x33]  }
 0x106   : > { %17806 = vmatmul.mubr.msk.bf16.gmra.mrb[120].mxu1 %vm440_vm1, %v23332_v47 }
 0x107   : > { %17809 = vmatprep.mubr.msk.bf16.mxu1 %vm23396_vm0, %v28107_v1 }
 0x109   : > { %v23622_v50 = vpop.f32.mrb[16].mxu1 }
 0x10a   : > { %v17699_v51 = vpop.f32.mrb[17].mxu1 }
 0x10b   : > { %v23625_v53 = vpop.f32.mrb[18].mxu1 }
 0x10c   : > { %v17700_v54 = vpop.f32.mrb[19].mxu1 }
 0x10e   : > { %17810 = vmatmul.mubr.msk.bf16.gmra.mrb[124].mxu1 %vm440_vm1, %v23333_v52 }
 0x10f   : > { %17813 = vmatprep.mubr.msk.bf16.mxu1 %vm23396_vm0, %v28107_v1 }
 0x111   : > { %v23630_v55 = vpop.f32.mrb[20].mxu1 }
 0x112   : > { %v17703_v56 = vpop.f32.mrb[21].mxu1 }
 0x113   : > { %v23633_v58 = vpop.f32.mrb[22].mxu1 }
 0x114   : > { %v17704_v59 = vpop.f32.mrb[23].mxu1 }
 0x116   : > { %17814 = vmatmul.mubr.msk.bf16.gmra.mrb[128].mxu1 %vm440_vm1, %v23334_v57  ;;  %v23344_v57 = vld [vmem:[%s23472_s10 + $0x148] sm:$0xff]  }
 0x117   : > { %17817 = vmatprep.mubr.msk.bf16.mxu1 %vm23396_vm0, %v28107_v1 }
 0x119   : > { %v23638_v60 = vpop.f32.mrb[24].mxu1 }
 0x11a   : > { %v17707_v61 = vpop.f32.mrb[25].mxu1 }
 0x11b   : > { %v23641_v63 = vpop.f32.mrb[26].mxu1 }
 0x11c   : > { %v17708_v3 = vpop.f32.mrb[27].mxu1 }
 0x11e   : > { %17818 = vmatmul.mubr.msk.bf16.gmra.mrb[132].mxu1 %vm440_vm1, %v23335_v62 }
 0x11f   : > { %17821 = vmatprep.mubr.msk.bf16.mxu1 %vm23396_vm0, %v28107_v1 }
 0x121   : > { %v23646_v4 = vpop.f32.mrb[28].mxu1 }
 0x122   : > { %v17711_v5 = vpop.f32.mrb[29].mxu1 }
 0x123   : > { %v23649_v7 = vpop.f32.mrb[30].mxu1  ;;  %v23345_v5 = vld [vmem:[%s23472_s10 + $0x150] sm:$0xff]  }
 0x124   : > { %28139 = vst [vmem:[#allocation4_spill] sm:$0xff] %v23649_v7  ;;  %v17712_v8 = vpop.f32.mrb[31].mxu1  ;;  %v2170_v7 = vld [vmem:[%s28102_s3 + $0xf0] sm:$0xff] }
 0x126   : > { %17822 = vmatmul.mubr.msk.bf16.gmra.mrb[136].mxu1 %vm440_vm1, %v23336_v6 }
 0x127   : > { %17825 = vmatprep.mubr.msk.bf16.mxu1 %vm23396_vm0, %v28107_v1 }
 0x129   : > { %v23654_v9 = vpop.f32.mrb[32].mxu1 }
 0x12a   : > { %v17715_v10 = vpop.f32.mrb[33].mxu1 }
 0x12b   : > { %v23657_v12 = vpop.f32.mrb[34].mxu1 }
 0x12c   : > { %28140 = vst [vmem:[#allocation5_spill] sm:$0xff] %v23657_v12  ;;  %v17716_v13 = vpop.f32.mrb[35].mxu1  ;;  %v2174_v12 = vld [vmem:[%s28102_s3 + $0x110] sm:$0xff] }
 0x12e   : > { %17826 = vmatmul.mubr.msk.bf16.gmra.mrb[140].mxu1 %vm440_vm1, %v23337_v11  ;;  %v23346_v11 = vld [vmem:[%s23472_s10 + $0x158] sm:$0xff]  }
 0x12f   : > { %17829 = vmatprep.mubr.msk.bf16.mxu1 %vm23396_vm0, %v28107_v1 }
 0x131   : > { %v23662_v14 = vpop.f32.mrb[36].mxu1 }
 0x132   : > { %v17719_v15 = vpop.f32.mrb[37].mxu1 }
 0x133   : > { %v23665_v17 = vpop.f32.mrb[38].mxu1 }
 0x134   : > { %28141 = vst [vmem:[#allocation6_spill] sm:$0xff] %v23665_v17  ;;  %v17720_v18 = vpop.f32.mrb[39].mxu1  ;;  %v2178_v17 = vld [vmem:[%s28102_s3 + $0x130] sm:$0xff] }
 0x135   : > { %v23347_v18 = vld [vmem:[%s23472_s10 + $0x160] sm:$0xff]  }
 0x136   : > { %17830 = vmatmul.mubr.msk.bf16.gmra.mrb[144].mxu1 %vm440_vm1, %v23338_v16 }
 0x137   : > { %17833 = vmatprep.mubr.msk.bf16.mxu1 %vm23396_vm0, %v28107_v1 }
 0x139   : > { %v23670_v19 = vpop.f32.mrb[40].mxu1 }
 0x13a   : > { %v17723_v20 = vpop.f32.mrb[41].mxu1 }
 0x13b   : > { %v23673_v22 = vpop.f32.mrb[42].mxu1 }
 0x13c   : > { %28142 = vst [vmem:[#allocation7_spill] sm:$0xff] %v23673_v22  ;;  %v17724_v23 = vpop.f32.mrb[43].mxu1 }
 0x13e   : > { %17834 = vmatmul.mubr.msk.bf16.gmra.mrb[148].mxu1 %vm440_vm1, %v23339_v21 }
 0x13f   : > { %17837 = vmatprep.mubr.msk.bf16.mxu1 %vm23396_vm0, %v28107_v1 }
 0x141   : > { %v23678_v24 = vpop.f32.mrb[44].mxu1 }
 0x142   : > { %v17727_v25 = vpop.f32.mrb[45].mxu1 }
 0x143   : > { %v23681_v27 = vpop.f32.mrb[46].mxu1 }
 0x144   : > { %28143 = vst [vmem:[#allocation8_spill] sm:$0xff] %v23681_v27  ;;  %v17728_v28 = vpop.f32.mrb[47].mxu1 }
 0x146   : > { %17838 = vmatmul.mubr.msk.bf16.gmra.mrb[152].mxu1 %vm440_vm1, %v23340_v26  ;;  %v23348_v26 = vld [vmem:[%s23472_s10 + $0x168] sm:$0xff]  }
 0x147   : > { %17841 = vmatprep.mubr.msk.bf16.mxu1 %vm23396_vm0, %v28107_v1 }
 0x149   : > { %v23686_v29 = vpop.f32.mrb[48].mxu1 }
 0x14a   : > { %v17731_v31 = vpop.f32.mrb[49].mxu1 }
 0x14b   : > { %v23689_v34 = vpop.f32.mrb[50].mxu1 }
 0x14c   : > { %v17732_v36 = vpop.f32.mrb[51].mxu1 }
 0x14e   : > { %17842 = vmatmul.mubr.msk.bf16.gmra.mrb[156].mxu1 %vm440_vm1, %v23341_v32 }
 0x14f   : > { %17845 = vmatprep.mubr.msk.bf16.mxu1 %vm23396_vm0, %v28107_v1 }
 0x151   : > { %v23694_v37 = vpop.f32.mrb[52].mxu1 }
 0x152   : > { %v17735_v39 = vpop.f32.mrb[53].mxu1 }
 0x153   : > { %v23697_v42 = vpop.f32.mrb[54].mxu1  ;;  %v23349_v39 = vld [vmem:[%s23472_s10 + $0x170] sm:$0xff]  }
 0x154   : > { %v17736_v44 = vpop.f32.mrb[55].mxu1 }
 0x156   : > { %17846 = vmatmul.mubr.msk.bf16.gmra.mrb[160].mxu1 %vm440_vm1, %v23342_v41 }
 0x157   : > { %17849 = vmatprep.mubr.msk.bf16.mxu1 %vm23396_vm0, %v28107_v1 }
 0x159   : > { %v23702_v46 = vpop.f32.mrb[56].mxu1 }
 0x15a   : > { %v17739_v47 = vpop.f32.mrb[57].mxu1 }
 0x15b   : > { %v23705_v51 = vpop.f32.mrb[58].mxu1 }
 0x15c   : > { %v17740_v52 = vpop.f32.mrb[59].mxu1 }
 0x15d   : > { %v23350_v52 = vld [vmem:[%s23472_s10 + $0x178] sm:$0xff]  }
 0x15e   : > { %17850 = vmatmul.mubr.msk.bf16.gmra.mrb[164].mxu1 %vm440_vm1, %v23343_v49 }
 0x15f   : > { %17857 = vmatprep.mubr.msk.bf16.mxu1 %vm23396_vm0, %v28107_v1 }
 0x161   : > { %v23710_v54 = vpop.f32.mrb[60].mxu1 }
 0x162   : > { %v17743_v56 = vpop.f32.mrb[61].mxu1 }
 0x163   : > { %v23713_v59 = vpop.f32.mrb[62].mxu1  ;;  %v2161_v56 = vld [vmem:[%s28102_s3 + $0xa8] sm:$0xff] }
 0x164   : > { %v17744_v61 = vpop.f32.mrb[63].mxu1 }
 0x166   : > { %17858 = vmatmul.mubr.msk.bf16.vlgmr.msra.gmra.mrb[168].mxu1 %vm440_vm1, %v23344_v57 }
 0x167   : > { %17942 = vmatpush3.bf16.msra.mxu1 %v23450_v0  ;;  %17861 = vmatprep.mubr.msk.bf16.mxu1 %vm23396_vm0, %v28107_v1 }
 0x168   : > { %17943 = vmatprep.subr.bf16.mxu1 %v28107_v1 }
 0x169   : > { %v23720_v62 = vpop.f32.mrb[64].mxu1 }
 0x16a   : > { %v17747_v3 = vpop.f32.mrb[65].mxu1 }
 0x16b   : > { %v23723_v6 = vpop.f32.mrb[66].mxu1  ;;  %17944 = vmatpush3.bf16.msra.mxu1 %v23457_v2  ;;  %v2162_v3 = vld [vmem:[%s28102_s3 + $0xb0] sm:$0xff] }
 0x16c   : > { %v17748_v8 = vpop.f32.mrb[67].mxu1 }
 0x16d   : > { %v23397_v8 = vmov 0  }
 0x16e   : > { %17862 = vmatmul.mubr.msk.bf16.gmra.mrb[172].mxu1 %vm440_vm1, %v23345_v5  ;;  %v2140_v5 = vld [vmem:[%s28102_s3] sm:$0xff]  ;;  %23298 = vset.pattern.permute.xlu0 %v23397_v8 }
 0x16f   : > { %17865 = vmatprep.mubr.msk.bf16.mxu1 %vm23396_vm0, %v28107_v1  ;;  %2183 = vperm.xlu0 %23298, %v2140_v5  }
 0x170   : > { %23299 = vset.pattern.permute.xlu1 %v23397_v8  ;;  %v2154_v8 = vld [vmem:[%s28102_s3 + $0x70] sm:$0xff] }
 0x171   : > { %v23729_v0 = vpop.f32.mrb[68].mxu1 }
 0x172   : > { %v17751_v10 = vpop.f32.mrb[69].mxu1 }
 0x173   : > { %v23732_v13 = vpop.f32.mrb[70].mxu1 }
 0x174   : > { %v17752_v15 = vpop.f32.mrb[71].mxu1 }
 0x175   : > { %v23351_v15 = vld [vmem:[%s23472_s10 + $0x180] sm:$0xff]  }
 0x176   : > { %17866 = vmatmul.mubr.msk.bf16.gmra.mrb[176].mxu1 %vm440_vm1, %v23346_v11 }
 0x177   : > { %17869 = vmatprep.mubr.msk.bf16.mxu1 %vm23396_vm0, %v28107_v1 }
 0x179   : > { %v23737_v2 = vpop.f32.mrb[72].mxu1 }
 0x17a   : > { %v17755_v16 = vpop.f32.mrb[73].mxu1 }
 0x17b   : > { %v23740_v20 = vpop.f32.mrb[74].mxu1  ;;  %v2157_v16 = vld [vmem:[%s28102_s3 + $0x88] sm:$0xff] }
 0x17c   : > { %v17756_v21 = vpop.f32.mrb[75].mxu1 }
 0x17d   : > { %v2141_v21 = vld [vmem:[%s28102_s3 + $0x8] sm:$0xff] }
 0x17e   : > { %17870 = vmatmul.mubr.msk.bf16.gmra.mrb[180].mxu1 %vm440_vm1, %v23347_v18  ;;  %2188 = vperm.xlu0 %23298, %v2141_v21  }
 0x17f   : > { %17873 = vmatprep.mubr.msk.bf16.mxu1 %vm23396_vm0, %v28107_v1 }
 0x181   : > { %v23745_v23 = vpop.f32.mrb[76].mxu1 }
 0x182   : > { %28144 = vst [vmem:[#allocation9_spill] sm:$0xff] %v23745_v23  ;;  %v17759_v25 = vpop.f32.mrb[77].mxu1 }
 0x183   : > { %v23748_v28 = vpop.f32.mrb[78].mxu1 }
 0x184   : > { %28145 = vst [vmem:[#allocation10_spill] sm:$0xff] %v23748_v28  ;;  %v17760_v31 = vpop.f32.mrb[79].mxu1 }
 0x185   : > { %v2144_v31 = vld [vmem:[%s28102_s3 + $0x20] sm:$0xff] }
 0x186   : > { %17874 = vmatmul.mubr.msk.bf16.gmra.mrb[184].mxu1 %vm440_vm1, %v23348_v26  ;;  %2203 = vperm.xlu0 %23298, %v2144_v31   ;;  %v23353_v31 = vld [vmem:[%s23472_s10 + $0x190] sm:$0xff]  }
 0x187   : > { %17877 = vmatprep.mubr.msk.bf16.mxu1 %vm23396_vm0, %v28107_v1  ;;  %v2158_v26 = vld [vmem:[%s28102_s3 + $0x90] sm:$0xff] }
 0x189   : > { %v23753_v32 = vpop.f32.mrb[80].mxu1 }
 0x18a   : > { %v17763_v36 = vpop.f32.mrb[81].mxu1 }
 0x18b   : > { %v701_v41 = vpop.f32.mrb[82].mxu1 }
 0x18c   : > { %v17764_v44 = vpop.f32.mrb[83].mxu1  ;;  %v23352_v41 = vld [vmem:[%s23472_s10 + $0x188] sm:$0xff]  }
 0x18d   : > { %v2153_v44 = vld [vmem:[%s28102_s3 + $0x68] sm:$0xff] }
 0x18e   : > { %17878 = vmatmul.mubr.msk.bf16.gmra.mrb[188].mxu1 %vm440_vm1, %v23349_v39 }
 0x18f   : > { %17881 = vmatprep.mubr.msk.bf16.mxu1 %vm23396_vm0, %v28107_v1 }
 0x191   : > { %v23759_v47 = vpop.f32.mrb[84].mxu1 }
 0x192   : > { %v17771_v49 = vpop.f32.mrb[85].mxu1 }
 0x193   : > { %v23764_v57 = vpop.f32.mrb[86].mxu1 }
 0x194   : > { %v17772_v61 = vpop.f32.mrb[87].mxu1 }
 0x195   : > { %v2146_v61 = vld [vmem:[%s28102_s3 + $0x30] sm:$0xff] }
 0x196   : > { %17882 = vmatmul.mubr.msk.bf16.gmra.mrb[192].mxu1 %vm440_vm1, %v23350_v52  ;;  %v2142_v52 = vld [vmem:[%s28102_s3 + $0x10] sm:$0xff]  ;;  %2213 = vperm.xlu0 %23298, %v2146_v61  }
 0x197   : > { %17885 = vmatprep.mubr.msk.bf16.mxu1 %vm23396_vm0, %v28107_v1  ;;  %2193 = vperm.xlu1 %23299, %v2142_v52   ;;  %v2145_v52 = vld [vmem:[%s28102_s3 + $0x28] sm:$0xff]  ;;  %v2150_v61 = vld [vmem:[%s28102_s3 + $0x50] sm:$0xff] }
 0x199   : > { %v23774_v10 = vpop.f32.mrb[88].mxu1 }
 0x19a   : > { %v17775_v11 = vpop.f32.mrb[89].mxu1 }
 0x19b   : > { %v23779_v18 = vpop.f32.mrb[90].mxu1  ;;  %v2143_v11 = vld [vmem:[%s28102_s3 + $0x18] sm:$0xff] }
 0x19c   : > { %v17776_v25 = vpop.f32.mrb[91].mxu1  ;;  %2198 = vperm.xlu1 %23299, %v2143_v11  }
 0x19e   : > { %17886 = vmatmul.mubr.msk.bf16.gmra.mrb[196].mxu1 %vm440_vm1, %v23351_v15  ;;  %v2148_v15 = vld [vmem:[%s28102_s3 + $0x40] sm:$0xff] }
 0x19f   : > { %17889 = vmatprep.mubr.msk.bf16.mxu1 %vm23396_vm0, %v28107_v1  ;;  %2223 = vperm.xlu0 %23298, %v2148_v15   ;;  %v2147_v15 = vld [vmem:[%s28102_s3 + $0x38] sm:$0xff] }
 0x1a0   : > { %2208 = vperm.xlu1 %23299, %v2145_v52  }
 0x1a1   : > { %v23792_v36 = vpop.f32.mrb[92].mxu1 }
 0x1a2   : > { %v17779_v39 = vpop.f32.mrb[93].mxu1 }
 0x1a3   : > { %v23797_v49 = vpop.f32.mrb[94].mxu1  ;;  %2233 = vperm.xlu0 %23298, %v2150_v61   ;;  %v2149_v39 = vld [vmem:[%s28102_s3 + $0x48] sm:$0xff] }
 0x1a4   : > { %v17780_v5 = vpop.f32.mrb[95].mxu1  ;;  %2218 = vperm.xlu1 %23299, %v2147_v15  }
 0x1a6   : > { %17890 = vmatmul.mubr.msk.bf16.gmra.mrb[200].mxu1 %vm440_vm1, %v23352_v41 }
 0x1a7   : > { %17893 = vmatprep.mubr.msk.bf16.mxu1 %vm23396_vm0, %v28107_v1 }
 0x1a8   : > { %2228 = vperm.xlu1 %23299, %v2149_v39  }
 0x1a9   : > { %v23816_v21 = vpop.f32.mrb[96].mxu1 }
 0x1aa   : > { %v17783_v25 = vpop.f32.mrb[97].mxu1 }
 0x1ab   : > { %v23821_v41 = vpop.f32.mrb[98].mxu1  ;;  %v2152_v25 = vld [vmem:[%s28102_s3 + $0x60] sm:$0xff] }
 0x1ac   : > { %v17784_v5 = vpop.f32.mrb[99].mxu1  ;;  %2243 = vperm.xlu0 %23298, %v2152_v25  }
 0x1ad   : > { %v23354_v5 = vld [vmem:[%s23472_s10 + $0x198] sm:$0xff]  }
 0x1ae   : > { %17894 = vmatmul.mubr.msk.bf16.gmra.mrb[204].mxu1 %vm440_vm1, %v23353_v31  ;;  %v2156_v31 = vld [vmem:[%s28102_s3 + $0x80] sm:$0xff] }
 0x1af   : > { %17897 = vmatprep.mubr.msk.bf16.mxu1 %vm23396_vm0, %v28107_v1 }
 0x1b0   : > { %2253 = vperm.xlu0 %23298, %v2154_v8  }
 0x1b1   : > { %v23840_v52 = vpop.f32.mrb[100].mxu1 }
 0x1b2   : > { %v17787_v61 = vpop.f32.mrb[101].mxu1 }
 0x1b3   : > { %v23845_v11 = vpop.f32.mrb[102].mxu1  ;;  %v2151_v61 = vld [vmem:[%s28102_s3 + $0x58] sm:$0xff] }
 0x1b4   : > { %v17788_v15 = vpop.f32.mrb[103].mxu1  ;;  %2238 = vperm.xlu1 %23299, %v2151_v61   ;;  %2263 = vperm.xlu0 %23298, %v2156_v31  }
 0x1b5   : > { %v23355_v15 = vld [vmem:[%s23472_s10 + $0x1a0] sm:$0xff]  }
 0x1b6   : > { %17898 = vmatmul.mubr.msk.bf16.gmra.mrb[208].mxu1 %vm440_vm1, %v23354_v5  ;;  %v2160_v5 = vld [vmem:[%s28102_s3 + $0xa0] sm:$0xff] }
 0x1b7   : > { %17901 = vmatprep.mubr.msk.bf16.mxu1 %vm23396_vm0, %v28107_v1 }
 0x1b8   : > { %2248 = vperm.xlu1 %23299, %v2153_v44   ;;  %2273 = vperm.xlu0 %23298, %v2158_v26  }
 0x1b9   : > { %v23864_v39 = vpop.f32.mrb[104].mxu1 }
 0x1ba   : > { %v17791_v8 = vpop.f32.mrb[105].mxu1 }
 0x1bb   : > { %v23869_v25 = vpop.f32.mrb[106].mxu1  ;;  %v2155_v8 = vld [vmem:[%s28102_s3 + $0x78] sm:$0xff] }
 0x1bc   : > { %v17792_v61 = vpop.f32.mrb[107].mxu1  ;;  %2258 = vperm.xlu1 %23299, %v2155_v8   ;;  %2283 = vperm.xlu0 %23298, %v2160_v5  }
 0x1bd   : > { %v23356_v61 = vld [vmem:[%s23472_s10 + $0x1a8] sm:$0xff]  }
 0x1be   : > { %17902 = vmatmul.mubr.msk.bf16.gmra.mrb[212].mxu1 %vm440_vm1, %v23355_v15  ;;  %v2164_v15 = vld [vmem:[%s28102_s3 + $0xc0] sm:$0xff] }
 0x1bf   : > { %17905 = vmatprep.mubr.msk.bf16.mxu1 %vm23396_vm0, %v28107_v1 }
 0x1c0   : > { %2268 = vperm.xlu1 %23299, %v2157_v16   ;;  %2293 = vperm.xlu0 %23298, %v2162_v3  }
 0x1c1   : > { %v23888_v44 = vpop.f32.mrb[108].mxu1 }
 0x1c2   : > { %v17795_v26 = vpop.f32.mrb[109].mxu1 }
 0x1c3   : > { %v23893_v31 = vpop.f32.mrb[110].mxu1  ;;  %v2159_v26 = vld [vmem:[%s28102_s3 + $0x98] sm:$0xff] }
 0x1c4   : > { %v17796_v8 = vpop.f32.mrb[111].mxu1  ;;  %2278 = vperm.xlu1 %23299, %v2159_v26   ;;  %2303 = vperm.xlu0 %23298, %v2164_v15  }
 0x1c5   : > { %v23357_v8 = vld [vmem:[%s23472_s10 + $0x1b0] sm:$0xff]  }
 0x1c6   : > { %17906 = vmatmul.mubr.msk.bf16.gmra.mrb[216].mxu1 %vm440_vm1, %v23356_v61  ;;  %v2168_v61 = vld [vmem:[%s28102_s3 + $0xe0] sm:$0xff] }
 0x1c7   : > { %17909 = vmatprep.mubr.msk.bf16.mxu1 %vm23396_vm0, %v28107_v1  ;;  %v2166_v1 = vld [vmem:[%s28102_s3 + $0xd0] sm:$0xff] }
 0x1c8   : > { %2288 = vperm.xlu1 %23299, %v2161_v56   ;;  %2313 = vperm.xlu0 %23298, %v2166_v1  }
 0x1c9   : > { %v23912_v16 = vpop.f32.mrb[112].mxu1 }
 0x1ca   : > { %28146 = vst [vmem:[#allocation11_spill] sm:$0xff] %v23912_v16  ;;  %v17799_v3 = vpop.f32.mrb[113].mxu1  ;;  %v28148_v16 = vmov 0.0  }
 0x1cb   : > { %v23917_v5 = vpop.f32.mrb[114].mxu1  ;;  %v2163_v3 = vld [vmem:[%s28102_s3 + $0xb8] sm:$0xff]  ;;  %2428 = vst.msk [vmem:[#allocation2] sm:$0xff] %vm2427_vm2, %v28148_v16  ;;  %2429 = vst.msk [vmem:[#allocation2 + $0x8] sm:$0xff] %vm2427_vm2, %v28148_v16 }
 0x1cc   : > { %28147 = vst [vmem:[#allocation12_spill] sm:$0xff] %v23917_v5  ;;  %v17800_v26 = vpop.f32.mrb[115].mxu1  ;;  %2298 = vperm.xlu1 %23299, %v2163_v3   ;;  %2323 = vperm.xlu0 %23298, %v2168_v61   ;;  %v2165_v5 = vld [vmem:[%s28102_s3 + $0xc8] sm:$0xff]  ;;  %2430 = vst.msk [vmem:[#allocation2 + $0x10] sm:$0xff] %vm2427_vm2, %v28148_v16 }
 0x1cd   : > { %v23358_v26 = vld [vmem:[%s23472_s10 + $0x1b8] sm:$0xff]   ;;  %2431 = vst.msk [vmem:[#allocation2 + $0x18] sm:$0xff] %vm2427_vm2, %v28148_v16  ;;  %2476 = vst.msk [vmem:[#allocation2 + $0x16a] sm:$0xff] %vm2427_vm2, %v28148_v16 }
 0x1ce   : > { %17910 = vmatmul.mubr.msk.bf16.gmra.mrb[220].mxu1 %vm440_vm1, %v23357_v8  ;;  %v2172_v8 = vld [vmem:[%s28102_s3 + $0x100] sm:$0xff]  ;;  %2477 = vst.msk [vmem:[#allocation2 + $0x172] sm:$0xff] %vm2427_vm2, %v28148_v16  ;;  %2478 = vst.msk [vmem:[#allocation2 + $0x17a] sm:$0xff] %vm2427_vm2, %v28148_v16 }
 0x1cf   : > { %17913 = vmatprep.mubr.msk.bf16.mxu1 %vm23396_vm0, %v28148_v16  ;;  %2479 = vst.msk [vmem:[#allocation2 + $0x182] sm:$0xff] %vm2427_vm2, %v28148_v16 }
 0x1d0   : > { %2308 = vperm.xlu1 %23299, %v2165_v5   ;;  %2333 = vperm.xlu0 %23298, %v2170_v7   ;;  %2433 = vst.msk [vmem:[#allocation2 + $0x20] sm:$0x3f] %vm2432_vm3, %v28148_v16  ;;  %2480 = vst.msk [vmem:[#allocation2 + $0x18a] sm:$0x3f] %vm2432_vm3, %v28148_v16 }
 0x1d1   : > { %v23936_v56 = vpop.f32.mrb[116].mxu1 }
 0x1d2   : > { %v17803_v1 = vpop.f32.mrb[117].mxu1 }
 0x1d3   : > { %v23941_v15 = vpop.f32.mrb[118].mxu1  ;;  %v2167_v1 = vld [vmem:[%s28102_s3 + $0xd8] sm:$0xff] }
 0x1d4   : > { %28149 = vst [vmem:[#allocation13_spill] sm:$0xff] %v23941_v15  ;;  %v17804_v3 = vpop.f32.mrb[119].mxu1  ;;  %2318 = vperm.xlu1 %23299, %v2167_v1   ;;  %2343 = vperm.xlu0 %23298, %v2172_v8   ;;  %v2169_v15 = vld [vmem:[%s28102_s3 + $0xe8] sm:$0xff] }
 0x1d5   : > { %v23359_v3 = vld [vmem:[%s23472_s10 + $0x1c0] sm:$0xff]  }
 0x1d6   : > { %17914 = vmatmul.mubr.msk.bf16.gmra.mrb[224].mxu1 %vm440_vm1, %v23358_v26  ;;  %v2176_v26 = vld [vmem:[%s28102_s3 + $0x120] sm:$0xff] }
 0x1d7   : > { %17917 = vmatprep.mubr.msk.bf16.mxu1 %vm23396_vm0, %v28148_v16 }
 0x1d8   : > { %2328 = vperm.xlu1 %23299, %v2169_v15   ;;  %2353 = vperm.xlu0 %23298, %v2174_v12  }
 0x1d9   : > { %v23960_v5 = vpop.f32.mrb[120].mxu1 }
 0x1da   : > { %v17807_v7 = vpop.f32.mrb[121].mxu1 }
 0x1db   : > { %v23965_v61 = vpop.f32.mrb[122].mxu1  ;;  %v2171_v7 = vld [vmem:[%s28102_s3 + $0xf8] sm:$0xff] }
 0x1dc   : > { %28150 = vst [vmem:[#allocation14_spill] sm:$0xff] %v23965_v61  ;;  %v17808_v1 = vpop.f32.mrb[123].mxu1  ;;  %2338 = vperm.xlu1 %23299, %v2171_v7   ;;  %2363 = vperm.xlu0 %23298, %v2176_v26   ;;  %v2173_v61 = vld [vmem:[%s28102_s3 + $0x108] sm:$0xff] }
 0x1dd   : > { %v23360_v1 = vld [vmem:[%s23472_s10 + $0x1c8] sm:$0xff]  }
 0x1de   : > { %17918 = vmatmul.mubr.msk.bf16.gmra.mrb[228].mxu1 %vm440_vm1, %v23359_v3  ;;  %v2180_v3 = vld [vmem:[%s28102_s3 + $0x140] sm:$0xf] }
 0x1df   : > { %17921 = vmatprep.mubr.msk.bf16.mxu1 %vm23396_vm0, %v28148_v16 }
 0x1e0   : > { %2348 = vperm.xlu1 %23299, %v2173_v61   ;;  %2373 = vperm.xlu0 %23298, %v2178_v17  }
 0x1e1   : > { %v23984_v15 = vpop.f32.mrb[124].mxu1 }
 0x1e2   : > { %v17811_v12 = vpop.f32.mrb[125].mxu1 }
 0x1e3   : > { %v23989_v8 = vpop.f32.mrb[126].mxu1  ;;  %v2175_v12 = vld [vmem:[%s28102_s3 + $0x118] sm:$0xff] }
 0x1e4   : > { %28151 = vst [vmem:[#allocation15_spill] sm:$0xff] %v23989_v8  ;;  %v17812_v7 = vpop.f32.mrb[127].mxu1  ;;  %2358 = vperm.xlu1 %23299, %v2175_v12   ;;  %2383 = vperm.xlu0 %23298, %v2180_v3   ;;  %v2177_v8 = vld [vmem:[%s28102_s3 + $0x128] sm:$0xff]  ;;  %v2179_v3 = vld [vmem:[%s28102_s3 + $0x138] sm:$0xff] }
 0x1e5   : > { %v23361_v7 = vld [vmem:[%s23472_s10 + $0x1d0] sm:$0xff]  }
 0x1e6   : > { %17922 = vmatmul.mubr.msk.bf16.gmra.mrb[232].mxu1 %vm440_vm1, %v23360_v1 }
 0x1e7   : > { %17925 = vmatprep.mubr.msk.bf16.mxu1 %vm23396_vm0, %v28148_v16 }
 0x1e8   : > { %2368 = vperm.xlu1 %23299, %v2177_v8  }
 0x1e9   : > { %v24008_v17 = vpop.f32.mrb[128].mxu1 }
 0x1ea   : > { %28152 = vst [vmem:[#allocation16_spill] sm:$0xff] %v24008_v17  ;;  %v17815_v61 = vpop.f32.mrb[129].mxu1  ;;  %v23362_v17 = vld [vmem:[%s23472_s10 + $0x1d8] sm:$0xff]  }
 0x1eb   : > { %v24013_v26 = vpop.f32.mrb[130].mxu1 }
 0x1ec   : > { %28153 = vst [vmem:[#allocation17_spill] sm:$0xff] %v24013_v26  ;;  %v17816_v22 = vpop.f32.mrb[131].mxu1  ;;  %2378 = vperm.xlu1 %23299, %v2179_v3  }
 0x1ee   : > { %17926 = vmatmul.mubr.msk.bf16.gmra.mrb[236].mxu1 %vm440_vm1, %v23361_v7 }
 0x1ef   : > { %17929 = vmatprep.mubr.msk.bf16.mxu1 %vm23396_vm0, %v28148_v16 }
 0x1f1   : > { %v24026_v61 = vpop.f32.mrb[132].mxu1 }
 0x1f2   : > { %28154 = vst [vmem:[#allocation18_spill] sm:$0xff] %v24026_v61  ;;  %v17819_v1 = vpop.f32.mrb[133].mxu1 }
 0x1f3   : > { %v24031_v8 = vpop.f32.mrb[134].mxu1  ;;  %v23363_v1 = vld [vmem:[%s23472_s10 + $0x1e0] sm:$0xff]  }
 0x1f4   : > { %28155 = vst [vmem:[#allocation19_spill] sm:$0xff] %v24031_v8  ;;  %v17820_v12 = vpop.f32.mrb[135].mxu1 }
 0x1f6   : > { %17930 = vmatmul.mubr.msk.bf16.gmra.mrb[240].mxu1 %vm440_vm1, %v23362_v17 }
 0x1f7   : > { %17933 = vmatprep.mubr.msk.bf16.mxu1 %vm23396_vm0, %v28148_v16 }
 0x1f9   : > { %v24038_v3 = vpop.f32.mrb[136].mxu1 }
 0x1fa   : > { %28156 = vst [vmem:[#allocation20_spill] sm:$0xff] %v24038_v3  ;;  %v17823_v26 = vpop.f32.mrb[137].mxu1 }
 0x1fb   : > { %v24043_v22 = vpop.f32.mrb[138].mxu1  ;;  %v23364_v26 = vld [vmem:[%s23472_s10 + $0x1e8] ss:$0 sps:$4 sm:$0x33]  }
 0x1fc   : > { %28157 = vst [vmem:[#allocation21_spill] sm:$0xff] %v24043_v22  ;;  %v17824_v61 = vpop.f32.mrb[139].mxu1 }
 0x1fe   : > { %17934 = vmatmul.mubr.msk.bf16.gmra.mrb[244].mxu1 %vm440_vm1, %v23363_v1 }
 0x1ff   : > { %17937 = vmatprep.mubr.msk.bf16.mxu1 %vm23396_vm0, %v28148_v16 }
 0x201   : > { %v24050_v17 = vpop.f32.mrb[140].mxu1 }
 0x202   : > { %28158 = vst [vmem:[#allocation22_spill] sm:$0xff] %v24050_v17  ;;  %v17827_v7 = vpop.f32.mrb[141].mxu1 }
 0x203   : > { %v24055_v27 = vpop.f32.mrb[142].mxu1  ;;  %v23365_v7 = vld [vmem:[%s23472_s10 + $0x1ec] sm:$0xff]  }
 0x204   : > { %28159 = vst [vmem:[#allocation23_spill] sm:$0xff] %v24055_v27  ;;  %v17828_v3 = vpop.f32.mrb[143].mxu1 }
 0x206   : > { %17938 = vmatmul.mubr.msk.bf16.gmra.mrb[248].mxu1 %vm440_vm1, %v23364_v26 }
 0x207   : > { %17945 = vmatprep.mubr.msk.bf16.mxu1 %vm23396_vm0, %v28148_v16 }
 0x209   : > { %v24062_v1 = vpop.f32.mrb[144].mxu1 }
 0x20a   : > { %28160 = vst [vmem:[#allocation24_spill] sm:$0xff] %v24062_v1  ;;  %v17831_v12 = vpop.f32.mrb[145].mxu1 }
 0x20b   : > { %v24067_v8 = vpop.f32.mrb[146].mxu1  ;;  %v23366_v12 = vld [vmem:[%s23472_s10 + $0x1f4] sm:$0xff]  }
 0x20c   : > { %28161 = vst [vmem:[#allocation25_spill] sm:$0xff] %v24067_v8  ;;  %v17832_v17 = vpop.f32.mrb[147].mxu1 }
 0x20e   : > { %17946 = vmatmul.mubr.msk.bf16.vlgmr.msra.gmra.mrb[252].mxu1 %vm440_vm1, %v23365_v7 }
 0x20f   : > { %17949 = vmatprep.mubr.msk.bf16.mxu1 %vm23396_vm0, %v28148_v16 }
 0x211   : > { %v24074_v26 = vpop.f32.mrb[148].mxu1 }
 0x212   : > { %28162 = vst [vmem:[#allocation26_spill] sm:$0xff] %v24074_v26  ;;  %v17835_v61 = vpop.f32.mrb[149].mxu1 }
 0x213   : > { %v24079_v22 = vpop.f32.mrb[150].mxu1  ;;  %v23367_v61 = vld [vmem:[%s23472_s10 + $0x1fc] sm:$0xff]  }
 0x214   : > { %28163 = vst [vmem:[#allocation27_spill] sm:$0xff] %v24079_v22  ;;  %v17836_v1 = vpop.f32.mrb[151].mxu1 }
 0x216   : > { %17950 = vmatmul.mubr.msk.bf16.gmra.mrb[0].mxu1 %vm440_vm1, %v23366_v12 }
 0x217   : > { %17953 = vmatprep.mubr.msk.bf16.mxu1 %vm23396_vm0, %v28148_v16 }
 0x219   : > { %v24086_v7 = vpop.f32.mrb[152].mxu1 }
 0x21a   : > { %28164 = vst [vmem:[#allocation28_spill] sm:$0xff] %v24086_v7  ;;  %v17839_v3 = vpop.f32.mrb[153].mxu1 }
 0x21b   : > { %v24091_v27 = vpop.f32.mrb[154].mxu1  ;;  %v23368_v3 = vld [vmem:[%s23472_s10 + $0x204] sm:$0xff]  }
 0x21c   : > { %28165 = vst [vmem:[#allocation29_spill] sm:$0xff] %v24091_v27  ;;  %v17840_v26 = vpop.f32.mrb[155].mxu1 }
 0x21e   : > { %17954 = vmatmul.mubr.msk.bf16.gmra.mrb[4].mxu1 %vm440_vm1, %v23367_v61 }
 0x21f   : > { %17957 = vmatprep.mubr.msk.bf16.mxu1 %vm23396_vm0, %v28148_v16 }
 0x221   : > { %v24098_v12 = vpop.f32.mrb[156].mxu1 }
 0x222   : > { %28166 = vst [vmem:[#allocation30_spill] sm:$0xff] %v24098_v12  ;;  %v17843_v17 = vpop.f32.mrb[157].mxu1 }
 0x223   : > { %v24103_v8 = vpop.f32.mrb[158].mxu1  ;;  %v23369_v17 = vld [vmem:[%s23472_s10 + $0x20c] sm:$0xff]  }
 0x224   : > { %28167 = vst [vmem:[#allocation31_spill] sm:$0xff] %v24103_v8  ;;  %v17844_v7 = vpop.f32.mrb[159].mxu1  ;;  %v23372_v8 = vld [vmem:[%s23472_s10 + $0x224] sm:$0xff]  }
 0x225   : > { %v23371_v7 = vld [vmem:[%s23472_s10 + $0x21c] sm:$0xff]  }
 0x226   : > { %17958 = vmatmul.mubr.msk.bf16.gmra.mrb[8].mxu1 %vm440_vm1, %v23368_v3 }
 0x227   : > { %17961 = vmatprep.mubr.msk.bf16.mxu1 %vm23396_vm0, %v28148_v16 }
 0x229   : > { %v24110_v61 = vpop.f32.mrb[160].mxu1 }
 0x22a   : > { %28168 = vst [vmem:[#allocation32_spill] sm:$0xff] %v24110_v61  ;;  %v17847_v1 = vpop.f32.mrb[161].mxu1 }
 0x22b   : > { %v24115_v22 = vpop.f32.mrb[162].mxu1  ;;  %v23370_v1 = vld [vmem:[%s23472_s10 + $0x214] sm:$0xff]  }
 0x22c   : > { %28169 = vst [vmem:[#allocation33_spill] sm:$0xff] %v24115_v22  ;;  %v17848_v12 = vpop.f32.mrb[163].mxu1  ;;  %v28170_v22 = vmax.f32 %v23590_v30, %v23759_v47  ;;  %v28172_v30 = vmax.f32 %v23598_v35, %v23774_v10  ;;  %v28174_v35 = vmax.f32 %v23606_v40, %v23792_v36  ;;  %v28176_v40 = vmax.f32 %v23614_v45, %v23816_v21 }
 0x22d   : > { %v28178_v45 = vmax.f32 %v23622_v50, %v23840_v52 }
 0x22e   : > { %17962 = vmatmul.mubr.msk.bf16.gmra.mrb[12].mxu1 %vm440_vm1, %v23369_v17 }
 0x22f   : > { %17965 = vmatprep.mubr.msk.bf16.mxu1 %vm23396_vm0, %v28148_v16 }
 0x231   : > { %v24122_v3 = vpop.f32.mrb[164].mxu1 }
 0x232   : > { %v17851_v26 = vpop.f32.mrb[165].mxu1 }
 0x233   : > { %v1109_v27 = vpop.f32.mrb[166].mxu1 }
 0x234   : > { %v17852_v61 = vpop.f32.mrb[167].mxu1  ;;  %v28171_v27 = vmax.f32 %v23593_v33, %v23764_v57  ;;  %v28173_v33 = vmax.f32 %v23601_v38, %v23779_v18  ;;  %v28175_v38 = vmax.f32 %v23609_v43, %v23797_v49  ;;  %v28177_v43 = vmax.f32 %v23617_v48, %v23821_v41 }
 0x236   : > { %17966 = vmatmul.mubr.msk.bf16.gmra.mrb[16].mxu1 %vm440_vm1, %v23370_v1 }
 0x237   : > { %17969 = vmatprep.mubr.msk.bf16.mxu1 %vm23396_vm0, %v28148_v16 }
 0x239   : > { %v1395_v12 = vpop.f32.mrb[168].mxu1 }
 0x23a   : > { %v17859_v17 = vpop.f32.mrb[169].mxu1  ;;  %v24134_v28 = vmax.f32 %v28170_v22, %v1395_v12 }
 0x23b   : > { %v1398_v26 = vpop.f32.mrb[170].mxu1 }
 0x23c   : > { %v17860_v23 = vpop.f32.mrb[171].mxu1  ;;  %v24139_v61 = vmax.f32 %v28171_v27, %v1398_v26  ;;  %v23373_v26 = vld [vmem:[%s23472_s10 + $0x22c] sm:$0xff]  }
 0x23e   : > { %17970 = vmatmul.mubr.msk.bf16.gmra.mrb[20].mxu1 %vm440_vm1, %v23371_v7 }
 0x23f   : > { %17973 = vmatprep.mubr.msk.bf16.mxu1 %vm23396_vm0, %v28148_v16 }
 0x241   : > { %v1403_v1 = vpop.f32.mrb[172].mxu1 }
 0x242   : > { %v17863_v17 = vpop.f32.mrb[173].mxu1  ;;  %v24148_v47 = vmax.f32 %v28172_v30, %v1403_v1  ;;  %v23374_v30 = vld [vmem:[%s23472_s10 + $0x234] sm:$0xff]  }
 0x243   : > { %v1406_v22 = vpop.f32.mrb[174].mxu1 }
 0x244   : > { %v17864_v23 = vpop.f32.mrb[175].mxu1  ;;  %v24153_v57 = vmax.f32 %v28173_v33, %v1406_v22 }
 0x246   : > { %17974 = vmatmul.mubr.msk.bf16.gmra.mrb[24].mxu1 %vm440_vm1, %v23372_v8 }
 0x247   : > { %17977 = vmatprep.mubr.msk.bf16.mxu1 %vm23396_vm0, %v28148_v16 }
 0x249   : > { %v1411_v7 = vpop.f32.mrb[176].mxu1 }
 0x24a   : > { %v17867_v12 = vpop.f32.mrb[177].mxu1  ;;  %v24162_v10 = vmax.f32 %v28174_v35, %v1411_v7  ;;  %v15360_v35 = vld [vmem:[%s28103_s4 + $0x18] sm:$0xff] }
 0x24b   : > { %v1414_v27 = vpop.f32.mrb[178].mxu1  ;;  %v23375_v12 = vld [vmem:[%s23472_s10 + $0x23c] sm:$0xff]  }
 0x24c   : > { %v17868_v1 = vpop.f32.mrb[179].mxu1  ;;  %v24167_v18 = vmax.f32 %v28175_v38, %v1414_v27  ;;  %v28179_v27 = vmax.f32 %v23625_v53, %v23845_v11  ;;  %v23398_v38 = vmov 0.0|0.0   ;;  %v23376_v53 = vld [vmem:[%s23472_s10 + $0x244] sm:$0xff]   ;;  %v28180_v11 = vmax.f32 %v23630_v55, %v23864_v39 }
 0x24d   : > { %21239 = vmatprep.subr.bf16.mxu1 %v23398_v38  ;;  %21269 = vmatprep.subr.bf16.mxu0 %v23398_v38  ;;  %v28182_v39 = vmax.f32 %v23638_v60, %v23888_v44  ;;  %v15788_v60 = vld [vmem:[%s28103_s4 + $0xa8] sm:$0xff] }
 0x24e   : > { %17978 = vmatmul.mubr.msk.bf16.gmra.mrb[28].mxu1 %vm440_vm1, %v23373_v26  ;;  %v15359_v26 = vld [vmem:[%s28103_s4 + $0x10] sm:$0xff] }
 0x24f   : > { %17981 = vmatprep.mubr.msk.bf16.mxu1 %vm23396_vm0, %v28148_v16  ;;  %v21240_v50 = vpack.c.bf16 %v15360_v35, %v15359_v26 }
 0x251   : > { %v1419_v8 = vpop.f32.mrb[180].mxu1  ;;  %21241 = vmatpush3.bf16.msra.mxu1 %v21240_v50 }
 0x252   : > { %v17871_v17 = vpop.f32.mrb[181].mxu1  ;;  %v24176_v36 = vmax.f32 %v28176_v40, %v1419_v8  ;;  %21242 = vmatprep.subr.bf16.mxu1 %v23398_v38  ;;  %v28181_v40 = vmax.f32 %v23633_v58, %v23869_v25  ;;  %v23377_v25 = vld [vmem:[%s23472_s10 + $0x24c] sm:$0xff]  }
 0x253   : > { %v1422_v22 = vpop.f32.mrb[182].mxu1 }
 0x254   : > { %v17872_v23 = vpop.f32.mrb[183].mxu1  ;;  %v24181_v49 = vmax.f32 %v28177_v43, %v1422_v22 }
 0x256   : > { %17982 = vmatmul.mubr.msk.bf16.gmra.mrb[32].mxu1 %vm440_vm1, %v23374_v30 }
 0x257   : > { %17985 = vmatprep.mubr.msk.bf16.mxu1 %vm23396_vm0, %v28148_v16 }
 0x259   : > { %v1427_v33 = vpop.f32.mrb[184].mxu1 }
 0x25a   : > { %v17875_v7 = vpop.f32.mrb[185].mxu1  ;;  %v24206_v48 = vmax.f32 %v28178_v45, %v1427_v33 }
 0x25b   : > { %v1430_v21 = vpop.f32.mrb[186].mxu1  ;;  %v28183_v7 = vmax.f32 %v23641_v63, %v23893_v31  ;;  %v28184_v31 = vld [vmem:[#allocation11_spill] sm:$0xff] }
 0x25c   : > { %v17876_v41 = vpop.f32.mrb[187].mxu1  ;;  %v24217_v1 = vmax.f32 %v28179_v27, %v1430_v21  ;;  %v15787_v21 = vld [vmem:[%s28103_s4 + $0xa0] sm:$0xff]  ;;  %v23378_v27 = vld [vmem:[%s23472_s10 + $0x254] sm:$0xff]  }
 0x25d   : > { %v24258_v44 = vpack.c.bf16 %v15788_v60, %v15787_v21  ;;  %v28185_v41 = vmax.f32 %v23646_v4, %v28184_v31  ;;  %v28189_v4 = vmax.f32 %v23654_v9, %v23936_v56  ;;  %v28193_v9 = vmax.f32 %v23662_v14, %v23960_v5  ;;  %v23380_v31 = vld [vmem:[%s23472_s10 + $0x264] sm:$0xff]  }
 0x25e   : > { %17986 = vmatmul.mubr.msk.bf16.gmra.mrb[36].mxu1 %vm440_vm1, %v23375_v12  ;;  %v28197_v14 = vmax.f32 %v23670_v19, %v23984_v15  ;;  %v28201_v19 = vld [vmem:[#allocation16_spill] sm:$0xff] }
 0x25f   : > { %17989 = vmatprep.mubr.msk.bf16.mxu1 %vm23396_vm0, %v28148_v16  ;;  %21271 = vmatpush3.bf16.msra.mxu0 %v24258_v44  ;;  %v28202_v15 = vmax.f32 %v23678_v24, %v28201_v19  ;;  %v28206_v24 = vld [vmem:[#allocation18_spill] sm:$0xff] }
 0x260   : > { %21272 = vmatprep.subr.bf16.mxu0 %v23398_v38 }
 0x261   : > { %v1435_v52 = vpop.f32.mrb[188].mxu1 }
 0x262   : > { %v17879_v8 = vpop.f32.mrb[189].mxu1  ;;  %v24229_v17 = vmax.f32 %v28180_v11, %v1435_v52  ;;  %v28186_v52 = vld [vmem:[#allocation4_spill] sm:$0xff] }
 0x263   : > { %v1438_v30 = vpop.f32.mrb[190].mxu1  ;;  %v28187_v8 = vld [vmem:[#allocation12_spill] sm:$0xff] }
 0x264   : > { %v24234_v22 = vmax.f32 %v28181_v40, %v1438_v30  ;;  %v17880_v23 = vpop.f32.mrb[191].mxu1 }
 0x266   : > { %17990 = vmatmul.mubr.msk.bf16.gmra.mrb[40].mxu1 %vm440_vm1, %v23376_v53  ;;  %v28188_v53 = vmax.f32 %v28186_v52, %v28187_v8 }
 0x267   : > { %17993 = vmatprep.mubr.msk.bf16.mxu1 %vm23396_vm0, %v28148_v16 }
 0x269   : > { %v1443_v55 = vpop.f32.mrb[192].mxu1 }
 0x26a   : > { %v24244_v43 = vmax.f32 %v28182_v39, %v1443_v55  ;;  %v17883_v58 = vpop.f32.mrb[193].mxu1  ;;  %v23379_v39 = vld [vmem:[%s23472_s10 + $0x25c] sm:$0xff]  }
 0x26b   : > { %v1446_v33 = vpop.f32.mrb[194].mxu1 }
 0x26c   : > { %v24250_v12 = vmax.f32 %v28183_v7, %v1446_v33  ;;  %v17884_v45 = vpop.f32.mrb[195].mxu1  ;;  %v28191_v33 = vld [vmem:[#allocation13_spill] sm:$0xff] }
 0x26e   : > { %17994 = vmatmul.mubr.msk.bf16.gmra.mrb[44].mxu1 %vm440_vm1, %v23377_v25  ;;  %v28190_v25 = vld [vmem:[#allocation5_spill] sm:$0xff] }
 0x26f   : > { %17997 = vmatprep.mubr.msk.bf16.mxu1 %vm23396_vm0, %v28148_v16  ;;  %v28192_v7 = vmax.f32 %v28190_v25, %v28191_v33 }
 0x271   : > { %v1451_v63 = vpop.f32.mrb[196].mxu1 }
 0x272   : > { %v24268_v26 = vmax.f32 %v28185_v41, %v1451_v63  ;;  %v17887_v35 = vpop.f32.mrb[197].mxu1 }
 0x273   : > { %v1454_v50 = vpop.f32.mrb[198].mxu1  ;;  %v28194_v35 = vld [vmem:[#allocation6_spill] sm:$0xff] }
 0x274   : > { %v24274_v11 = vmax.f32 %v28188_v53, %v1454_v50  ;;  %v17888_v30 = vpop.f32.mrb[199].mxu1 }
 0x276   : > { %17998 = vmatmul.mubr.msk.bf16.gmra.mrb[48].mxu1 %vm440_vm1, %v23378_v27  ;;  %v28195_v27 = vld [vmem:[#allocation14_spill] sm:$0xff] }
 0x277   : > { %18001 = vmatprep.mubr.msk.bf16.mxu1 %vm23396_vm0, %v28148_v16  ;;  %v28196_v50 = vmax.f32 %v28194_v35, %v28195_v27 }
 0x279   : > { %v1459_v40 = vpop.f32.mrb[200].mxu1 }
 0x27a   : > { %v24282_v23 = vmax.f32 %v28189_v4, %v1459_v40  ;;  %v17891_v55 = vpop.f32.mrb[201].mxu1  ;;  %v23381_v40 = vld [vmem:[%s23472_s10 + $0x26c] sm:$0xff]  }
 0x27b   : > { %v1462_v58 = vpop.f32.mrb[202].mxu1  ;;  %v28198_v55 = vld [vmem:[#allocation7_spill] sm:$0xff] }
 0x27c   : > { %v24288_v45 = vmax.f32 %v28192_v7, %v1462_v58  ;;  %v17892_v21 = vpop.f32.mrb[203].mxu1 }
 0x27e   : > { %18002 = vmatmul.mubr.msk.bf16.gmra.mrb[52].mxu1 %vm440_vm1, %v23379_v39  ;;  %v28199_v39 = vld [vmem:[#allocation15_spill] sm:$0xff] }
 0x27f   : > { %18005 = vmatprep.mubr.msk.bf16.mxu1 %vm23396_vm0, %v28148_v16  ;;  %v28200_v58 = vmax.f32 %v28198_v55, %v28199_v39  ;;  %v28208_v55 = vld [vmem:[#allocation19_spill] sm:$0xff] }
 0x280   : > { %v28209_v39 = vmax.f32 %v23689_v34, %v28208_v55  ;;  %v28212_v34 = vld [vmem:[#allocation21_spill] sm:$0xff] }
 0x281   : > { %v1467_v60 = vpop.f32.mrb[204].mxu1 }
 0x282   : > { %v24296_v56 = vmax.f32 %v28193_v9, %v1467_v60  ;;  %v17895_v63 = vpop.f32.mrb[205].mxu1  ;;  %v23382_v9 = vld [vmem:[%s23472_s10 + $0x274] sm:$0xff]  }
 0x283   : > { %v1470_v41 = vpop.f32.mrb[206].mxu1 }
 0x284   : > { %v24302_v52 = vmax.f32 %v28196_v50, %v1470_v41  ;;  %v17896_v8 = vpop.f32.mrb[207].mxu1  ;;  %v28204_v41 = vld [vmem:[#allocation17_spill] sm:$0xff] }
 0x286   : > { %18006 = vmatmul.mubr.msk.bf16.gmra.mrb[56].mxu1 %vm440_vm1, %v23380_v31  ;;  %v28203_v31 = vld [vmem:[#allocation8_spill] sm:$0xff] }
 0x287   : > { %18009 = vmatprep.mubr.msk.bf16.mxu1 %vm23396_vm0, %v28148_v16  ;;  %v28205_v35 = vmax.f32 %v28203_v31, %v28204_v41  ;;  %v28213_v31 = vmax.f32 %v23697_v42, %v28212_v34 }
 0x289   : > { %v1475_v53 = vpop.f32.mrb[208].mxu1 }
 0x28a   : > { %v24310_v5 = vmax.f32 %v28197_v14, %v1475_v53  ;;  %v17899_v30 = vpop.f32.mrb[209].mxu1  ;;  %v28207_v53 = vmax.f32 %v23686_v29, %v28206_v24  ;;  %v28210_v29 = vld [vmem:[#allocation20_spill] sm:$0xff] }
 0x28b   : > { %v1478_v4 = vpop.f32.mrb[210].mxu1  ;;  %v28211_v19 = vmax.f32 %v23694_v37, %v28210_v29 }
 0x28c   : > { %v24316_v25 = vmax.f32 %v28200_v58, %v1478_v4  ;;  %v17900_v33 = vpop.f32.mrb[211].mxu1 }
 0x28e   : > { %18010 = vmatmul.mubr.msk.bf16.gmra.mrb[60].mxu1 %vm440_vm1, %v23381_v40  ;;  %v23383_v40 = vld [vmem:[%s23472_s10 + $0x27c] sm:$0xff]  }
 0x28f   : > { %18013 = vmatprep.mubr.msk.bf16.mxu1 %vm23396_vm0, %v28148_v16 }
 0x291   : > { %v1483_v7 = vpop.f32.mrb[212].mxu1 }
 0x292   : > { %v24324_v21 = vmax.f32 %v28202_v15, %v1483_v7  ;;  %v17903_v60 = vpop.f32.mrb[213].mxu1 }
 0x293   : > { %v1486_v63 = vpop.f32.mrb[214].mxu1 }
 0x294   : > { %v24330_v27 = vmax.f32 %v28205_v35, %v1486_v63  ;;  %v17904_v50 = vpop.f32.mrb[215].mxu1 }
 0x296   : > { %18014 = vmatmul.mubr.msk.bf16.gmra.mrb[64].mxu1 %vm440_vm1, %v23382_v9  ;;  %v23384_v9 = vld [vmem:[%s23472_s10 + $0x284] sm:$0xff]  }
 0x297   : > { %18017 = vmatprep.mubr.msk.bf16.mxu1 %vm23396_vm0, %v28148_v16 }
 0x299   : > { %v1491_v8 = vpop.f32.mrb[216].mxu1 }
 0x29a   : > { %v24338_v14 = vmax.f32 %v28207_v53, %v1491_v8  ;;  %v17907_v30 = vpop.f32.mrb[217].mxu1  ;;  %v28214_v8 = vld [vmem:[#allocation22_spill] sm:$0xff] }
 0x29b   : > { %v1494_v4 = vpop.f32.mrb[218].mxu1  ;;  %v28215_v37 = vmax.f32 %v23702_v46, %v28214_v8  ;;  %v23385_v30 = vld [vmem:[%s23472_s10 + $0x28c] ss:$0 sps:$4 sm:$0x33]  }
 0x29c   : > { %v24344_v58 = vmax.f32 %v28209_v39, %v1494_v4  ;;  %v17908_v33 = vpop.f32.mrb[219].mxu1  ;;  %v28216_v4 = vld [vmem:[#allocation23_spill] sm:$0xff] }
 0x29d   : > { %v28217_v42 = vmax.f32 %v23705_v51, %v28216_v4 }
 0x29e   : > { %18018 = vmatmul.mubr.msk.bf16.gmra.mrb[68].mxu1 %vm440_vm1, %v23383_v40 }
 0x29f   : > { %18021 = vmatprep.mubr.msk.bf16.mxu1 %vm23396_vm0, %v28148_v16 }
 0x2a1   : > { %v1499_v7 = vpop.f32.mrb[220].mxu1 }
 0x2a2   : > { %v24352_v15 = vmax.f32 %v28211_v19, %v1499_v7  ;;  %v17911_v60 = vpop.f32.mrb[221].mxu1  ;;  %v28218_v7 = vld [vmem:[#allocation24_spill] sm:$0xff] }
 0x2a3   : > { %v1502_v63 = vpop.f32.mrb[222].mxu1  ;;  %v28219_v46 = vmax.f32 %v23710_v54, %v28218_v7  ;;  %v28222_v54 = vld [vmem:[#allocation26_spill] sm:$0xff]  ;;  %v28226_v7 = vld [vmem:[#allocation28_spill] sm:$0xff] }
 0x2a4   : > { %v24358_v41 = vmax.f32 %v28213_v31, %v1502_v63  ;;  %v17912_v35 = vpop.f32.mrb[223].mxu1  ;;  %v28220_v63 = vld [vmem:[#allocation25_spill] sm:$0xff]  ;;  %v28223_v8 = vmax.f32 %v23720_v62, %v28222_v54 }
 0x2a5   : > { %v28221_v51 = vmax.f32 %v23713_v59, %v28220_v63  ;;  %v2525_v35 = vld [vmem:[#allocation2 + $0x9] sm:$0xff]  ;;  %v2526_v59 = vld [vmem:[#allocation2 + $0x11] sm:$0xff]  ;;  %v2527_v62 = vld [vmem:[#allocation2 + $0x19] sm:$0xff] }
 0x2a6   : > { %18022 = vmatmul.mubr.msk.bf16.gmra.mrb[72].mxu1 %vm440_vm1, %v23384_v9  ;;  %v2524_v9 = vld [vmem:[#allocation2 + $0x1] sm:$0xff] }
 0x2a7   : > { %18025 = vmatprep.mubr.msk.bf16.mxu1 %vm23396_vm0, %v28148_v16 }
 0x2a9   : > { %v1507_v50 = vpop.f32.mrb[224].mxu1 }
 0x2aa   : > { %v24366_v24 = vmax.f32 %v28215_v37, %v1507_v50  ;;  %v17915_v53 = vpop.f32.mrb[225].mxu1 }
 0x2ab   : > { %v1510_v40 = vpop.f32.mrb[226].mxu1 }
 0x2ac   : > { %v24372_v55 = vmax.f32 %v28217_v42, %v1510_v40  ;;  %v17916_v39 = vpop.f32.mrb[227].mxu1  ;;  %v28224_v40 = vld [vmem:[#allocation27_spill] sm:$0xff] }
 0x2ad   : > { %v28225_v4 = vmax.f32 %v23723_v6, %v28224_v40  ;;  %v28228_v6 = vld [vmem:[#allocation29_spill] sm:$0xff] }
 0x2ae   : > { %18026 = vmatmul.mubr.msk.bf16.gmra.mrb[76].mxu1 %vm440_vm1, %v23385_v30  ;;  %v28229_v63 = vmax.f32 %v23732_v13, %v28228_v6  ;;  %v28235_v13 = vld [vmem:[#allocation32_spill] sm:$0xff] }
 0x2af   : > { %18033 = vmatprep.mubr.msk.f32.mxu1 %vm23396_vm0, %v28148_v16 }
 0x2b1   : > { %v1515_v33 = vpop.f32.mrb[228].mxu1 }
 0x2b2   : > { %v24380_v29 = vmax.f32 %v28219_v46, %v1515_v33  ;;  %v17919_v19 = vpop.f32.mrb[229].mxu1  ;;  %v28227_v46 = vmax.f32 %v23729_v0, %v28226_v7 }
 0x2b3   : > { %v1518_v60 = vpop.f32.mrb[230].mxu1 }
 0x2b4   : > { %v24385_v34 = vmax.f32 %v28221_v51, %v1518_v60  ;;  %v17920_v31 = vpop.f32.mrb[231].mxu1 }
 0x2b6   : > { %18034 = vmatmul.mubr.msk.f32.vlgmr.msra.gmra.mrb[80].mxu1 %vm2427_vm2, %v2524_v9 }
 0x2b7   : > { %18036 = vmatprep.mubr.msk.f32.mxu1 %vm23396_vm0, %v28148_v16 }
 0x2b9   : > { %v1523_v50 = vpop.f32.mrb[232].mxu1 }
 0x2ba   : > { %v24393_v37 = vmax.f32 %v28223_v8, %v1523_v50  ;;  %v17923_v53 = vpop.f32.mrb[233].mxu1  ;;  %18037 = vmatmul.mubr.msk.f32.gmra.mrb[82].mxu1 %vm2427_vm2, %v2525_v35  ;;  %v28230_v50 = vld [vmem:[#allocation30_spill] sm:$0xff] }
 0x2bb   : > { %v1526_v30 = vpop.f32.mrb[234].mxu1  ;;  %18039 = vmatprep.mubr.msk.f32.mxu1 %vm23396_vm0, %v28148_v16  ;;  %v28231_v54 = vmax.f32 %v23737_v2, %v28230_v50  ;;  %v28238_v2 = vld [vmem:[#allocation33_spill] sm:$0xff] }
 0x2bc   : > { %v24401_v42 = vmax.f32 %v28225_v4, %v1526_v30  ;;  %v17924_v39 = vpop.f32.mrb[235].mxu1  ;;  %v28232_v30 = vld [vmem:[#allocation31_spill] sm:$0xff] }
 0x2be   : > { %18040 = vmatmul.mubr.msk.f32.gmra.mrb[84].mxu1 %vm2427_vm2, %v2526_v59  ;;  %v28233_v59 = vmax.f32 %v23740_v20, %v28232_v30  ;;  %v28240_v20 = vmax.f32 %v23753_v32, %v24122_v3 }
 0x2bf   : > { %18042 = vmatprep.mubr.msk.f32.mxu1 %vm23396_vm0, %v28148_v16 }
 0x2c1   : > { %v1531_v33 = vpop.f32.mrb[236].mxu1 }
 0x2c2   : > { %v24409_v19 = vmax.f32 %v28227_v46, %v1531_v33  ;;  %v17927_v60 = vpop.f32.mrb[237].mxu1  ;;  %18043 = vmatmul.mubr.msk.f32.gmra.mrb[86].mxu1 %vm2427_vm2, %v2527_v62  ;;  %v28234_v62 = vld [vmem:[#allocation9_spill] sm:$0xff] }
 0x2c3   : > { %v1534_v9 = vpop.f32.mrb[238].mxu1  ;;  %18045 = vmatprep.mubr.msk.f32.mxu1 %vm23396_vm0, %v28148_v16  ;;  %v28236_v33 = vmax.f32 %v28234_v62, %v28235_v13  ;;  %v2184_v62 = vpop.permute.xlu0 %2183 }
 0x2c4   : > { %v24417_v51 = vmax.f32 %v28229_v63, %v1534_v9  ;;  %v17928_v31 = vpop.f32.mrb[239].mxu1  ;;  %v28237_v9 = vld [vmem:[#allocation10_spill] sm:$0xff] }
 0x2c5   : > { %v28239_v6 = vmax.f32 %v28237_v9, %v28238_v2 }
 0x2c9   : > { %v1539_v35 = vpop.f32.mrb[240].mxu1 }
 0x2ca   : > { %v24422_v0 = vmax.f32 %v28231_v54, %v1539_v35  ;;  %v17931_v8 = vpop.f32.mrb[241].mxu1 }
 0x2cb   : > { %v1542_v53 = vpop.f32.mrb[242].mxu1 }
 0x2cc   : > { %v24427_v40 = vmax.f32 %v28233_v59, %v1542_v53  ;;  %v17932_v4 = vpop.f32.mrb[243].mxu1  ;;  %v24447_v59 = vld [vmem:[%s28101_s2] ss:$0 sm:$0xff] }
 0x2d1   : > { %v1547_v39 = vpop.f32.mrb[244].mxu1 }
 0x2d2   : > { %v24432_v7 = vmax.f32 %v28236_v33, %v1547_v39  ;;  %v17935_v46 = vpop.f32.mrb[245].mxu1 }
 0x2d3   : > { %v1550_v60 = vpop.f32.mrb[246].mxu1 }
 0x2d4   : > { %v24437_v63 = vmax.f32 %v28239_v6, %v1550_v60  ;;  %v17936_v31 = vpop.f32.mrb[247].mxu1  ;;  %v2189_v6 = vpop.permute.xlu0 %2188 }
 0x2d9   : > { %v1555_v35 = vpop.f32.mrb[248].mxu1 }
 0x2da   : > { %v24442_v50 = vmax.f32 %v28240_v20, %v1555_v35  ;;  %v17939_v54 = vpop.f32.mrb[249].mxu1 }
 0x2db   : > { %v1558_v8 = vpop.f32.mrb[250].mxu1  ;;  %v2194_v54 = vpop.permute.xlu1 %2193 }
 0x2dc   : > { %v17940_v53 = vpop.f32.mrb[251].mxu1 }
 0x2e1   : > { %v1844_v30 = vpop.f32.mrb[252].mxu1 }
 0x2e2   : > { %v2010_v4 = vmax.f32 %v24134_v28, %v1844_v30  ;;  %v17947_v39 = vpop.f32.mrb[253].mxu1 }
 0x2e3   : > { %v1847_v13 = vpop.f32.mrb[254].mxu1  ;;  %v15831_v39 = vld [vmem:[%s28103_s4 + $0xb8] sm:$0xff] }
 0x2e4   : > { %v2058_v33 = vadd.f32 %v24447_v59, %v2010_v4  ;;  %v2011_v32 = vmax.f32 %v24139_v61, %v1847_v13  ;;  %v17948_v3 = vpop.f32.mrb[255].mxu1  ;;  %v15830_v4 = vld [vmem:[%s28103_s4 + $0xb0] sm:$0xff] }
 0x2e5   : > { %v2199_v3 = vpop.permute.xlu1 %2198 }
 0x2e6   : > { %v2099_v46 = vmax.f32 %v2058_v33, 0.0  ;;  %v2059_v60 = vadd.f32 %v24447_v59, %v2011_v32  ;;  %v21273_v32 = vpack.c.bf16 %v15831_v39, %v15830_v4 }
 0x2e8   : > { %v2386_v9 = vmul.f32 %v2184_v62, %v2099_v46  ;;  %v2100_v2 = vmax.f32 %v2059_v60, 0.0 }
 0x2e9   : > { %v1852_v31 = vpop.f32.mrb[0].mxu1  ;;  %v2209_v4 = vpop.permute.xlu1 %2208 }
 0x2ea   : > { %2434 = vst.msk [vmem:[#allocation2 + $0x26] sm:$0xff] %vm2427_vm2, %v2386_v9  ;;  %v2387_v35 = vmul.f32 %v2189_v6, %v2100_v2  ;;  %v2012_v28 = vmax.f32 %v24148_v47, %v1852_v31  ;;  %v17951_v20 = vpop.f32.mrb[1].mxu1 }
 0x2eb   : > { %v1855_v8 = vpop.f32.mrb[2].mxu1 }
 0x2ec   : > { %2435 = vst.msk [vmem:[#allocation2 + $0x2e] sm:$0xff] %vm2427_vm2, %v2387_v35  ;;  %v2060_v61 = vadd.f32 %v24447_v59, %v2012_v28  ;;  %v2013_v53 = vmax.f32 %v24153_v57, %v1855_v8  ;;  %v17952_v30 = vpop.f32.mrb[3].mxu1 }
 0x2ee   : > { %v2101_v62 = vmax.f32 %v2060_v61, 0.0  ;;  %v2061_v47 = vadd.f32 %v24447_v59, %v2013_v53  ;;  %v2204_v53 = vpop.permute.xlu0 %2203 }
 0x2f0   : > { %v2388_v13 = vmul.f32 %v2194_v54, %v2101_v62  ;;  %v2102_v33 = vmax.f32 %v2061_v47, 0.0 }
 0x2f1   : > { %v1860_v46 = vpop.f32.mrb[4].mxu1  ;;  %v2528_v60 = vld [vmem:[#allocation2 + $0x21] sm:$0xff] }
 0x2f2   : > { %v7178_v9 = vld [vmem:[#allocation2 + $0x24] sm:$0xff]  ;;  %2436 = vst.msk [vmem:[#allocation2 + $0x36] sm:$0xff] %vm2427_vm2, %v2388_v13  ;;  %v2389_v57 = vmul.f32 %v2199_v3, %v2102_v33  ;;  %v2014_v2 = vmax.f32 %v24162_v10, %v1860_v46  ;;  %v17955_v6 = vpop.f32.mrb[5].mxu1  ;;  %18046 = vmatmul.mubr.msk.f32.gmra.mrb[88].mxu1 %vm2427_vm2, %v2528_v60 }
 0x2f3   : > { %19304 = vmatmul.mubr.msk.f32.vlgmr.msra.gmra.mrb[0].mxu0 %vm2427_vm2, %v7178_v9  ;;  %v1863_v31 = vpop.f32.mrb[6].mxu1  ;;  %18048 = vmatprep.mubr.msk.f32.mxu1 %vm23396_vm0, %v28148_v16  ;;  %v2529_v10 = vld [vmem:[#allocation2 + $0x29] sm:$0xff] }
 0x2f4   : > { %19306 = vmatprep.mubr.msk.f32.mxu0 %vm23396_vm0, %v28148_v16  ;;  %2437 = vst.msk [vmem:[#allocation2 + $0x3e] sm:$0xff] %vm2427_vm2, %v2389_v57  ;;  %v2062_v35 = vadd.f32 %v24447_v59, %v2014_v2  ;;  %v2015_v28 = vmax.f32 %v24167_v18, %v1863_v31  ;;  %v17956_v20 = vpop.f32.mrb[7].mxu1  ;;  %21274 = vmatpush3.bf16.msra.mxu0 %v21273_v32  ;;  %v7179_v54 = vld [vmem:[#allocation2 + $0x2c] sm:$0xff]  ;;  %v2214_v31 = vpop.permute.xlu0 %2213 }
 0x2f5   : > { %21275 = vmatprep.subr.bf16.mxu0 %v23398_v38  ;;  %v2523_v20 = vld [vmem:[%s28103_s4 + $0x8] sm:$0xff] }
 0x2f6   : > { %v2103_v8 = vmax.f32 %v2062_v35, 0.0  ;;  %v2063_v61 = vadd.f32 %v24447_v59, %v2015_v28  ;;  %18049 = vmatmul.mubr.msk.f32.gmra.mrb[90].mxu1 %vm2427_vm2, %v2529_v10  ;;  %v2219_v10 = vpop.permute.xlu1 %2218 }
 0x2f7   : > { %19307 = vmatmul.mubr.msk.f32.gmra.mrb[2].mxu0 %vm2427_vm2, %v7179_v54  ;;  %18051 = vmatprep.mubr.msk.f32.mxu1 %vm23396_vm0, %v28148_v16 }
 0x2f8   : > { %19309 = vmatprep.mubr.msk.f32.mxu0 %vm23396_vm0, %v28148_v16  ;;  %v2390_v18 = vmul.f32 %v2204_v53, %v2103_v8  ;;  %v2104_v30 = vmax.f32 %v2063_v61, 0.0 }
 0x2f9   : > { %v1868_v39 = vpop.f32.mrb[8].mxu1  ;;  %v2530_v62 = vld [vmem:[#allocation2 + $0x31] sm:$0xff] }
 0x2fa   : > { %v7180_v47 = vld [vmem:[#allocation2 + $0x34] sm:$0xff]  ;;  %2438 = vst.msk [vmem:[#allocation2 + $0x46] sm:$0xff] %vm2427_vm2, %v2390_v18  ;;  %v2391_v13 = vmul.f32 %v2209_v4, %v2104_v30  ;;  %v2016_v33 = vmax.f32 %v24176_v36, %v1868_v39  ;;  %v17959_v32 = vpop.f32.mrb[9].mxu1  ;;  %18052 = vmatmul.mubr.msk.f32.gmra.mrb[92].mxu1 %vm2427_vm2, %v2530_v62 }
 0x2fb   : > { %19310 = vmatmul.mubr.msk.f32.gmra.mrb[4].mxu0 %vm2427_vm2, %v7180_v47  ;;  %v1871_v3 = vpop.f32.mrb[10].mxu1  ;;  %18054 = vmatprep.mubr.msk.f32.mxu1 %vm23396_vm0, %v28148_v16  ;;  %v2531_v36 = vld [vmem:[#allocation2 + $0x39] sm:$0xff] }
 0x2fc   : > { %19312 = vmatprep.mubr.msk.f32.mxu0 %vm23396_vm0, %v28148_v16  ;;  %2439 = vst.msk [vmem:[#allocation2 + $0x4e] sm:$0xff] %vm2427_vm2, %v2391_v13  ;;  %v2064_v46 = vadd.f32 %v24447_v59, %v2016_v33  ;;  %v2017_v60 = vmax.f32 %v24181_v49, %v1871_v3  ;;  %v17960_v9 = vpop.f32.mrb[11].mxu1  ;;  %v7181_v57 = vld [vmem:[#allocation2 + $0x3c] sm:$0xff] }
 0x2fd   : > { %v2522_v49 = vld [vmem:[%s28103_s4] sm:$0xff]  ;;  %v2229_v9 = vpop.permute.xlu1 %2228 }
 0x2fe   : > { %v2105_v2 = vmax.f32 %v2064_v46, 0.0  ;;  %v2065_v6 = vadd.f32 %v24447_v59, %v2017_v60  ;;  %18055 = vmatmul.mubr.msk.f32.gmra.mrb[94].mxu1 %vm2427_vm2, %v2531_v36  ;;  %v21243_v53 = vpack.c.bf16 %v2523_v20, %v2522_v49  ;;  %v2224_v46 = vpop.permute.xlu0 %2223 }
 0x2ff   : > { %19313 = vmatmul.mubr.msk.f32.gmra.mrb[6].mxu0 %vm2427_vm2, %v7181_v57  ;;  %18057 = vmatprep.mubr.msk.f32.mxu1 %vm23396_vm0, %v28148_v16 }
 0x300   : > { %19315 = vmatprep.mubr.msk.f32.mxu0 %vm23396_vm0, %v28148_v16  ;;  %v2392_v35 = vmul.f32 %v2214_v31, %v2105_v2  ;;  %v2106_v28 = vmax.f32 %v2065_v6, 0.0  ;;  %21244 = vmatpush3.bf16.msra.mxu1 %v21243_v53 }
 0x301   : > { %v1876_v54 = vpop.f32.mrb[12].mxu1  ;;  %v2532_v8 = vld [vmem:[#allocation2 + $0x41] sm:$0xff]  ;;  %21245 = vmatprep.subr.bf16.mxu1 %v23398_v38 }
 0x302   : > { %v7182_v61 = vld [vmem:[#allocation2 + $0x44] sm:$0xff]  ;;  %2440 = vst.msk [vmem:[#allocation2 + $0x56] sm:$0xff] %vm2427_vm2, %v2392_v35  ;;  %v2393_v18 = vmul.f32 %v2219_v10, %v2106_v28  ;;  %v2018_v30 = vmax.f32 %v24206_v48, %v1876_v54  ;;  %v17963_v4 = vpop.f32.mrb[13].mxu1  ;;  %18058 = vmatmul.mubr.msk.f32.gmra.mrb[96].mxu1 %vm2427_vm2, %v2532_v8  ;;  %v2234_v53 = vpop.permute.xlu0 %2233 }
 0x303   : > { %19316 = vmatmul.mubr.msk.f32.gmra.mrb[8].mxu0 %vm2427_vm2, %v7182_v61  ;;  %v1879_v39 = vpop.f32.mrb[14].mxu1  ;;  %18060 = vmatprep.mubr.msk.f32.mxu1 %vm23396_vm0, %v28148_v16  ;;  %v2533_v48 = vld [vmem:[#allocation2 + $0x49] sm:$0xff] }
 0x304   : > { %19318 = vmatprep.mubr.msk.f32.mxu0 %vm23396_vm0, %v28148_v16  ;;  %2441 = vst.msk [vmem:[#allocation2 + $0x5e] sm:$0xff] %vm2427_vm2, %v2393_v18  ;;  %v2066_v62 = vadd.f32 %v24447_v59, %v2018_v30  ;;  %v2019_v47 = vmax.f32 %v24217_v1, %v1879_v39  ;;  %v17964_v13 = vpop.f32.mrb[15].mxu1  ;;  %v7183_v33 = vld [vmem:[#allocation2 + $0x4c] sm:$0xff] }
 0x306   : > { %v2107_v32 = vmax.f32 %v2066_v62, 0.0  ;;  %v2067_v3 = vadd.f32 %v24447_v59, %v2019_v47  ;;  %18061 = vmatmul.mubr.msk.f32.gmra.mrb[98].mxu1 %vm2427_vm2, %v2533_v48 }
 0x307   : > { %19319 = vmatmul.mubr.msk.f32.gmra.mrb[10].mxu0 %vm2427_vm2, %v7183_v33  ;;  %18063 = vmatprep.mubr.msk.f32.mxu1 %vm23396_vm0, %v28148_v16 }
 0x308   : > { %19321 = vmatprep.mubr.msk.f32.mxu0 %vm23396_vm0, %v28148_v16  ;;  %v2394_v1 = vmul.f32 %v2224_v46, %v2107_v32  ;;  %v2108_v60 = vmax.f32 %v2067_v3, 0.0 }
 0x309   : > { %v1884_v36 = vpop.f32.mrb[16].mxu1  ;;  %v2534_v57 = vld [vmem:[#allocation2 + $0x51] sm:$0xff] }
 0x30a   : > { %v7184_v2 = vld [vmem:[#allocation2 + $0x54] sm:$0xff]  ;;  %2442 = vst.msk [vmem:[#allocation2 + $0x66] sm:$0xff] %vm2427_vm2, %v2394_v1  ;;  %v2395_v6 = vmul.f32 %v2229_v9, %v2108_v60  ;;  %v2020_v31 = vmax.f32 %v24229_v17, %v1884_v36  ;;  %v17967_v35 = vpop.f32.mrb[17].mxu1  ;;  %18064 = vmatmul.mubr.msk.f32.gmra.mrb[100].mxu1 %vm2427_vm2, %v2534_v57  ;;  %v2244_v36 = vpop.permute.xlu0 %2243 }
 0x30b   : > { %19322 = vmatmul.mubr.msk.f32.gmra.mrb[12].mxu0 %vm2427_vm2, %v7184_v2  ;;  %v1887_v28 = vpop.f32.mrb[18].mxu1  ;;  %18066 = vmatprep.mubr.msk.f32.mxu1 %vm23396_vm0, %v28148_v16  ;;  %v2535_v17 = vld [vmem:[#allocation2 + $0x59] sm:$0xff] }
 0x30c   : > { %19324 = vmatprep.mubr.msk.f32.mxu0 %vm23396_vm0, %v28148_v16  ;;  %2443 = vst.msk [vmem:[#allocation2 + $0x6e] sm:$0xff] %vm2427_vm2, %v2395_v6  ;;  %v2068_v49 = vadd.f32 %v24447_v59, %v2020_v31  ;;  %v2021_v20 = vmax.f32 %v24234_v22, %v1887_v28  ;;  %v17968_v10 = vpop.f32.mrb[19].mxu1  ;;  %v7185_v54 = vld [vmem:[#allocation2 + $0x5c] sm:$0xff]  ;;  %v2239_v22 = vpop.permute.xlu1 %2238 }
 0x30e   : > { %v2109_v8 = vmax.f32 %v2068_v49, 0.0  ;;  %v2069_v61 = vadd.f32 %v24447_v59, %v2021_v20  ;;  %18067 = vmatmul.mubr.msk.f32.gmra.mrb[102].mxu1 %vm2427_vm2, %v2535_v17 }
 0x30f   : > { %19325 = vmatmul.mubr.msk.f32.gmra.mrb[14].mxu0 %vm2427_vm2, %v7185_v54  ;;  %18069 = vmatprep.mubr.msk.f32.mxu1 %vm23396_vm0, %v28148_v16 }
 0x310   : > { %19327 = vmatprep.mubr.msk.f32.mxu0 %vm23396_vm0, %v28148_v16  ;;  %v2396_v18 = vmul.f32 %v2234_v53, %v2109_v8  ;;  %v2110_v30 = vmax.f32 %v2069_v61, 0.0 }
 0x311   : > { %v1892_v4 = vpop.f32.mrb[20].mxu1  ;;  %v2536_v39 = vld [vmem:[#allocation2 + $0x61] sm:$0xff] }
 0x312   : > { %v7186_v62 = vld [vmem:[#allocation2 + $0x64] sm:$0xff]  ;;  %2444 = vst.msk [vmem:[#allocation2 + $0x76] sm:$0xff] %vm2427_vm2, %v2396_v18  ;;  %v2397_v47 = vmul.f32 %v2239_v22, %v2110_v30  ;;  %v2022_v13 = vmax.f32 %v24244_v43, %v1892_v4  ;;  %v17971_v48 = vpop.f32.mrb[21].mxu1  ;;  %18070 = vmatmul.mubr.msk.f32.gmra.mrb[104].mxu1 %vm2427_vm2, %v2536_v39  ;;  %v2254_v30 = vpop.permute.xlu0 %2253 }
 0x313   : > { %19328 = vmatmul.mubr.msk.f32.gmra.mrb[16].mxu0 %vm2427_vm2, %v7186_v62  ;;  %v1895_v33 = vpop.f32.mrb[22].mxu1  ;;  %18072 = vmatprep.mubr.msk.f32.mxu1 %vm23396_vm0, %v28148_v16  ;;  %v2537_v43 = vld [vmem:[#allocation2 + $0x69] sm:$0xff] }
 0x314   : > { %19330 = vmatprep.mubr.msk.f32.mxu0 %vm23396_vm0, %v28148_v16  ;;  %2445 = vst.msk [vmem:[#allocation2 + $0x7e] sm:$0xff] %vm2427_vm2, %v2397_v47  ;;  %v2070_v32 = vadd.f32 %v24447_v59, %v2022_v13  ;;  %v2023_v3 = vmax.f32 %v24250_v12, %v1895_v33  ;;  %v17972_v46 = vpop.f32.mrb[23].mxu1  ;;  %v7187_v1 = vld [vmem:[#allocation2 + $0x6c] sm:$0xff]  ;;  %v2249_v12 = vpop.permute.xlu1 %2248 }
 0x316   : > { %v2111_v60 = vmax.f32 %v2070_v32, 0.0  ;;  %v2071_v9 = vadd.f32 %v24447_v59, %v2023_v3  ;;  %18073 = vmatmul.mubr.msk.f32.gmra.mrb[106].mxu1 %vm2427_vm2, %v2537_v43 }
 0x317   : > { %19331 = vmatmul.mubr.msk.f32.gmra.mrb[18].mxu0 %vm2427_vm2, %v7187_v1  ;;  %18075 = vmatprep.mubr.msk.f32.mxu1 %vm23396_vm0, %v28148_v16 }
 0x318   : > { %19333 = vmatprep.mubr.msk.f32.mxu0 %vm23396_vm0, %v28148_v16  ;;  %v2398_v57 = vmul.f32 %v2244_v36, %v2111_v60  ;;  %v2112_v2 = vmax.f32 %v2071_v9, 0.0  ;;  %v2264_v36 = vpop.permute.xlu0 %2263 }
 0x319   : > { %v1900_v6 = vpop.f32.mrb[24].mxu1  ;;  %v2538_v31 = vld [vmem:[#allocation2 + $0x71] sm:$0xff] }
 0x31a   : > { %v7188_v35 = vld [vmem:[#allocation2 + $0x74] sm:$0xff]  ;;  %2446 = vst.msk [vmem:[#allocation2 + $0x86] sm:$0xff] %vm2427_vm2, %v2398_v57  ;;  %v2399_v28 = vmul.f32 %v2249_v12, %v2112_v2  ;;  %v2024_v49 = vmax.f32 %v24268_v26, %v1900_v6  ;;  %v17975_v20 = vpop.f32.mrb[25].mxu1  ;;  %18076 = vmatmul.mubr.msk.f32.gmra.mrb[108].mxu1 %vm2427_vm2, %v2538_v31 }
 0x31b   : > { %19334 = vmatmul.mubr.msk.f32.gmra.mrb[20].mxu0 %vm2427_vm2, %v7188_v35  ;;  %v1903_v10 = vpop.f32.mrb[26].mxu1  ;;  %18078 = vmatprep.mubr.msk.f32.mxu1 %vm23396_vm0, %v28148_v16  ;;  %v2539_v26 = vld [vmem:[#allocation2 + $0x79] sm:$0xff] }
 0x31c   : > { %19336 = vmatprep.mubr.msk.f32.mxu0 %vm23396_vm0, %v28148_v16  ;;  %2447 = vst.msk [vmem:[#allocation2 + $0x8e] sm:$0xff] %vm2427_vm2, %v2399_v28  ;;  %v2072_v17 = vadd.f32 %v24447_v59, %v2024_v49  ;;  %v2025_v54 = vmax.f32 %v24274_v11, %v1903_v10  ;;  %v17976_v8 = vpop.f32.mrb[27].mxu1  ;;  %v7189_v61 = vld [vmem:[#allocation2 + $0x7c] sm:$0xff]  ;;  %v2259_v11 = vpop.permute.xlu1 %2258 }
 0x31e   : > { %v2113_v53 = vmax.f32 %v2072_v17, 0.0  ;;  %v2073_v18 = vadd.f32 %v24447_v59, %v2025_v54  ;;  %18079 = vmatmul.mubr.msk.f32.gmra.mrb[110].mxu1 %vm2427_vm2, %v2539_v26 }
 0x31f   : > { %19337 = vmatmul.mubr.msk.f32.gmra.mrb[22].mxu0 %vm2427_vm2, %v7189_v61  ;;  %18081 = vmatprep.mubr.msk.f32.mxu1 %vm23396_vm0, %v28148_v16 }
 0x320   : > { %19339 = vmatprep.mubr.msk.f32.mxu0 %vm23396_vm0, %v28148_v16  ;;  %v2400_v22 = vmul.f32 %v2254_v30, %v2113_v53  ;;  %v2114_v4 = vmax.f32 %v2073_v18, 0.0  ;;  %v2274_v53 = vpop.permute.xlu0 %2273 }
 0x321   : > { %v1908_v39 = vpop.f32.mrb[28].mxu1  ;;  %v2540_v62 = vld [vmem:[#allocation2 + $0x81] sm:$0xff] }
 0x322   : > { %v7190_v47 = vld [vmem:[#allocation2 + $0x84] sm:$0xff]  ;;  %2448 = vst.msk [vmem:[#allocation2 + $0x96] sm:$0xff] %vm2427_vm2, %v2400_v22  ;;  %v2401_v13 = vmul.f32 %v2259_v11, %v2114_v4  ;;  %v2026_v48 = vmax.f32 %v24282_v23, %v1908_v39  ;;  %v17979_v33 = vpop.f32.mrb[29].mxu1  ;;  %18082 = vmatmul.mubr.msk.f32.gmra.mrb[112].mxu1 %vm2427_vm2, %v2540_v62 }
 0x323   : > { %19340 = vmatmul.mubr.msk.f32.gmra.mrb[24].mxu0 %vm2427_vm2, %v7190_v47  ;;  %v1911_v32 = vpop.f32.mrb[30].mxu1  ;;  %18084 = vmatprep.mubr.msk.f32.mxu1 %vm23396_vm0, %v28148_v16  ;;  %v2541_v23 = vld [vmem:[#allocation2 + $0x89] sm:$0xff] }
 0x324   : > { %19342 = vmatprep.mubr.msk.f32.mxu0 %vm23396_vm0, %v28148_v16  ;;  %2449 = vst.msk [vmem:[#allocation2 + $0x9e] sm:$0xff] %vm2427_vm2, %v2401_v13  ;;  %v2074_v3 = vadd.f32 %v24447_v59, %v2026_v48  ;;  %v2027_v46 = vmax.f32 %v24288_v45, %v1911_v32  ;;  %v17980_v43 = vpop.f32.mrb[31].mxu1  ;;  %v7191_v1 = vld [vmem:[#allocation2 + $0x8c] sm:$0xff]  ;;  %v2269_v45 = vpop.permute.xlu1 %2268 }
 0x326   : > { %v2115_v60 = vmax.f32 %v2074_v3, 0.0  ;;  %v2075_v9 = vadd.f32 %v24447_v59, %v2027_v46  ;;  %18085 = vmatmul.mubr.msk.f32.gmra.mrb[114].mxu1 %vm2427_vm2, %v2541_v23  ;;  %v2284_v23 = vpop.permute.xlu0 %2283 }
 0x327   : > { %19343 = vmatmul.mubr.msk.f32.gmra.mrb[26].mxu0 %vm2427_vm2, %v7191_v1  ;;  %18087 = vmatprep.mubr.msk.f32.mxu1 %vm23396_vm0, %v28148_v16 }
 0x328   : > { %19345 = vmatprep.mubr.msk.f32.mxu0 %vm23396_vm0, %v28148_v16  ;;  %v2402_v57 = vmul.f32 %v2264_v36, %v2115_v60  ;;  %v2116_v2 = vmax.f32 %v2075_v9, 0.0 }
 0x329   : > { %v1916_v12 = vpop.f32.mrb[32].mxu1  ;;  %v2542_v6 = vld [vmem:[#allocation2 + $0x91] sm:$0xff] }
 0x32a   : > { %v7192_v31 = vld [vmem:[#allocation2 + $0x94] sm:$0xff]  ;;  %2450 = vst.msk [vmem:[#allocation2 + $0xa6] sm:$0xff] %vm2427_vm2, %v2402_v57  ;;  %v2403_v35 = vmul.f32 %v2269_v45, %v2116_v2  ;;  %v2028_v28 = vmax.f32 %v24296_v56, %v1916_v12  ;;  %v17983_v49 = vpop.f32.mrb[33].mxu1  ;;  %18088 = vmatmul.mubr.msk.f32.gmra.mrb[116].mxu1 %vm2427_vm2, %v2542_v6 }
 0x32b   : > { %19346 = vmatmul.mubr.msk.f32.gmra.mrb[28].mxu0 %vm2427_vm2, %v7192_v31  ;;  %v1919_v20 = vpop.f32.mrb[34].mxu1  ;;  %18090 = vmatprep.mubr.msk.f32.mxu1 %vm23396_vm0, %v28148_v16  ;;  %v2543_v56 = vld [vmem:[#allocation2 + $0x99] sm:$0xff] }
 0x32c   : > { %19348 = vmatprep.mubr.msk.f32.mxu0 %vm23396_vm0, %v28148_v16  ;;  %2451 = vst.msk [vmem:[#allocation2 + $0xae] sm:$0xff] %vm2427_vm2, %v2403_v35  ;;  %v2076_v10 = vadd.f32 %v24447_v59, %v2028_v28  ;;  %v2029_v17 = vmax.f32 %v24302_v52, %v1919_v20  ;;  %v17984_v54 = vpop.f32.mrb[35].mxu1  ;;  %v7193_v8 = vld [vmem:[#allocation2 + $0x9c] sm:$0xff]  ;;  %v2279_v52 = vpop.permute.xlu1 %2278 }
 0x32e   : > { %v2117_v26 = vmax.f32 %v2076_v10, 0.0  ;;  %v2077_v61 = vadd.f32 %v24447_v59, %v2029_v17  ;;  %18091 = vmatmul.mubr.msk.f32.gmra.mrb[118].mxu1 %vm2427_vm2, %v2543_v56  ;;  %v2294_v17 = vpop.permute.xlu0 %2293 }
 0x32f   : > { %19349 = vmatmul.mubr.msk.f32.gmra.mrb[30].mxu0 %vm2427_vm2, %v7193_v8  ;;  %18093 = vmatprep.mubr.msk.f32.mxu1 %vm23396_vm0, %v28148_v16 }
 0x330   : > { %19351 = vmatprep.mubr.msk.f32.mxu0 %vm23396_vm0, %v28148_v16  ;;  %v2404_v18 = vmul.f32 %v2274_v53, %v2117_v26  ;;  %v2118_v30 = vmax.f32 %v2077_v61, 0.0 }
 0x331   : > { %v1924_v22 = vpop.f32.mrb[36].mxu1  ;;  %v2544_v4 = vld [vmem:[#allocation2 + $0xa1] sm:$0xff] }
 0x332   : > { %v7194_v11 = vld [vmem:[#allocation2 + $0xa4] sm:$0xff]  ;;  %2452 = vst.msk [vmem:[#allocation2 + $0xb6] sm:$0xff] %vm2427_vm2, %v2404_v18  ;;  %v2405_v39 = vmul.f32 %v2279_v52, %v2118_v30  ;;  %v2030_v62 = vmax.f32 %v24310_v5, %v1924_v22  ;;  %v17987_v47 = vpop.f32.mrb[37].mxu1  ;;  %18094 = vmatmul.mubr.msk.f32.gmra.mrb[120].mxu1 %vm2427_vm2, %v2544_v4 }
 0x333   : > { %19352 = vmatmul.mubr.msk.f32.gmra.mrb[32].mxu0 %vm2427_vm2, %v7194_v11  ;;  %v1927_v13 = vpop.f32.mrb[38].mxu1  ;;  %18096 = vmatprep.mubr.msk.f32.mxu1 %vm23396_vm0, %v28148_v16  ;;  %v2545_v5 = vld [vmem:[#allocation2 + $0xa9] sm:$0xff] }
 0x334   : > { %19354 = vmatprep.mubr.msk.f32.mxu0 %vm23396_vm0, %v28148_v16  ;;  %2453 = vst.msk [vmem:[#allocation2 + $0xbe] sm:$0xff] %vm2427_vm2, %v2405_v39  ;;  %v2078_v48 = vadd.f32 %v24447_v59, %v2030_v62  ;;  %v2031_v33 = vmax.f32 %v24316_v25, %v1927_v13  ;;  %v17988_v32 = vpop.f32.mrb[39].mxu1  ;;  %v7195_v3 = vld [vmem:[#allocation2 + $0xac] sm:$0xff]  ;;  %v2289_v25 = vpop.permute.xlu1 %2288 }
 0x335   : > { %v2304_v13 = vpop.permute.xlu0 %2303 }
 0x336   : > { %v2119_v46 = vmax.f32 %v2078_v48, 0.0  ;;  %v2079_v43 = vadd.f32 %v24447_v59, %v2031_v33  ;;  %18097 = vmatmul.mubr.msk.f32.gmra.mrb[122].mxu1 %vm2427_vm2, %v2545_v5 }
 0x337   : > { %19355 = vmatmul.mubr.msk.f32.gmra.mrb[34].mxu0 %vm2427_vm2, %v7195_v3  ;;  %18099 = vmatprep.mubr.msk.f32.mxu1 %vm23396_vm0, %v28148_v16 }
 0x338   : > { %19357 = vmatprep.mubr.msk.f32.mxu0 %vm23396_vm0, %v28148_v16  ;;  %v2406_v1 = vmul.f32 %v2284_v23, %v2119_v46  ;;  %v2120_v60 = vmax.f32 %v2079_v43, 0.0 }
 0x339   : > { %v1932_v9 = vpop.f32.mrb[40].mxu1  ;;  %v2546_v36 = vld [vmem:[#allocation2 + $0xb1] sm:$0xff] }
 0x33a   : > { %v7196_v57 = vld [vmem:[#allocation2 + $0xb4] sm:$0xff]  ;;  %2454 = vst.msk [vmem:[#allocation2 + $0xc6] sm:$0xff] %vm2427_vm2, %v2406_v1  ;;  %v2407_v2 = vmul.f32 %v2289_v25, %v2120_v60  ;;  %v2032_v45 = vmax.f32 %v24324_v21, %v1932_v9  ;;  %v17991_v12 = vpop.f32.mrb[41].mxu1  ;;  %18100 = vmatmul.mubr.msk.f32.gmra.mrb[124].mxu1 %vm2427_vm2, %v2546_v36 }
 0x33b   : > { %19358 = vmatmul.mubr.msk.f32.gmra.mrb[36].mxu0 %vm2427_vm2, %v7196_v57  ;;  %v1935_v6 = vpop.f32.mrb[42].mxu1  ;;  %18102 = vmatprep.mubr.msk.f32.mxu1 %vm23396_vm0, %v28148_v16  ;;  %v2547_v21 = vld [vmem:[#allocation2 + $0xb9] sm:$0xff] }
 0x33c   : > { %19360 = vmatprep.mubr.msk.f32.mxu0 %vm23396_vm0, %v28148_v16  ;;  %2455 = vst.msk [vmem:[#allocation2 + $0xce] sm:$0xff] %vm2427_vm2, %v2407_v2  ;;  %v2080_v31 = vadd.f32 %v24447_v59, %v2032_v45  ;;  %v2033_v35 = vmax.f32 %v24330_v27, %v1935_v6  ;;  %v17992_v28 = vpop.f32.mrb[43].mxu1  ;;  %v7197_v49 = vld [vmem:[#allocation2 + $0xbc] sm:$0xff]  ;;  %v2299_v27 = vpop.permute.xlu1 %2298 }
 0x33d   : > { %v2314_v45 = vpop.permute.xlu0 %2313 }
 0x33e   : > { %v2121_v20 = vmax.f32 %v2080_v31, 0.0  ;;  %v2081_v10 = vadd.f32 %v24447_v59, %v2033_v35  ;;  %18103 = vmatmul.mubr.msk.f32.gmra.mrb[126].mxu1 %vm2427_vm2, %v2547_v21 }
 0x33f   : > { %19361 = vmatmul.mubr.msk.f32.gmra.mrb[38].mxu0 %vm2427_vm2, %v7197_v49  ;;  %18105 = vmatprep.mubr.msk.f32.mxu1 %vm23396_vm0, %v28148_v16 }
 0x340   : > { %19363 = vmatprep.mubr.msk.f32.mxu0 %vm23396_vm0, %v28148_v16  ;;  %v2408_v54 = vmul.f32 %v2294_v17, %v2121_v20  ;;  %v2122_v56 = vmax.f32 %v2081_v10, 0.0 }
 0x341   : > { %v1940_v8 = vpop.f32.mrb[44].mxu1  ;;  %v2548_v26 = vld [vmem:[#allocation2 + $0xc1] sm:$0xff] }
 0x342   : > { %v7198_v61 = vld [vmem:[#allocation2 + $0xc4] sm:$0xff]  ;;  %2456 = vst.msk [vmem:[#allocation2 + $0xd6] sm:$0xff] %vm2427_vm2, %v2408_v54  ;;  %v2409_v53 = vmul.f32 %v2299_v27, %v2122_v56  ;;  %v2034_v18 = vmax.f32 %v24338_v14, %v1940_v8  ;;  %v17995_v30 = vpop.f32.mrb[45].mxu1  ;;  %18106 = vmatmul.mubr.msk.f32.gmra.mrb[128].mxu1 %vm2427_vm2, %v2548_v26 }
 0x343   : > { %19364 = vmatmul.mubr.msk.f32.gmra.mrb[40].mxu0 %vm2427_vm2, %v7198_v61  ;;  %v1943_v52 = vpop.f32.mrb[46].mxu1  ;;  %18108 = vmatprep.mubr.msk.f32.mxu1 %vm23396_vm0, %v28148_v16  ;;  %v2549_v14 = vld [vmem:[#allocation2 + $0xc9] sm:$0xff]  ;;  %v2324_v61 = vpop.permute.xlu0 %2323 }
 0x344   : > { %19366 = vmatprep.mubr.msk.f32.mxu0 %vm23396_vm0, %v28148_v16  ;;  %2457 = vst.msk [vmem:[#allocation2 + $0xde] sm:$0xff] %vm2427_vm2, %v2409_v53  ;;  %v2082_v22 = vadd.f32 %v24447_v59, %v2034_v18  ;;  %v2035_v4 = vmax.f32 %v24344_v58, %v1943_v52  ;;  %v17996_v11 = vpop.f32.mrb[47].mxu1  ;;  %v7199_v39 = vld [vmem:[#allocation2 + $0xcc] sm:$0xff]  ;;  %v2309_v58 = vpop.permute.xlu1 %2308 }
 0x346   : > { %v2123_v62 = vmax.f32 %v2082_v22, 0.0  ;;  %v2083_v47 = vadd.f32 %v24447_v59, %v2035_v4  ;;  %18109 = vmatmul.mubr.msk.f32.gmra.mrb[130].mxu1 %vm2427_vm2, %v2549_v14 }
 0x347   : > { %19367 = vmatmul.mubr.msk.f32.gmra.mrb[42].mxu0 %vm2427_vm2, %v7199_v39  ;;  %18111 = vmatprep.mubr.msk.f32.mxu1 %vm23396_vm0, %v28148_v16 }
 0x348   : > { %19369 = vmatprep.mubr.msk.f32.mxu0 %vm23396_vm0, %v28148_v16  ;;  %v2410_v48 = vmul.f32 %v2304_v13, %v2123_v62  ;;  %v2124_v33 = vmax.f32 %v2083_v47, 0.0 }
 0x349   : > { %v1948_v32 = vpop.f32.mrb[48].mxu1  ;;  %v2550_v5 = vld [vmem:[#allocation2 + $0xd1] sm:$0xff] }
 0x34a   : > { %v7200_v3 = vld [vmem:[#allocation2 + $0xd4] sm:$0xff]  ;;  %2458 = vst.msk [vmem:[#allocation2 + $0xe6] sm:$0xff] %vm2427_vm2, %v2410_v48  ;;  %v2411_v46 = vmul.f32 %v2309_v58, %v2124_v33  ;;  %v2036_v43 = vmax.f32 %v24352_v15, %v1948_v32  ;;  %v17999_v23 = vpop.f32.mrb[49].mxu1  ;;  %18112 = vmatmul.mubr.msk.f32.gmra.mrb[132].mxu1 %vm2427_vm2, %v2550_v5  ;;  %v2334_v32 = vpop.permute.xlu0 %2333 }
 0x34b   : > { %19370 = vmatmul.mubr.msk.f32.gmra.mrb[44].mxu0 %vm2427_vm2, %v7200_v3  ;;  %v1951_v1 = vpop.f32.mrb[50].mxu1  ;;  %18114 = vmatprep.mubr.msk.f32.mxu1 %vm23396_vm0, %v28148_v16  ;;  %v2551_v15 = vld [vmem:[#allocation2 + $0xd9] sm:$0xff] }
 0x34c   : > { %19372 = vmatprep.mubr.msk.f32.mxu0 %vm23396_vm0, %v28148_v16  ;;  %2459 = vst.msk [vmem:[#allocation2 + $0xee] sm:$0xff] %vm2427_vm2, %v2411_v46  ;;  %v2084_v60 = vadd.f32 %v24447_v59, %v2036_v43  ;;  %v2037_v25 = vmax.f32 %v24358_v41, %v1951_v1  ;;  %v18000_v9 = vpop.f32.mrb[51].mxu1  ;;  %v7201_v36 = vld [vmem:[#allocation2 + $0xdc] sm:$0xff]  ;;  %v2319_v41 = vpop.permute.xlu1 %2318 }
 0x34e   : > { %v2125_v57 = vmax.f32 %v2084_v60, 0.0  ;;  %v2085_v2 = vadd.f32 %v24447_v59, %v2037_v25  ;;  %18115 = vmatmul.mubr.msk.f32.gmra.mrb[134].mxu1 %vm2427_vm2, %v2551_v15 }
 0x34f   : > { %19373 = vmatmul.mubr.msk.f32.gmra.mrb[46].mxu0 %vm2427_vm2, %v7201_v36  ;;  %18117 = vmatprep.mubr.msk.f32.mxu1 %vm23396_vm0, %v28148_v16 }
 0x350   : > { %19375 = vmatprep.mubr.msk.f32.mxu0 %vm23396_vm0, %v28148_v16  ;;  %v2412_v12 = vmul.f32 %v2314_v45, %v2125_v57  ;;  %v2126_v6 = vmax.f32 %v2085_v2, 0.0 }
 0x351   : > { %v1956_v31 = vpop.f32.mrb[52].mxu1  ;;  %v2552_v35 = vld [vmem:[#allocation2 + $0xe1] sm:$0xff] }
 0x352   : > { %v7202_v28 = vld [vmem:[#allocation2 + $0xe4] sm:$0xff]  ;;  %2460 = vst.msk [vmem:[#allocation2 + $0xf6] sm:$0xff] %vm2427_vm2, %v2412_v12  ;;  %v2413_v21 = vmul.f32 %v2319_v41, %v2126_v6  ;;  %v2038_v49 = vmax.f32 %v24366_v24, %v1956_v31  ;;  %v18003_v20 = vpop.f32.mrb[53].mxu1  ;;  %18118 = vmatmul.mubr.msk.f32.gmra.mrb[136].mxu1 %vm2427_vm2, %v2552_v35  ;;  %v2344_v31 = vpop.permute.xlu0 %2343 }
 0x353   : > { %19376 = vmatmul.mubr.msk.f32.gmra.mrb[48].mxu0 %vm2427_vm2, %v7202_v28  ;;  %v1959_v10 = vpop.f32.mrb[54].mxu1  ;;  %18120 = vmatprep.mubr.msk.f32.mxu1 %vm23396_vm0, %v28148_v16  ;;  %v2553_v24 = vld [vmem:[#allocation2 + $0xe9] sm:$0xff] }
 0x354   : > { %19378 = vmatprep.mubr.msk.f32.mxu0 %vm23396_vm0, %v28148_v16  ;;  %2461 = vst.msk [vmem:[#allocation2 + $0xfe] sm:$0xff] %vm2427_vm2, %v2413_v21  ;;  %v2086_v17 = vadd.f32 %v24447_v59, %v2038_v49  ;;  %v2039_v54 = vmax.f32 %v24372_v55, %v1959_v10  ;;  %v18004_v56 = vpop.f32.mrb[55].mxu1  ;;  %v7203_v27 = vld [vmem:[#allocation2 + $0xec] sm:$0xff]  ;;  %v2329_v55 = vpop.permute.xlu1 %2328 }
 0x355   : > { %v15874_v12 = vld [vmem:[%s28103_s4 + $0xc8] sm:$0xff] }
 0x356   : > { %v2127_v8 = vmax.f32 %v2086_v17, 0.0  ;;  %v2087_v26 = vadd.f32 %v24447_v59, %v2039_v54  ;;  %18121 = vmatmul.mubr.msk.f32.gmra.mrb[138].mxu1 %vm2427_vm2, %v2553_v24  ;;  %v7656_v10 = vld [vmem:[#allocation2 + $0x25] sm:$0xff] }
 0x357   : > { %19379 = vmatmul.mubr.msk.f32.gmra.mrb[50].mxu0 %vm2427_vm2, %v7203_v27  ;;  %18123 = vmatprep.mubr.msk.f32.mxu1 %vm23396_vm0, %v28148_v16 }
 0x358   : > { %19381 = vmatprep.mubr.msk.f32.mxu0 %vm23396_vm0, %v28148_v16  ;;  %v2414_v53 = vmul.f32 %v2324_v61, %v2127_v8  ;;  %v2128_v18 = vmax.f32 %v2087_v26, 0.0  ;;  %v7657_v61 = vld [vmem:[#allocation2 + $0x2d] sm:$0xff] }
 0x359   : > { %v1964_v30 = vpop.f32.mrb[56].mxu1  ;;  %v2554_v52 = vld [vmem:[#allocation2 + $0xf1] sm:$0xff] }
 0x35a   : > { %v7204_v22 = vld [vmem:[#allocation2 + $0xf4] sm:$0xff]  ;;  %2462 = vst.msk [vmem:[#allocation2 + $0x106] sm:$0xff] %vm2427_vm2, %v2414_v53  ;;  %v2415_v4 = vmul.f32 %v2329_v55, %v2128_v18  ;;  %v2040_v11 = vmax.f32 %v24380_v29, %v1964_v30  ;;  %v18007_v14 = vpop.f32.mrb[57].mxu1  ;;  %18124 = vmatmul.mubr.msk.f32.gmra.mrb[140].mxu1 %vm2427_vm2, %v2554_v52  ;;  %v2354_v55 = vpop.permute.xlu0 %2353 }
 0x35b   : > { %19382 = vmatmul.mubr.msk.f32.gmra.mrb[52].mxu0 %vm2427_vm2, %v7204_v22  ;;  %v1967_v39 = vpop.f32.mrb[58].mxu1  ;;  %18126 = vmatprep.mubr.msk.f32.mxu1 %vm23396_vm0, %v28148_v16  ;;  %v2555_v29 = vld [vmem:[#allocation2 + $0xf9] sm:$0xff] }
 0x35c   : > { %19384 = vmatprep.mubr.msk.f32.mxu0 %vm23396_vm0, %v28148_v16  ;;  %2463 = vst.msk [vmem:[#allocation2 + $0x10e] sm:$0xff] %vm2427_vm2, %v2415_v4  ;;  %v2088_v62 = vadd.f32 %v24447_v59, %v2040_v11  ;;  %v2041_v47 = vmax.f32 %v24385_v34, %v1967_v39  ;;  %v18008_v13 = vpop.f32.mrb[59].mxu1  ;;  %v7205_v48 = vld [vmem:[#allocation2 + $0xfc] sm:$0xff]  ;;  %v2339_v34 = vpop.permute.xlu1 %2338 }
 0x35d   : > { %v7658_v11 = vld [vmem:[#allocation2 + $0x35] sm:$0xff] }
 0x35e   : > { %v2129_v33 = vmax.f32 %v2088_v62, 0.0  ;;  %v2089_v58 = vadd.f32 %v24447_v59, %v2041_v47  ;;  %18127 = vmatmul.mubr.msk.f32.gmra.mrb[142].mxu1 %vm2427_vm2, %v2555_v29 }
 0x35f   : > { %19385 = vmatmul.mubr.msk.f32.gmra.mrb[54].mxu0 %vm2427_vm2, %v7205_v48  ;;  %18129 = vmatprep.mubr.msk.f32.mxu1 %vm23396_vm0, %v28148_v16 }
 0x360   : > { %19387 = vmatprep.mubr.msk.f32.mxu0 %vm23396_vm0, %v28148_v16  ;;  %v2416_v5 = vmul.f32 %v2334_v32, %v2129_v33  ;;  %v2130_v3 = vmax.f32 %v2089_v58, 0.0  ;;  %v2349_v21 = vpop.permute.xlu1 %2348  ;;  %v7659_v33 = vld [vmem:[#allocation2 + $0x3d] sm:$0xff] }
 0x361   : > { %v1972_v46 = vpop.f32.mrb[60].mxu1  ;;  %v2556_v43 = vld [vmem:[#allocation2 + $0x101] sm:$0xff] }
 0x362   : > { %v7206_v23 = vld [vmem:[#allocation2 + $0x104] sm:$0xff]  ;;  %2464 = vst.msk [vmem:[#allocation2 + $0x116] sm:$0xff] %vm2427_vm2, %v2416_v5  ;;  %v2417_v1 = vmul.f32 %v2339_v34, %v2130_v3  ;;  %v2042_v60 = vmax.f32 %v24393_v37, %v1972_v46  ;;  %v18011_v25 = vpop.f32.mrb[61].mxu1  ;;  %18130 = vmatmul.mubr.msk.f32.gmra.mrb[144].mxu1 %vm2427_vm2, %v2556_v43  ;;  %v2364_v5 = vpop.permute.xlu0 %2363 }
 0x363   : > { %19388 = vmatmul.mubr.msk.f32.gmra.mrb[56].mxu0 %vm2427_vm2, %v7206_v23  ;;  %v1975_v9 = vpop.f32.mrb[62].mxu1  ;;  %18132 = vmatprep.mubr.msk.f32.mxu1 %vm23396_vm0, %v28148_v16  ;;  %v15873_v37 = vld [vmem:[%s28103_s4 + $0xc0] sm:$0xff]  ;;  %v2557_v2 = vld [vmem:[#allocation2 + $0x109] sm:$0xff] }
 0x364   : > { %19390 = vmatprep.mubr.msk.f32.mxu0 %vm23396_vm0, %v28148_v16  ;;  %2465 = vst.msk [vmem:[#allocation2 + $0x11e] sm:$0xff] %vm2427_vm2, %v2417_v1  ;;  %v2090_v15 = vadd.f32 %v24447_v59, %v2042_v60  ;;  %v2043_v36 = vmax.f32 %v24401_v42, %v1975_v9  ;;  %v18012_v57 = vpop.f32.mrb[63].mxu1  ;;  %v7207_v45 = vld [vmem:[#allocation2 + $0x10c] sm:$0xff]  ;;  %v21276_v28 = vpack.c.bf16 %v15874_v12, %v15873_v37  ;;  %v2359_v52 = vpop.permute.xlu1 %2358  ;;  %v23386_v9 = vld [vmem:[%s28101_s2] ss:$0 sm:$0xff] }
 0x365   : > { %v7660_v23 = vld [vmem:[#allocation2 + $0x45] sm:$0xff]  ;;  %v7661_v37 = vld [vmem:[#allocation2 + $0x4d] sm:$0xff] }
 0x366   : > { %v2131_v6 = vmax.f32 %v2090_v15, 0.0  ;;  %v2091_v41 = vadd.f32 %v24447_v59, %v2043_v36  ;;  %18133 = vmatmul.mubr.msk.f32.gmra.mrb[146].mxu1 %vm2427_vm2, %v2557_v2  ;;  %v2374_v12 = vpop.permute.xlu0 %2373 }
 0x367   : > { %19391 = vmatmul.mubr.msk.f32.gmra.mrb[58].mxu0 %vm2427_vm2, %v7207_v45  ;;  %18135 = vmatprep.mubr.msk.f32.mxu1 %vm23396_vm0, %v28148_v16 }
 0x368   : > { %19430 = vmatprep.mubr.msk.f32.mxu0 %vm23396_vm0, %v28148_v16  ;;  %v2418_v42 = vmul.f32 %v2344_v31, %v2131_v6  ;;  %v2132_v35 = vmax.f32 %v2091_v41, 0.0 }
 0x369   : > { %v1980_v49 = vpop.f32.mrb[64].mxu1  ;;  %v2558_v20 = vld [vmem:[#allocation2 + $0x111] sm:$0xff] }
 0x36a   : > { %2466 = vst.msk [vmem:[#allocation2 + $0x126] sm:$0xff] %vm2427_vm2, %v2418_v42  ;;  %v2419_v17 = vmul.f32 %v2349_v21, %v2132_v35  ;;  %v2044_v54 = vmax.f32 %v24409_v19, %v1980_v49  ;;  %v18015_v56 = vpop.f32.mrb[65].mxu1  ;;  %18136 = vmatmul.mubr.msk.f32.gmra.mrb[148].mxu1 %vm2427_vm2, %v2558_v20  ;;  %v7662_v35 = vld [vmem:[#allocation2 + $0x55] sm:$0xff]  ;;  %v2481_v20 = vld [vmem:[#allocation2] sm:$0xff] }
 0x36b   : > { %19431 = vmatmul.mubr.msk.f32.vlgmr.msra.gmra.mrb[0].mxu0 %vm2427_vm2, %v7656_v10  ;;  %v1983_v24 = vpop.f32.mrb[66].mxu1  ;;  %18138 = vmatprep.mubr.msk.f32.mxu1 %vm23396_vm0, %v28148_v16  ;;  %v2559_v19 = vld [vmem:[#allocation2 + $0x119] sm:$0xff] }
 0x36c   : > { %19433 = vmatprep.mubr.msk.f32.mxu0 %vm23396_vm0, %v28148_v16  ;;  %2467 = vst.msk [vmem:[#allocation2 + $0x12e] sm:$0xff] %vm2427_vm2, %v2419_v17  ;;  %v2092_v27 = vadd.f32 %v24447_v59, %v2044_v54  ;;  %v2045_v8 = vmax.f32 %v24417_v51, %v1983_v24  ;;  %v18016_v26 = vpop.f32.mrb[67].mxu1  ;;  %21277 = vmatpush3.bf16.msra.mxu0 %v21276_v28  ;;  %v7663_v56 = vld [vmem:[#allocation2 + $0x5d] sm:$0xff] }
 0x36d   : > { %21278 = vmatprep.subr.bf16.mxu0 %v23398_v38  ;;  %v7664_v26 = vld [vmem:[#allocation2 + $0x65] sm:$0xff] }
 0x36e   : > { %v2133_v53 = vmax.f32 %v2092_v27, 0.0  ;;  %v2093_v18 = vadd.f32 %v24447_v59, %v2045_v8  ;;  %18139 = vmatmul.mubr.msk.f32.gmra.mrb[150].mxu1 %vm2427_vm2, %v2559_v19  ;;  %v2482_v27 = vld [vmem:[#allocation2 + $0x8] sm:$0xff]  ;;  %v2483_v19 = vld [vmem:[#allocation2 + $0x10] sm:$0xff] }
 0x36f   : > { %19434 = vmatmul.mubr.msk.f32.gmra.mrb[2].mxu0 %vm2427_vm2, %v7657_v61  ;;  %18141 = vmatprep.mubr.msk.f32.mxu1 %vm23396_vm0, %v28148_v16  ;;  %v7665_v61 = vld [vmem:[#allocation2 + $0x6d] sm:$0xff] }
 0x370   : > { %19436 = vmatprep.mubr.msk.f32.mxu0 %vm23396_vm0, %v28148_v16  ;;  %v2420_v51 = vmul.f32 %v2354_v55, %v2133_v53  ;;  %v2134_v30 = vmax.f32 %v2093_v18, 0.0  ;;  %v2484_v53 = vld [vmem:[#allocation2 + $0x18] sm:$0xff]  ;;  %v2485_v55 = vld [vmem:[#allocation2 + $0x20] sm:$0xff] }
 0x371   : > { %v1988_v22 = vpop.f32.mrb[68].mxu1  ;;  %v2560_v4 = vld [vmem:[#allocation2 + $0x121] sm:$0xff]  ;;  %v7666_v18 = vld [vmem:[#allocation2 + $0x75] sm:$0xff] }
 0x372   : > { %2468 = vst.msk [vmem:[#allocation2 + $0x136] sm:$0xff] %vm2427_vm2, %v2420_v51  ;;  %v2421_v14 = vmul.f32 %v2359_v52, %v2134_v30  ;;  %v2046_v39 = vmax.f32 %v24422_v0, %v1988_v22  ;;  %v18019_v62 = vpop.f32.mrb[69].mxu1  ;;  %18142 = vmatmul.mubr.msk.f32.gmra.mrb[152].mxu1 %vm2427_vm2, %v2560_v4  ;;  %v7667_v51 = vld [vmem:[#allocation2 + $0x7d] sm:$0xff]  ;;  %v2486_v30 = vld [vmem:[#allocation2 + $0x28] sm:$0xff]  ;;  %v2487_v22 = vld [vmem:[#allocation2 + $0x30] sm:$0xff] }
 0x373   : > { %19437 = vmatmul.mubr.msk.f32.gmra.mrb[4].mxu0 %vm2427_vm2, %v7658_v11  ;;  %v1991_v47 = vpop.f32.mrb[70].mxu1  ;;  %18144 = vmatprep.mubr.msk.f32.mxu1 %vm23396_vm0, %v28148_v16  ;;  %v2561_v0 = vld [vmem:[#allocation2 + $0x129] sm:$0xff]  ;;  %v2488_v11 = vld [vmem:[#allocation2 + $0x38] sm:$0xff] }
 0x374   : > { %19439 = vmatprep.mubr.msk.f32.mxu0 %vm23396_vm0, %v28148_v16  ;;  %2469 = vst.msk [vmem:[#allocation2 + $0x13e] sm:$0xff] %vm2427_vm2, %v2421_v14  ;;  %v2094_v13 = vadd.f32 %v24447_v59, %v2046_v39  ;;  %v2047_v29 = vmax.f32 %v24427_v40, %v1991_v47  ;;  %v18020_v48 = vpop.f32.mrb[71].mxu1  ;;  %v2369_v40 = vpop.permute.xlu1 %2368  ;;  %v7668_v52 = vld [vmem:[#allocation2 + $0x85] sm:$0xff]  ;;  %v7669_v4 = vld [vmem:[#allocation2 + $0x8d] sm:$0xff]  ;;  %v7670_v14 = vld [vmem:[#allocation2 + $0x95] sm:$0xff] }
 0x375   : > { %v2489_v39 = vld [vmem:[#allocation2 + $0x40] sm:$0xff]  ;;  %v2490_v48 = vld [vmem:[#allocation2 + $0x48] sm:$0xff] }
 0x376   : > { %v2135_v58 = vmax.f32 %v2094_v13, 0.0  ;;  %v2095_v32 = vadd.f32 %v24447_v59, %v2047_v29  ;;  %18145 = vmatmul.mubr.msk.f32.gmra.mrb[154].mxu1 %vm2427_vm2, %v2561_v0  ;;  %v7671_v62 = vld [vmem:[#allocation2 + $0x9d] sm:$0xff]  ;;  %v15444_v13 = vld [vmem:[%s28103_s4 + $0x28] sm:$0xff] }
 0x377   : > { %19440 = vmatmul.mubr.msk.f32.gmra.mrb[6].mxu0 %vm2427_vm2, %v7659_v33  ;;  %18147 = vmatprep.mubr.msk.f32.mxu1 %vm23396_vm0, %v28148_v16  ;;  %v15443_v47 = vld [vmem:[%s28103_s4 + $0x20] sm:$0xff]  ;;  %v2491_v33 = vld [vmem:[#allocation2 + $0x50] sm:$0xff] }
 0x378   : > { %19442 = vmatprep.mubr.msk.f32.mxu0 %vm23396_vm0, %v28148_v16  ;;  %v2422_v3 = vmul.f32 %v2364_v5, %v2135_v58  ;;  %v2136_v34 = vmax.f32 %v2095_v32, 0.0  ;;  %v2379_v31 = vpop.permute.xlu1 %2378  ;;  %v21246_v29 = vpack.c.bf16 %v15444_v13, %v15443_v47  ;;  %v7672_v0 = vld [vmem:[#allocation2 + $0xa5] sm:$0xff]  ;;  %v7673_v58 = vld [vmem:[#allocation2 + $0xad] sm:$0xff]  ;;  %v2492_v32 = vld [vmem:[#allocation2 + $0x58] sm:$0xff] }
 0x379   : > { %v1996_v46 = vpop.f32.mrb[72].mxu1  ;;  %v2562_v43 = vld [vmem:[#allocation2 + $0x131] sm:$0xff]  ;;  %v2518_v13 = vld [vmem:[#allocation2 + $0x128] sm:$0xff] }
 0x37a   : > { %2470 = vst.msk [vmem:[#allocation2 + $0x146] sm:$0xff] %vm2427_vm2, %v2422_v3  ;;  %v2423_v59 = vmul.f32 %v2369_v40, %v2136_v34  ;;  %v2048_v1 = vmax.f32 %v24432_v7, %v1996_v46  ;;  %v18023_v60 = vpop.f32.mrb[73].mxu1  ;;  %18148 = vmatmul.mubr.msk.f32.gmra.mrb[156].mxu1 %vm2427_vm2, %v2562_v43  ;;  %v7674_v5 = vld [vmem:[#allocation2 + $0xb5] sm:$0xff]  ;;  %v2493_v3 = vld [vmem:[#allocation2 + $0x60] sm:$0xff]  ;;  %v2494_v40 = vld [vmem:[#allocation2 + $0x68] sm:$0xff] }
 0x37b   : > { %19443 = vmatmul.mubr.msk.f32.gmra.mrb[8].mxu0 %vm2427_vm2, %v7660_v23  ;;  %v1999_v25 = vpop.f32.mrb[74].mxu1  ;;  %18150 = vmatprep.mubr.msk.f32.mxu1 %vm23396_vm0, %v28148_v16  ;;  %v2563_v57 = vld [vmem:[#allocation2 + $0x139] sm:$0xff]  ;;  %v2564_v42 = vld [vmem:[#allocation2 + $0x141] sm:$0xf]  ;;  %v7676_v46 = vld [vmem:[#allocation2 + $0xc5] sm:$0xff] }
 0x37c   : > { %19445 = vmatprep.mubr.msk.f32.mxu0 %vm23396_vm0, %v28148_v16  ;;  %2471 = vst.msk [vmem:[#allocation2 + $0x14e] sm:$0xff] %vm2427_vm2, %v2423_v59  ;;  %v2096_v15 = vadd.f32 %v23386_v9, %v2048_v1  ;;  %v2049_v7 = vmax.f32 %v24437_v63, %v1999_v25  ;;  %v18024_v36 = vpop.f32.mrb[75].mxu1  ;;  %v7675_v34 = vld [vmem:[#allocation2 + $0xbd] sm:$0xff]  ;;  %v2495_v43 = vld [vmem:[#allocation2 + $0x70] sm:$0xff] }
 0x37d   : > { %v7677_v23 = vld [vmem:[#allocation2 + $0xcd] sm:$0xff]  ;;  %v2496_v59 = vld [vmem:[#allocation2 + $0x78] sm:$0xff]  ;;  %v2497_v60 = vld [vmem:[#allocation2 + $0x80] sm:$0xff] }
 0x37e   : > { %v2137_v2 = vmax.f32 %v2096_v15, 0.0  ;;  %v2097_v45 = vadd.f32 %v23386_v9, %v2049_v7  ;;  %18151 = vmatmul.mubr.msk.f32.gmra.mrb[158].mxu1 %vm2427_vm2, %v2563_v57  ;;  %v7678_v1 = vld [vmem:[#allocation2 + $0xd5] sm:$0xff]  ;;  %v7679_v25 = vld [vmem:[#allocation2 + $0xdd] sm:$0xff]  ;;  %v7680_v15 = vld [vmem:[#allocation2 + $0xe5] sm:$0xff] }
 0x37f   : > { %19446 = vmatmul.mubr.msk.f32.gmra.mrb[10].mxu0 %vm2427_vm2, %v7661_v37  ;;  %18153 = vmatprep.mubr.msk.f32.mxu1 %vm23396_vm0, %v28148_v16  ;;  %v2499_v7 = vld [vmem:[#allocation2 + $0x90] sm:$0xff]  ;;  %v2500_v57 = vld [vmem:[#allocation2 + $0x98] sm:$0xff] }
 0x380   : > { %19448 = vmatprep.mubr.msk.f32.mxu0 %vm23396_vm0, %v28148_v16  ;;  %v2424_v6 = vmul.f32 %v2374_v12, %v2137_v2  ;;  %v2138_v41 = vmax.f32 %v2097_v45, 0.0  ;;  %v7681_v36 = vld [vmem:[#allocation2 + $0xed] sm:$0xff]  ;;  %v7682_v37 = vld [vmem:[#allocation2 + $0xf5] sm:$0xff]  ;;  %v2501_v2 = vld [vmem:[#allocation2 + $0xa0] sm:$0xff] }
 0x381   : > { %v2004_v63 = vpop.f32.mrb[76].mxu1  ;;  %v7683_v45 = vld [vmem:[#allocation2 + $0xfd] sm:$0xff]  ;;  %v2502_v12 = vld [vmem:[#allocation2 + $0xa8] sm:$0xff] }
 0x382   : > { %2472 = vst.msk [vmem:[#allocation2 + $0x156] sm:$0xff] %vm2427_vm2, %v2424_v6  ;;  %v2425_v28 = vmul.f32 %v2379_v31, %v2138_v41  ;;  %v2050_v21 = vmax.f32 %v24442_v50, %v2004_v63  ;;  %18154 = vmatmul.mubr.msk.f32.gmra.mrb[160].mxu1 %vm2427_vm2, %v2564_v42  ;;  %v18027_v49 = vpop.f32.mrb[77].mxu1  ;;  %v2384_v50 = vpop.permute.xlu0 %2383  ;;  %v7684_v6 = vld [vmem:[#allocation2 + $0x105] sm:$0xff]  ;;  %v2503_v41 = vld [vmem:[#allocation2 + $0xb0] sm:$0xff]  ;;  %v2504_v63 = vld [vmem:[#allocation2 + $0xb8] sm:$0xff] }
 0x383   : > { %19449 = vmatmul.mubr.msk.f32.gmra.mrb[12].mxu0 %vm2427_vm2, %v7662_v35  ;;  %18160 = vmatprep.mubr.msk.f32.mxu1 %vm23396_vm0, %v28148_v16  ;;  %v2007_v10 = vpop.f32.mrb[78].mxu1  ;;  %v7685_v31 = vld [vmem:[#allocation2 + $0x10d] sm:$0xff]  ;;  %v7686_v42 = vld [vmem:[#allocation2 + $0x115] sm:$0xff]  ;;  %v2505_v35 = vld [vmem:[#allocation2 + $0xc0] sm:$0xff] }
 0x384   : > { %19451 = vmatprep.mubr.msk.f32.mxu0 %vm23396_vm0, %v28148_v16  ;;  %2473 = vst.msk [vmem:[#allocation2 + $0x15e] sm:$0xff] %vm2427_vm2, %v2425_v28  ;;  %v2098_v17 = vadd.f32 %v23386_v9, %v2050_v21  ;;  %v18028_v54 = vpop.f32.mrb[79].mxu1  ;;  %v2498_v9 = vld [vmem:[#allocation2 + $0x88] sm:$0xff]  ;;  %v7687_v28 = vld [vmem:[#allocation2 + $0x11d] sm:$0xff] }
 0x385   : > { %v2506_v21 = vld [vmem:[#allocation2 + $0xc8] sm:$0xff]  ;;  %v7690_v54 = vld [vmem:[#allocation2 + $0x135] sm:$0xff] }
 0x386   : > { %v2139_v24 = vmax.f32 %v2098_v17, 0.0  ;;  %18161 = vmatmul.mubr.msk.f32.vlgmr.msra.gmra.mrb[80].mxu1 %vm2427_vm2, %v2481_v20  ;;  %v7688_v49 = vld [vmem:[#allocation2 + $0x125] sm:$0xff]  ;;  %v2507_v20 = vld [vmem:[#allocation2 + $0xd0] sm:$0xff]  ;;  %v2508_v17 = vld [vmem:[#allocation2 + $0xd8] sm:$0xff] }
 0x387   : > { %19452 = vmatmul.mubr.msk.f32.gmra.mrb[14].mxu0 %vm2427_vm2, %v7663_v56  ;;  %18163 = vmatprep.mubr.msk.f32.mxu1 %vm23396_vm0, %v28148_v16  ;;  %v7689_v10 = vld [vmem:[#allocation2 + $0x12d] sm:$0xff]  ;;  %v2509_v56 = vld [vmem:[#allocation2 + $0xe0] sm:$0xff]  ;;  %v8136_v47 = vld [vmem:[#allocation2 + $0x36] sm:$0xff] }
 0x388   : > { %19454 = vmatprep.mubr.msk.f32.mxu0 %vm23396_vm0, %v28148_v16  ;;  %v2426_v8 = vmul.f32 %v2384_v50, %v2139_v24  ;;  %21247 = vmatpush3.bf16.msra.mxu1 %v21246_v29  ;;  %v7691_v24 = vld [vmem:[#allocation2 + $0x13d] sm:$0xff]  ;;  %v2510_v50 = vld [vmem:[#allocation2 + $0xe8] sm:$0xff] }
 0x389   : > { %21248 = vmatprep.subr.bf16.mxu1 %v23398_v38  ;;  %v8137_v29 = vld [vmem:[#allocation2 + $0x3e] sm:$0xff] }
 0x38a   : > { %2475 = vst.msk [vmem:[#allocation2 + $0x166] sm:$0xf] %vm2474_vm4, %v2426_v8  ;;  %18164 = vmatmul.mubr.msk.f32.gmra.mrb[82].mxu1 %vm2427_vm2, %v2482_v27  ;;  %v7692_v27 = vld [vmem:[#allocation2 + $0x145] sm:$0xff]  ;;  %v2511_v8 = vld [vmem:[#allocation2 + $0xf0] sm:$0xff] }
 0x38b   : > { %19455 = vmatmul.mubr.msk.f32.gmra.mrb[16].mxu0 %vm2427_vm2, %v7664_v26  ;;  %18166 = vmatprep.mubr.msk.f32.mxu1 %vm23396_vm0, %v28148_v16  ;;  %v7693_v26 = vld [vmem:[#allocation2 + $0x14d] sm:$0xff] }
 0x38c   : > { %19457 = vmatprep.mubr.msk.f32.mxu0 %vm23396_vm0, %v28148_v16 }
 0x38e   : > { %18167 = vmatmul.mubr.msk.f32.gmra.mrb[84].mxu1 %vm2427_vm2, %v2483_v19  ;;  %v2512_v19 = vld [vmem:[#allocation2 + $0xf8] sm:$0xff] }
 0x38f   : > { %19458 = vmatmul.mubr.msk.f32.gmra.mrb[18].mxu0 %vm2427_vm2, %v7665_v61  ;;  %18169 = vmatprep.mubr.msk.f32.mxu1 %vm23396_vm0, %v28148_v16  ;;  %v7694_v61 = vld [vmem:[#allocation2 + $0x155] sm:$0xff] }
 0x390   : > { %19460 = vmatprep.mubr.msk.f32.mxu0 %vm23396_vm0, %v28148_v16 }
 0x392   : > { %18170 = vmatmul.mubr.msk.f32.gmra.mrb[86].mxu1 %vm2427_vm2, %v2484_v53  ;;  %v2513_v53 = vld [vmem:[#allocation2 + $0x100] sm:$0xff] }
 0x393   : > { %19461 = vmatmul.mubr.msk.f32.gmra.mrb[20].mxu0 %vm2427_vm2, %v7666_v18  ;;  %18172 = vmatprep.mubr.msk.f32.mxu1 %vm23396_vm0, %v28148_v16  ;;  %v7695_v18 = vld [vmem:[#allocation2 + $0x15d] sm:$0xff] }
 0x394   : > { %19463 = vmatprep.mubr.msk.f32.mxu0 %vm23396_vm0, %v28148_v16 }
 0x396   : > { %18173 = vmatmul.mubr.msk.f32.gmra.mrb[88].mxu1 %vm2427_vm2, %v2485_v55  ;;  %v2514_v55 = vld [vmem:[#allocation2 + $0x108] sm:$0xff] }
 0x397   : > { %19464 = vmatmul.mubr.msk.f32.gmra.mrb[22].mxu0 %vm2427_vm2, %v7667_v51  ;;  %18175 = vmatprep.mubr.msk.f32.mxu1 %vm23396_vm0, %v28148_v16  ;;  %v7696_v51 = vld [vmem:[#allocation2 + $0x165] sm:$0xf] }
 0x398   : > { %19466 = vmatprep.mubr.msk.f32.mxu0 %vm23396_vm0, %v28148_v16 }
 0x39a   : > { %18176 = vmatmul.mubr.msk.f32.gmra.mrb[90].mxu1 %vm2427_vm2, %v2486_v30  ;;  %v15916_v30 = vld [vmem:[%s28103_s4 + $0xd0] sm:$0xff] }
 0x39b   : > { %19467 = vmatmul.mubr.msk.f32.gmra.mrb[24].mxu0 %vm2427_vm2, %v7668_v52  ;;  %18178 = vmatprep.mubr.msk.f32.mxu1 %vm23396_vm0, %v28148_v16  ;;  %v15917_v52 = vld [vmem:[%s28103_s4 + $0xd8] sm:$0xff] }
 0x39c   : > { %19469 = vmatprep.mubr.msk.f32.mxu0 %vm23396_vm0, %v28148_v16 }
 0x39e   : > { %18179 = vmatmul.mubr.msk.f32.gmra.mrb[92].mxu1 %vm2427_vm2, %v2487_v22  ;;  %v21279_v22 = vpack.c.bf16 %v15917_v52, %v15916_v30  ;;  %v8161_v30 = vld [vmem:[#allocation2 + $0xfe] sm:$0xff]  ;;  %v3375_v52 = vld [vmem:[#allocation2 + $0xaa] sm:$0xff] }
 0x39f   : > { %19470 = vmatmul.mubr.msk.f32.gmra.mrb[26].mxu0 %vm2427_vm2, %v7669_v4  ;;  %18181 = vmatprep.mubr.msk.f32.mxu1 %vm23396_vm0, %v28148_v16  ;;  %v2515_v4 = vld [vmem:[#allocation2 + $0x110] sm:$0xff] }
 0x3a0   : > { %19472 = vmatprep.mubr.msk.f32.mxu0 %vm23396_vm0, %v28148_v16 }
 0x3a2   : > { %18182 = vmatmul.mubr.msk.f32.gmra.mrb[94].mxu1 %vm2427_vm2, %v2488_v11  ;;  %v8134_v11 = vld [vmem:[#allocation2 + $0x26] sm:$0xff] }
 0x3a3   : > { %19473 = vmatmul.mubr.msk.f32.gmra.mrb[28].mxu0 %vm2427_vm2, %v7670_v14  ;;  %18184 = vmatprep.mubr.msk.f32.mxu1 %vm23396_vm0, %v28148_v16  ;;  %v2516_v14 = vld [vmem:[#allocation2 + $0x118] sm:$0xff] }
 0x3a4   : > { %19475 = vmatprep.mubr.msk.f32.mxu0 %vm23396_vm0, %v28148_v16 }
 0x3a6   : > { %18185 = vmatmul.mubr.msk.f32.gmra.mrb[96].mxu1 %vm2427_vm2, %v2489_v39  ;;  %v8135_v39 = vld [vmem:[#allocation2 + $0x2e] sm:$0xff] }
 0x3a7   : > { %19476 = vmatmul.mubr.msk.f32.gmra.mrb[30].mxu0 %vm2427_vm2, %v7671_v62  ;;  %18187 = vmatprep.mubr.msk.f32.mxu1 %vm23396_vm0, %v28148_v16  ;;  %v2517_v62 = vld [vmem:[#allocation2 + $0x120] sm:$0xff] }
 0x3a8   : > { %19478 = vmatprep.mubr.msk.f32.mxu0 %vm23396_vm0, %v28148_v16 }
 0x3aa   : > { %18188 = vmatmul.mubr.msk.f32.gmra.mrb[98].mxu1 %vm2427_vm2, %v2490_v48  ;;  %v2519_v48 = vld [vmem:[#allocation2 + $0x130] sm:$0xff] }
 0x3ab   : > { %19479 = vmatmul.mubr.msk.f32.gmra.mrb[32].mxu0 %vm2427_vm2, %v7672_v0  ;;  %18190 = vmatprep.mubr.msk.f32.mxu1 %vm23396_vm0, %v28148_v16  ;;  %v8138_v0 = vld [vmem:[#allocation2 + $0x46] sm:$0xff] }
 0x3ac   : > { %19481 = vmatprep.mubr.msk.f32.mxu0 %vm23396_vm0, %v28148_v16 }
 0x3ae   : > { %18191 = vmatmul.mubr.msk.f32.gmra.mrb[100].mxu1 %vm2427_vm2, %v2491_v33  ;;  %v2520_v33 = vld [vmem:[#allocation2 + $0x138] sm:$0xff] }
 0x3af   : > { %19482 = vmatmul.mubr.msk.f32.gmra.mrb[34].mxu0 %vm2427_vm2, %v7673_v58  ;;  %18193 = vmatprep.mubr.msk.f32.mxu1 %vm23396_vm0, %v28148_v16  ;;  %v8139_v58 = vld [vmem:[#allocation2 + $0x4e] sm:$0xff] }
 0x3b0   : > { %19484 = vmatprep.mubr.msk.f32.mxu0 %vm23396_vm0, %v28148_v16 }
 0x3b2   : > { %18194 = vmatmul.mubr.msk.f32.gmra.mrb[102].mxu1 %vm2427_vm2, %v2492_v32  ;;  %v2521_v32 = vld [vmem:[#allocation2 + $0x140] sm:$0xf] }
 0x3b3   : > { %19485 = vmatmul.mubr.msk.f32.gmra.mrb[36].mxu0 %vm2427_vm2, %v7674_v5  ;;  %18196 = vmatprep.mubr.msk.f32.mxu1 %vm23396_vm0, %v28148_v16  ;;  %v8140_v5 = vld [vmem:[#allocation2 + $0x56] sm:$0xff] }
 0x3b4   : > { %19487 = vmatprep.mubr.msk.f32.mxu0 %vm23396_vm0, %v28148_v16 }
 0x3b6   : > { %18197 = vmatmul.mubr.msk.f32.gmra.mrb[104].mxu1 %vm2427_vm2, %v2493_v3  ;;  %v3354_v3 = vld [vmem:[#allocation2 + $0x2] sm:$0xff] }
 0x3b7   : > { %19488 = vmatmul.mubr.msk.f32.gmra.mrb[38].mxu0 %vm2427_vm2, %v7675_v34  ;;  %18199 = vmatprep.mubr.msk.f32.mxu1 %vm23396_vm0, %v28148_v16  ;;  %v8141_v34 = vld [vmem:[#allocation2 + $0x5e] sm:$0xff] }
 0x3b8   : > { %19490 = vmatprep.mubr.msk.f32.mxu0 %vm23396_vm0, %v28148_v16 }
 0x3ba   : > { %18200 = vmatmul.mubr.msk.f32.gmra.mrb[106].mxu1 %vm2427_vm2, %v2494_v40  ;;  %v3355_v40 = vld [vmem:[#allocation2 + $0xa] sm:$0xff] }
 0x3bb   : > { %19491 = vmatmul.mubr.msk.f32.gmra.mrb[40].mxu0 %vm2427_vm2, %v7676_v46  ;;  %18202 = vmatprep.mubr.msk.f32.mxu1 %vm23396_vm0, %v28148_v16  ;;  %v8142_v46 = vld [vmem:[#allocation2 + $0x66] sm:$0xff] }
 0x3bc   : > { %19493 = vmatprep.mubr.msk.f32.mxu0 %vm23396_vm0, %v28148_v16 }
 0x3be   : > { %18203 = vmatmul.mubr.msk.f32.gmra.mrb[108].mxu1 %vm2427_vm2, %v2495_v43  ;;  %v3356_v43 = vld [vmem:[#allocation2 + $0x12] sm:$0xff] }
 0x3bf   : > { %19494 = vmatmul.mubr.msk.f32.gmra.mrb[42].mxu0 %vm2427_vm2, %v7677_v23  ;;  %18205 = vmatprep.mubr.msk.f32.mxu1 %vm23396_vm0, %v28148_v16  ;;  %v8143_v23 = vld [vmem:[#allocation2 + $0x6e] sm:$0xff] }
 0x3c0   : > { %19496 = vmatprep.mubr.msk.f32.mxu0 %vm23396_vm0, %v28148_v16 }
 0x3c2   : > { %18206 = vmatmul.mubr.msk.f32.gmra.mrb[110].mxu1 %vm2427_vm2, %v2496_v59  ;;  %v3357_v59 = vld [vmem:[#allocation2 + $0x1a] sm:$0xff] }
 0x3c3   : > { %19497 = vmatmul.mubr.msk.f32.gmra.mrb[44].mxu0 %vm2427_vm2, %v7678_v1  ;;  %18208 = vmatprep.mubr.msk.f32.mxu1 %vm23396_vm0, %v28148_v16  ;;  %v8144_v1 = vld [vmem:[#allocation2 + $0x76] sm:$0xff] }
 0x3c4   : > { %19499 = vmatprep.mubr.msk.f32.mxu0 %vm23396_vm0, %v28148_v16 }
 0x3c6   : > { %18209 = vmatmul.mubr.msk.f32.gmra.mrb[112].mxu1 %vm2427_vm2, %v2497_v60  ;;  %v3358_v60 = vld [vmem:[#allocation2 + $0x22] sm:$0xff] }
 0x3c7   : > { %19500 = vmatmul.mubr.msk.f32.gmra.mrb[46].mxu0 %vm2427_vm2, %v7679_v25  ;;  %18211 = vmatprep.mubr.msk.f32.mxu1 %vm23396_vm0, %v28148_v16  ;;  %v8145_v25 = vld [vmem:[#allocation2 + $0x7e] sm:$0xff] }
 0x3c8   : > { %19502 = vmatprep.mubr.msk.f32.mxu0 %vm23396_vm0, %v28148_v16 }
 0x3ca   : > { %18212 = vmatmul.mubr.msk.f32.gmra.mrb[114].mxu1 %vm2427_vm2, %v2498_v9  ;;  %v3359_v9 = vld [vmem:[#allocation2 + $0x2a] sm:$0xff] }
 0x3cb   : > { %19503 = vmatmul.mubr.msk.f32.gmra.mrb[48].mxu0 %vm2427_vm2, %v7680_v15  ;;  %18214 = vmatprep.mubr.msk.f32.mxu1 %vm23396_vm0, %v28148_v16  ;;  %v8146_v15 = vld [vmem:[#allocation2 + $0x86] sm:$0xff] }
 0x3cc   : > { %19505 = vmatprep.mubr.msk.f32.mxu0 %vm23396_vm0, %v28148_v16 }
 0x3ce   : > { %18215 = vmatmul.mubr.msk.f32.gmra.mrb[116].mxu1 %vm2427_vm2, %v2499_v7  ;;  %v3360_v7 = vld [vmem:[#allocation2 + $0x32] sm:$0xff] }
 0x3cf   : > { %19506 = vmatmul.mubr.msk.f32.gmra.mrb[50].mxu0 %vm2427_vm2, %v7681_v36  ;;  %18217 = vmatprep.mubr.msk.f32.mxu1 %vm23396_vm0, %v28148_v16  ;;  %v8147_v36 = vld [vmem:[#allocation2 + $0x8e] sm:$0xff] }
 0x3d0   : > { %19508 = vmatprep.mubr.msk.f32.mxu0 %vm23396_vm0, %v28148_v16 }
 0x3d2   : > { %18218 = vmatmul.mubr.msk.f32.gmra.mrb[118].mxu1 %vm2427_vm2, %v2500_v57  ;;  %v3361_v57 = vld [vmem:[#allocation2 + $0x3a] sm:$0xff] }
 0x3d3   : > { %19509 = vmatmul.mubr.msk.f32.gmra.mrb[52].mxu0 %vm2427_vm2, %v7682_v37  ;;  %18220 = vmatprep.mubr.msk.f32.mxu1 %vm23396_vm0, %v28148_v16  ;;  %v8148_v37 = vld [vmem:[#allocation2 + $0x96] sm:$0xff] }
 0x3d4   : > { %19511 = vmatprep.mubr.msk.f32.mxu0 %vm23396_vm0, %v28148_v16 }
 0x3d6   : > { %18221 = vmatmul.mubr.msk.f32.gmra.mrb[120].mxu1 %vm2427_vm2, %v2501_v2  ;;  %v3362_v2 = vld [vmem:[#allocation2 + $0x42] sm:$0xff] }
 0x3d7   : > { %19512 = vmatmul.mubr.msk.f32.gmra.mrb[54].mxu0 %vm2427_vm2, %v7683_v45  ;;  %18223 = vmatprep.mubr.msk.f32.mxu1 %vm23396_vm0, %v28148_v16  ;;  %v8149_v45 = vld [vmem:[#allocation2 + $0x9e] sm:$0xff] }
 0x3d8   : > { %19514 = vmatprep.mubr.msk.f32.mxu0 %vm23396_vm0, %v28148_v16 }
 0x3da   : > { %18224 = vmatmul.mubr.msk.f32.gmra.mrb[122].mxu1 %vm2427_vm2, %v2502_v12  ;;  %v15486_v12 = vld [vmem:[%s28103_s4 + $0x30] sm:$0xff] }
 0x3db   : > { %19515 = vmatmul.mubr.msk.f32.gmra.mrb[56].mxu0 %vm2427_vm2, %v7684_v6  ;;  %18226 = vmatprep.mubr.msk.f32.mxu1 %vm23396_vm0, %v28148_v16  ;;  %v15487_v6 = vld [vmem:[%s28103_s4 + $0x38] sm:$0xff] }
 0x3dc   : > { %19517 = vmatprep.mubr.msk.f32.mxu0 %vm23396_vm0, %v28148_v16 }
 0x3de   : > { %18227 = vmatmul.mubr.msk.f32.gmra.mrb[124].mxu1 %vm2427_vm2, %v2503_v41  ;;  %v21249_v41 = vpack.c.bf16 %v15487_v6, %v15486_v12  ;;  %v8614_v12 = vld [vmem:[#allocation2 + $0x37] sm:$0xff]  ;;  %v3391_v6 = vld [vmem:[#allocation2 + $0x12a] sm:$0xff] }
 0x3df   : > { %19518 = vmatmul.mubr.msk.f32.gmra.mrb[58].mxu0 %vm2427_vm2, %v7685_v31  ;;  %18229 = vmatprep.mubr.msk.f32.mxu1 %vm23396_vm0, %v28148_v16  ;;  %v3363_v31 = vld [vmem:[#allocation2 + $0x4a] sm:$0xff] }
 0x3e0   : > { %19520 = vmatprep.mubr.msk.f32.mxu0 %vm23396_vm0, %v28148_v16 }
 0x3e2   : > { %18230 = vmatmul.mubr.msk.f32.gmra.mrb[126].mxu1 %vm2427_vm2, %v2504_v63  ;;  %v8150_v63 = vld [vmem:[#allocation2 + $0xa6] sm:$0xff] }
 0x3e3   : > { %19521 = vmatmul.mubr.msk.f32.gmra.mrb[60].mxu0 %vm2427_vm2, %v7686_v42  ;;  %18232 = vmatprep.mubr.msk.f32.mxu1 %vm23396_vm0, %v28148_v16  ;;  %v3364_v42 = vld [vmem:[#allocation2 + $0x52] sm:$0xff] }
 0x3e4   : > { %19523 = vmatprep.mubr.msk.f32.mxu0 %vm23396_vm0, %v28148_v16 }
 0x3e6   : > { %18233 = vmatmul.mubr.msk.f32.gmra.mrb[128].mxu1 %vm2427_vm2, %v2505_v35  ;;  %v8151_v35 = vld [vmem:[#allocation2 + $0xae] sm:$0xff] }
 0x3e7   : > { %19524 = vmatmul.mubr.msk.f32.gmra.mrb[62].mxu0 %vm2427_vm2, %v7687_v28  ;;  %18235 = vmatprep.mubr.msk.f32.mxu1 %vm23396_vm0, %v28148_v16  ;;  %v3365_v28 = vld [vmem:[#allocation2 + $0x5a] sm:$0xff] }
 0x3e8   : > { %19526 = vmatprep.mubr.msk.f32.mxu0 %vm23396_vm0, %v28148_v16 }
 0x3ea   : > { %18236 = vmatmul.mubr.msk.f32.gmra.mrb[130].mxu1 %vm2427_vm2, %v2506_v21  ;;  %v8152_v21 = vld [vmem:[#allocation2 + $0xb6] sm:$0xff] }
 0x3eb   : > { %19527 = vmatmul.mubr.msk.f32.gmra.mrb[64].mxu0 %vm2427_vm2, %v7688_v49  ;;  %18238 = vmatprep.mubr.msk.f32.mxu1 %vm23396_vm0, %v28148_v16  ;;  %v3366_v49 = vld [vmem:[#allocation2 + $0x62] sm:$0xff] }
 0x3ec   : > { %19529 = vmatprep.mubr.msk.f32.mxu0 %vm23396_vm0, %v28148_v16 }
 0x3ee   : > { %18239 = vmatmul.mubr.msk.f32.gmra.mrb[132].mxu1 %vm2427_vm2, %v2507_v20  ;;  %v8153_v20 = vld [vmem:[#allocation2 + $0xbe] sm:$0xff] }
 0x3ef   : > { %19530 = vmatmul.mubr.msk.f32.gmra.mrb[66].mxu0 %vm2427_vm2, %v7689_v10  ;;  %18241 = vmatprep.mubr.msk.f32.mxu1 %vm23396_vm0, %v28148_v16  ;;  %v3367_v10 = vld [vmem:[#allocation2 + $0x6a] sm:$0xff] }
 0x3f0   : > { %19532 = vmatprep.mubr.msk.f32.mxu0 %vm23396_vm0, %v28148_v16 }
 0x3f2   : > { %18242 = vmatmul.mubr.msk.f32.gmra.mrb[134].mxu1 %vm2427_vm2, %v2508_v17  ;;  %v8154_v17 = vld [vmem:[#allocation2 + $0xc6] sm:$0xff] }
 0x3f3   : > { %19533 = vmatmul.mubr.msk.f32.gmra.mrb[68].mxu0 %vm2427_vm2, %v7690_v54  ;;  %18244 = vmatprep.mubr.msk.f32.mxu1 %vm23396_vm0, %v28148_v16  ;;  %v3368_v54 = vld [vmem:[#allocation2 + $0x72] sm:$0xff] }
 0x3f4   : > { %19535 = vmatprep.mubr.msk.f32.mxu0 %vm23396_vm0, %v28148_v16 }
 0x3f6   : > { %18245 = vmatmul.mubr.msk.f32.gmra.mrb[136].mxu1 %vm2427_vm2, %v2509_v56  ;;  %v8155_v56 = vld [vmem:[#allocation2 + $0xce] sm:$0xff] }
 0x3f7   : > { %19536 = vmatmul.mubr.msk.f32.gmra.mrb[70].mxu0 %vm2427_vm2, %v7691_v24  ;;  %18247 = vmatprep.mubr.msk.f32.mxu1 %vm23396_vm0, %v28148_v16  ;;  %v3369_v24 = vld [vmem:[#allocation2 + $0x7a] sm:$0xff] }
 0x3f8   : > { %19538 = vmatprep.mubr.msk.f32.mxu0 %vm23396_vm0, %v28148_v16 }
 0x3fa   : > { %18248 = vmatmul.mubr.msk.f32.gmra.mrb[138].mxu1 %vm2427_vm2, %v2510_v50  ;;  %v8156_v50 = vld [vmem:[#allocation2 + $0xd6] sm:$0xff] }
 0x3fb   : > { %19539 = vmatmul.mubr.msk.f32.gmra.mrb[72].mxu0 %vm2427_vm2, %v7692_v27  ;;  %18250 = vmatprep.mubr.msk.f32.mxu1 %vm23396_vm0, %v28148_v16  ;;  %v3370_v27 = vld [vmem:[#allocation2 + $0x82] sm:$0xff] }
 0x3fc   : > { %19541 = vmatprep.mubr.msk.f32.mxu0 %vm23396_vm0, %v28148_v16 }
 0x3fe   : > { %18251 = vmatmul.mubr.msk.f32.gmra.mrb[140].mxu1 %vm2427_vm2, %v2511_v8  ;;  %v8157_v8 = vld [vmem:[#allocation2 + $0xde] sm:$0xff] }
 0x3ff   : > { %19542 = vmatmul.mubr.msk.f32.gmra.mrb[74].mxu0 %vm2427_vm2, %v7693_v26  ;;  %18253 = vmatprep.mubr.msk.f32.mxu1 %vm23396_vm0, %v28148_v16  ;;  %v3371_v26 = vld [vmem:[#allocation2 + $0x8a] sm:$0xff] }
 0x400   : > { %19544 = vmatprep.mubr.msk.f32.mxu0 %vm23396_vm0, %v28148_v16 }
 0x402   : > { %18254 = vmatmul.mubr.msk.f32.gmra.mrb[142].mxu1 %vm2427_vm2, %v2512_v19  ;;  %v8158_v19 = vld [vmem:[#allocation2 + $0xe6] sm:$0xff] }
 0x403   : > { %19545 = vmatmul.mubr.msk.f32.gmra.mrb[76].mxu0 %vm2427_vm2, %v7694_v61  ;;  %18256 = vmatprep.mubr.msk.f32.mxu1 %vm23396_vm0, %v28148_v16  ;;  %v3372_v61 = vld [vmem:[#allocation2 + $0x92] sm:$0xff] }
 0x404   : > { %19547 = vmatprep.mubr.msk.f32.mxu0 %vm23396_vm0, %v28148_v16 }
 0x406   : > { %18257 = vmatmul.mubr.msk.f32.gmra.mrb[144].mxu1 %vm2427_vm2, %v2513_v53  ;;  %v8159_v53 = vld [vmem:[#allocation2 + $0xee] sm:$0xff] }
 0x407   : > { %19548 = vmatmul.mubr.msk.f32.gmra.mrb[78].mxu0 %vm2427_vm2, %v7695_v18  ;;  %18259 = vmatprep.mubr.msk.f32.mxu1 %vm23396_vm0, %v28148_v16  ;;  %v3373_v18 = vld [vmem:[#allocation2 + $0x9a] sm:$0xff] }
 0x408   : > { %19550 = vmatprep.mubr.msk.f32.mxu0 %vm23396_vm0, %v28148_v16 }
 0x40a   : > { %18260 = vmatmul.mubr.msk.f32.gmra.mrb[146].mxu1 %vm2427_vm2, %v2514_v55  ;;  %v8160_v55 = vld [vmem:[#allocation2 + $0xf6] sm:$0xff] }
 0x40b   : > { %19551 = vmatmul.mubr.msk.f32.gmra.mrb[80].mxu0 %vm2427_vm2, %v7696_v51  ;;  %18262 = vmatprep.mubr.msk.f32.mxu1 %vm23396_vm0, %v28148_v16  ;;  %v3374_v51 = vld [vmem:[#allocation2 + $0xa2] sm:$0xff] }
 0x40c   : > { %19557 = vmatprep.mubr.msk.f32.mxu0 %vm23396_vm0, %v28148_v16 }
 0x40e   : > { %18263 = vmatmul.mubr.msk.f32.gmra.mrb[148].mxu1 %vm2427_vm2, %v2515_v4  ;;  %v3376_v4 = vld [vmem:[#allocation2 + $0xb2] sm:$0xff] }
 0x40f   : > { %19558 = vmatmul.mubr.msk.f32.vlgmr.msra.gmra.mrb[0].mxu0 %vm2427_vm2, %v8134_v11  ;;  %18265 = vmatprep.mubr.msk.f32.mxu1 %vm23396_vm0, %v28148_v16  ;;  %v8163_v11 = vld [vmem:[#allocation2 + $0x10e] sm:$0xff] }
 0x410   : > { %19560 = vmatprep.mubr.msk.f32.mxu0 %vm23396_vm0, %v28148_v16  ;;  %21280 = vmatpush3.bf16.msra.mxu0 %v21279_v22  ;;  %v8162_v22 = vld [vmem:[#allocation2 + $0x106] sm:$0xff] }
 0x411   : > { %21281 = vmatprep.subr.bf16.mxu0 %v23398_v38 }
 0x412   : > { %18266 = vmatmul.mubr.msk.f32.gmra.mrb[150].mxu1 %vm2427_vm2, %v2516_v14  ;;  %v3377_v14 = vld [vmem:[#allocation2 + $0xba] sm:$0xff] }
 0x413   : > { %19561 = vmatmul.mubr.msk.f32.gmra.mrb[2].mxu0 %vm2427_vm2, %v8135_v39  ;;  %18268 = vmatprep.mubr.msk.f32.mxu1 %vm23396_vm0, %v28148_v16  ;;  %v8164_v39 = vld [vmem:[#allocation2 + $0x116] sm:$0xff] }
 0x414   : > { %19563 = vmatprep.mubr.msk.f32.mxu0 %vm23396_vm0, %v28148_v16 }
 0x416   : > { %18269 = vmatmul.mubr.msk.f32.gmra.mrb[152].mxu1 %vm2427_vm2, %v2517_v62  ;;  %v3378_v62 = vld [vmem:[#allocation2 + $0xc2] sm:$0xff] }
 0x417   : > { %19564 = vmatmul.mubr.msk.f32.gmra.mrb[4].mxu0 %vm2427_vm2, %v8136_v47  ;;  %18271 = vmatprep.mubr.msk.f32.mxu1 %vm23396_vm0, %v28148_v16  ;;  %v8165_v47 = vld [vmem:[#allocation2 + $0x11e] sm:$0xff] }
 0x418   : > { %19566 = vmatprep.mubr.msk.f32.mxu0 %vm23396_vm0, %v28148_v16 }
 0x41a   : > { %18272 = vmatmul.mubr.msk.f32.gmra.mrb[154].mxu1 %vm2427_vm2, %v2518_v13  ;;  %v3379_v13 = vld [vmem:[#allocation2 + $0xca] sm:$0xff] }
 0x41b   : > { %19567 = vmatmul.mubr.msk.f32.gmra.mrb[6].mxu0 %vm2427_vm2, %v8137_v29  ;;  %18274 = vmatprep.mubr.msk.f32.mxu1 %vm23396_vm0, %v28148_v16  ;;  %v8166_v29 = vld [vmem:[#allocation2 + $0x126] sm:$0xff] }
 0x41c   : > { %19569 = vmatprep.mubr.msk.f32.mxu0 %vm23396_vm0, %v28148_v16 }
 0x41e   : > { %18275 = vmatmul.mubr.msk.f32.gmra.mrb[156].mxu1 %vm2427_vm2, %v2519_v48  ;;  %v3380_v48 = vld [vmem:[#allocation2 + $0xd2] sm:$0xff] }
 0x41f   : > { %19570 = vmatmul.mubr.msk.f32.gmra.mrb[8].mxu0 %vm2427_vm2, %v8138_v0  ;;  %18277 = vmatprep.mubr.msk.f32.mxu1 %vm23396_vm0, %v28148_v16  ;;  %v8167_v0 = vld [vmem:[#allocation2 + $0x12e] sm:$0xff] }
 0x420   : > { %19572 = vmatprep.mubr.msk.f32.mxu0 %vm23396_vm0, %v28148_v16 }
 0x422   : > { %18278 = vmatmul.mubr.msk.f32.gmra.mrb[158].mxu1 %vm2427_vm2, %v2520_v33  ;;  %v3381_v33 = vld [vmem:[#allocation2 + $0xda] sm:$0xff] }
 0x423   : > { %19573 = vmatmul.mubr.msk.f32.gmra.mrb[10].mxu0 %vm2427_vm2, %v8139_v58  ;;  %18280 = vmatprep.mubr.msk.f32.mxu1 %vm23396_vm0, %v28148_v16  ;;  %v8168_v58 = vld [vmem:[#allocation2 + $0x136] sm:$0xff] }
 0x424   : > { %19575 = vmatprep.mubr.msk.f32.mxu0 %vm23396_vm0, %v28148_v16 }
 0x426   : > { %18281 = vmatmul.mubr.msk.f32.gmra.mrb[160].mxu1 %vm2427_vm2, %v2521_v32  ;;  %v3382_v32 = vld [vmem:[#allocation2 + $0xe2] sm:$0xff] }
 0x427   : > { %19576 = vmatmul.mubr.msk.f32.gmra.mrb[12].mxu0 %vm2427_vm2, %v8140_v5  ;;  %18287 = vmatprep.mubr.msk.f32.mxu1 %vm23396_vm0, %v28148_v16  ;;  %v8169_v5 = vld [vmem:[#allocation2 + $0x13e] sm:$0xff] }
 0x428   : > { %19578 = vmatprep.mubr.msk.f32.mxu0 %vm23396_vm0, %v28148_v16 }
 0x42a   : > { %18288 = vmatmul.mubr.msk.f32.vlgmr.msra.gmra.mrb[80].mxu1 %vm2427_vm2, %v3354_v3  ;;  %v3383_v3 = vld [vmem:[#allocation2 + $0xea] sm:$0xff] }
 0x42b   : > { %19579 = vmatmul.mubr.msk.f32.gmra.mrb[14].mxu0 %vm2427_vm2, %v8141_v34  ;;  %18290 = vmatprep.mubr.msk.f32.mxu1 %vm23396_vm0, %v28148_v16  ;;  %v8170_v34 = vld [vmem:[#allocation2 + $0x146] sm:$0xff] }
 0x42c   : > { %19581 = vmatprep.mubr.msk.f32.mxu0 %vm23396_vm0, %v28148_v16  ;;  %21250 = vmatpush3.bf16.msra.mxu1 %v21249_v41  ;;  %v8615_v41 = vld [vmem:[#allocation2 + $0x3f] sm:$0xff] }
 0x42d   : > { %21251 = vmatprep.subr.bf16.mxu1 %v23398_v38 }
 0x42e   : > { %18291 = vmatmul.mubr.msk.f32.gmra.mrb[82].mxu1 %vm2427_vm2, %v3355_v40  ;;  %v3384_v40 = vld [vmem:[#allocation2 + $0xf2] sm:$0xff] }
 0x42f   : > { %19582 = vmatmul.mubr.msk.f32.gmra.mrb[16].mxu0 %vm2427_vm2, %v8142_v46  ;;  %18293 = vmatprep.mubr.msk.f32.mxu1 %vm23396_vm0, %v28148_v16  ;;  %v8171_v46 = vld [vmem:[#allocation2 + $0x14e] sm:$0xff] }
 0x430   : > { %19584 = vmatprep.mubr.msk.f32.mxu0 %vm23396_vm0, %v28148_v16 }
 0x432   : > { %18294 = vmatmul.mubr.msk.f32.gmra.mrb[84].mxu1 %vm2427_vm2, %v3356_v43  ;;  %v3385_v43 = vld [vmem:[#allocation2 + $0xfa] sm:$0xff] }
 0x433   : > { %19585 = vmatmul.mubr.msk.f32.gmra.mrb[18].mxu0 %vm2427_vm2, %v8143_v23  ;;  %18296 = vmatprep.mubr.msk.f32.mxu1 %vm23396_vm0, %v28148_v16  ;;  %v8172_v23 = vld [vmem:[#allocation2 + $0x156] sm:$0xff] }
 0x434   : > { %19587 = vmatprep.mubr.msk.f32.mxu0 %vm23396_vm0, %v28148_v16 }
 0x436   : > { %18297 = vmatmul.mubr.msk.f32.gmra.mrb[86].mxu1 %vm2427_vm2, %v3357_v59  ;;  %v3386_v59 = vld [vmem:[#allocation2 + $0x102] sm:$0xff] }
 0x437   : > { %19588 = vmatmul.mubr.msk.f32.gmra.mrb[20].mxu0 %vm2427_vm2, %v8144_v1  ;;  %18299 = vmatprep.mubr.msk.f32.mxu1 %vm23396_vm0, %v28148_v16  ;;  %v8173_v1 = vld [vmem:[#allocation2 + $0x15e] sm:$0xff] }
 0x438   : > { %19590 = vmatprep.mubr.msk.f32.mxu0 %vm23396_vm0, %v28148_v16 }
 0x43a   : > { %18300 = vmatmul.mubr.msk.f32.gmra.mrb[88].mxu1 %vm2427_vm2, %v3358_v60  ;;  %v3387_v60 = vld [vmem:[#allocation2 + $0x10a] sm:$0xff] }
 0x43b   : > { %19591 = vmatmul.mubr.msk.f32.gmra.mrb[22].mxu0 %vm2427_vm2, %v8145_v25  ;;  %18302 = vmatprep.mubr.msk.f32.mxu1 %vm23396_vm0, %v28148_v16  ;;  %v8174_v25 = vld [vmem:[#allocation2 + $0x166] sm:$0xf] }
 0x43c   : > { %19593 = vmatprep.mubr.msk.f32.mxu0 %vm23396_vm0, %v28148_v16 }
 0x43e   : > { %18303 = vmatmul.mubr.msk.f32.gmra.mrb[90].mxu1 %vm2427_vm2, %v3359_v9  ;;  %v15959_v9 = vld [vmem:[%s28103_s4 + $0xe0] sm:$0xff] }
 0x43f   : > { %19594 = vmatmul.mubr.msk.f32.gmra.mrb[24].mxu0 %vm2427_vm2, %v8146_v15  ;;  %18305 = vmatprep.mubr.msk.f32.mxu1 %vm23396_vm0, %v28148_v16  ;;  %v15960_v15 = vld [vmem:[%s28103_s4 + $0xe8] sm:$0xff] }
 0x440   : > { %19596 = vmatprep.mubr.msk.f32.mxu0 %vm23396_vm0, %v28148_v16 }
 0x442   : > { %18306 = vmatmul.mubr.msk.f32.gmra.mrb[92].mxu1 %vm2427_vm2, %v3360_v7  ;;  %v21282_v7 = vpack.c.bf16 %v15960_v15, %v15959_v9  ;;  %v8639_v9 = vld [vmem:[#allocation2 + $0xff] sm:$0xff]  ;;  %v3853_v15 = vld [vmem:[#allocation2 + $0xab] sm:$0xff] }
 0x443   : > { %19597 = vmatmul.mubr.msk.f32.gmra.mrb[26].mxu0 %vm2427_vm2, %v8147_v36  ;;  %18308 = vmatprep.mubr.msk.f32.mxu1 %vm23396_vm0, %v28148_v16  ;;  %v3388_v36 = vld [vmem:[#allocation2 + $0x112] sm:$0xff] }
 0x444   : > { %19599 = vmatprep.mubr.msk.f32.mxu0 %vm23396_vm0, %v28148_v16 }
 0x446   : > { %18309 = vmatmul.mubr.msk.f32.gmra.mrb[94].mxu1 %vm2427_vm2, %v3361_v57  ;;  %v8612_v57 = vld [vmem:[#allocation2 + $0x27] sm:$0xff] }
 0x447   : > { %19600 = vmatmul.mubr.msk.f32.gmra.mrb[28].mxu0 %vm2427_vm2, %v8148_v37  ;;  %18311 = vmatprep.mubr.msk.f32.mxu1 %vm23396_vm0, %v28148_v16  ;;  %v3389_v37 = vld [vmem:[#allocation2 + $0x11a] sm:$0xff] }
 0x448   : > { %19602 = vmatprep.mubr.msk.f32.mxu0 %vm23396_vm0, %v28148_v16 }
 0x44a   : > { %18312 = vmatmul.mubr.msk.f32.gmra.mrb[96].mxu1 %vm2427_vm2, %v3362_v2  ;;  %v8613_v2 = vld [vmem:[#allocation2 + $0x2f] sm:$0xff] }
 0x44b   : > { %19603 = vmatmul.mubr.msk.f32.gmra.mrb[30].mxu0 %vm2427_vm2, %v8149_v45  ;;  %18314 = vmatprep.mubr.msk.f32.mxu1 %vm23396_vm0, %v28148_v16  ;;  %v3390_v45 = vld [vmem:[#allocation2 + $0x122] sm:$0xff] }
 0x44c   : > { %19605 = vmatprep.mubr.msk.f32.mxu0 %vm23396_vm0, %v28148_v16 }
 0x44e   : > { %18315 = vmatmul.mubr.msk.f32.gmra.mrb[98].mxu1 %vm2427_vm2, %v3363_v31  ;;  %v3392_v31 = vld [vmem:[#allocation2 + $0x132] sm:$0xff] }
 0x44f   : > { %19606 = vmatmul.mubr.msk.f32.gmra.mrb[32].mxu0 %vm2427_vm2, %v8150_v63  ;;  %18317 = vmatprep.mubr.msk.f32.mxu1 %vm23396_vm0, %v28148_v16  ;;  %v8616_v63 = vld [vmem:[#allocation2 + $0x47] sm:$0xff] }
 0x450   : > { %19608 = vmatprep.mubr.msk.f32.mxu0 %vm23396_vm0, %v28148_v16 }
 0x452   : > { %18318 = vmatmul.mubr.msk.f32.gmra.mrb[100].mxu1 %vm2427_vm2, %v3364_v42  ;;  %v3393_v42 = vld [vmem:[#allocation2 + $0x13a] sm:$0xff] }
 0x453   : > { %19609 = vmatmul.mubr.msk.f32.gmra.mrb[34].mxu0 %vm2427_vm2, %v8151_v35  ;;  %18320 = vmatprep.mubr.msk.f32.mxu1 %vm23396_vm0, %v28148_v16  ;;  %v8617_v35 = vld [vmem:[#allocation2 + $0x4f] sm:$0xff] }
 0x454   : > { %19611 = vmatprep.mubr.msk.f32.mxu0 %vm23396_vm0, %v28148_v16 }
 0x456   : > { %18321 = vmatmul.mubr.msk.f32.gmra.mrb[102].mxu1 %vm2427_vm2, %v3365_v28  ;;  %v3394_v28 = vld [vmem:[#allocation2 + $0x142] sm:$0xf] }
 0x457   : > { %19612 = vmatmul.mubr.msk.f32.gmra.mrb[36].mxu0 %vm2427_vm2, %v8152_v21  ;;  %18323 = vmatprep.mubr.msk.f32.mxu1 %vm23396_vm0, %v28148_v16  ;;  %v8618_v21 = vld [vmem:[#allocation2 + $0x57] sm:$0xff] }
 0x458   : > { %19614 = vmatprep.mubr.msk.f32.mxu0 %vm23396_vm0, %v28148_v16 }
 0x45a   : > { %18324 = vmatmul.mubr.msk.f32.gmra.mrb[104].mxu1 %vm2427_vm2, %v3366_v49  ;;  %v3832_v49 = vld [vmem:[#allocation2 + $0x3] sm:$0xff] }
 0x45b   : > { %19615 = vmatmul.mubr.msk.f32.gmra.mrb[38].mxu0 %vm2427_vm2, %v8153_v20  ;;  %18326 = vmatprep.mubr.msk.f32.mxu1 %vm23396_vm0, %v28148_v16  ;;  %v8619_v20 = vld [vmem:[#allocation2 + $0x5f] sm:$0xff] }
 0x45c   : > { %19617 = vmatprep.mubr.msk.f32.mxu0 %vm23396_vm0, %v28148_v16 }
 0x45e   : > { %18327 = vmatmul.mubr.msk.f32.gmra.mrb[106].mxu1 %vm2427_vm2, %v3367_v10  ;;  %v3833_v10 = vld [vmem:[#allocation2 + $0xb] sm:$0xff] }
 0x45f   : > { %19618 = vmatmul.mubr.msk.f32.gmra.mrb[40].mxu0 %vm2427_vm2, %v8154_v17  ;;  %18329 = vmatprep.mubr.msk.f32.mxu1 %vm23396_vm0, %v28148_v16  ;;  %v8620_v17 = vld [vmem:[#allocation2 + $0x67] sm:$0xff] }
 0x460   : > { %19620 = vmatprep.mubr.msk.f32.mxu0 %vm23396_vm0, %v28148_v16 }
 0x462   : > { %18330 = vmatmul.mubr.msk.f32.gmra.mrb[108].mxu1 %vm2427_vm2, %v3368_v54  ;;  %v3834_v54 = vld [vmem:[#allocation2 + $0x13] sm:$0xff] }
 0x463   : > { %19621 = vmatmul.mubr.msk.f32.gmra.mrb[42].mxu0 %vm2427_vm2, %v8155_v56  ;;  %18332 = vmatprep.mubr.msk.f32.mxu1 %vm23396_vm0, %v28148_v16  ;;  %v8621_v56 = vld [vmem:[#allocation2 + $0x6f] sm:$0xff] }
 0x464   : > { %19623 = vmatprep.mubr.msk.f32.mxu0 %vm23396_vm0, %v28148_v16 }
 0x466   : > { %18333 = vmatmul.mubr.msk.f32.gmra.mrb[110].mxu1 %vm2427_vm2, %v3369_v24  ;;  %v3835_v24 = vld [vmem:[#allocation2 + $0x1b] sm:$0xff] }
 0x467   : > { %19624 = vmatmul.mubr.msk.f32.gmra.mrb[44].mxu0 %vm2427_vm2, %v8156_v50  ;;  %18335 = vmatprep.mubr.msk.f32.mxu1 %vm23396_vm0, %v28148_v16  ;;  %v8622_v50 = vld [vmem:[#allocation2 + $0x77] sm:$0xff] }
 0x468   : > { %19626 = vmatprep.mubr.msk.f32.mxu0 %vm23396_vm0, %v28148_v16 }
 0x46a   : > { %18336 = vmatmul.mubr.msk.f32.gmra.mrb[112].mxu1 %vm2427_vm2, %v3370_v27  ;;  %v3836_v27 = vld [vmem:[#allocation2 + $0x23] sm:$0xff] }
 0x46b   : > { %19627 = vmatmul.mubr.msk.f32.gmra.mrb[46].mxu0 %vm2427_vm2, %v8157_v8  ;;  %18338 = vmatprep.mubr.msk.f32.mxu1 %vm23396_vm0, %v28148_v16  ;;  %v8623_v8 = vld [vmem:[#allocation2 + $0x7f] sm:$0xff] }
 0x46c   : > { %19629 = vmatprep.mubr.msk.f32.mxu0 %vm23396_vm0, %v28148_v16 }
 0x46e   : > { %18339 = vmatmul.mubr.msk.f32.gmra.mrb[114].mxu1 %vm2427_vm2, %v3371_v26  ;;  %v3837_v26 = vld [vmem:[#allocation2 + $0x2b] sm:$0xff] }
 0x46f   : > { %19630 = vmatmul.mubr.msk.f32.gmra.mrb[48].mxu0 %vm2427_vm2, %v8158_v19  ;;  %18341 = vmatprep.mubr.msk.f32.mxu1 %vm23396_vm0, %v28148_v16  ;;  %v8624_v19 = vld [vmem:[#allocation2 + $0x87] sm:$0xff] }
 0x470   : > { %19632 = vmatprep.mubr.msk.f32.mxu0 %vm23396_vm0, %v28148_v16 }
 0x472   : > { %18342 = vmatmul.mubr.msk.f32.gmra.mrb[116].mxu1 %vm2427_vm2, %v3372_v61  ;;  %v3838_v61 = vld [vmem:[#allocation2 + $0x33] sm:$0xff] }
 0x473   : > { %19633 = vmatmul.mubr.msk.f32.gmra.mrb[50].mxu0 %vm2427_vm2, %v8159_v53  ;;  %18344 = vmatprep.mubr.msk.f32.mxu1 %vm23396_vm0, %v28148_v16  ;;  %v8625_v53 = vld [vmem:[#allocation2 + $0x8f] sm:$0xff] }
 0x474   : > { %19635 = vmatprep.mubr.msk.f32.mxu0 %vm23396_vm0, %v28148_v16 }
 0x476   : > { %18345 = vmatmul.mubr.msk.f32.gmra.mrb[118].mxu1 %vm2427_vm2, %v3373_v18  ;;  %v3839_v18 = vld [vmem:[#allocation2 + $0x3b] sm:$0xff] }
 0x477   : > { %19636 = vmatmul.mubr.msk.f32.gmra.mrb[52].mxu0 %vm2427_vm2, %v8160_v55  ;;  %18347 = vmatprep.mubr.msk.f32.mxu1 %vm23396_vm0, %v28148_v16  ;;  %v8626_v55 = vld [vmem:[#allocation2 + $0x97] sm:$0xff] }
 0x478   : > { %19638 = vmatprep.mubr.msk.f32.mxu0 %vm23396_vm0, %v28148_v16 }
 0x47a   : > { %18348 = vmatmul.mubr.msk.f32.gmra.mrb[120].mxu1 %vm2427_vm2, %v3374_v51  ;;  %v3840_v51 = vld [vmem:[#allocation2 + $0x43] sm:$0xff] }
 0x47b   : > { %19639 = vmatmul.mubr.msk.f32.gmra.mrb[54].mxu0 %vm2427_vm2, %v8161_v30  ;;  %18350 = vmatprep.mubr.msk.f32.mxu1 %vm23396_vm0, %v28148_v16  ;;  %v8627_v30 = vld [vmem:[#allocation2 + $0x9f] sm:$0xff] }
 0x47c   : > { %19641 = vmatprep.mubr.msk.f32.mxu0 %vm23396_vm0, %v28148_v16 }
 0x47e   : > { %18351 = vmatmul.mubr.msk.f32.gmra.mrb[122].mxu1 %vm2427_vm2, %v3375_v52  ;;  %v15529_v52 = vld [vmem:[%s28103_s4 + $0x40] sm:$0xff] }
 0x47f   : > { %19642 = vmatmul.mubr.msk.f32.gmra.mrb[56].mxu0 %vm2427_vm2, %v8162_v22  ;;  %18353 = vmatprep.mubr.msk.f32.mxu1 %vm23396_vm0, %v28148_v16  ;;  %v15530_v22 = vld [vmem:[%s28103_s4 + $0x48] sm:$0xff] }
 0x480   : > { %19644 = vmatprep.mubr.msk.f32.mxu0 %vm23396_vm0, %v28148_v16 }
 0x482   : > { %18354 = vmatmul.mubr.msk.f32.gmra.mrb[124].mxu1 %vm2427_vm2, %v3376_v4  ;;  %v21252_v4 = vpack.c.bf16 %v15530_v22, %v15529_v52  ;;  %v9092_v52 = vld [vmem:[#allocation2 + $0x38] sm:$0xff]  ;;  %v3869_v22 = vld [vmem:[#allocation2 + $0x12b] sm:$0xff] }
 0x483   : > { %19645 = vmatmul.mubr.msk.f32.gmra.mrb[58].mxu0 %vm2427_vm2, %v8163_v11  ;;  %18356 = vmatprep.mubr.msk.f32.mxu1 %vm23396_vm0, %v28148_v16  ;;  %v3841_v11 = vld [vmem:[#allocation2 + $0x4b] sm:$0xff] }
 0x484   : > { %19647 = vmatprep.mubr.msk.f32.mxu0 %vm23396_vm0, %v28148_v16 }
 0x486   : > { %18357 = vmatmul.mubr.msk.f32.gmra.mrb[126].mxu1 %vm2427_vm2, %v3377_v14  ;;  %v8628_v14 = vld [vmem:[#allocation2 + $0xa7] sm:$0xff] }
 0x487   : > { %19648 = vmatmul.mubr.msk.f32.gmra.mrb[60].mxu0 %vm2427_vm2, %v8164_v39  ;;  %18359 = vmatprep.mubr.msk.f32.mxu1 %vm23396_vm0, %v28148_v16  ;;  %v3842_v39 = vld [vmem:[#allocation2 + $0x53] sm:$0xff] }
 0x488   : > { %19650 = vmatprep.mubr.msk.f32.mxu0 %vm23396_vm0, %v28148_v16 }
 0x48a   : > { %18360 = vmatmul.mubr.msk.f32.gmra.mrb[128].mxu1 %vm2427_vm2, %v3378_v62  ;;  %v8629_v62 = vld [vmem:[#allocation2 + $0xaf] sm:$0xff] }
 0x48b   : > { %19651 = vmatmul.mubr.msk.f32.gmra.mrb[62].mxu0 %vm2427_vm2, %v8165_v47  ;;  %18362 = vmatprep.mubr.msk.f32.mxu1 %vm23396_vm0, %v28148_v16  ;;  %v3843_v47 = vld [vmem:[#allocation2 + $0x5b] sm:$0xff] }
 0x48c   : > { %19653 = vmatprep.mubr.msk.f32.mxu0 %vm23396_vm0, %v28148_v16 }
 0x48e   : > { %18363 = vmatmul.mubr.msk.f32.gmra.mrb[130].mxu1 %vm2427_vm2, %v3379_v13  ;;  %v8630_v13 = vld [vmem:[#allocation2 + $0xb7] sm:$0xff] }
 0x48f   : > { %19654 = vmatmul.mubr.msk.f32.gmra.mrb[64].mxu0 %vm2427_vm2, %v8166_v29  ;;  %18365 = vmatprep.mubr.msk.f32.mxu1 %vm23396_vm0, %v28148_v16  ;;  %v3844_v29 = vld [vmem:[#allocation2 + $0x63] sm:$0xff] }
 0x490   : > { %19656 = vmatprep.mubr.msk.f32.mxu0 %vm23396_vm0, %v28148_v16 }
 0x492   : > { %18366 = vmatmul.mubr.msk.f32.gmra.mrb[132].mxu1 %vm2427_vm2, %v3380_v48  ;;  %v8631_v48 = vld [vmem:[#allocation2 + $0xbf] sm:$0xff] }
 0x493   : > { %19657 = vmatmul.mubr.msk.f32.gmra.mrb[66].mxu0 %vm2427_vm2, %v8167_v0  ;;  %18368 = vmatprep.mubr.msk.f32.mxu1 %vm23396_vm0, %v28148_v16  ;;  %v3845_v0 = vld [vmem:[#allocation2 + $0x6b] sm:$0xff] }
 0x494   : > { %19659 = vmatprep.mubr.msk.f32.mxu0 %vm23396_vm0, %v28148_v16 }
 0x496   : > { %18369 = vmatmul.mubr.msk.f32.gmra.mrb[134].mxu1 %vm2427_vm2, %v3381_v33  ;;  %v8632_v33 = vld [vmem:[#allocation2 + $0xc7] sm:$0xff] }
 0x497   : > { %19660 = vmatmul.mubr.msk.f32.gmra.mrb[68].mxu0 %vm2427_vm2, %v8168_v58  ;;  %18371 = vmatprep.mubr.msk.f32.mxu1 %vm23396_vm0, %v28148_v16  ;;  %v3846_v58 = vld [vmem:[#allocation2 + $0x73] sm:$0xff] }
 0x498   : > { %19662 = vmatprep.mubr.msk.f32.mxu0 %vm23396_vm0, %v28148_v16 }
 0x49a   : > { %18372 = vmatmul.mubr.msk.f32.gmra.mrb[136].mxu1 %vm2427_vm2, %v3382_v32  ;;  %v8633_v32 = vld [vmem:[#allocation2 + $0xcf] sm:$0xff] }
 0x49b   : > { %19663 = vmatmul.mubr.msk.f32.gmra.mrb[70].mxu0 %vm2427_vm2, %v8169_v5  ;;  %18374 = vmatprep.mubr.msk.f32.mxu1 %vm23396_vm0, %v28148_v16  ;;  %v3847_v5 = vld [vmem:[#allocation2 + $0x7b] sm:$0xff] }
 0x49c   : > { %19665 = vmatprep.mubr.msk.f32.mxu0 %vm23396_vm0, %v28148_v16 }
 0x49e   : > { %18375 = vmatmul.mubr.msk.f32.gmra.mrb[138].mxu1 %vm2427_vm2, %v3383_v3  ;;  %v8634_v3 = vld [vmem:[#allocation2 + $0xd7] sm:$0xff] }
 0x49f   : > { %19666 = vmatmul.mubr.msk.f32.gmra.mrb[72].mxu0 %vm2427_vm2, %v8170_v34  ;;  %18377 = vmatprep.mubr.msk.f32.mxu1 %vm23396_vm0, %v28148_v16  ;;  %v3848_v34 = vld [vmem:[#allocation2 + $0x83] sm:$0xff] }
 0x4a0   : > { %19668 = vmatprep.mubr.msk.f32.mxu0 %vm23396_vm0, %v28148_v16 }
 0x4a2   : > { %18378 = vmatmul.mubr.msk.f32.gmra.mrb[140].mxu1 %vm2427_vm2, %v3384_v40  ;;  %v8635_v40 = vld [vmem:[#allocation2 + $0xdf] sm:$0xff] }
 0x4a3   : > { %19669 = vmatmul.mubr.msk.f32.gmra.mrb[74].mxu0 %vm2427_vm2, %v8171_v46  ;;  %18380 = vmatprep.mubr.msk.f32.mxu1 %vm23396_vm0, %v28148_v16  ;;  %v3849_v46 = vld [vmem:[#allocation2 + $0x8b] sm:$0xff] }
 0x4a4   : > { %19671 = vmatprep.mubr.msk.f32.mxu0 %vm23396_vm0, %v28148_v16 }
 0x4a6   : > { %18381 = vmatmul.mubr.msk.f32.gmra.mrb[142].mxu1 %vm2427_vm2, %v3385_v43  ;;  %v8636_v43 = vld [vmem:[#allocation2 + $0xe7] sm:$0xff] }
 0x4a7   : > { %19672 = vmatmul.mubr.msk.f32.gmra.mrb[76].mxu0 %vm2427_vm2, %v8172_v23  ;;  %18383 = vmatprep.mubr.msk.f32.mxu1 %vm23396_vm0, %v28148_v16  ;;  %v3850_v23 = vld [vmem:[#allocation2 + $0x93] sm:$0xff] }
 0x4a8   : > { %19674 = vmatprep.mubr.msk.f32.mxu0 %vm23396_vm0, %v28148_v16 }
 0x4aa   : > { %18384 = vmatmul.mubr.msk.f32.gmra.mrb[144].mxu1 %vm2427_vm2, %v3386_v59  ;;  %v8637_v59 = vld [vmem:[#allocation2 + $0xef] sm:$0xff] }
 0x4ab   : > { %19675 = vmatmul.mubr.msk.f32.gmra.mrb[78].mxu0 %vm2427_vm2, %v8173_v1  ;;  %18386 = vmatprep.mubr.msk.f32.mxu1 %vm23396_vm0, %v28148_v16  ;;  %v3851_v1 = vld [vmem:[#allocation2 + $0x9b] sm:$0xff] }
 0x4ac   : > { %19677 = vmatprep.mubr.msk.f32.mxu0 %vm23396_vm0, %v28148_v16 }
 0x4ae   : > { %18387 = vmatmul.mubr.msk.f32.gmra.mrb[146].mxu1 %vm2427_vm2, %v3387_v60  ;;  %v8638_v60 = vld [vmem:[#allocation2 + $0xf7] sm:$0xff] }
 0x4af   : > { %19678 = vmatmul.mubr.msk.f32.gmra.mrb[80].mxu0 %vm2427_vm2, %v8174_v25  ;;  %18389 = vmatprep.mubr.msk.f32.mxu1 %vm23396_vm0, %v28148_v16  ;;  %v3852_v25 = vld [vmem:[#allocation2 + $0xa3] sm:$0xff] }
 0x4b0   : > { %19684 = vmatprep.mubr.msk.f32.mxu0 %vm23396_vm0, %v28148_v16 }
 0x4b2   : > { %18390 = vmatmul.mubr.msk.f32.gmra.mrb[148].mxu1 %vm2427_vm2, %v3388_v36  ;;  %v3854_v36 = vld [vmem:[#allocation2 + $0xb3] sm:$0xff] }
 0x4b3   : > { %19685 = vmatmul.mubr.msk.f32.vlgmr.msra.gmra.mrb[0].mxu0 %vm2427_vm2, %v8612_v57  ;;  %18392 = vmatprep.mubr.msk.f32.mxu1 %vm23396_vm0, %v28148_v16  ;;  %v8641_v57 = vld [vmem:[#allocation2 + $0x10f] sm:$0xff] }
 0x4b4   : > { %19687 = vmatprep.mubr.msk.f32.mxu0 %vm23396_vm0, %v28148_v16  ;;  %21283 = vmatpush3.bf16.msra.mxu0 %v21282_v7  ;;  %v8640_v7 = vld [vmem:[#allocation2 + $0x107] sm:$0xff] }
 0x4b5   : > { %21284 = vmatprep.subr.bf16.mxu0 %v23398_v38 }
 0x4b6   : > { %18393 = vmatmul.mubr.msk.f32.gmra.mrb[150].mxu1 %vm2427_vm2, %v3389_v37  ;;  %v3855_v37 = vld [vmem:[#allocation2 + $0xbb] sm:$0xff] }
 0x4b7   : > { %19688 = vmatmul.mubr.msk.f32.gmra.mrb[2].mxu0 %vm2427_vm2, %v8613_v2  ;;  %18395 = vmatprep.mubr.msk.f32.mxu1 %vm23396_vm0, %v28148_v16  ;;  %v8642_v2 = vld [vmem:[#allocation2 + $0x117] sm:$0xff] }
 0x4b8   : > { %19690 = vmatprep.mubr.msk.f32.mxu0 %vm23396_vm0, %v28148_v16 }
 0x4ba   : > { %18396 = vmatmul.mubr.msk.f32.gmra.mrb[152].mxu1 %vm2427_vm2, %v3390_v45  ;;  %v3856_v45 = vld [vmem:[#allocation2 + $0xc3] sm:$0xff] }
 0x4bb   : > { %19691 = vmatmul.mubr.msk.f32.gmra.mrb[4].mxu0 %vm2427_vm2, %v8614_v12  ;;  %18398 = vmatprep.mubr.msk.f32.mxu1 %vm23396_vm0, %v28148_v16  ;;  %v8643_v12 = vld [vmem:[#allocation2 + $0x11f] sm:$0xff] }
 0x4bc   : > { %19693 = vmatprep.mubr.msk.f32.mxu0 %vm23396_vm0, %v28148_v16 }
 0x4be   : > { %18399 = vmatmul.mubr.msk.f32.gmra.mrb[154].mxu1 %vm2427_vm2, %v3391_v6  ;;  %v3857_v6 = vld [vmem:[#allocation2 + $0xcb] sm:$0xff] }
 0x4bf   : > { %19694 = vmatmul.mubr.msk.f32.gmra.mrb[6].mxu0 %vm2427_vm2, %v8615_v41  ;;  %18401 = vmatprep.mubr.msk.f32.mxu1 %vm23396_vm0, %v28148_v16  ;;  %v8644_v41 = vld [vmem:[#allocation2 + $0x127] sm:$0xff] }
 0x4c0   : > { %19696 = vmatprep.mubr.msk.f32.mxu0 %vm23396_vm0, %v28148_v16 }
 0x4c2   : > { %18402 = vmatmul.mubr.msk.f32.gmra.mrb[156].mxu1 %vm2427_vm2, %v3392_v31  ;;  %v3858_v31 = vld [vmem:[#allocation2 + $0xd3] sm:$0xff] }
 0x4c3   : > { %19697 = vmatmul.mubr.msk.f32.gmra.mrb[8].mxu0 %vm2427_vm2, %v8616_v63  ;;  %18404 = vmatprep.mubr.msk.f32.mxu1 %vm23396_vm0, %v28148_v16  ;;  %v8645_v63 = vld [vmem:[#allocation2 + $0x12f] sm:$0xff] }
 0x4c4   : > { %19699 = vmatprep.mubr.msk.f32.mxu0 %vm23396_vm0, %v28148_v16 }
 0x4c6   : > { %18405 = vmatmul.mubr.msk.f32.gmra.mrb[158].mxu1 %vm2427_vm2, %v3393_v42  ;;  %v3859_v42 = vld [vmem:[#allocation2 + $0xdb] sm:$0xff] }
 0x4c7   : > { %19700 = vmatmul.mubr.msk.f32.gmra.mrb[10].mxu0 %vm2427_vm2, %v8617_v35  ;;  %18407 = vmatprep.mubr.msk.f32.mxu1 %vm23396_vm0, %v28148_v16  ;;  %v8646_v35 = vld [vmem:[#allocation2 + $0x137] sm:$0xff] }
 0x4c8   : > { %19702 = vmatprep.mubr.msk.f32.mxu0 %vm23396_vm0, %v28148_v16 }
 0x4ca   : > { %18408 = vmatmul.mubr.msk.f32.gmra.mrb[160].mxu1 %vm2427_vm2, %v3394_v28  ;;  %v3860_v28 = vld [vmem:[#allocation2 + $0xe3] sm:$0xff] }
 0x4cb   : > { %19703 = vmatmul.mubr.msk.f32.gmra.mrb[12].mxu0 %vm2427_vm2, %v8618_v21  ;;  %18414 = vmatprep.mubr.msk.f32.mxu1 %vm23396_vm0, %v28148_v16  ;;  %v8647_v21 = vld [vmem:[#allocation2 + $0x13f] sm:$0xff] }
 0x4cc   : > { %19705 = vmatprep.mubr.msk.f32.mxu0 %vm23396_vm0, %v28148_v16 }
 0x4ce   : > { %18415 = vmatmul.mubr.msk.f32.vlgmr.msra.gmra.mrb[80].mxu1 %vm2427_vm2, %v3832_v49  ;;  %v3861_v49 = vld [vmem:[#allocation2 + $0xeb] sm:$0xff] }
 0x4cf   : > { %19706 = vmatmul.mubr.msk.f32.gmra.mrb[14].mxu0 %vm2427_vm2, %v8619_v20  ;;  %18417 = vmatprep.mubr.msk.f32.mxu1 %vm23396_vm0, %v28148_v16  ;;  %v8648_v20 = vld [vmem:[#allocation2 + $0x147] sm:$0xff] }
 0x4d0   : > { %19708 = vmatprep.mubr.msk.f32.mxu0 %vm23396_vm0, %v28148_v16  ;;  %21253 = vmatpush3.bf16.msra.mxu1 %v21252_v4  ;;  %v9093_v4 = vld [vmem:[#allocation2 + $0x40] sm:$0xff] }
 0x4d1   : > { %21254 = vmatprep.subr.bf16.mxu1 %v23398_v38 }
 0x4d2   : > { %18418 = vmatmul.mubr.msk.f32.gmra.mrb[82].mxu1 %vm2427_vm2, %v3833_v10  ;;  %v3862_v10 = vld [vmem:[#allocation2 + $0xf3] sm:$0xff] }
 0x4d3   : > { %19709 = vmatmul.mubr.msk.f32.gmra.mrb[16].mxu0 %vm2427_vm2, %v8620_v17  ;;  %18420 = vmatprep.mubr.msk.f32.mxu1 %vm23396_vm0, %v28148_v16  ;;  %v8649_v17 = vld [vmem:[#allocation2 + $0x14f] sm:$0xff] }
 0x4d4   : > { %19711 = vmatprep.mubr.msk.f32.mxu0 %vm23396_vm0, %v28148_v16 }
 0x4d6   : > { %18421 = vmatmul.mubr.msk.f32.gmra.mrb[84].mxu1 %vm2427_vm2, %v3834_v54  ;;  %v3863_v54 = vld [vmem:[#allocation2 + $0xfb] sm:$0xff] }
 0x4d7   : > { %19712 = vmatmul.mubr.msk.f32.gmra.mrb[18].mxu0 %vm2427_vm2, %v8621_v56  ;;  %18423 = vmatprep.mubr.msk.f32.mxu1 %vm23396_vm0, %v28148_v16  ;;  %v8650_v56 = vld [vmem:[#allocation2 + $0x157] sm:$0xff] }
 0x4d8   : > { %19714 = vmatprep.mubr.msk.f32.mxu0 %vm23396_vm0, %v28148_v16 }
 0x4da   : > { %18424 = vmatmul.mubr.msk.f32.gmra.mrb[86].mxu1 %vm2427_vm2, %v3835_v24  ;;  %v3864_v24 = vld [vmem:[#allocation2 + $0x103] sm:$0xff] }
 0x4db   : > { %19715 = vmatmul.mubr.msk.f32.gmra.mrb[20].mxu0 %vm2427_vm2, %v8622_v50  ;;  %18426 = vmatprep.mubr.msk.f32.mxu1 %vm23396_vm0, %v28148_v16  ;;  %v8651_v50 = vld [vmem:[#allocation2 + $0x15f] sm:$0xff] }
 0x4dc   : > { %19717 = vmatprep.mubr.msk.f32.mxu0 %vm23396_vm0, %v28148_v16 }
 0x4de   : > { %18427 = vmatmul.mubr.msk.f32.gmra.mrb[88].mxu1 %vm2427_vm2, %v3836_v27  ;;  %v3865_v27 = vld [vmem:[#allocation2 + $0x10b] sm:$0xff] }
 0x4df   : > { %19718 = vmatmul.mubr.msk.f32.gmra.mrb[22].mxu0 %vm2427_vm2, %v8623_v8  ;;  %18429 = vmatprep.mubr.msk.f32.mxu1 %vm23396_vm0, %v28148_v16  ;;  %v8652_v8 = vld [vmem:[#allocation2 + $0x167] sm:$0xf] }
 0x4e0   : > { %19720 = vmatprep.mubr.msk.f32.mxu0 %vm23396_vm0, %v28148_v16 }
 0x4e2   : > { %18430 = vmatmul.mubr.msk.f32.gmra.mrb[90].mxu1 %vm2427_vm2, %v3837_v26  ;;  %v16002_v26 = vld [vmem:[%s28103_s4 + $0xf0] sm:$0xff] }
 0x4e3   : > { %19721 = vmatmul.mubr.msk.f32.gmra.mrb[24].mxu0 %vm2427_vm2, %v8624_v19  ;;  %18432 = vmatprep.mubr.msk.f32.mxu1 %vm23396_vm0, %v28148_v16  ;;  %v16003_v19 = vld [vmem:[%s28103_s4 + $0xf8] sm:$0xff] }
 0x4e4   : > { %19723 = vmatprep.mubr.msk.f32.mxu0 %vm23396_vm0, %v28148_v16 }
 0x4e6   : > { %18433 = vmatmul.mubr.msk.f32.gmra.mrb[92].mxu1 %vm2427_vm2, %v3838_v61  ;;  %v21285_v61 = vpack.c.bf16 %v16003_v19, %v16002_v26  ;;  %v9117_v26 = vld [vmem:[#allocation2 + $0x100] sm:$0xff]  ;;  %v4331_v19 = vld [vmem:[#allocation2 + $0xac] sm:$0xff] }
 0x4e7   : > { %19724 = vmatmul.mubr.msk.f32.gmra.mrb[26].mxu0 %vm2427_vm2, %v8625_v53  ;;  %18435 = vmatprep.mubr.msk.f32.mxu1 %vm23396_vm0, %v28148_v16  ;;  %v3866_v53 = vld [vmem:[#allocation2 + $0x113] sm:$0xff] }
 0x4e8   : > { %19726 = vmatprep.mubr.msk.f32.mxu0 %vm23396_vm0, %v28148_v16 }
 0x4ea   : > { %18436 = vmatmul.mubr.msk.f32.gmra.mrb[94].mxu1 %vm2427_vm2, %v3839_v18  ;;  %v9090_v18 = vld [vmem:[#allocation2 + $0x28] sm:$0xff] }
 0x4eb   : > { %19727 = vmatmul.mubr.msk.f32.gmra.mrb[28].mxu0 %vm2427_vm2, %v8626_v55  ;;  %18438 = vmatprep.mubr.msk.f32.mxu1 %vm23396_vm0, %v28148_v16  ;;  %v3867_v55 = vld [vmem:[#allocation2 + $0x11b] sm:$0xff] }
 0x4ec   : > { %19729 = vmatprep.mubr.msk.f32.mxu0 %vm23396_vm0, %v28148_v16 }
 0x4ee   : > { %18439 = vmatmul.mubr.msk.f32.gmra.mrb[96].mxu1 %vm2427_vm2, %v3840_v51  ;;  %v9091_v51 = vld [vmem:[#allocation2 + $0x30] sm:$0xff] }
 0x4ef   : > { %19730 = vmatmul.mubr.msk.f32.gmra.mrb[30].mxu0 %vm2427_vm2, %v8627_v30  ;;  %18441 = vmatprep.mubr.msk.f32.mxu1 %vm23396_vm0, %v28148_v16  ;;  %v3868_v30 = vld [vmem:[#allocation2 + $0x123] sm:$0xff] }
 0x4f0   : > { %19732 = vmatprep.mubr.msk.f32.mxu0 %vm23396_vm0, %v28148_v16 }
 0x4f2   : > { %18442 = vmatmul.mubr.msk.f32.gmra.mrb[98].mxu1 %vm2427_vm2, %v3841_v11  ;;  %v3870_v11 = vld [vmem:[#allocation2 + $0x133] sm:$0xff] }
 0x4f3   : > { %19733 = vmatmul.mubr.msk.f32.gmra.mrb[32].mxu0 %vm2427_vm2, %v8628_v14  ;;  %18444 = vmatprep.mubr.msk.f32.mxu1 %vm23396_vm0, %v28148_v16  ;;  %v9094_v14 = vld [vmem:[#allocation2 + $0x48] sm:$0xff] }
 0x4f4   : > { %19735 = vmatprep.mubr.msk.f32.mxu0 %vm23396_vm0, %v28148_v16 }
 0x4f6   : > { %18445 = vmatmul.mubr.msk.f32.gmra.mrb[100].mxu1 %vm2427_vm2, %v3842_v39  ;;  %v3871_v39 = vld [vmem:[#allocation2 + $0x13b] sm:$0xff] }
 0x4f7   : > { %19736 = vmatmul.mubr.msk.f32.gmra.mrb[34].mxu0 %vm2427_vm2, %v8629_v62  ;;  %18447 = vmatprep.mubr.msk.f32.mxu1 %vm23396_vm0, %v28148_v16  ;;  %v9095_v62 = vld [vmem:[#allocation2 + $0x50] sm:$0xff] }
 0x4f8   : > { %19738 = vmatprep.mubr.msk.f32.mxu0 %vm23396_vm0, %v28148_v16 }
 0x4fa   : > { %18448 = vmatmul.mubr.msk.f32.gmra.mrb[102].mxu1 %vm2427_vm2, %v3843_v47  ;;  %v3872_v47 = vld [vmem:[#allocation2 + $0x143] sm:$0xf] }
 0x4fb   : > { %19739 = vmatmul.mubr.msk.f32.gmra.mrb[36].mxu0 %vm2427_vm2, %v8630_v13  ;;  %18450 = vmatprep.mubr.msk.f32.mxu1 %vm23396_vm0, %v28148_v16  ;;  %v9096_v13 = vld [vmem:[#allocation2 + $0x58] sm:$0xff] }
 0x4fc   : > { %19741 = vmatprep.mubr.msk.f32.mxu0 %vm23396_vm0, %v28148_v16 }
 0x4fe   : > { %18451 = vmatmul.mubr.msk.f32.gmra.mrb[104].mxu1 %vm2427_vm2, %v3844_v29  ;;  %v4310_v29 = vld [vmem:[#allocation2 + $0x4] sm:$0xff] }
 0x4ff   : > { %19742 = vmatmul.mubr.msk.f32.gmra.mrb[38].mxu0 %vm2427_vm2, %v8631_v48  ;;  %18453 = vmatprep.mubr.msk.f32.mxu1 %vm23396_vm0, %v28148_v16  ;;  %v9097_v48 = vld [vmem:[#allocation2 + $0x60] sm:$0xff] }
 0x500   : > { %19744 = vmatprep.mubr.msk.f32.mxu0 %vm23396_vm0, %v28148_v16 }
 0x502   : > { %18454 = vmatmul.mubr.msk.f32.gmra.mrb[106].mxu1 %vm2427_vm2, %v3845_v0  ;;  %v4311_v0 = vld [vmem:[#allocation2 + $0xc] sm:$0xff] }
 0x503   : > { %19745 = vmatmul.mubr.msk.f32.gmra.mrb[40].mxu0 %vm2427_vm2, %v8632_v33  ;;  %18456 = vmatprep.mubr.msk.f32.mxu1 %vm23396_vm0, %v28148_v16  ;;  %v9098_v33 = vld [vmem:[#allocation2 + $0x68] sm:$0xff] }
 0x504   : > { %19747 = vmatprep.mubr.msk.f32.mxu0 %vm23396_vm0, %v28148_v16 }
 0x506   : > { %18457 = vmatmul.mubr.msk.f32.gmra.mrb[108].mxu1 %vm2427_vm2, %v3846_v58  ;;  %v4312_v58 = vld [vmem:[#allocation2 + $0x14] sm:$0xff] }
 0x507   : > { %19748 = vmatmul.mubr.msk.f32.gmra.mrb[42].mxu0 %vm2427_vm2, %v8633_v32  ;;  %18459 = vmatprep.mubr.msk.f32.mxu1 %vm23396_vm0, %v28148_v16  ;;  %v9099_v32 = vld [vmem:[#allocation2 + $0x70] sm:$0xff] }
 0x508   : > { %19750 = vmatprep.mubr.msk.f32.mxu0 %vm23396_vm0, %v28148_v16 }
 0x50a   : > { %18460 = vmatmul.mubr.msk.f32.gmra.mrb[110].mxu1 %vm2427_vm2, %v3847_v5  ;;  %v4313_v5 = vld [vmem:[#allocation2 + $0x1c] sm:$0xff] }
 0x50b   : > { %19751 = vmatmul.mubr.msk.f32.gmra.mrb[44].mxu0 %vm2427_vm2, %v8634_v3  ;;  %18462 = vmatprep.mubr.msk.f32.mxu1 %vm23396_vm0, %v28148_v16  ;;  %v9100_v3 = vld [vmem:[#allocation2 + $0x78] sm:$0xff] }
 0x50c   : > { %19753 = vmatprep.mubr.msk.f32.mxu0 %vm23396_vm0, %v28148_v16 }
 0x50e   : > { %18463 = vmatmul.mubr.msk.f32.gmra.mrb[112].mxu1 %vm2427_vm2, %v3848_v34  ;;  %v4314_v34 = vld [vmem:[#allocation2 + $0x24] sm:$0xff] }
 0x50f   : > { %19754 = vmatmul.mubr.msk.f32.gmra.mrb[46].mxu0 %vm2427_vm2, %v8635_v40  ;;  %18465 = vmatprep.mubr.msk.f32.mxu1 %vm23396_vm0, %v28148_v16  ;;  %v9101_v40 = vld [vmem:[#allocation2 + $0x80] sm:$0xff] }
 0x510   : > { %19756 = vmatprep.mubr.msk.f32.mxu0 %vm23396_vm0, %v28148_v16 }
 0x512   : > { %18466 = vmatmul.mubr.msk.f32.gmra.mrb[114].mxu1 %vm2427_vm2, %v3849_v46  ;;  %v4315_v46 = vld [vmem:[#allocation2 + $0x2c] sm:$0xff] }
 0x513   : > { %19757 = vmatmul.mubr.msk.f32.gmra.mrb[48].mxu0 %vm2427_vm2, %v8636_v43  ;;  %18468 = vmatprep.mubr.msk.f32.mxu1 %vm23396_vm0, %v28148_v16  ;;  %v9102_v43 = vld [vmem:[#allocation2 + $0x88] sm:$0xff] }
 0x514   : > { %19759 = vmatprep.mubr.msk.f32.mxu0 %vm23396_vm0, %v28148_v16 }
 0x516   : > { %18469 = vmatmul.mubr.msk.f32.gmra.mrb[116].mxu1 %vm2427_vm2, %v3850_v23  ;;  %v4316_v23 = vld [vmem:[#allocation2 + $0x34] sm:$0xff] }
 0x517   : > { %19760 = vmatmul.mubr.msk.f32.gmra.mrb[50].mxu0 %vm2427_vm2, %v8637_v59  ;;  %18471 = vmatprep.mubr.msk.f32.mxu1 %vm23396_vm0, %v28148_v16  ;;  %v9103_v59 = vld [vmem:[#allocation2 + $0x90] sm:$0xff] }
 0x518   : > { %19762 = vmatprep.mubr.msk.f32.mxu0 %vm23396_vm0, %v28148_v16 }
 0x51a   : > { %18472 = vmatmul.mubr.msk.f32.gmra.mrb[118].mxu1 %vm2427_vm2, %v3851_v1  ;;  %v4317_v1 = vld [vmem:[#allocation2 + $0x3c] sm:$0xff] }
 0x51b   : > { %19763 = vmatmul.mubr.msk.f32.gmra.mrb[52].mxu0 %vm2427_vm2, %v8638_v60  ;;  %18474 = vmatprep.mubr.msk.f32.mxu1 %vm23396_vm0, %v28148_v16  ;;  %v9104_v60 = vld [vmem:[#allocation2 + $0x98] sm:$0xff] }
 0x51c   : > { %19765 = vmatprep.mubr.msk.f32.mxu0 %vm23396_vm0, %v28148_v16 }
 0x51e   : > { %18475 = vmatmul.mubr.msk.f32.gmra.mrb[120].mxu1 %vm2427_vm2, %v3852_v25  ;;  %v4318_v25 = vld [vmem:[#allocation2 + $0x44] sm:$0xff] }
 0x51f   : > { %19766 = vmatmul.mubr.msk.f32.gmra.mrb[54].mxu0 %vm2427_vm2, %v8639_v9  ;;  %18477 = vmatprep.mubr.msk.f32.mxu1 %vm23396_vm0, %v28148_v16  ;;  %v9105_v9 = vld [vmem:[#allocation2 + $0xa0] sm:$0xff] }
 0x520   : > { %19768 = vmatprep.mubr.msk.f32.mxu0 %vm23396_vm0, %v28148_v16 }
 0x522   : > { %18478 = vmatmul.mubr.msk.f32.gmra.mrb[122].mxu1 %vm2427_vm2, %v3853_v15  ;;  %v15572_v15 = vld [vmem:[%s28103_s4 + $0x50] sm:$0xff] }
 0x523   : > { %19769 = vmatmul.mubr.msk.f32.gmra.mrb[56].mxu0 %vm2427_vm2, %v8640_v7  ;;  %18480 = vmatprep.mubr.msk.f32.mxu1 %vm23396_vm0, %v28148_v16  ;;  %v15573_v7 = vld [vmem:[%s28103_s4 + $0x58] sm:$0xff] }
 0x524   : > { %19771 = vmatprep.mubr.msk.f32.mxu0 %vm23396_vm0, %v28148_v16 }
 0x526   : > { %18481 = vmatmul.mubr.msk.f32.gmra.mrb[124].mxu1 %vm2427_vm2, %v3854_v36  ;;  %v21255_v36 = vpack.c.bf16 %v15573_v7, %v15572_v15  ;;  %v9570_v15 = vld [vmem:[#allocation2 + $0x46] sm:$0xff] }
 0x527   : > { %19772 = vmatmul.mubr.msk.f32.gmra.mrb[58].mxu0 %vm2427_vm2, %v8641_v57  ;;  %18483 = vmatprep.mubr.msk.f32.mxu1 %vm23396_vm0, %v28148_v16  ;;  %v4319_v57 = vld [vmem:[#allocation2 + $0x4c] sm:$0xff] }
 0x528   : > { %19774 = vmatprep.mubr.msk.f32.mxu0 %vm23396_vm0, %v28148_v16  ;;  %v4347_v7 = vld [vmem:[#allocation2 + $0x12c] sm:$0xff] }
 0x52a   : > { %18484 = vmatmul.mubr.msk.f32.gmra.mrb[126].mxu1 %vm2427_vm2, %v3855_v37  ;;  %v9106_v37 = vld [vmem:[#allocation2 + $0xa8] sm:$0xff] }
 0x52b   : > { %19775 = vmatmul.mubr.msk.f32.gmra.mrb[60].mxu0 %vm2427_vm2, %v8642_v2  ;;  %18486 = vmatprep.mubr.msk.f32.mxu1 %vm23396_vm0, %v28148_v16  ;;  %v4320_v2 = vld [vmem:[#allocation2 + $0x54] sm:$0xff] }
 0x52c   : > { %19777 = vmatprep.mubr.msk.f32.mxu0 %vm23396_vm0, %v28148_v16 }
 0x52e   : > { %18487 = vmatmul.mubr.msk.f32.gmra.mrb[128].mxu1 %vm2427_vm2, %v3856_v45  ;;  %v9107_v45 = vld [vmem:[#allocation2 + $0xb0] sm:$0xff] }
 0x52f   : > { %19778 = vmatmul.mubr.msk.f32.gmra.mrb[62].mxu0 %vm2427_vm2, %v8643_v12  ;;  %18489 = vmatprep.mubr.msk.f32.mxu1 %vm23396_vm0, %v28148_v16  ;;  %v4321_v12 = vld [vmem:[#allocation2 + $0x5c] sm:$0xff] }
 0x530   : > { %19780 = vmatprep.mubr.msk.f32.mxu0 %vm23396_vm0, %v28148_v16 }
 0x532   : > { %18490 = vmatmul.mubr.msk.f32.gmra.mrb[130].mxu1 %vm2427_vm2, %v3857_v6  ;;  %v9108_v6 = vld [vmem:[#allocation2 + $0xb8] sm:$0xff] }
 0x533   : > { %19781 = vmatmul.mubr.msk.f32.gmra.mrb[64].mxu0 %vm2427_vm2, %v8644_v41  ;;  %18492 = vmatprep.mubr.msk.f32.mxu1 %vm23396_vm0, %v28148_v16  ;;  %v4322_v41 = vld [vmem:[#allocation2 + $0x64] sm:$0xff] }
 0x534   : > { %19783 = vmatprep.mubr.msk.f32.mxu0 %vm23396_vm0, %v28148_v16 }
 0x536   : > { %18493 = vmatmul.mubr.msk.f32.gmra.mrb[132].mxu1 %vm2427_vm2, %v3858_v31  ;;  %v9109_v31 = vld [vmem:[#allocation2 + $0xc0] sm:$0xff] }
 0x537   : > { %19784 = vmatmul.mubr.msk.f32.gmra.mrb[66].mxu0 %vm2427_vm2, %v8645_v63  ;;  %18495 = vmatprep.mubr.msk.f32.mxu1 %vm23396_vm0, %v28148_v16  ;;  %v4323_v63 = vld [vmem:[#allocation2 + $0x6c] sm:$0xff] }
 0x538   : > { %19786 = vmatprep.mubr.msk.f32.mxu0 %vm23396_vm0, %v28148_v16 }
 0x53a   : > { %18496 = vmatmul.mubr.msk.f32.gmra.mrb[134].mxu1 %vm2427_vm2, %v3859_v42  ;;  %v9110_v42 = vld [vmem:[#allocation2 + $0xc8] sm:$0xff] }
 0x53b   : > { %19787 = vmatmul.mubr.msk.f32.gmra.mrb[68].mxu0 %vm2427_vm2, %v8646_v35  ;;  %18498 = vmatprep.mubr.msk.f32.mxu1 %vm23396_vm0, %v28148_v16  ;;  %v4324_v35 = vld [vmem:[#allocation2 + $0x74] sm:$0xff] }
 0x53c   : > { %19789 = vmatprep.mubr.msk.f32.mxu0 %vm23396_vm0, %v28148_v16 }
 0x53e   : > { %18499 = vmatmul.mubr.msk.f32.gmra.mrb[136].mxu1 %vm2427_vm2, %v3860_v28  ;;  %v9111_v28 = vld [vmem:[#allocation2 + $0xd0] sm:$0xff] }
 0x53f   : > { %19790 = vmatmul.mubr.msk.f32.gmra.mrb[70].mxu0 %vm2427_vm2, %v8647_v21  ;;  %18501 = vmatprep.mubr.msk.f32.mxu1 %vm23396_vm0, %v28148_v16  ;;  %v4325_v21 = vld [vmem:[#allocation2 + $0x7c] sm:$0xff] }
 0x540   : > { %19792 = vmatprep.mubr.msk.f32.mxu0 %vm23396_vm0, %v28148_v16 }
 0x542   : > { %18502 = vmatmul.mubr.msk.f32.gmra.mrb[138].mxu1 %vm2427_vm2, %v3861_v49  ;;  %v9112_v49 = vld [vmem:[#allocation2 + $0xd8] sm:$0xff] }
 0x543   : > { %19793 = vmatmul.mubr.msk.f32.gmra.mrb[72].mxu0 %vm2427_vm2, %v8648_v20  ;;  %18504 = vmatprep.mubr.msk.f32.mxu1 %vm23396_vm0, %v28148_v16  ;;  %v4326_v20 = vld [vmem:[#allocation2 + $0x84] sm:$0xff] }
 0x544   : > { %19795 = vmatprep.mubr.msk.f32.mxu0 %vm23396_vm0, %v28148_v16 }
 0x546   : > { %18505 = vmatmul.mubr.msk.f32.gmra.mrb[140].mxu1 %vm2427_vm2, %v3862_v10  ;;  %v9113_v10 = vld [vmem:[#allocation2 + $0xe0] sm:$0xff] }
 0x547   : > { %19796 = vmatmul.mubr.msk.f32.gmra.mrb[74].mxu0 %vm2427_vm2, %v8649_v17  ;;  %18507 = vmatprep.mubr.msk.f32.mxu1 %vm23396_vm0, %v28148_v16  ;;  %v4327_v17 = vld [vmem:[#allocation2 + $0x8c] sm:$0xff] }
 0x548   : > { %19798 = vmatprep.mubr.msk.f32.mxu0 %vm23396_vm0, %v28148_v16 }
 0x54a   : > { %18508 = vmatmul.mubr.msk.f32.gmra.mrb[142].mxu1 %vm2427_vm2, %v3863_v54  ;;  %v9114_v54 = vld [vmem:[#allocation2 + $0xe8] sm:$0xff] }
 0x54b   : > { %19799 = vmatmul.mubr.msk.f32.gmra.mrb[76].mxu0 %vm2427_vm2, %v8650_v56  ;;  %18510 = vmatprep.mubr.msk.f32.mxu1 %vm23396_vm0, %v28148_v16  ;;  %v4328_v56 = vld [vmem:[#allocation2 + $0x94] sm:$0xff] }
 0x54c   : > { %19801 = vmatprep.mubr.msk.f32.mxu0 %vm23396_vm0, %v28148_v16 }
 0x54e   : > { %18511 = vmatmul.mubr.msk.f32.gmra.mrb[144].mxu1 %vm2427_vm2, %v3864_v24  ;;  %v9115_v24 = vld [vmem:[#allocation2 + $0xf0] sm:$0xff] }
 0x54f   : > { %19802 = vmatmul.mubr.msk.f32.gmra.mrb[78].mxu0 %vm2427_vm2, %v8651_v50  ;;  %18513 = vmatprep.mubr.msk.f32.mxu1 %vm23396_vm0, %v28148_v16  ;;  %v4329_v50 = vld [vmem:[#allocation2 + $0x9c] sm:$0xff] }
 0x550   : > { %19804 = vmatprep.mubr.msk.f32.mxu0 %vm23396_vm0, %v28148_v16 }
 0x552   : > { %18514 = vmatmul.mubr.msk.f32.gmra.mrb[146].mxu1 %vm2427_vm2, %v3865_v27  ;;  %v9116_v27 = vld [vmem:[#allocation2 + $0xf8] sm:$0xff] }
 0x553   : > { %19805 = vmatmul.mubr.msk.f32.gmra.mrb[80].mxu0 %vm2427_vm2, %v8652_v8  ;;  %18516 = vmatprep.mubr.msk.f32.mxu1 %vm23396_vm0, %v28148_v16  ;;  %v4330_v8 = vld [vmem:[#allocation2 + $0xa4] sm:$0xff] }
 0x554   : > { %19811 = vmatprep.mubr.msk.f32.mxu0 %vm23396_vm0, %v28148_v16 }
 0x556   : > { %18517 = vmatmul.mubr.msk.f32.gmra.mrb[148].mxu1 %vm2427_vm2, %v3866_v53  ;;  %v4332_v53 = vld [vmem:[#allocation2 + $0xb4] sm:$0xff] }
 0x557   : > { %19812 = vmatmul.mubr.msk.f32.vlgmr.msra.gmra.mrb[0].mxu0 %vm2427_vm2, %v9090_v18  ;;  %18519 = vmatprep.mubr.msk.f32.mxu1 %vm23396_vm0, %v28148_v16  ;;  %v9119_v18 = vld [vmem:[#allocation2 + $0x110] sm:$0xff] }
 0x558   : > { %19814 = vmatprep.mubr.msk.f32.mxu0 %vm23396_vm0, %v28148_v16  ;;  %21286 = vmatpush3.bf16.msra.mxu0 %v21285_v61  ;;  %v9118_v61 = vld [vmem:[#allocation2 + $0x108] sm:$0xff] }
 0x559   : > { %21287 = vmatprep.subr.bf16.mxu0 %v23398_v38 }
 0x55a   : > { %18520 = vmatmul.mubr.msk.f32.gmra.mrb[150].mxu1 %vm2427_vm2, %v3867_v55  ;;  %v4333_v55 = vld [vmem:[#allocation2 + $0xbc] sm:$0xff] }
 0x55b   : > { %19815 = vmatmul.mubr.msk.f32.gmra.mrb[2].mxu0 %vm2427_vm2, %v9091_v51  ;;  %18522 = vmatprep.mubr.msk.f32.mxu1 %vm23396_vm0, %v28148_v16  ;;  %v9120_v51 = vld [vmem:[#allocation2 + $0x118] sm:$0xff] }
 0x55c   : > { %19817 = vmatprep.mubr.msk.f32.mxu0 %vm23396_vm0, %v28148_v16 }
 0x55e   : > { %18523 = vmatmul.mubr.msk.f32.gmra.mrb[152].mxu1 %vm2427_vm2, %v3868_v30  ;;  %v4334_v30 = vld [vmem:[#allocation2 + $0xc4] sm:$0xff] }
 0x55f   : > { %19818 = vmatmul.mubr.msk.f32.gmra.mrb[4].mxu0 %vm2427_vm2, %v9092_v52  ;;  %18525 = vmatprep.mubr.msk.f32.mxu1 %vm23396_vm0, %v28148_v16  ;;  %v9121_v52 = vld [vmem:[#allocation2 + $0x120] sm:$0xff] }
 0x560   : > { %19820 = vmatprep.mubr.msk.f32.mxu0 %vm23396_vm0, %v28148_v16 }
 0x562   : > { %18526 = vmatmul.mubr.msk.f32.gmra.mrb[154].mxu1 %vm2427_vm2, %v3869_v22  ;;  %v4335_v22 = vld [vmem:[#allocation2 + $0xcc] sm:$0xff] }
 0x563   : > { %19821 = vmatmul.mubr.msk.f32.gmra.mrb[6].mxu0 %vm2427_vm2, %v9093_v4  ;;  %18528 = vmatprep.mubr.msk.f32.mxu1 %vm23396_vm0, %v28148_v16  ;;  %v9122_v4 = vld [vmem:[#allocation2 + $0x128] sm:$0xff] }
 0x564   : > { %19823 = vmatprep.mubr.msk.f32.mxu0 %vm23396_vm0, %v28148_v16 }
 0x566   : > { %18529 = vmatmul.mubr.msk.f32.gmra.mrb[156].mxu1 %vm2427_vm2, %v3870_v11  ;;  %v4336_v11 = vld [vmem:[#allocation2 + $0xd4] sm:$0xff] }
 0x567   : > { %19824 = vmatmul.mubr.msk.f32.gmra.mrb[8].mxu0 %vm2427_vm2, %v9094_v14  ;;  %18531 = vmatprep.mubr.msk.f32.mxu1 %vm23396_vm0, %v28148_v16  ;;  %v9123_v14 = vld [vmem:[#allocation2 + $0x130] sm:$0xff] }
 0x568   : > { %19826 = vmatprep.mubr.msk.f32.mxu0 %vm23396_vm0, %v28148_v16 }
 0x56a   : > { %18532 = vmatmul.mubr.msk.f32.gmra.mrb[158].mxu1 %vm2427_vm2, %v3871_v39  ;;  %v4337_v39 = vld [vmem:[#allocation2 + $0xdc] sm:$0xff] }
 0x56b   : > { %19827 = vmatmul.mubr.msk.f32.gmra.mrb[10].mxu0 %vm2427_vm2, %v9095_v62  ;;  %18534 = vmatprep.mubr.msk.f32.mxu1 %vm23396_vm0, %v28148_v16  ;;  %v9124_v62 = vld [vmem:[#allocation2 + $0x138] sm:$0xff] }
 0x56c   : > { %19829 = vmatprep.mubr.msk.f32.mxu0 %vm23396_vm0, %v28148_v16 }
 0x56e   : > { %18535 = vmatmul.mubr.msk.f32.gmra.mrb[160].mxu1 %vm2427_vm2, %v3872_v47  ;;  %v4338_v47 = vld [vmem:[#allocation2 + $0xe4] sm:$0xff] }
 0x56f   : > { %19830 = vmatmul.mubr.msk.f32.gmra.mrb[12].mxu0 %vm2427_vm2, %v9096_v13  ;;  %18541 = vmatprep.mubr.msk.f32.mxu1 %vm23396_vm0, %v28148_v16  ;;  %v9125_v13 = vld [vmem:[#allocation2 + $0x140] sm:$0xff] }
 0x570   : > { %19832 = vmatprep.mubr.msk.f32.mxu0 %vm23396_vm0, %v28148_v16 }
 0x572   : > { %18542 = vmatmul.mubr.msk.f32.vlgmr.msra.gmra.mrb[80].mxu1 %vm2427_vm2, %v4310_v29  ;;  %v4339_v29 = vld [vmem:[#allocation2 + $0xec] sm:$0xff] }
 0x573   : > { %19833 = vmatmul.mubr.msk.f32.gmra.mrb[14].mxu0 %vm2427_vm2, %v9097_v48  ;;  %18544 = vmatprep.mubr.msk.f32.mxu1 %vm23396_vm0, %v28148_v16  ;;  %v9126_v48 = vld [vmem:[#allocation2 + $0x148] sm:$0xff] }
 0x574   : > { %19835 = vmatprep.mubr.msk.f32.mxu0 %vm23396_vm0, %v28148_v16  ;;  %21256 = vmatpush3.bf16.msra.mxu1 %v21255_v36  ;;  %v9571_v36 = vld [vmem:[#allocation2 + $0x4e] sm:$0xff] }
 0x575   : > { %21257 = vmatprep.subr.bf16.mxu1 %v23398_v38 }
 0x576   : > { %18545 = vmatmul.mubr.msk.f32.gmra.mrb[82].mxu1 %vm2427_vm2, %v4311_v0  ;;  %v4340_v0 = vld [vmem:[#allocation2 + $0xf4] sm:$0xff] }
 0x577   : > { %19836 = vmatmul.mubr.msk.f32.gmra.mrb[16].mxu0 %vm2427_vm2, %v9098_v33  ;;  %18547 = vmatprep.mubr.msk.f32.mxu1 %vm23396_vm0, %v28148_v16  ;;  %v9127_v33 = vld [vmem:[#allocation2 + $0x150] sm:$0xff] }
 0x578   : > { %19838 = vmatprep.mubr.msk.f32.mxu0 %vm23396_vm0, %v28148_v16 }
 0x57a   : > { %18548 = vmatmul.mubr.msk.f32.gmra.mrb[84].mxu1 %vm2427_vm2, %v4312_v58  ;;  %v4341_v58 = vld [vmem:[#allocation2 + $0xfc] sm:$0xff] }
 0x57b   : > { %19839 = vmatmul.mubr.msk.f32.gmra.mrb[18].mxu0 %vm2427_vm2, %v9099_v32  ;;  %18550 = vmatprep.mubr.msk.f32.mxu1 %vm23396_vm0, %v28148_v16  ;;  %v9128_v32 = vld [vmem:[#allocation2 + $0x158] sm:$0xff] }
 0x57c   : > { %19841 = vmatprep.mubr.msk.f32.mxu0 %vm23396_vm0, %v28148_v16 }
 0x57e   : > { %18551 = vmatmul.mubr.msk.f32.gmra.mrb[86].mxu1 %vm2427_vm2, %v4313_v5  ;;  %v4342_v5 = vld [vmem:[#allocation2 + $0x104] sm:$0xff] }
 0x57f   : > { %19842 = vmatmul.mubr.msk.f32.gmra.mrb[20].mxu0 %vm2427_vm2, %v9100_v3  ;;  %18553 = vmatprep.mubr.msk.f32.mxu1 %vm23396_vm0, %v28148_v16  ;;  %v9129_v3 = vld [vmem:[#allocation2 + $0x160] sm:$0xff] }
 0x580   : > { %19844 = vmatprep.mubr.msk.f32.mxu0 %vm23396_vm0, %v28148_v16 }
 0x582   : > { %18554 = vmatmul.mubr.msk.f32.gmra.mrb[88].mxu1 %vm2427_vm2, %v4314_v34  ;;  %v4343_v34 = vld [vmem:[#allocation2 + $0x10c] sm:$0xff] }
 0x583   : > { %19845 = vmatmul.mubr.msk.f32.gmra.mrb[22].mxu0 %vm2427_vm2, %v9101_v40  ;;  %18556 = vmatprep.mubr.msk.f32.mxu1 %vm23396_vm0, %v28148_v16  ;;  %v9130_v40 = vld [vmem:[#allocation2 + $0x168] sm:$0xf] }
 0x584   : > { %19847 = vmatprep.mubr.msk.f32.mxu0 %vm23396_vm0, %v28148_v16 }
 0x586   : > { %18557 = vmatmul.mubr.msk.f32.gmra.mrb[90].mxu1 %vm2427_vm2, %v4315_v46  ;;  %v16045_v46 = vld [vmem:[%s28103_s4 + $0x100] sm:$0xff] }
 0x587   : > { %19848 = vmatmul.mubr.msk.f32.gmra.mrb[24].mxu0 %vm2427_vm2, %v9102_v43  ;;  %18559 = vmatprep.mubr.msk.f32.mxu1 %vm23396_vm0, %v28148_v16  ;;  %v16046_v43 = vld [vmem:[%s28103_s4 + $0x108] sm:$0xff] }
 0x588   : > { %19850 = vmatprep.mubr.msk.f32.mxu0 %vm23396_vm0, %v28148_v16 }
 0x58a   : > { %18560 = vmatmul.mubr.msk.f32.gmra.mrb[92].mxu1 %vm2427_vm2, %v4316_v23  ;;  %v21288_v23 = vpack.c.bf16 %v16046_v43, %v16045_v46  ;;  %v9595_v46 = vld [vmem:[#allocation2 + $0x10e] sm:$0xff]  ;;  %v4809_v43 = vld [vmem:[#allocation2 + $0xba] sm:$0xff] }
 0x58b   : > { %19851 = vmatmul.mubr.msk.f32.gmra.mrb[26].mxu0 %vm2427_vm2, %v9103_v59  ;;  %18562 = vmatprep.mubr.msk.f32.mxu1 %vm23396_vm0, %v28148_v16  ;;  %v4344_v59 = vld [vmem:[#allocation2 + $0x114] sm:$0xff] }
 0x58c   : > { %19853 = vmatprep.mubr.msk.f32.mxu0 %vm23396_vm0, %v28148_v16 }
 0x58e   : > { %18563 = vmatmul.mubr.msk.f32.gmra.mrb[94].mxu1 %vm2427_vm2, %v4317_v1  ;;  %v9568_v1 = vld [vmem:[#allocation2 + $0x36] sm:$0xff] }
 0x58f   : > { %19854 = vmatmul.mubr.msk.f32.gmra.mrb[28].mxu0 %vm2427_vm2, %v9104_v60  ;;  %18565 = vmatprep.mubr.msk.f32.mxu1 %vm23396_vm0, %v28148_v16  ;;  %v4345_v60 = vld [vmem:[#allocation2 + $0x11c] sm:$0xff] }
 0x590   : > { %19856 = vmatprep.mubr.msk.f32.mxu0 %vm23396_vm0, %v28148_v16 }
 0x592   : > { %18566 = vmatmul.mubr.msk.f32.gmra.mrb[96].mxu1 %vm2427_vm2, %v4318_v25  ;;  %v9569_v25 = vld [vmem:[#allocation2 + $0x3e] sm:$0xff] }
 0x593   : > { %19857 = vmatmul.mubr.msk.f32.gmra.mrb[30].mxu0 %vm2427_vm2, %v9105_v9  ;;  %18568 = vmatprep.mubr.msk.f32.mxu1 %vm23396_vm0, %v28148_v16  ;;  %v4346_v9 = vld [vmem:[#allocation2 + $0x124] sm:$0xff] }
 0x594   : > { %19859 = vmatprep.mubr.msk.f32.mxu0 %vm23396_vm0, %v28148_v16 }
 0x596   : > { %18569 = vmatmul.mubr.msk.f32.gmra.mrb[98].mxu1 %vm2427_vm2, %v4319_v57  ;;  %v4348_v57 = vld [vmem:[#allocation2 + $0x134] sm:$0xff] }
 0x597   : > { %19860 = vmatmul.mubr.msk.f32.gmra.mrb[32].mxu0 %vm2427_vm2, %v9106_v37  ;;  %18571 = vmatprep.mubr.msk.f32.mxu1 %vm23396_vm0, %v28148_v16  ;;  %v9572_v37 = vld [vmem:[#allocation2 + $0x56] sm:$0xff] }
 0x598   : > { %19862 = vmatprep.mubr.msk.f32.mxu0 %vm23396_vm0, %v28148_v16 }
 0x59a   : > { %18572 = vmatmul.mubr.msk.f32.gmra.mrb[100].mxu1 %vm2427_vm2, %v4320_v2  ;;  %v4349_v2 = vld [vmem:[#allocation2 + $0x13c] sm:$0xff] }
 0x59b   : > { %19863 = vmatmul.mubr.msk.f32.gmra.mrb[34].mxu0 %vm2427_vm2, %v9107_v45  ;;  %18574 = vmatprep.mubr.msk.f32.mxu1 %vm23396_vm0, %v28148_v16  ;;  %v9573_v45 = vld [vmem:[#allocation2 + $0x5e] sm:$0xff] }
 0x59c   : > { %19865 = vmatprep.mubr.msk.f32.mxu0 %vm23396_vm0, %v28148_v16 }
 0x59e   : > { %18575 = vmatmul.mubr.msk.f32.gmra.mrb[102].mxu1 %vm2427_vm2, %v4321_v12  ;;  %v4350_v12 = vld [vmem:[#allocation2 + $0x144] sm:$0xf] }
 0x59f   : > { %19866 = vmatmul.mubr.msk.f32.gmra.mrb[36].mxu0 %vm2427_vm2, %v9108_v6  ;;  %18577 = vmatprep.mubr.msk.f32.mxu1 %vm23396_vm0, %v28148_v16  ;;  %v9574_v6 = vld [vmem:[#allocation2 + $0x66] sm:$0xff] }
 0x5a0   : > { %19868 = vmatprep.mubr.msk.f32.mxu0 %vm23396_vm0, %v28148_v16 }
 0x5a2   : > { %18578 = vmatmul.mubr.msk.f32.gmra.mrb[104].mxu1 %vm2427_vm2, %v4322_v41  ;;  %v4788_v41 = vld [vmem:[#allocation2 + $0x12] sm:$0xff] }
 0x5a3   : > { %19869 = vmatmul.mubr.msk.f32.gmra.mrb[38].mxu0 %vm2427_vm2, %v9109_v31  ;;  %18580 = vmatprep.mubr.msk.f32.mxu1 %vm23396_vm0, %v28148_v16  ;;  %v9575_v31 = vld [vmem:[#allocation2 + $0x6e] sm:$0xff] }
 0x5a4   : > { %19871 = vmatprep.mubr.msk.f32.mxu0 %vm23396_vm0, %v28148_v16 }
 0x5a6   : > { %18581 = vmatmul.mubr.msk.f32.gmra.mrb[106].mxu1 %vm2427_vm2, %v4323_v63  ;;  %v4789_v63 = vld [vmem:[#allocation2 + $0x1a] sm:$0xff] }
 0x5a7   : > { %19872 = vmatmul.mubr.msk.f32.gmra.mrb[40].mxu0 %vm2427_vm2, %v9110_v42  ;;  %18583 = vmatprep.mubr.msk.f32.mxu1 %vm23396_vm0, %v28148_v16  ;;  %v9576_v42 = vld [vmem:[#allocation2 + $0x76] sm:$0xff] }
 0x5a8   : > { %19874 = vmatprep.mubr.msk.f32.mxu0 %vm23396_vm0, %v28148_v16 }
 0x5aa   : > { %18584 = vmatmul.mubr.msk.f32.gmra.mrb[108].mxu1 %vm2427_vm2, %v4324_v35  ;;  %v4790_v35 = vld [vmem:[#allocation2 + $0x22] sm:$0xff] }
 0x5ab   : > { %19875 = vmatmul.mubr.msk.f32.gmra.mrb[42].mxu0 %vm2427_vm2, %v9111_v28  ;;  %18586 = vmatprep.mubr.msk.f32.mxu1 %vm23396_vm0, %v28148_v16  ;;  %v9577_v28 = vld [vmem:[#allocation2 + $0x7e] sm:$0xff] }
 0x5ac   : > { %19877 = vmatprep.mubr.msk.f32.mxu0 %vm23396_vm0, %v28148_v16 }
 0x5ae   : > { %18587 = vmatmul.mubr.msk.f32.gmra.mrb[110].mxu1 %vm2427_vm2, %v4325_v21  ;;  %v4791_v21 = vld [vmem:[#allocation2 + $0x2a] sm:$0xff] }
 0x5af   : > { %19878 = vmatmul.mubr.msk.f32.gmra.mrb[44].mxu0 %vm2427_vm2, %v9112_v49  ;;  %18589 = vmatprep.mubr.msk.f32.mxu1 %vm23396_vm0, %v28148_v16  ;;  %v9578_v49 = vld [vmem:[#allocation2 + $0x86] sm:$0xff] }
 0x5b0   : > { %19880 = vmatprep.mubr.msk.f32.mxu0 %vm23396_vm0, %v28148_v16 }
 0x5b2   : > { %18590 = vmatmul.mubr.msk.f32.gmra.mrb[112].mxu1 %vm2427_vm2, %v4326_v20  ;;  %v4792_v20 = vld [vmem:[#allocation2 + $0x32] sm:$0xff] }
 0x5b3   : > { %19881 = vmatmul.mubr.msk.f32.gmra.mrb[46].mxu0 %vm2427_vm2, %v9113_v10  ;;  %18592 = vmatprep.mubr.msk.f32.mxu1 %vm23396_vm0, %v28148_v16  ;;  %v9579_v10 = vld [vmem:[#allocation2 + $0x8e] sm:$0xff] }
 0x5b4   : > { %19883 = vmatprep.mubr.msk.f32.mxu0 %vm23396_vm0, %v28148_v16 }
 0x5b6   : > { %18593 = vmatmul.mubr.msk.f32.gmra.mrb[114].mxu1 %vm2427_vm2, %v4327_v17  ;;  %v4793_v17 = vld [vmem:[#allocation2 + $0x3a] sm:$0xff] }
 0x5b7   : > { %19884 = vmatmul.mubr.msk.f32.gmra.mrb[48].mxu0 %vm2427_vm2, %v9114_v54  ;;  %18595 = vmatprep.mubr.msk.f32.mxu1 %vm23396_vm0, %v28148_v16  ;;  %v9580_v54 = vld [vmem:[#allocation2 + $0x96] sm:$0xff] }
 0x5b8   : > { %19886 = vmatprep.mubr.msk.f32.mxu0 %vm23396_vm0, %v28148_v16 }
 0x5ba   : > { %18596 = vmatmul.mubr.msk.f32.gmra.mrb[116].mxu1 %vm2427_vm2, %v4328_v56  ;;  %v4794_v56 = vld [vmem:[#allocation2 + $0x42] sm:$0xff] }
 0x5bb   : > { %19887 = vmatmul.mubr.msk.f32.gmra.mrb[50].mxu0 %vm2427_vm2, %v9115_v24  ;;  %18598 = vmatprep.mubr.msk.f32.mxu1 %vm23396_vm0, %v28148_v16  ;;  %v9581_v24 = vld [vmem:[#allocation2 + $0x9e] sm:$0xff] }
 0x5bc   : > { %19889 = vmatprep.mubr.msk.f32.mxu0 %vm23396_vm0, %v28148_v16 }
 0x5be   : > { %18599 = vmatmul.mubr.msk.f32.gmra.mrb[118].mxu1 %vm2427_vm2, %v4329_v50  ;;  %v4795_v50 = vld [vmem:[#allocation2 + $0x4a] sm:$0xff] }
 0x5bf   : > { %19890 = vmatmul.mubr.msk.f32.gmra.mrb[52].mxu0 %vm2427_vm2, %v9116_v27  ;;  %18601 = vmatprep.mubr.msk.f32.mxu1 %vm23396_vm0, %v28148_v16  ;;  %v9582_v27 = vld [vmem:[#allocation2 + $0xa6] sm:$0xff] }
 0x5c0   : > { %19892 = vmatprep.mubr.msk.f32.mxu0 %vm23396_vm0, %v28148_v16 }
 0x5c2   : > { %18602 = vmatmul.mubr.msk.f32.gmra.mrb[120].mxu1 %vm2427_vm2, %v4330_v8  ;;  %v4796_v8 = vld [vmem:[#allocation2 + $0x52] sm:$0xff] }
 0x5c3   : > { %19893 = vmatmul.mubr.msk.f32.gmra.mrb[54].mxu0 %vm2427_vm2, %v9117_v26  ;;  %18604 = vmatprep.mubr.msk.f32.mxu1 %vm23396_vm0, %v28148_v16  ;;  %v9583_v26 = vld [vmem:[#allocation2 + $0xae] sm:$0xff] }
 0x5c4   : > { %19895 = vmatprep.mubr.msk.f32.mxu0 %vm23396_vm0, %v28148_v16 }
 0x5c6   : > { %18605 = vmatmul.mubr.msk.f32.gmra.mrb[122].mxu1 %vm2427_vm2, %v4331_v19  ;;  %v15615_v19 = vld [vmem:[%s28103_s4 + $0x60] sm:$0xff] }
 0x5c7   : > { %19896 = vmatmul.mubr.msk.f32.gmra.mrb[56].mxu0 %vm2427_vm2, %v9118_v61  ;;  %18607 = vmatprep.mubr.msk.f32.mxu1 %vm23396_vm0, %v28148_v16  ;;  %v15616_v61 = vld [vmem:[%s28103_s4 + $0x68] sm:$0xff] }
 0x5c8   : > { %19898 = vmatprep.mubr.msk.f32.mxu0 %vm23396_vm0, %v28148_v16 }
 0x5ca   : > { %18608 = vmatmul.mubr.msk.f32.gmra.mrb[124].mxu1 %vm2427_vm2, %v4332_v53  ;;  %v21258_v53 = vpack.c.bf16 %v15616_v61, %v15615_v19  ;;  %v10048_v19 = vld [vmem:[#allocation2 + $0x47] sm:$0xff]  ;;  %v4825_v61 = vld [vmem:[#allocation2 + $0x13a] sm:$0xff] }
 0x5cb   : > { %19899 = vmatmul.mubr.msk.f32.gmra.mrb[58].mxu0 %vm2427_vm2, %v9119_v18  ;;  %18610 = vmatprep.mubr.msk.f32.mxu1 %vm23396_vm0, %v28148_v16  ;;  %v4797_v18 = vld [vmem:[#allocation2 + $0x5a] sm:$0xff] }
 0x5cc   : > { %19901 = vmatprep.mubr.msk.f32.mxu0 %vm23396_vm0, %v28148_v16 }
 0x5ce   : > { %18611 = vmatmul.mubr.msk.f32.gmra.mrb[126].mxu1 %vm2427_vm2, %v4333_v55  ;;  %v9584_v55 = vld [vmem:[#allocation2 + $0xb6] sm:$0xff] }
 0x5cf   : > { %19902 = vmatmul.mubr.msk.f32.gmra.mrb[60].mxu0 %vm2427_vm2, %v9120_v51  ;;  %18613 = vmatprep.mubr.msk.f32.mxu1 %vm23396_vm0, %v28148_v16  ;;  %v4798_v51 = vld [vmem:[#allocation2 + $0x62] sm:$0xff] }
 0x5d0   : > { %19904 = vmatprep.mubr.msk.f32.mxu0 %vm23396_vm0, %v28148_v16 }
 0x5d2   : > { %18614 = vmatmul.mubr.msk.f32.gmra.mrb[128].mxu1 %vm2427_vm2, %v4334_v30  ;;  %v9585_v30 = vld [vmem:[#allocation2 + $0xbe] sm:$0xff] }
 0x5d3   : > { %19905 = vmatmul.mubr.msk.f32.gmra.mrb[62].mxu0 %vm2427_vm2, %v9121_v52  ;;  %18616 = vmatprep.mubr.msk.f32.mxu1 %vm23396_vm0, %v28148_v16  ;;  %v4799_v52 = vld [vmem:[#allocation2 + $0x6a] sm:$0xff] }
 0x5d4   : > { %19907 = vmatprep.mubr.msk.f32.mxu0 %vm23396_vm0, %v28148_v16 }
 0x5d6   : > { %18617 = vmatmul.mubr.msk.f32.gmra.mrb[130].mxu1 %vm2427_vm2, %v4335_v22  ;;  %v9586_v22 = vld [vmem:[#allocation2 + $0xc6] sm:$0xff] }
 0x5d7   : > { %19908 = vmatmul.mubr.msk.f32.gmra.mrb[64].mxu0 %vm2427_vm2, %v9122_v4  ;;  %18619 = vmatprep.mubr.msk.f32.mxu1 %vm23396_vm0, %v28148_v16  ;;  %v4800_v4 = vld [vmem:[#allocation2 + $0x72] sm:$0xff] }
 0x5d8   : > { %19910 = vmatprep.mubr.msk.f32.mxu0 %vm23396_vm0, %v28148_v16 }
 0x5da   : > { %18620 = vmatmul.mubr.msk.f32.gmra.mrb[132].mxu1 %vm2427_vm2, %v4336_v11  ;;  %v9587_v11 = vld [vmem:[#allocation2 + $0xce] sm:$0xff] }
 0x5db   : > { %19911 = vmatmul.mubr.msk.f32.gmra.mrb[66].mxu0 %vm2427_vm2, %v9123_v14  ;;  %18622 = vmatprep.mubr.msk.f32.mxu1 %vm23396_vm0, %v28148_v16  ;;  %v4801_v14 = vld [vmem:[#allocation2 + $0x7a] sm:$0xff] }
 0x5dc   : > { %19913 = vmatprep.mubr.msk.f32.mxu0 %vm23396_vm0, %v28148_v16 }
 0x5de   : > { %18623 = vmatmul.mubr.msk.f32.gmra.mrb[134].mxu1 %vm2427_vm2, %v4337_v39  ;;  %v9588_v39 = vld [vmem:[#allocation2 + $0xd6] sm:$0xff] }
 0x5df   : > { %19914 = vmatmul.mubr.msk.f32.gmra.mrb[68].mxu0 %vm2427_vm2, %v9124_v62  ;;  %18625 = vmatprep.mubr.msk.f32.mxu1 %vm23396_vm0, %v28148_v16  ;;  %v4802_v62 = vld [vmem:[#allocation2 + $0x82] sm:$0xff] }
 0x5e0   : > { %19916 = vmatprep.mubr.msk.f32.mxu0 %vm23396_vm0, %v28148_v16 }
 0x5e2   : > { %18626 = vmatmul.mubr.msk.f32.gmra.mrb[136].mxu1 %vm2427_vm2, %v4338_v47  ;;  %v9589_v47 = vld [vmem:[#allocation2 + $0xde] sm:$0xff] }
 0x5e3   : > { %19917 = vmatmul.mubr.msk.f32.gmra.mrb[70].mxu0 %vm2427_vm2, %v9125_v13  ;;  %18628 = vmatprep.mubr.msk.f32.mxu1 %vm23396_vm0, %v28148_v16  ;;  %v4803_v13 = vld [vmem:[#allocation2 + $0x8a] sm:$0xff] }
 0x5e4   : > { %19919 = vmatprep.mubr.msk.f32.mxu0 %vm23396_vm0, %v28148_v16 }
 0x5e6   : > { %18629 = vmatmul.mubr.msk.f32.gmra.mrb[138].mxu1 %vm2427_vm2, %v4339_v29  ;;  %v9590_v29 = vld [vmem:[#allocation2 + $0xe6] sm:$0xff] }
 0x5e7   : > { %19920 = vmatmul.mubr.msk.f32.gmra.mrb[72].mxu0 %vm2427_vm2, %v9126_v48  ;;  %18631 = vmatprep.mubr.msk.f32.mxu1 %vm23396_vm0, %v28148_v16  ;;  %v4804_v48 = vld [vmem:[#allocation2 + $0x92] sm:$0xff] }
 0x5e8   : > { %19922 = vmatprep.mubr.msk.f32.mxu0 %vm23396_vm0, %v28148_v16 }
 0x5ea   : > { %18632 = vmatmul.mubr.msk.f32.gmra.mrb[140].mxu1 %vm2427_vm2, %v4340_v0  ;;  %v9591_v0 = vld [vmem:[#allocation2 + $0xee] sm:$0xff] }
 0x5eb   : > { %19923 = vmatmul.mubr.msk.f32.gmra.mrb[74].mxu0 %vm2427_vm2, %v9127_v33  ;;  %18634 = vmatprep.mubr.msk.f32.mxu1 %vm23396_vm0, %v28148_v16  ;;  %v4805_v33 = vld [vmem:[#allocation2 + $0x9a] sm:$0xff] }
 0x5ec   : > { %19925 = vmatprep.mubr.msk.f32.mxu0 %vm23396_vm0, %v28148_v16 }
 0x5ee   : > { %18635 = vmatmul.mubr.msk.f32.gmra.mrb[142].mxu1 %vm2427_vm2, %v4341_v58  ;;  %v9592_v58 = vld [vmem:[#allocation2 + $0xf6] sm:$0xff] }
 0x5ef   : > { %19926 = vmatmul.mubr.msk.f32.gmra.mrb[76].mxu0 %vm2427_vm2, %v9128_v32  ;;  %18637 = vmatprep.mubr.msk.f32.mxu1 %vm23396_vm0, %v28148_v16  ;;  %v4806_v32 = vld [vmem:[#allocation2 + $0xa2] sm:$0xff] }
 0x5f0   : > { %19928 = vmatprep.mubr.msk.f32.mxu0 %vm23396_vm0, %v28148_v16 }
 0x5f2   : > { %18638 = vmatmul.mubr.msk.f32.gmra.mrb[144].mxu1 %vm2427_vm2, %v4342_v5  ;;  %v9593_v5 = vld [vmem:[#allocation2 + $0xfe] sm:$0xff] }
 0x5f3   : > { %19929 = vmatmul.mubr.msk.f32.gmra.mrb[78].mxu0 %vm2427_vm2, %v9129_v3  ;;  %18640 = vmatprep.mubr.msk.f32.mxu1 %vm23396_vm0, %v28148_v16  ;;  %v4807_v3 = vld [vmem:[#allocation2 + $0xaa] sm:$0xff] }
 0x5f4   : > { %19931 = vmatprep.mubr.msk.f32.mxu0 %vm23396_vm0, %v28148_v16 }
 0x5f6   : > { %18641 = vmatmul.mubr.msk.f32.gmra.mrb[146].mxu1 %vm2427_vm2, %v4343_v34  ;;  %v9594_v34 = vld [vmem:[#allocation2 + $0x106] sm:$0xff] }
 0x5f7   : > { %19932 = vmatmul.mubr.msk.f32.gmra.mrb[80].mxu0 %vm2427_vm2, %v9130_v40  ;;  %18643 = vmatprep.mubr.msk.f32.mxu1 %vm23396_vm0, %v28148_v16  ;;  %v4808_v40 = vld [vmem:[#allocation2 + $0xb2] sm:$0xff] }
 0x5f8   : > { %19938 = vmatprep.mubr.msk.f32.mxu0 %vm23396_vm0, %v28148_v16 }
 0x5fa   : > { %18644 = vmatmul.mubr.msk.f32.gmra.mrb[148].mxu1 %vm2427_vm2, %v4344_v59  ;;  %v4810_v59 = vld [vmem:[#allocation2 + $0xc2] sm:$0xff] }
 0x5fb   : > { %19939 = vmatmul.mubr.msk.f32.vlgmr.msra.gmra.mrb[0].mxu0 %vm2427_vm2, %v9568_v1  ;;  %18646 = vmatprep.mubr.msk.f32.mxu1 %vm23396_vm0, %v28148_v16  ;;  %v9597_v1 = vld [vmem:[#allocation2 + $0x11e] sm:$0xff] }
 0x5fc   : > { %19941 = vmatprep.mubr.msk.f32.mxu0 %vm23396_vm0, %v28148_v16  ;;  %21289 = vmatpush3.bf16.msra.mxu0 %v21288_v23  ;;  %v9596_v23 = vld [vmem:[#allocation2 + $0x116] sm:$0xff] }
 0x5fd   : > { %21290 = vmatprep.subr.bf16.mxu0 %v23398_v38 }
 0x5fe   : > { %18647 = vmatmul.mubr.msk.f32.gmra.mrb[150].mxu1 %vm2427_vm2, %v4345_v60  ;;  %v4811_v60 = vld [vmem:[#allocation2 + $0xca] sm:$0xff] }
 0x5ff   : > { %19942 = vmatmul.mubr.msk.f32.gmra.mrb[2].mxu0 %vm2427_vm2, %v9569_v25  ;;  %18649 = vmatprep.mubr.msk.f32.mxu1 %vm23396_vm0, %v28148_v16  ;;  %v9598_v25 = vld [vmem:[#allocation2 + $0x126] sm:$0xff] }
 0x600   : > { %19944 = vmatprep.mubr.msk.f32.mxu0 %vm23396_vm0, %v28148_v16 }
 0x602   : > { %18650 = vmatmul.mubr.msk.f32.gmra.mrb[152].mxu1 %vm2427_vm2, %v4346_v9  ;;  %v4812_v9 = vld [vmem:[#allocation2 + $0xd2] sm:$0xff] }
 0x603   : > { %19945 = vmatmul.mubr.msk.f32.gmra.mrb[4].mxu0 %vm2427_vm2, %v9570_v15  ;;  %18652 = vmatprep.mubr.msk.f32.mxu1 %vm23396_vm0, %v28148_v16  ;;  %v9599_v15 = vld [vmem:[#allocation2 + $0x12e] sm:$0xff] }
 0x604   : > { %19947 = vmatprep.mubr.msk.f32.mxu0 %vm23396_vm0, %v28148_v16 }
 0x606   : > { %18653 = vmatmul.mubr.msk.f32.gmra.mrb[154].mxu1 %vm2427_vm2, %v4347_v7  ;;  %v4813_v7 = vld [vmem:[#allocation2 + $0xda] sm:$0xff] }
 0x607   : > { %19948 = vmatmul.mubr.msk.f32.gmra.mrb[6].mxu0 %vm2427_vm2, %v9571_v36  ;;  %18655 = vmatprep.mubr.msk.f32.mxu1 %vm23396_vm0, %v28148_v16  ;;  %v9600_v36 = vld [vmem:[#allocation2 + $0x136] sm:$0xff] }
 0x608   : > { %19950 = vmatprep.mubr.msk.f32.mxu0 %vm23396_vm0, %v28148_v16 }
 0x60a   : > { %18656 = vmatmul.mubr.msk.f32.gmra.mrb[156].mxu1 %vm2427_vm2, %v4348_v57  ;;  %v4814_v57 = vld [vmem:[#allocation2 + $0xe2] sm:$0xff] }
 0x60b   : > { %19951 = vmatmul.mubr.msk.f32.gmra.mrb[8].mxu0 %vm2427_vm2, %v9572_v37  ;;  %18658 = vmatprep.mubr.msk.f32.mxu1 %vm23396_vm0, %v28148_v16  ;;  %v9601_v37 = vld [vmem:[#allocation2 + $0x13e] sm:$0xff] }
 0x60c   : > { %19953 = vmatprep.mubr.msk.f32.mxu0 %vm23396_vm0, %v28148_v16 }
 0x60e   : > { %18659 = vmatmul.mubr.msk.f32.gmra.mrb[158].mxu1 %vm2427_vm2, %v4349_v2  ;;  %v4815_v2 = vld [vmem:[#allocation2 + $0xea] sm:$0xff] }
 0x60f   : > { %19954 = vmatmul.mubr.msk.f32.gmra.mrb[10].mxu0 %vm2427_vm2, %v9573_v45  ;;  %18661 = vmatprep.mubr.msk.f32.mxu1 %vm23396_vm0, %v28148_v16  ;;  %v9602_v45 = vld [vmem:[#allocation2 + $0x146] sm:$0xff] }
 0x610   : > { %19956 = vmatprep.mubr.msk.f32.mxu0 %vm23396_vm0, %v28148_v16 }
 0x612   : > { %18662 = vmatmul.mubr.msk.f32.gmra.mrb[160].mxu1 %vm2427_vm2, %v4350_v12  ;;  %v4816_v12 = vld [vmem:[#allocation2 + $0xf2] sm:$0xff] }
 0x613   : > { %19957 = vmatmul.mubr.msk.f32.gmra.mrb[12].mxu0 %vm2427_vm2, %v9574_v6  ;;  %18668 = vmatprep.mubr.msk.f32.mxu1 %vm23396_vm0, %v28148_v16  ;;  %v9603_v6 = vld [vmem:[#allocation2 + $0x14e] sm:$0xff] }
 0x614   : > { %19959 = vmatprep.mubr.msk.f32.mxu0 %vm23396_vm0, %v28148_v16 }
 0x616   : > { %18669 = vmatmul.mubr.msk.f32.vlgmr.msra.gmra.mrb[80].mxu1 %vm2427_vm2, %v4788_v41  ;;  %v4817_v41 = vld [vmem:[#allocation2 + $0xfa] sm:$0xff] }
 0x617   : > { %19960 = vmatmul.mubr.msk.f32.gmra.mrb[14].mxu0 %vm2427_vm2, %v9575_v31  ;;  %18671 = vmatprep.mubr.msk.f32.mxu1 %vm23396_vm0, %v28148_v16  ;;  %v9604_v31 = vld [vmem:[#allocation2 + $0x156] sm:$0xff] }
 0x618   : > { %19962 = vmatprep.mubr.msk.f32.mxu0 %vm23396_vm0, %v28148_v16  ;;  %21259 = vmatpush3.bf16.msra.mxu1 %v21258_v53  ;;  %v10049_v53 = vld [vmem:[#allocation2 + $0x4f] sm:$0xff] }
 0x619   : > { %21260 = vmatprep.subr.bf16.mxu1 %v23398_v38 }
 0x61a   : > { %18672 = vmatmul.mubr.msk.f32.gmra.mrb[82].mxu1 %vm2427_vm2, %v4789_v63  ;;  %v4818_v63 = vld [vmem:[#allocation2 + $0x102] sm:$0xff] }
 0x61b   : > { %19963 = vmatmul.mubr.msk.f32.gmra.mrb[16].mxu0 %vm2427_vm2, %v9576_v42  ;;  %18674 = vmatprep.mubr.msk.f32.mxu1 %vm23396_vm0, %v28148_v16  ;;  %v9605_v42 = vld [vmem:[#allocation2 + $0x15e] sm:$0xff] }
 0x61c   : > { %19965 = vmatprep.mubr.msk.f32.mxu0 %vm23396_vm0, %v28148_v16 }
 0x61e   : > { %18675 = vmatmul.mubr.msk.f32.gmra.mrb[84].mxu1 %vm2427_vm2, %v4790_v35  ;;  %v4819_v35 = vld [vmem:[#allocation2 + $0x10a] sm:$0xff] }
 0x61f   : > { %19966 = vmatmul.mubr.msk.f32.gmra.mrb[18].mxu0 %vm2427_vm2, %v9577_v28  ;;  %18677 = vmatprep.mubr.msk.f32.mxu1 %vm23396_vm0, %v28148_v16  ;;  %v9606_v28 = vld [vmem:[#allocation2 + $0x166] sm:$0xff] }
 0x620   : > { %19968 = vmatprep.mubr.msk.f32.mxu0 %vm23396_vm0, %v28148_v16 }
 0x622   : > { %18678 = vmatmul.mubr.msk.f32.gmra.mrb[86].mxu1 %vm2427_vm2, %v4791_v21  ;;  %v9607_v21 = vld [vmem:[#allocation2 + $0x16e] sm:$0xff] }
 0x623   : > { %19969 = vmatmul.mubr.msk.f32.gmra.mrb[20].mxu0 %vm2427_vm2, %v9578_v49  ;;  %18680 = vmatprep.mubr.msk.f32.mxu1 %vm23396_vm0, %v28148_v16  ;;  %v4820_v49 = vld [vmem:[#allocation2 + $0x112] sm:$0xff] }
 0x624   : > { %19971 = vmatprep.mubr.msk.f32.mxu0 %vm23396_vm0, %v28148_v16 }
 0x626   : > { %18681 = vmatmul.mubr.msk.f32.gmra.mrb[88].mxu1 %vm2427_vm2, %v4792_v20  ;;  %v9608_v20 = vld [vmem:[#allocation2 + $0x176] sm:$0xf] }
 0x627   : > { %19972 = vmatmul.mubr.msk.f32.gmra.mrb[22].mxu0 %vm2427_vm2, %v9579_v10  ;;  %18683 = vmatprep.mubr.msk.f32.mxu1 %vm23396_vm0, %v28148_v16  ;;  %v4821_v10 = vld [vmem:[#allocation2 + $0x11a] sm:$0xff] }
 0x628   : > { %19974 = vmatprep.mubr.msk.f32.mxu0 %vm23396_vm0, %v28148_v16 }
 0x62a   : > { %18684 = vmatmul.mubr.msk.f32.gmra.mrb[90].mxu1 %vm2427_vm2, %v4793_v17  ;;  %v16088_v17 = vld [vmem:[%s28103_s4 + $0x110] sm:$0xff] }
 0x62b   : > { %19975 = vmatmul.mubr.msk.f32.gmra.mrb[24].mxu0 %vm2427_vm2, %v9580_v54  ;;  %18686 = vmatprep.mubr.msk.f32.mxu1 %vm23396_vm0, %v28148_v16  ;;  %v16089_v54 = vld [vmem:[%s28103_s4 + $0x118] sm:$0xff] }
 0x62c   : > { %19977 = vmatprep.mubr.msk.f32.mxu0 %vm23396_vm0, %v28148_v16 }
 0x62e   : > { %18687 = vmatmul.mubr.msk.f32.gmra.mrb[92].mxu1 %vm2427_vm2, %v4794_v56  ;;  %v21291_v56 = vpack.c.bf16 %v16089_v54, %v16088_v17  ;;  %v10073_v17 = vld [vmem:[#allocation2 + $0x10f] sm:$0xff]  ;;  %v5287_v54 = vld [vmem:[#allocation2 + $0xbb] sm:$0xff] }
 0x62f   : > { %19978 = vmatmul.mubr.msk.f32.gmra.mrb[26].mxu0 %vm2427_vm2, %v9581_v24  ;;  %18689 = vmatprep.mubr.msk.f32.mxu1 %vm23396_vm0, %v28148_v16  ;;  %v4822_v24 = vld [vmem:[#allocation2 + $0x122] sm:$0xff] }
 0x630   : > { %19980 = vmatprep.mubr.msk.f32.mxu0 %vm23396_vm0, %v28148_v16 }
 0x632   : > { %18690 = vmatmul.mubr.msk.f32.gmra.mrb[94].mxu1 %vm2427_vm2, %v4795_v50  ;;  %v10046_v50 = vld [vmem:[#allocation2 + $0x37] sm:$0xff] }
 0x633   : > { %19981 = vmatmul.mubr.msk.f32.gmra.mrb[28].mxu0 %vm2427_vm2, %v9582_v27  ;;  %18692 = vmatprep.mubr.msk.f32.mxu1 %vm23396_vm0, %v28148_v16  ;;  %v4823_v27 = vld [vmem:[#allocation2 + $0x12a] sm:$0xff] }
 0x634   : > { %19983 = vmatprep.mubr.msk.f32.mxu0 %vm23396_vm0, %v28148_v16 }
 0x636   : > { %18693 = vmatmul.mubr.msk.f32.gmra.mrb[96].mxu1 %vm2427_vm2, %v4796_v8  ;;  %v10047_v8 = vld [vmem:[#allocation2 + $0x3f] sm:$0xff] }
 0x637   : > { %19984 = vmatmul.mubr.msk.f32.gmra.mrb[30].mxu0 %vm2427_vm2, %v9583_v26  ;;  %18695 = vmatprep.mubr.msk.f32.mxu1 %vm23396_vm0, %v28148_v16  ;;  %v4824_v26 = vld [vmem:[#allocation2 + $0x132] sm:$0xff] }
 0x638   : > { %19986 = vmatprep.mubr.msk.f32.mxu0 %vm23396_vm0, %v28148_v16 }
 0x63a   : > { %18696 = vmatmul.mubr.msk.f32.gmra.mrb[98].mxu1 %vm2427_vm2, %v4797_v18  ;;  %v4826_v18 = vld [vmem:[#allocation2 + $0x142] sm:$0xff] }
 0x63b   : > { %19987 = vmatmul.mubr.msk.f32.gmra.mrb[32].mxu0 %vm2427_vm2, %v9584_v55  ;;  %18698 = vmatprep.mubr.msk.f32.mxu1 %vm23396_vm0, %v28148_v16  ;;  %v10050_v55 = vld [vmem:[#allocation2 + $0x57] sm:$0xff] }
 0x63c   : > { %19989 = vmatprep.mubr.msk.f32.mxu0 %vm23396_vm0, %v28148_v16 }
 0x63e   : > { %18699 = vmatmul.mubr.msk.f32.gmra.mrb[100].mxu1 %vm2427_vm2, %v4798_v51  ;;  %v4827_v51 = vld [vmem:[#allocation2 + $0x14a] sm:$0xff] }
 0x63f   : > { %19990 = vmatmul.mubr.msk.f32.gmra.mrb[34].mxu0 %vm2427_vm2, %v9585_v30  ;;  %18701 = vmatprep.mubr.msk.f32.mxu1 %vm23396_vm0, %v28148_v16  ;;  %v10051_v30 = vld [vmem:[#allocation2 + $0x5f] sm:$0xff] }
 0x640   : > { %19992 = vmatprep.mubr.msk.f32.mxu0 %vm23396_vm0, %v28148_v16 }
 0x642   : > { %18702 = vmatmul.mubr.msk.f32.gmra.mrb[102].mxu1 %vm2427_vm2, %v4799_v52  ;;  %v4828_v52 = vld [vmem:[#allocation2 + $0x152] sm:$0xf] }
 0x643   : > { %19993 = vmatmul.mubr.msk.f32.gmra.mrb[36].mxu0 %vm2427_vm2, %v9586_v22  ;;  %18704 = vmatprep.mubr.msk.f32.mxu1 %vm23396_vm0, %v28148_v16  ;;  %v10052_v22 = vld [vmem:[#allocation2 + $0x67] sm:$0xff] }
 0x644   : > { %19995 = vmatprep.mubr.msk.f32.mxu0 %vm23396_vm0, %v28148_v16 }
 0x646   : > { %18705 = vmatmul.mubr.msk.f32.gmra.mrb[104].mxu1 %vm2427_vm2, %v4800_v4  ;;  %v5266_v4 = vld [vmem:[#allocation2 + $0x13] sm:$0xff] }
 0x647   : > { %19996 = vmatmul.mubr.msk.f32.gmra.mrb[38].mxu0 %vm2427_vm2, %v9587_v11  ;;  %18707 = vmatprep.mubr.msk.f32.mxu1 %vm23396_vm0, %v28148_v16  ;;  %v10053_v11 = vld [vmem:[#allocation2 + $0x6f] sm:$0xff] }
 0x648   : > { %19998 = vmatprep.mubr.msk.f32.mxu0 %vm23396_vm0, %v28148_v16 }
 0x64a   : > { %18708 = vmatmul.mubr.msk.f32.gmra.mrb[106].mxu1 %vm2427_vm2, %v4801_v14  ;;  %v5267_v14 = vld [vmem:[#allocation2 + $0x1b] sm:$0xff] }
 0x64b   : > { %19999 = vmatmul.mubr.msk.f32.gmra.mrb[40].mxu0 %vm2427_vm2, %v9588_v39  ;;  %18710 = vmatprep.mubr.msk.f32.mxu1 %vm23396_vm0, %v28148_v16  ;;  %v10054_v39 = vld [vmem:[#allocation2 + $0x77] sm:$0xff] }
 0x64c   : > { %20001 = vmatprep.mubr.msk.f32.mxu0 %vm23396_vm0, %v28148_v16 }
 0x64e   : > { %18711 = vmatmul.mubr.msk.f32.gmra.mrb[108].mxu1 %vm2427_vm2, %v4802_v62  ;;  %v5268_v62 = vld [vmem:[#allocation2 + $0x23] sm:$0xff] }
 0x64f   : > { %20002 = vmatmul.mubr.msk.f32.gmra.mrb[42].mxu0 %vm2427_vm2, %v9589_v47  ;;  %18713 = vmatprep.mubr.msk.f32.mxu1 %vm23396_vm0, %v28148_v16  ;;  %v10055_v47 = vld [vmem:[#allocation2 + $0x7f] sm:$0xff] }
 0x650   : > { %20004 = vmatprep.mubr.msk.f32.mxu0 %vm23396_vm0, %v28148_v16 }
 0x652   : > { %18714 = vmatmul.mubr.msk.f32.gmra.mrb[110].mxu1 %vm2427_vm2, %v4803_v13  ;;  %v5269_v13 = vld [vmem:[#allocation2 + $0x2b] sm:$0xff] }
 0x653   : > { %20005 = vmatmul.mubr.msk.f32.gmra.mrb[44].mxu0 %vm2427_vm2, %v9590_v29  ;;  %18716 = vmatprep.mubr.msk.f32.mxu1 %vm23396_vm0, %v28148_v16  ;;  %v10056_v29 = vld [vmem:[#allocation2 + $0x87] sm:$0xff] }
 0x654   : > { %20007 = vmatprep.mubr.msk.f32.mxu0 %vm23396_vm0, %v28148_v16 }
 0x656   : > { %18717 = vmatmul.mubr.msk.f32.gmra.mrb[112].mxu1 %vm2427_vm2, %v4804_v48  ;;  %v5270_v48 = vld [vmem:[#allocation2 + $0x33] sm:$0xff] }
 0x657   : > { %20008 = vmatmul.mubr.msk.f32.gmra.mrb[46].mxu0 %vm2427_vm2, %v9591_v0  ;;  %18719 = vmatprep.mubr.msk.f32.mxu1 %vm23396_vm0, %v28148_v16  ;;  %v10057_v0 = vld [vmem:[#allocation2 + $0x8f] sm:$0xff] }
 0x658   : > { %20010 = vmatprep.mubr.msk.f32.mxu0 %vm23396_vm0, %v28148_v16 }
 0x65a   : > { %18720 = vmatmul.mubr.msk.f32.gmra.mrb[114].mxu1 %vm2427_vm2, %v4805_v33  ;;  %v5271_v33 = vld [vmem:[#allocation2 + $0x3b] sm:$0xff] }
 0x65b   : > { %20011 = vmatmul.mubr.msk.f32.gmra.mrb[48].mxu0 %vm2427_vm2, %v9592_v58  ;;  %18722 = vmatprep.mubr.msk.f32.mxu1 %vm23396_vm0, %v28148_v16  ;;  %v10058_v58 = vld [vmem:[#allocation2 + $0x97] sm:$0xff] }
 0x65c   : > { %20013 = vmatprep.mubr.msk.f32.mxu0 %vm23396_vm0, %v28148_v16 }
 0x65e   : > { %18723 = vmatmul.mubr.msk.f32.gmra.mrb[116].mxu1 %vm2427_vm2, %v4806_v32  ;;  %v5272_v32 = vld [vmem:[#allocation2 + $0x43] sm:$0xff] }
 0x65f   : > { %20014 = vmatmul.mubr.msk.f32.gmra.mrb[50].mxu0 %vm2427_vm2, %v9593_v5  ;;  %18725 = vmatprep.mubr.msk.f32.mxu1 %vm23396_vm0, %v28148_v16  ;;  %v10059_v5 = vld [vmem:[#allocation2 + $0x9f] sm:$0xff] }
 0x660   : > { %20016 = vmatprep.mubr.msk.f32.mxu0 %vm23396_vm0, %v28148_v16 }
 0x662   : > { %18726 = vmatmul.mubr.msk.f32.gmra.mrb[118].mxu1 %vm2427_vm2, %v4807_v3  ;;  %v5273_v3 = vld [vmem:[#allocation2 + $0x4b] sm:$0xff] }
 0x663   : > { %20017 = vmatmul.mubr.msk.f32.gmra.mrb[52].mxu0 %vm2427_vm2, %v9594_v34  ;;  %18728 = vmatprep.mubr.msk.f32.mxu1 %vm23396_vm0, %v28148_v16  ;;  %v10060_v34 = vld [vmem:[#allocation2 + $0xa7] sm:$0xff] }
 0x664   : > { %20019 = vmatprep.mubr.msk.f32.mxu0 %vm23396_vm0, %v28148_v16 }
 0x666   : > { %18729 = vmatmul.mubr.msk.f32.gmra.mrb[120].mxu1 %vm2427_vm2, %v4808_v40  ;;  %v5274_v40 = vld [vmem:[#allocation2 + $0x53] sm:$0xff] }
 0x667   : > { %20020 = vmatmul.mubr.msk.f32.gmra.mrb[54].mxu0 %vm2427_vm2, %v9595_v46  ;;  %18731 = vmatprep.mubr.msk.f32.mxu1 %vm23396_vm0, %v28148_v16  ;;  %v10061_v46 = vld [vmem:[#allocation2 + $0xaf] sm:$0xff] }
 0x668   : > { %20022 = vmatprep.mubr.msk.f32.mxu0 %vm23396_vm0, %v28148_v16 }
 0x66a   : > { %18732 = vmatmul.mubr.msk.f32.gmra.mrb[122].mxu1 %vm2427_vm2, %v4809_v43  ;;  %v15658_v43 = vld [vmem:[%s28103_s4 + $0x70] sm:$0xff] }
 0x66b   : > { %20023 = vmatmul.mubr.msk.f32.gmra.mrb[56].mxu0 %vm2427_vm2, %v9596_v23  ;;  %18734 = vmatprep.mubr.msk.f32.mxu1 %vm23396_vm0, %v28148_v16  ;;  %v15659_v23 = vld [vmem:[%s28103_s4 + $0x78] sm:$0xff] }
 0x66c   : > { %20025 = vmatprep.mubr.msk.f32.mxu0 %vm23396_vm0, %v28148_v16 }
 0x66e   : > { %18735 = vmatmul.mubr.msk.f32.gmra.mrb[124].mxu1 %vm2427_vm2, %v4810_v59  ;;  %v21261_v59 = vpack.c.bf16 %v15659_v23, %v15658_v43  ;;  %v10526_v43 = vld [vmem:[#allocation2 + $0x48] sm:$0xff]  ;;  %v5303_v23 = vld [vmem:[#allocation2 + $0x13b] sm:$0xff] }
 0x66f   : > { %20026 = vmatmul.mubr.msk.f32.gmra.mrb[58].mxu0 %vm2427_vm2, %v9597_v1  ;;  %18737 = vmatprep.mubr.msk.f32.mxu1 %vm23396_vm0, %v28148_v16  ;;  %v5275_v1 = vld [vmem:[#allocation2 + $0x5b] sm:$0xff] }
 0x670   : > { %20028 = vmatprep.mubr.msk.f32.mxu0 %vm23396_vm0, %v28148_v16 }
 0x672   : > { %18738 = vmatmul.mubr.msk.f32.gmra.mrb[126].mxu1 %vm2427_vm2, %v4811_v60  ;;  %v10062_v60 = vld [vmem:[#allocation2 + $0xb7] sm:$0xff] }
 0x673   : > { %20029 = vmatmul.mubr.msk.f32.gmra.mrb[60].mxu0 %vm2427_vm2, %v9598_v25  ;;  %18740 = vmatprep.mubr.msk.f32.mxu1 %vm23396_vm0, %v28148_v16  ;;  %v5276_v25 = vld [vmem:[#allocation2 + $0x63] sm:$0xff] }
 0x674   : > { %20031 = vmatprep.mubr.msk.f32.mxu0 %vm23396_vm0, %v28148_v16 }
 0x676   : > { %18741 = vmatmul.mubr.msk.f32.gmra.mrb[128].mxu1 %vm2427_vm2, %v4812_v9  ;;  %v10063_v9 = vld [vmem:[#allocation2 + $0xbf] sm:$0xff] }
 0x677   : > { %20032 = vmatmul.mubr.msk.f32.gmra.mrb[62].mxu0 %vm2427_vm2, %v9599_v15  ;;  %18743 = vmatprep.mubr.msk.f32.mxu1 %vm23396_vm0, %v28148_v16  ;;  %v5277_v15 = vld [vmem:[#allocation2 + $0x6b] sm:$0xff] }
 0x678   : > { %20034 = vmatprep.mubr.msk.f32.mxu0 %vm23396_vm0, %v28148_v16 }
 0x67a   : > { %18744 = vmatmul.mubr.msk.f32.gmra.mrb[130].mxu1 %vm2427_vm2, %v4813_v7  ;;  %v10064_v7 = vld [vmem:[#allocation2 + $0xc7] sm:$0xff] }
 0x67b   : > { %20035 = vmatmul.mubr.msk.f32.gmra.mrb[64].mxu0 %vm2427_vm2, %v9600_v36  ;;  %18746 = vmatprep.mubr.msk.f32.mxu1 %vm23396_vm0, %v28148_v16  ;;  %v5278_v36 = vld [vmem:[#allocation2 + $0x73] sm:$0xff] }
 0x67c   : > { %20037 = vmatprep.mubr.msk.f32.mxu0 %vm23396_vm0, %v28148_v16 }
 0x67e   : > { %18747 = vmatmul.mubr.msk.f32.gmra.mrb[132].mxu1 %vm2427_vm2, %v4814_v57  ;;  %v10065_v57 = vld [vmem:[#allocation2 + $0xcf] sm:$0xff] }
 0x67f   : > { %20038 = vmatmul.mubr.msk.f32.gmra.mrb[66].mxu0 %vm2427_vm2, %v9601_v37  ;;  %18749 = vmatprep.mubr.msk.f32.mxu1 %vm23396_vm0, %v28148_v16  ;;  %v5279_v37 = vld [vmem:[#allocation2 + $0x7b] sm:$0xff] }
 0x680   : > { %20040 = vmatprep.mubr.msk.f32.mxu0 %vm23396_vm0, %v28148_v16 }
 0x682   : > { %18750 = vmatmul.mubr.msk.f32.gmra.mrb[134].mxu1 %vm2427_vm2, %v4815_v2  ;;  %v10066_v2 = vld [vmem:[#allocation2 + $0xd7] sm:$0xff] }
 0x683   : > { %20041 = vmatmul.mubr.msk.f32.gmra.mrb[68].mxu0 %vm2427_vm2, %v9602_v45  ;;  %18752 = vmatprep.mubr.msk.f32.mxu1 %vm23396_vm0, %v28148_v16  ;;  %v5280_v45 = vld [vmem:[#allocation2 + $0x83] sm:$0xff] }
 0x684   : > { %20043 = vmatprep.mubr.msk.f32.mxu0 %vm23396_vm0, %v28148_v16 }
 0x686   : > { %18753 = vmatmul.mubr.msk.f32.gmra.mrb[136].mxu1 %vm2427_vm2, %v4816_v12  ;;  %v10067_v12 = vld [vmem:[#allocation2 + $0xdf] sm:$0xff] }
 0x687   : > { %20044 = vmatmul.mubr.msk.f32.gmra.mrb[70].mxu0 %vm2427_vm2, %v9603_v6  ;;  %18755 = vmatprep.mubr.msk.f32.mxu1 %vm23396_vm0, %v28148_v16  ;;  %v5281_v6 = vld [vmem:[#allocation2 + $0x8b] sm:$0xff] }
 0x688   : > { %20046 = vmatprep.mubr.msk.f32.mxu0 %vm23396_vm0, %v28148_v16 }
 0x68a   : > { %18756 = vmatmul.mubr.msk.f32.gmra.mrb[138].mxu1 %vm2427_vm2, %v4817_v41  ;;  %v10068_v41 = vld [vmem:[#allocation2 + $0xe7] sm:$0xff] }
 0x68b   : > { %20047 = vmatmul.mubr.msk.f32.gmra.mrb[72].mxu0 %vm2427_vm2, %v9604_v31  ;;  %18758 = vmatprep.mubr.msk.f32.mxu1 %vm23396_vm0, %v28148_v16  ;;  %v5282_v31 = vld [vmem:[#allocation2 + $0x93] sm:$0xff] }
 0x68c   : > { %20049 = vmatprep.mubr.msk.f32.mxu0 %vm23396_vm0, %v28148_v16 }
 0x68e   : > { %18759 = vmatmul.mubr.msk.f32.gmra.mrb[140].mxu1 %vm2427_vm2, %v4818_v63  ;;  %v10069_v63 = vld [vmem:[#allocation2 + $0xef] sm:$0xff] }
 0x68f   : > { %20050 = vmatmul.mubr.msk.f32.gmra.mrb[74].mxu0 %vm2427_vm2, %v9605_v42  ;;  %18761 = vmatprep.mubr.msk.f32.mxu1 %vm23396_vm0, %v28148_v16  ;;  %v5283_v42 = vld [vmem:[#allocation2 + $0x9b] sm:$0xff] }
 0x690   : > { %20052 = vmatprep.mubr.msk.f32.mxu0 %vm23396_vm0, %v28148_v16 }
 0x692   : > { %18762 = vmatmul.mubr.msk.f32.gmra.mrb[142].mxu1 %vm2427_vm2, %v4819_v35  ;;  %v10070_v35 = vld [vmem:[#allocation2 + $0xf7] sm:$0xff] }
 0x693   : > { %20053 = vmatmul.mubr.msk.f32.gmra.mrb[76].mxu0 %vm2427_vm2, %v9606_v28  ;;  %18764 = vmatprep.mubr.msk.f32.mxu1 %vm23396_vm0, %v28148_v16  ;;  %v5284_v28 = vld [vmem:[#allocation2 + $0xa3] sm:$0xff] }
 0x694   : > { %20055 = vmatprep.mubr.msk.f32.mxu0 %vm23396_vm0, %v28148_v16 }
 0x696   : > { %18765 = vmatmul.mubr.msk.f32.gmra.mrb[144].mxu1 %vm2427_vm2, %v4820_v49  ;;  %v5285_v49 = vld [vmem:[#allocation2 + $0xab] sm:$0xff] }
 0x697   : > { %20056 = vmatmul.mubr.msk.f32.gmra.mrb[78].mxu0 %vm2427_vm2, %v9607_v21  ;;  %18767 = vmatprep.mubr.msk.f32.mxu1 %vm23396_vm0, %v28148_v16  ;;  %v10071_v21 = vld [vmem:[#allocation2 + $0xff] sm:$0xff] }
 0x698   : > { %20058 = vmatprep.mubr.msk.f32.mxu0 %vm23396_vm0, %v28148_v16 }
 0x69a   : > { %18768 = vmatmul.mubr.msk.f32.gmra.mrb[146].mxu1 %vm2427_vm2, %v4821_v10  ;;  %v5286_v10 = vld [vmem:[#allocation2 + $0xb3] sm:$0xff] }
 0x69b   : > { %20059 = vmatmul.mubr.msk.f32.gmra.mrb[80].mxu0 %vm2427_vm2, %v9608_v20  ;;  %18770 = vmatprep.mubr.msk.f32.mxu1 %vm23396_vm0, %v28148_v16  ;;  %v10072_v20 = vld [vmem:[#allocation2 + $0x107] sm:$0xff] }
 0x69c   : > { %20065 = vmatprep.mubr.msk.f32.mxu0 %vm23396_vm0, %v28148_v16 }
 0x69e   : > { %18771 = vmatmul.mubr.msk.f32.gmra.mrb[148].mxu1 %vm2427_vm2, %v4822_v24  ;;  %v5288_v24 = vld [vmem:[#allocation2 + $0xc3] sm:$0xff] }
 0x69f   : > { %20066 = vmatmul.mubr.msk.f32.vlgmr.msra.gmra.mrb[0].mxu0 %vm2427_vm2, %v10046_v50  ;;  %18773 = vmatprep.mubr.msk.f32.mxu1 %vm23396_vm0, %v28148_v16  ;;  %v10075_v50 = vld [vmem:[#allocation2 + $0x11f] sm:$0xff] }
 0x6a0   : > { %20068 = vmatprep.mubr.msk.f32.mxu0 %vm23396_vm0, %v28148_v16  ;;  %21292 = vmatpush3.bf16.msra.mxu0 %v21291_v56  ;;  %v10074_v56 = vld [vmem:[#allocation2 + $0x117] sm:$0xff] }
 0x6a1   : > { %21293 = vmatprep.subr.bf16.mxu0 %v23398_v38 }
 0x6a2   : > { %18774 = vmatmul.mubr.msk.f32.gmra.mrb[150].mxu1 %vm2427_vm2, %v4823_v27  ;;  %v5289_v27 = vld [vmem:[#allocation2 + $0xcb] sm:$0xff] }
 0x6a3   : > { %20069 = vmatmul.mubr.msk.f32.gmra.mrb[2].mxu0 %vm2427_vm2, %v10047_v8  ;;  %18776 = vmatprep.mubr.msk.f32.mxu1 %vm23396_vm0, %v28148_v16  ;;  %v10076_v8 = vld [vmem:[#allocation2 + $0x127] sm:$0xff] }
 0x6a4   : > { %20071 = vmatprep.mubr.msk.f32.mxu0 %vm23396_vm0, %v28148_v16 }
 0x6a6   : > { %18777 = vmatmul.mubr.msk.f32.gmra.mrb[152].mxu1 %vm2427_vm2, %v4824_v26  ;;  %v5290_v26 = vld [vmem:[#allocation2 + $0xd3] sm:$0xff] }
 0x6a7   : > { %20072 = vmatmul.mubr.msk.f32.gmra.mrb[4].mxu0 %vm2427_vm2, %v10048_v19  ;;  %18779 = vmatprep.mubr.msk.f32.mxu1 %vm23396_vm0, %v28148_v16  ;;  %v10077_v19 = vld [vmem:[#allocation2 + $0x12f] sm:$0xff] }
 0x6a8   : > { %20074 = vmatprep.mubr.msk.f32.mxu0 %vm23396_vm0, %v28148_v16 }
 0x6aa   : > { %18780 = vmatmul.mubr.msk.f32.gmra.mrb[154].mxu1 %vm2427_vm2, %v4825_v61  ;;  %v5291_v61 = vld [vmem:[#allocation2 + $0xdb] sm:$0xff] }
 0x6ab   : > { %20075 = vmatmul.mubr.msk.f32.gmra.mrb[6].mxu0 %vm2427_vm2, %v10049_v53  ;;  %18782 = vmatprep.mubr.msk.f32.mxu1 %vm23396_vm0, %v28148_v16  ;;  %v10078_v53 = vld [vmem:[#allocation2 + $0x137] sm:$0xff] }
 0x6ac   : > { %20077 = vmatprep.mubr.msk.f32.mxu0 %vm23396_vm0, %v28148_v16 }
 0x6ae   : > { %18783 = vmatmul.mubr.msk.f32.gmra.mrb[156].mxu1 %vm2427_vm2, %v4826_v18  ;;  %v5292_v18 = vld [vmem:[#allocation2 + $0xe3] sm:$0xff] }
 0x6af   : > { %20078 = vmatmul.mubr.msk.f32.gmra.mrb[8].mxu0 %vm2427_vm2, %v10050_v55  ;;  %18785 = vmatprep.mubr.msk.f32.mxu1 %vm23396_vm0, %v28148_v16  ;;  %v10079_v55 = vld [vmem:[#allocation2 + $0x13f] sm:$0xff] }
 0x6b0   : > { %20080 = vmatprep.mubr.msk.f32.mxu0 %vm23396_vm0, %v28148_v16 }
 0x6b2   : > { %18786 = vmatmul.mubr.msk.f32.gmra.mrb[158].mxu1 %vm2427_vm2, %v4827_v51  ;;  %v5293_v51 = vld [vmem:[#allocation2 + $0xeb] sm:$0xff] }
 0x6b3   : > { %20081 = vmatmul.mubr.msk.f32.gmra.mrb[10].mxu0 %vm2427_vm2, %v10051_v30  ;;  %18788 = vmatprep.mubr.msk.f32.mxu1 %vm23396_vm0, %v28148_v16  ;;  %v10080_v30 = vld [vmem:[#allocation2 + $0x147] sm:$0xff] }
 0x6b4   : > { %20083 = vmatprep.mubr.msk.f32.mxu0 %vm23396_vm0, %v28148_v16 }
 0x6b6   : > { %18789 = vmatmul.mubr.msk.f32.gmra.mrb[160].mxu1 %vm2427_vm2, %v4828_v52  ;;  %v5294_v52 = vld [vmem:[#allocation2 + $0xf3] sm:$0xff] }
 0x6b7   : > { %20084 = vmatmul.mubr.msk.f32.gmra.mrb[12].mxu0 %vm2427_vm2, %v10052_v22  ;;  %18795 = vmatprep.mubr.msk.f32.mxu1 %vm23396_vm0, %v28148_v16  ;;  %v10081_v22 = vld [vmem:[#allocation2 + $0x14f] sm:$0xff] }
 0x6b8   : > { %20086 = vmatprep.mubr.msk.f32.mxu0 %vm23396_vm0, %v28148_v16 }
 0x6ba   : > { %18796 = vmatmul.mubr.msk.f32.vlgmr.msra.gmra.mrb[80].mxu1 %vm2427_vm2, %v5266_v4  ;;  %v5295_v4 = vld [vmem:[#allocation2 + $0xfb] sm:$0xff] }
 0x6bb   : > { %20087 = vmatmul.mubr.msk.f32.gmra.mrb[14].mxu0 %vm2427_vm2, %v10053_v11  ;;  %18798 = vmatprep.mubr.msk.f32.mxu1 %vm23396_vm0, %v28148_v16  ;;  %v10082_v11 = vld [vmem:[#allocation2 + $0x157] sm:$0xff] }
 0x6bc   : > { %20089 = vmatprep.mubr.msk.f32.mxu0 %vm23396_vm0, %v28148_v16  ;;  %21262 = vmatpush3.bf16.msra.mxu1 %v21261_v59  ;;  %v10527_v59 = vld [vmem:[#allocation2 + $0x50] sm:$0xff] }
 0x6bd   : > { %21263 = vmatprep.subr.bf16.mxu1 %v23398_v38 }
 0x6be   : > { %18799 = vmatmul.mubr.msk.f32.gmra.mrb[82].mxu1 %vm2427_vm2, %v5267_v14  ;;  %v5296_v14 = vld [vmem:[#allocation2 + $0x103] sm:$0xff] }
 0x6bf   : > { %20090 = vmatmul.mubr.msk.f32.gmra.mrb[16].mxu0 %vm2427_vm2, %v10054_v39  ;;  %18801 = vmatprep.mubr.msk.f32.mxu1 %vm23396_vm0, %v28148_v16  ;;  %v10083_v39 = vld [vmem:[#allocation2 + $0x15f] sm:$0xff] }
 0x6c0   : > { %20092 = vmatprep.mubr.msk.f32.mxu0 %vm23396_vm0, %v28148_v16 }
 0x6c2   : > { %18802 = vmatmul.mubr.msk.f32.gmra.mrb[84].mxu1 %vm2427_vm2, %v5268_v62  ;;  %v5297_v62 = vld [vmem:[#allocation2 + $0x10b] sm:$0xff] }
 0x6c3   : > { %20093 = vmatmul.mubr.msk.f32.gmra.mrb[18].mxu0 %vm2427_vm2, %v10055_v47  ;;  %18804 = vmatprep.mubr.msk.f32.mxu1 %vm23396_vm0, %v28148_v16  ;;  %v10084_v47 = vld [vmem:[#allocation2 + $0x167] sm:$0xff] }
 0x6c4   : > { %20095 = vmatprep.mubr.msk.f32.mxu0 %vm23396_vm0, %v28148_v16 }
 0x6c6   : > { %18805 = vmatmul.mubr.msk.f32.gmra.mrb[86].mxu1 %vm2427_vm2, %v5269_v13  ;;  %v10085_v13 = vld [vmem:[#allocation2 + $0x16f] sm:$0xff] }
 0x6c7   : > { %20096 = vmatmul.mubr.msk.f32.gmra.mrb[20].mxu0 %vm2427_vm2, %v10056_v29  ;;  %18807 = vmatprep.mubr.msk.f32.mxu1 %vm23396_vm0, %v28148_v16  ;;  %v5298_v29 = vld [vmem:[#allocation2 + $0x113] sm:$0xff] }
 0x6c8   : > { %20098 = vmatprep.mubr.msk.f32.mxu0 %vm23396_vm0, %v28148_v16 }
 0x6ca   : > { %18808 = vmatmul.mubr.msk.f32.gmra.mrb[88].mxu1 %vm2427_vm2, %v5270_v48  ;;  %v10086_v48 = vld [vmem:[#allocation2 + $0x177] sm:$0xf] }
 0x6cb   : > { %20099 = vmatmul.mubr.msk.f32.gmra.mrb[22].mxu0 %vm2427_vm2, %v10057_v0  ;;  %18810 = vmatprep.mubr.msk.f32.mxu1 %vm23396_vm0, %v28148_v16  ;;  %v5299_v0 = vld [vmem:[#allocation2 + $0x11b] sm:$0xff] }
 0x6cc   : > { %20101 = vmatprep.mubr.msk.f32.mxu0 %vm23396_vm0, %v28148_v16 }
 0x6ce   : > { %18811 = vmatmul.mubr.msk.f32.gmra.mrb[90].mxu1 %vm2427_vm2, %v5271_v33  ;;  %v16131_v33 = vld [vmem:[%s28103_s4 + $0x120] sm:$0xff] }
 0x6cf   : > { %20102 = vmatmul.mubr.msk.f32.gmra.mrb[24].mxu0 %vm2427_vm2, %v10058_v58  ;;  %18813 = vmatprep.mubr.msk.f32.mxu1 %vm23396_vm0, %v28148_v16  ;;  %v16132_v58 = vld [vmem:[%s28103_s4 + $0x128] sm:$0xff] }
 0x6d0   : > { %20104 = vmatprep.mubr.msk.f32.mxu0 %vm23396_vm0, %v28148_v16 }
 0x6d2   : > { %18814 = vmatmul.mubr.msk.f32.gmra.mrb[92].mxu1 %vm2427_vm2, %v5272_v32  ;;  %v21294_v32 = vpack.c.bf16 %v16132_v58, %v16131_v33  ;;  %v10551_v33 = vld [vmem:[#allocation2 + $0x110] sm:$0xff]  ;;  %v5765_v58 = vld [vmem:[#allocation2 + $0xbc] sm:$0xff] }
 0x6d3   : > { %20105 = vmatmul.mubr.msk.f32.gmra.mrb[26].mxu0 %vm2427_vm2, %v10059_v5  ;;  %18816 = vmatprep.mubr.msk.f32.mxu1 %vm23396_vm0, %v28148_v16  ;;  %v5300_v5 = vld [vmem:[#allocation2 + $0x123] sm:$0xff] }
 0x6d4   : > { %20107 = vmatprep.mubr.msk.f32.mxu0 %vm23396_vm0, %v28148_v16 }
 0x6d6   : > { %18817 = vmatmul.mubr.msk.f32.gmra.mrb[94].mxu1 %vm2427_vm2, %v5273_v3  ;;  %v10524_v3 = vld [vmem:[#allocation2 + $0x38] sm:$0xff] }
 0x6d7   : > { %20108 = vmatmul.mubr.msk.f32.gmra.mrb[28].mxu0 %vm2427_vm2, %v10060_v34  ;;  %18819 = vmatprep.mubr.msk.f32.mxu1 %vm23396_vm0, %v28148_v16  ;;  %v5301_v34 = vld [vmem:[#allocation2 + $0x12b] sm:$0xff] }
 0x6d8   : > { %20110 = vmatprep.mubr.msk.f32.mxu0 %vm23396_vm0, %v28148_v16 }
 0x6da   : > { %18820 = vmatmul.mubr.msk.f32.gmra.mrb[96].mxu1 %vm2427_vm2, %v5274_v40  ;;  %v10525_v40 = vld [vmem:[#allocation2 + $0x40] sm:$0xff] }
 0x6db   : > { %20111 = vmatmul.mubr.msk.f32.gmra.mrb[30].mxu0 %vm2427_vm2, %v10061_v46  ;;  %18822 = vmatprep.mubr.msk.f32.mxu1 %vm23396_vm0, %v28148_v16  ;;  %v5302_v46 = vld [vmem:[#allocation2 + $0x133] sm:$0xff] }
 0x6dc   : > { %20113 = vmatprep.mubr.msk.f32.mxu0 %vm23396_vm0, %v28148_v16 }
 0x6de   : > { %18823 = vmatmul.mubr.msk.f32.gmra.mrb[98].mxu1 %vm2427_vm2, %v5275_v1  ;;  %v5304_v1 = vld [vmem:[#allocation2 + $0x143] sm:$0xff] }
 0x6df   : > { %20114 = vmatmul.mubr.msk.f32.gmra.mrb[32].mxu0 %vm2427_vm2, %v10062_v60  ;;  %18825 = vmatprep.mubr.msk.f32.mxu1 %vm23396_vm0, %v28148_v16  ;;  %v10528_v60 = vld [vmem:[#allocation2 + $0x58] sm:$0xff] }
 0x6e0   : > { %20116 = vmatprep.mubr.msk.f32.mxu0 %vm23396_vm0, %v28148_v16 }
 0x6e2   : > { %18826 = vmatmul.mubr.msk.f32.gmra.mrb[100].mxu1 %vm2427_vm2, %v5276_v25  ;;  %v5305_v25 = vld [vmem:[#allocation2 + $0x14b] sm:$0xff] }
 0x6e3   : > { %20117 = vmatmul.mubr.msk.f32.gmra.mrb[34].mxu0 %vm2427_vm2, %v10063_v9  ;;  %18828 = vmatprep.mubr.msk.f32.mxu1 %vm23396_vm0, %v28148_v16  ;;  %v10529_v9 = vld [vmem:[#allocation2 + $0x60] sm:$0xff] }
 0x6e4   : > { %20119 = vmatprep.mubr.msk.f32.mxu0 %vm23396_vm0, %v28148_v16 }
 0x6e6   : > { %18829 = vmatmul.mubr.msk.f32.gmra.mrb[102].mxu1 %vm2427_vm2, %v5277_v15  ;;  %v5306_v15 = vld [vmem:[#allocation2 + $0x153] sm:$0xf] }
 0x6e7   : > { %20120 = vmatmul.mubr.msk.f32.gmra.mrb[36].mxu0 %vm2427_vm2, %v10064_v7  ;;  %18831 = vmatprep.mubr.msk.f32.mxu1 %vm23396_vm0, %v28148_v16  ;;  %v10530_v7 = vld [vmem:[#allocation2 + $0x68] sm:$0xff] }
 0x6e8   : > { %20122 = vmatprep.mubr.msk.f32.mxu0 %vm23396_vm0, %v28148_v16 }
 0x6ea   : > { %18832 = vmatmul.mubr.msk.f32.gmra.mrb[104].mxu1 %vm2427_vm2, %v5278_v36  ;;  %v5744_v36 = vld [vmem:[#allocation2 + $0x14] sm:$0xff] }
 0x6eb   : > { %20123 = vmatmul.mubr.msk.f32.gmra.mrb[38].mxu0 %vm2427_vm2, %v10065_v57  ;;  %18834 = vmatprep.mubr.msk.f32.mxu1 %vm23396_vm0, %v28148_v16  ;;  %v10531_v57 = vld [vmem:[#allocation2 + $0x70] sm:$0xff] }
 0x6ec   : > { %20125 = vmatprep.mubr.msk.f32.mxu0 %vm23396_vm0, %v28148_v16 }
 0x6ee   : > { %18835 = vmatmul.mubr.msk.f32.gmra.mrb[106].mxu1 %vm2427_vm2, %v5279_v37  ;;  %v5745_v37 = vld [vmem:[#allocation2 + $0x1c] sm:$0xff] }
 0x6ef   : > { %20126 = vmatmul.mubr.msk.f32.gmra.mrb[40].mxu0 %vm2427_vm2, %v10066_v2  ;;  %18837 = vmatprep.mubr.msk.f32.mxu1 %vm23396_vm0, %v28148_v16  ;;  %v10532_v2 = vld [vmem:[#allocation2 + $0x78] sm:$0xff] }
 0x6f0   : > { %20128 = vmatprep.mubr.msk.f32.mxu0 %vm23396_vm0, %v28148_v16 }
 0x6f2   : > { %18838 = vmatmul.mubr.msk.f32.gmra.mrb[108].mxu1 %vm2427_vm2, %v5280_v45  ;;  %v5746_v45 = vld [vmem:[#allocation2 + $0x24] sm:$0xff] }
 0x6f3   : > { %20129 = vmatmul.mubr.msk.f32.gmra.mrb[42].mxu0 %vm2427_vm2, %v10067_v12  ;;  %18840 = vmatprep.mubr.msk.f32.mxu1 %vm23396_vm0, %v28148_v16  ;;  %v10533_v12 = vld [vmem:[#allocation2 + $0x80] sm:$0xff] }
 0x6f4   : > { %20131 = vmatprep.mubr.msk.f32.mxu0 %vm23396_vm0, %v28148_v16 }
 0x6f6   : > { %18841 = vmatmul.mubr.msk.f32.gmra.mrb[110].mxu1 %vm2427_vm2, %v5281_v6  ;;  %v5747_v6 = vld [vmem:[#allocation2 + $0x2c] sm:$0xff] }
 0x6f7   : > { %20132 = vmatmul.mubr.msk.f32.gmra.mrb[44].mxu0 %vm2427_vm2, %v10068_v41  ;;  %18843 = vmatprep.mubr.msk.f32.mxu1 %vm23396_vm0, %v28148_v16  ;;  %v10534_v41 = vld [vmem:[#allocation2 + $0x88] sm:$0xff] }
 0x6f8   : > { %20134 = vmatprep.mubr.msk.f32.mxu0 %vm23396_vm0, %v28148_v16 }
 0x6fa   : > { %18844 = vmatmul.mubr.msk.f32.gmra.mrb[112].mxu1 %vm2427_vm2, %v5282_v31  ;;  %v5748_v31 = vld [vmem:[#allocation2 + $0x34] sm:$0xff] }
 0x6fb   : > { %20135 = vmatmul.mubr.msk.f32.gmra.mrb[46].mxu0 %vm2427_vm2, %v10069_v63  ;;  %18846 = vmatprep.mubr.msk.f32.mxu1 %vm23396_vm0, %v28148_v16  ;;  %v10535_v63 = vld [vmem:[#allocation2 + $0x90] sm:$0xff] }
 0x6fc   : > { %20137 = vmatprep.mubr.msk.f32.mxu0 %vm23396_vm0, %v28148_v16 }
 0x6fe   : > { %18847 = vmatmul.mubr.msk.f32.gmra.mrb[114].mxu1 %vm2427_vm2, %v5283_v42  ;;  %v5749_v42 = vld [vmem:[#allocation2 + $0x3c] sm:$0xff] }
 0x6ff   : > { %20138 = vmatmul.mubr.msk.f32.gmra.mrb[48].mxu0 %vm2427_vm2, %v10070_v35  ;;  %18849 = vmatprep.mubr.msk.f32.mxu1 %vm23396_vm0, %v28148_v16  ;;  %v10536_v35 = vld [vmem:[#allocation2 + $0x98] sm:$0xff] }
 0x700   : > { %20140 = vmatprep.mubr.msk.f32.mxu0 %vm23396_vm0, %v28148_v16 }
 0x702   : > { %18850 = vmatmul.mubr.msk.f32.gmra.mrb[116].mxu1 %vm2427_vm2, %v5284_v28  ;;  %v5750_v28 = vld [vmem:[#allocation2 + $0x44] sm:$0xff] }
 0x703   : > { %20141 = vmatmul.mubr.msk.f32.gmra.mrb[50].mxu0 %vm2427_vm2, %v10071_v21  ;;  %18852 = vmatprep.mubr.msk.f32.mxu1 %vm23396_vm0, %v28148_v16  ;;  %v10537_v21 = vld [vmem:[#allocation2 + $0xa0] sm:$0xff] }
 0x704   : > { %20143 = vmatprep.mubr.msk.f32.mxu0 %vm23396_vm0, %v28148_v16 }
 0x706   : > { %18853 = vmatmul.mubr.msk.f32.gmra.mrb[118].mxu1 %vm2427_vm2, %v5285_v49  ;;  %v5751_v49 = vld [vmem:[#allocation2 + $0x4c] sm:$0xff] }
 0x707   : > { %20144 = vmatmul.mubr.msk.f32.gmra.mrb[52].mxu0 %vm2427_vm2, %v10072_v20  ;;  %18855 = vmatprep.mubr.msk.f32.mxu1 %vm23396_vm0, %v28148_v16  ;;  %v10538_v20 = vld [vmem:[#allocation2 + $0xa8] sm:$0xff] }
 0x708   : > { %20146 = vmatprep.mubr.msk.f32.mxu0 %vm23396_vm0, %v28148_v16 }
 0x70a   : > { %18856 = vmatmul.mubr.msk.f32.gmra.mrb[120].mxu1 %vm2427_vm2, %v5286_v10  ;;  %v5752_v10 = vld [vmem:[#allocation2 + $0x54] sm:$0xff] }
 0x70b   : > { %20147 = vmatmul.mubr.msk.f32.gmra.mrb[54].mxu0 %vm2427_vm2, %v10073_v17  ;;  %18858 = vmatprep.mubr.msk.f32.mxu1 %vm23396_vm0, %v28148_v16  ;;  %v10539_v17 = vld [vmem:[#allocation2 + $0xb0] sm:$0xff] }
 0x70c   : > { %20149 = vmatprep.mubr.msk.f32.mxu0 %vm23396_vm0, %v28148_v16 }
 0x70e   : > { %18859 = vmatmul.mubr.msk.f32.gmra.mrb[122].mxu1 %vm2427_vm2, %v5287_v54  ;;  %v15701_v54 = vld [vmem:[%s28103_s4 + $0x80] sm:$0xff] }
 0x70f   : > { %20150 = vmatmul.mubr.msk.f32.gmra.mrb[56].mxu0 %vm2427_vm2, %v10074_v56  ;;  %18861 = vmatprep.mubr.msk.f32.mxu1 %vm23396_vm0, %v28148_v16  ;;  %v15702_v56 = vld [vmem:[%s28103_s4 + $0x88] sm:$0xff] }
 0x710   : > { %20152 = vmatprep.mubr.msk.f32.mxu0 %vm23396_vm0, %v28148_v16 }
 0x712   : > { %18862 = vmatmul.mubr.msk.f32.gmra.mrb[124].mxu1 %vm2427_vm2, %v5288_v24  ;;  %v21264_v24 = vpack.c.bf16 %v15702_v56, %v15701_v54  ;;  %v11004_v54 = vld [vmem:[#allocation2 + $0x49] sm:$0xff]  ;;  %v5781_v56 = vld [vmem:[#allocation2 + $0x13c] sm:$0xff] }
 0x713   : > { %20153 = vmatmul.mubr.msk.f32.gmra.mrb[58].mxu0 %vm2427_vm2, %v10075_v50  ;;  %18864 = vmatprep.mubr.msk.f32.mxu1 %vm23396_vm0, %v28148_v16  ;;  %v5753_v50 = vld [vmem:[#allocation2 + $0x5c] sm:$0xff] }
 0x714   : > { %20155 = vmatprep.mubr.msk.f32.mxu0 %vm23396_vm0, %v28148_v16 }
 0x716   : > { %18865 = vmatmul.mubr.msk.f32.gmra.mrb[126].mxu1 %vm2427_vm2, %v5289_v27  ;;  %v10540_v27 = vld [vmem:[#allocation2 + $0xb8] sm:$0xff] }
 0x717   : > { %20156 = vmatmul.mubr.msk.f32.gmra.mrb[60].mxu0 %vm2427_vm2, %v10076_v8  ;;  %18867 = vmatprep.mubr.msk.f32.mxu1 %vm23396_vm0, %v28148_v16  ;;  %v5754_v8 = vld [vmem:[#allocation2 + $0x64] sm:$0xff] }
 0x718   : > { %20158 = vmatprep.mubr.msk.f32.mxu0 %vm23396_vm0, %v28148_v16 }
 0x71a   : > { %18868 = vmatmul.mubr.msk.f32.gmra.mrb[128].mxu1 %vm2427_vm2, %v5290_v26  ;;  %v10541_v26 = vld [vmem:[#allocation2 + $0xc0] sm:$0xff] }
 0x71b   : > { %20159 = vmatmul.mubr.msk.f32.gmra.mrb[62].mxu0 %vm2427_vm2, %v10077_v19  ;;  %18870 = vmatprep.mubr.msk.f32.mxu1 %vm23396_vm0, %v28148_v16  ;;  %v5755_v19 = vld [vmem:[#allocation2 + $0x6c] sm:$0xff] }
 0x71c   : > { %20161 = vmatprep.mubr.msk.f32.mxu0 %vm23396_vm0, %v28148_v16 }
 0x71e   : > { %18871 = vmatmul.mubr.msk.f32.gmra.mrb[130].mxu1 %vm2427_vm2, %v5291_v61  ;;  %v10542_v61 = vld [vmem:[#allocation2 + $0xc8] sm:$0xff] }
 0x71f   : > { %20162 = vmatmul.mubr.msk.f32.gmra.mrb[64].mxu0 %vm2427_vm2, %v10078_v53  ;;  %18873 = vmatprep.mubr.msk.f32.mxu1 %vm23396_vm0, %v28148_v16  ;;  %v5756_v53 = vld [vmem:[#allocation2 + $0x74] sm:$0xff] }
 0x720   : > { %20164 = vmatprep.mubr.msk.f32.mxu0 %vm23396_vm0, %v28148_v16 }
 0x722   : > { %18874 = vmatmul.mubr.msk.f32.gmra.mrb[132].mxu1 %vm2427_vm2, %v5292_v18  ;;  %v10543_v18 = vld [vmem:[#allocation2 + $0xd0] sm:$0xff] }
 0x723   : > { %20165 = vmatmul.mubr.msk.f32.gmra.mrb[66].mxu0 %vm2427_vm2, %v10079_v55  ;;  %18876 = vmatprep.mubr.msk.f32.mxu1 %vm23396_vm0, %v28148_v16  ;;  %v5757_v55 = vld [vmem:[#allocation2 + $0x7c] sm:$0xff] }
 0x724   : > { %20167 = vmatprep.mubr.msk.f32.mxu0 %vm23396_vm0, %v28148_v16 }
 0x726   : > { %18877 = vmatmul.mubr.msk.f32.gmra.mrb[134].mxu1 %vm2427_vm2, %v5293_v51  ;;  %v10544_v51 = vld [vmem:[#allocation2 + $0xd8] sm:$0xff] }
 0x727   : > { %20168 = vmatmul.mubr.msk.f32.gmra.mrb[68].mxu0 %vm2427_vm2, %v10080_v30  ;;  %18879 = vmatprep.mubr.msk.f32.mxu1 %vm23396_vm0, %v28148_v16  ;;  %v5758_v30 = vld [vmem:[#allocation2 + $0x84] sm:$0xff] }
 0x728   : > { %20170 = vmatprep.mubr.msk.f32.mxu0 %vm23396_vm0, %v28148_v16 }
 0x72a   : > { %18880 = vmatmul.mubr.msk.f32.gmra.mrb[136].mxu1 %vm2427_vm2, %v5294_v52  ;;  %v10545_v52 = vld [vmem:[#allocation2 + $0xe0] sm:$0xff] }
 0x72b   : > { %20171 = vmatmul.mubr.msk.f32.gmra.mrb[70].mxu0 %vm2427_vm2, %v10081_v22  ;;  %18882 = vmatprep.mubr.msk.f32.mxu1 %vm23396_vm0, %v28148_v16  ;;  %v5759_v22 = vld [vmem:[#allocation2 + $0x8c] sm:$0xff] }
 0x72c   : > { %20173 = vmatprep.mubr.msk.f32.mxu0 %vm23396_vm0, %v28148_v16 }
 0x72e   : > { %18883 = vmatmul.mubr.msk.f32.gmra.mrb[138].mxu1 %vm2427_vm2, %v5295_v4  ;;  %v10546_v4 = vld [vmem:[#allocation2 + $0xe8] sm:$0xff] }
 0x72f   : > { %20174 = vmatmul.mubr.msk.f32.gmra.mrb[72].mxu0 %vm2427_vm2, %v10082_v11  ;;  %18885 = vmatprep.mubr.msk.f32.mxu1 %vm23396_vm0, %v28148_v16  ;;  %v5760_v11 = vld [vmem:[#allocation2 + $0x94] sm:$0xff] }
 0x730   : > { %20176 = vmatprep.mubr.msk.f32.mxu0 %vm23396_vm0, %v28148_v16 }
 0x732   : > { %18886 = vmatmul.mubr.msk.f32.gmra.mrb[140].mxu1 %vm2427_vm2, %v5296_v14  ;;  %v10547_v14 = vld [vmem:[#allocation2 + $0xf0] sm:$0xff] }
 0x733   : > { %20177 = vmatmul.mubr.msk.f32.gmra.mrb[74].mxu0 %vm2427_vm2, %v10083_v39  ;;  %18888 = vmatprep.mubr.msk.f32.mxu1 %vm23396_vm0, %v28148_v16  ;;  %v5761_v39 = vld [vmem:[#allocation2 + $0x9c] sm:$0xff] }
 0x734   : > { %20179 = vmatprep.mubr.msk.f32.mxu0 %vm23396_vm0, %v28148_v16 }
 0x736   : > { %18889 = vmatmul.mubr.msk.f32.gmra.mrb[142].mxu1 %vm2427_vm2, %v5297_v62  ;;  %v10548_v62 = vld [vmem:[#allocation2 + $0xf8] sm:$0xff] }
 0x737   : > { %20180 = vmatmul.mubr.msk.f32.gmra.mrb[76].mxu0 %vm2427_vm2, %v10084_v47  ;;  %18891 = vmatprep.mubr.msk.f32.mxu1 %vm23396_vm0, %v28148_v16  ;;  %v5762_v47 = vld [vmem:[#allocation2 + $0xa4] sm:$0xff] }
 0x738   : > { %20182 = vmatprep.mubr.msk.f32.mxu0 %vm23396_vm0, %v28148_v16 }
 0x73a   : > { %18892 = vmatmul.mubr.msk.f32.gmra.mrb[144].mxu1 %vm2427_vm2, %v5298_v29  ;;  %v5763_v29 = vld [vmem:[#allocation2 + $0xac] sm:$0xff] }
 0x73b   : > { %20183 = vmatmul.mubr.msk.f32.gmra.mrb[78].mxu0 %vm2427_vm2, %v10085_v13  ;;  %18894 = vmatprep.mubr.msk.f32.mxu1 %vm23396_vm0, %v28148_v16  ;;  %v10549_v13 = vld [vmem:[#allocation2 + $0x100] sm:$0xff] }
 0x73c   : > { %20185 = vmatprep.mubr.msk.f32.mxu0 %vm23396_vm0, %v28148_v16 }
 0x73e   : > { %18895 = vmatmul.mubr.msk.f32.gmra.mrb[146].mxu1 %vm2427_vm2, %v5299_v0  ;;  %v5764_v0 = vld [vmem:[#allocation2 + $0xb4] sm:$0xff] }
 0x73f   : > { %20186 = vmatmul.mubr.msk.f32.gmra.mrb[80].mxu0 %vm2427_vm2, %v10086_v48  ;;  %18897 = vmatprep.mubr.msk.f32.mxu1 %vm23396_vm0, %v28148_v16  ;;  %v10550_v48 = vld [vmem:[#allocation2 + $0x108] sm:$0xff] }
 0x740   : > { %20192 = vmatprep.mubr.msk.f32.mxu0 %vm23396_vm0, %v28148_v16 }
 0x742   : > { %18898 = vmatmul.mubr.msk.f32.gmra.mrb[148].mxu1 %vm2427_vm2, %v5300_v5  ;;  %v5766_v5 = vld [vmem:[#allocation2 + $0xc4] sm:$0xff] }
 0x743   : > { %20193 = vmatmul.mubr.msk.f32.vlgmr.msra.gmra.mrb[0].mxu0 %vm2427_vm2, %v10524_v3  ;;  %18900 = vmatprep.mubr.msk.f32.mxu1 %vm23396_vm0, %v28148_v16  ;;  %v10553_v3 = vld [vmem:[#allocation2 + $0x120] sm:$0xff] }
 0x744   : > { %20195 = vmatprep.mubr.msk.f32.mxu0 %vm23396_vm0, %v28148_v16  ;;  %21295 = vmatpush3.bf16.msra.mxu0 %v21294_v32  ;;  %v10552_v32 = vld [vmem:[#allocation2 + $0x118] sm:$0xff] }
 0x745   : > { %21296 = vmatprep.subr.bf16.mxu0 %v23398_v38 }
 0x746   : > { %18901 = vmatmul.mubr.msk.f32.gmra.mrb[150].mxu1 %vm2427_vm2, %v5301_v34  ;;  %v5767_v34 = vld [vmem:[#allocation2 + $0xcc] sm:$0xff] }
 0x747   : > { %20196 = vmatmul.mubr.msk.f32.gmra.mrb[2].mxu0 %vm2427_vm2, %v10525_v40  ;;  %18903 = vmatprep.mubr.msk.f32.mxu1 %vm23396_vm0, %v28148_v16  ;;  %v10554_v40 = vld [vmem:[#allocation2 + $0x128] sm:$0xff] }
 0x748   : > { %20198 = vmatprep.mubr.msk.f32.mxu0 %vm23396_vm0, %v28148_v16 }
 0x74a   : > { %18904 = vmatmul.mubr.msk.f32.gmra.mrb[152].mxu1 %vm2427_vm2, %v5302_v46  ;;  %v5768_v46 = vld [vmem:[#allocation2 + $0xd4] sm:$0xff] }
 0x74b   : > { %20199 = vmatmul.mubr.msk.f32.gmra.mrb[4].mxu0 %vm2427_vm2, %v10526_v43  ;;  %18906 = vmatprep.mubr.msk.f32.mxu1 %vm23396_vm0, %v28148_v16  ;;  %v10555_v43 = vld [vmem:[#allocation2 + $0x130] sm:$0xff] }
 0x74c   : > { %20201 = vmatprep.mubr.msk.f32.mxu0 %vm23396_vm0, %v28148_v16 }
 0x74e   : > { %18907 = vmatmul.mubr.msk.f32.gmra.mrb[154].mxu1 %vm2427_vm2, %v5303_v23  ;;  %v5769_v23 = vld [vmem:[#allocation2 + $0xdc] sm:$0xff] }
 0x74f   : > { %20202 = vmatmul.mubr.msk.f32.gmra.mrb[6].mxu0 %vm2427_vm2, %v10527_v59  ;;  %18909 = vmatprep.mubr.msk.f32.mxu1 %vm23396_vm0, %v28148_v16  ;;  %v10556_v59 = vld [vmem:[#allocation2 + $0x138] sm:$0xff] }
 0x750   : > { %20204 = vmatprep.mubr.msk.f32.mxu0 %vm23396_vm0, %v28148_v16 }
 0x752   : > { %18910 = vmatmul.mubr.msk.f32.gmra.mrb[156].mxu1 %vm2427_vm2, %v5304_v1  ;;  %v5770_v1 = vld [vmem:[#allocation2 + $0xe4] sm:$0xff] }
 0x753   : > { %20205 = vmatmul.mubr.msk.f32.gmra.mrb[8].mxu0 %vm2427_vm2, %v10528_v60  ;;  %18912 = vmatprep.mubr.msk.f32.mxu1 %vm23396_vm0, %v28148_v16  ;;  %v10557_v60 = vld [vmem:[#allocation2 + $0x140] sm:$0xff] }
 0x754   : > { %20207 = vmatprep.mubr.msk.f32.mxu0 %vm23396_vm0, %v28148_v16 }
 0x756   : > { %18913 = vmatmul.mubr.msk.f32.gmra.mrb[158].mxu1 %vm2427_vm2, %v5305_v25  ;;  %v5771_v25 = vld [vmem:[#allocation2 + $0xec] sm:$0xff] }
 0x757   : > { %20208 = vmatmul.mubr.msk.f32.gmra.mrb[10].mxu0 %vm2427_vm2, %v10529_v9  ;;  %18915 = vmatprep.mubr.msk.f32.mxu1 %vm23396_vm0, %v28148_v16  ;;  %v10558_v9 = vld [vmem:[#allocation2 + $0x148] sm:$0xff] }
 0x758   : > { %20210 = vmatprep.mubr.msk.f32.mxu0 %vm23396_vm0, %v28148_v16 }
 0x75a   : > { %18916 = vmatmul.mubr.msk.f32.gmra.mrb[160].mxu1 %vm2427_vm2, %v5306_v15  ;;  %v5772_v15 = vld [vmem:[#allocation2 + $0xf4] sm:$0xff] }
 0x75b   : > { %20211 = vmatmul.mubr.msk.f32.gmra.mrb[12].mxu0 %vm2427_vm2, %v10530_v7  ;;  %18922 = vmatprep.mubr.msk.f32.mxu1 %vm23396_vm0, %v28148_v16  ;;  %v10559_v7 = vld [vmem:[#allocation2 + $0x150] sm:$0xff] }
 0x75c   : > { %20213 = vmatprep.mubr.msk.f32.mxu0 %vm23396_vm0, %v28148_v16 }
 0x75e   : > { %18923 = vmatmul.mubr.msk.f32.vlgmr.msra.gmra.mrb[80].mxu1 %vm2427_vm2, %v5744_v36  ;;  %v5773_v36 = vld [vmem:[#allocation2 + $0xfc] sm:$0xff] }
 0x75f   : > { %20214 = vmatmul.mubr.msk.f32.gmra.mrb[14].mxu0 %vm2427_vm2, %v10531_v57  ;;  %18925 = vmatprep.mubr.msk.f32.mxu1 %vm23396_vm0, %v28148_v16  ;;  %v10560_v57 = vld [vmem:[#allocation2 + $0x158] sm:$0xff] }
 0x760   : > { %20216 = vmatprep.mubr.msk.f32.mxu0 %vm23396_vm0, %v28148_v16  ;;  %21265 = vmatpush3.bf16.msra.mxu1 %v21264_v24  ;;  %v11005_v24 = vld [vmem:[#allocation2 + $0x51] sm:$0xff] }
 0x761   : > { %21266 = vmatprep.subr.bf16.mxu1 %v23398_v38 }
 0x762   : > { %18926 = vmatmul.mubr.msk.f32.gmra.mrb[82].mxu1 %vm2427_vm2, %v5745_v37  ;;  %v5774_v37 = vld [vmem:[#allocation2 + $0x104] sm:$0xff] }
 0x763   : > { %20217 = vmatmul.mubr.msk.f32.gmra.mrb[16].mxu0 %vm2427_vm2, %v10532_v2  ;;  %18928 = vmatprep.mubr.msk.f32.mxu1 %vm23396_vm0, %v28148_v16  ;;  %v10561_v2 = vld [vmem:[#allocation2 + $0x160] sm:$0xff] }
 0x764   : > { %20219 = vmatprep.mubr.msk.f32.mxu0 %vm23396_vm0, %v28148_v16 }
 0x766   : > { %18929 = vmatmul.mubr.msk.f32.gmra.mrb[84].mxu1 %vm2427_vm2, %v5746_v45  ;;  %v5775_v45 = vld [vmem:[#allocation2 + $0x10c] sm:$0xff] }
 0x767   : > { %20220 = vmatmul.mubr.msk.f32.gmra.mrb[18].mxu0 %vm2427_vm2, %v10533_v12  ;;  %18931 = vmatprep.mubr.msk.f32.mxu1 %vm23396_vm0, %v28148_v16  ;;  %v10562_v12 = vld [vmem:[#allocation2 + $0x168] sm:$0xff] }
 0x768   : > { %20222 = vmatprep.mubr.msk.f32.mxu0 %vm23396_vm0, %v28148_v16 }
 0x76a   : > { %18932 = vmatmul.mubr.msk.f32.gmra.mrb[86].mxu1 %vm2427_vm2, %v5747_v6  ;;  %v10563_v6 = vld [vmem:[#allocation2 + $0x170] sm:$0xff] }
 0x76b   : > { %20223 = vmatmul.mubr.msk.f32.gmra.mrb[20].mxu0 %vm2427_vm2, %v10534_v41  ;;  %18934 = vmatprep.mubr.msk.f32.mxu1 %vm23396_vm0, %v28148_v16  ;;  %v5776_v41 = vld [vmem:[#allocation2 + $0x114] sm:$0xff] }
 0x76c   : > { %20225 = vmatprep.mubr.msk.f32.mxu0 %vm23396_vm0, %v28148_v16 }
 0x76e   : > { %18935 = vmatmul.mubr.msk.f32.gmra.mrb[88].mxu1 %vm2427_vm2, %v5748_v31  ;;  %v10564_v31 = vld [vmem:[#allocation2 + $0x178] sm:$0xf] }
 0x76f   : > { %20226 = vmatmul.mubr.msk.f32.gmra.mrb[22].mxu0 %vm2427_vm2, %v10535_v63  ;;  %18937 = vmatprep.mubr.msk.f32.mxu1 %vm23396_vm0, %v28148_v16  ;;  %v5777_v63 = vld [vmem:[#allocation2 + $0x11c] sm:$0xff] }
 0x770   : > { %20228 = vmatprep.mubr.msk.f32.mxu0 %vm23396_vm0, %v28148_v16 }
 0x772   : > { %18938 = vmatmul.mubr.msk.f32.gmra.mrb[90].mxu1 %vm2427_vm2, %v5749_v42  ;;  %v16174_v42 = vld [vmem:[%s28103_s4 + $0x130] sm:$0xff] }
 0x773   : > { %20229 = vmatmul.mubr.msk.f32.gmra.mrb[24].mxu0 %vm2427_vm2, %v10536_v35  ;;  %18940 = vmatprep.mubr.msk.f32.mxu1 %vm23396_vm0, %v28148_v16  ;;  %v16175_v35 = vld [vmem:[%s28103_s4 + $0x138] sm:$0xff] }
 0x774   : > { %20231 = vmatprep.mubr.msk.f32.mxu0 %vm23396_vm0, %v28148_v16 }
 0x776   : > { %18941 = vmatmul.mubr.msk.f32.gmra.mrb[92].mxu1 %vm2427_vm2, %v5750_v28  ;;  %v21297_v28 = vpack.c.bf16 %v16175_v35, %v16174_v42  ;;  %v11029_v42 = vld [vmem:[#allocation2 + $0x111] sm:$0xff]  ;;  %v6243_v35 = vld [vmem:[#allocation2 + $0xbd] sm:$0xff] }
 0x777   : > { %20232 = vmatmul.mubr.msk.f32.gmra.mrb[26].mxu0 %vm2427_vm2, %v10537_v21  ;;  %18943 = vmatprep.mubr.msk.f32.mxu1 %vm23396_vm0, %v28148_v16  ;;  %v5778_v21 = vld [vmem:[#allocation2 + $0x124] sm:$0xff] }
 0x778   : > { %20234 = vmatprep.mubr.msk.f32.mxu0 %vm23396_vm0, %v28148_v16 }
 0x77a   : > { %18944 = vmatmul.mubr.msk.f32.gmra.mrb[94].mxu1 %vm2427_vm2, %v5751_v49  ;;  %v11002_v49 = vld [vmem:[#allocation2 + $0x39] sm:$0xff] }
 0x77b   : > { %20235 = vmatmul.mubr.msk.f32.gmra.mrb[28].mxu0 %vm2427_vm2, %v10538_v20  ;;  %18946 = vmatprep.mubr.msk.f32.mxu1 %vm23396_vm0, %v28148_v16  ;;  %v5779_v20 = vld [vmem:[#allocation2 + $0x12c] sm:$0xff] }
 0x77c   : > { %20237 = vmatprep.mubr.msk.f32.mxu0 %vm23396_vm0, %v28148_v16 }
 0x77e   : > { %18947 = vmatmul.mubr.msk.f32.gmra.mrb[96].mxu1 %vm2427_vm2, %v5752_v10  ;;  %v11003_v10 = vld [vmem:[#allocation2 + $0x41] sm:$0xff] }
 0x77f   : > { %20238 = vmatmul.mubr.msk.f32.gmra.mrb[30].mxu0 %vm2427_vm2, %v10539_v17  ;;  %18949 = vmatprep.mubr.msk.f32.mxu1 %vm23396_vm0, %v28148_v16  ;;  %v5780_v17 = vld [vmem:[#allocation2 + $0x134] sm:$0xff] }
 0x780   : > { %20240 = vmatprep.mubr.msk.f32.mxu0 %vm23396_vm0, %v28148_v16 }
 0x782   : > { %18950 = vmatmul.mubr.msk.f32.gmra.mrb[98].mxu1 %vm2427_vm2, %v5753_v50  ;;  %v5782_v50 = vld [vmem:[#allocation2 + $0x144] sm:$0xff] }
 0x783   : > { %20241 = vmatmul.mubr.msk.f32.gmra.mrb[32].mxu0 %vm2427_vm2, %v10540_v27  ;;  %18952 = vmatprep.mubr.msk.f32.mxu1 %vm23396_vm0, %v28148_v16  ;;  %v11006_v27 = vld [vmem:[#allocation2 + $0x59] sm:$0xff] }
 0x784   : > { %20243 = vmatprep.mubr.msk.f32.mxu0 %vm23396_vm0, %v28148_v16 }
 0x786   : > { %18953 = vmatmul.mubr.msk.f32.gmra.mrb[100].mxu1 %vm2427_vm2, %v5754_v8  ;;  %v5783_v8 = vld [vmem:[#allocation2 + $0x14c] sm:$0xff] }
 0x787   : > { %20244 = vmatmul.mubr.msk.f32.gmra.mrb[34].mxu0 %vm2427_vm2, %v10541_v26  ;;  %18955 = vmatprep.mubr.msk.f32.mxu1 %vm23396_vm0, %v28148_v16  ;;  %v11007_v26 = vld [vmem:[#allocation2 + $0x61] sm:$0xff] }
 0x788   : > { %20246 = vmatprep.mubr.msk.f32.mxu0 %vm23396_vm0, %v28148_v16 }
 0x78a   : > { %18956 = vmatmul.mubr.msk.f32.gmra.mrb[102].mxu1 %vm2427_vm2, %v5755_v19  ;;  %v5784_v19 = vld [vmem:[#allocation2 + $0x154] sm:$0xf] }
 0x78b   : > { %20247 = vmatmul.mubr.msk.f32.gmra.mrb[36].mxu0 %vm2427_vm2, %v10542_v61  ;;  %18958 = vmatprep.mubr.msk.f32.mxu1 %vm23396_vm0, %v28148_v16  ;;  %v11008_v61 = vld [vmem:[#allocation2 + $0x69] sm:$0xff] }
 0x78c   : > { %20249 = vmatprep.mubr.msk.f32.mxu0 %vm23396_vm0, %v28148_v16 }
 0x78e   : > { %18959 = vmatmul.mubr.msk.f32.gmra.mrb[104].mxu1 %vm2427_vm2, %v5756_v53  ;;  %v6222_v53 = vld [vmem:[#allocation2 + $0x15] sm:$0xff] }
 0x78f   : > { %20250 = vmatmul.mubr.msk.f32.gmra.mrb[38].mxu0 %vm2427_vm2, %v10543_v18  ;;  %18961 = vmatprep.mubr.msk.f32.mxu1 %vm23396_vm0, %v28148_v16  ;;  %v11009_v18 = vld [vmem:[#allocation2 + $0x71] sm:$0xff] }
 0x790   : > { %20252 = vmatprep.mubr.msk.f32.mxu0 %vm23396_vm0, %v28148_v16 }
 0x792   : > { %18962 = vmatmul.mubr.msk.f32.gmra.mrb[106].mxu1 %vm2427_vm2, %v5757_v55  ;;  %v6223_v55 = vld [vmem:[#allocation2 + $0x1d] sm:$0xff] }
 0x793   : > { %20253 = vmatmul.mubr.msk.f32.gmra.mrb[40].mxu0 %vm2427_vm2, %v10544_v51  ;;  %18964 = vmatprep.mubr.msk.f32.mxu1 %vm23396_vm0, %v28148_v16  ;;  %v11010_v51 = vld [vmem:[#allocation2 + $0x79] sm:$0xff] }
 0x794   : > { %20255 = vmatprep.mubr.msk.f32.mxu0 %vm23396_vm0, %v28148_v16 }
 0x796   : > { %18965 = vmatmul.mubr.msk.f32.gmra.mrb[108].mxu1 %vm2427_vm2, %v5758_v30  ;;  %v6224_v30 = vld [vmem:[#allocation2 + $0x25] sm:$0xff] }
 0x797   : > { %20256 = vmatmul.mubr.msk.f32.gmra.mrb[42].mxu0 %vm2427_vm2, %v10545_v52  ;;  %18967 = vmatprep.mubr.msk.f32.mxu1 %vm23396_vm0, %v28148_v16  ;;  %v11011_v52 = vld [vmem:[#allocation2 + $0x81] sm:$0xff] }
 0x798   : > { %20258 = vmatprep.mubr.msk.f32.mxu0 %vm23396_vm0, %v28148_v16 }
 0x79a   : > { %18968 = vmatmul.mubr.msk.f32.gmra.mrb[110].mxu1 %vm2427_vm2, %v5759_v22  ;;  %v6225_v22 = vld [vmem:[#allocation2 + $0x2d] sm:$0xff] }
 0x79b   : > { %20259 = vmatmul.mubr.msk.f32.gmra.mrb[44].mxu0 %vm2427_vm2, %v10546_v4  ;;  %18970 = vmatprep.mubr.msk.f32.mxu1 %vm23396_vm0, %v28148_v16  ;;  %v11012_v4 = vld [vmem:[#allocation2 + $0x89] sm:$0xff] }
 0x79c   : > { %20261 = vmatprep.mubr.msk.f32.mxu0 %vm23396_vm0, %v28148_v16 }
 0x79e   : > { %18971 = vmatmul.mubr.msk.f32.gmra.mrb[112].mxu1 %vm2427_vm2, %v5760_v11  ;;  %v6226_v11 = vld [vmem:[#allocation2 + $0x35] sm:$0xff] }
 0x79f   : > { %20262 = vmatmul.mubr.msk.f32.gmra.mrb[46].mxu0 %vm2427_vm2, %v10547_v14  ;;  %18973 = vmatprep.mubr.msk.f32.mxu1 %vm23396_vm0, %v28148_v16  ;;  %v11013_v14 = vld [vmem:[#allocation2 + $0x91] sm:$0xff] }
 0x7a0   : > { %20264 = vmatprep.mubr.msk.f32.mxu0 %vm23396_vm0, %v28148_v16 }
 0x7a2   : > { %18974 = vmatmul.mubr.msk.f32.gmra.mrb[114].mxu1 %vm2427_vm2, %v5761_v39  ;;  %v6227_v39 = vld [vmem:[#allocation2 + $0x3d] sm:$0xff] }
 0x7a3   : > { %20265 = vmatmul.mubr.msk.f32.gmra.mrb[48].mxu0 %vm2427_vm2, %v10548_v62  ;;  %18976 = vmatprep.mubr.msk.f32.mxu1 %vm23396_vm0, %v28148_v16  ;;  %v11014_v62 = vld [vmem:[#allocation2 + $0x99] sm:$0xff] }
 0x7a4   : > { %20267 = vmatprep.mubr.msk.f32.mxu0 %vm23396_vm0, %v28148_v16 }
 0x7a6   : > { %18977 = vmatmul.mubr.msk.f32.gmra.mrb[116].mxu1 %vm2427_vm2, %v5762_v47  ;;  %v6228_v47 = vld [vmem:[#allocation2 + $0x45] sm:$0xff] }
 0x7a7   : > { %20268 = vmatmul.mubr.msk.f32.gmra.mrb[50].mxu0 %vm2427_vm2, %v10549_v13  ;;  %18979 = vmatprep.mubr.msk.f32.mxu1 %vm23396_vm0, %v28148_v16  ;;  %v11015_v13 = vld [vmem:[#allocation2 + $0xa1] sm:$0xff] }
 0x7a8   : > { %20270 = vmatprep.mubr.msk.f32.mxu0 %vm23396_vm0, %v28148_v16 }
 0x7aa   : > { %18980 = vmatmul.mubr.msk.f32.gmra.mrb[118].mxu1 %vm2427_vm2, %v5763_v29  ;;  %v6229_v29 = vld [vmem:[#allocation2 + $0x4d] sm:$0xff] }
 0x7ab   : > { %20271 = vmatmul.mubr.msk.f32.gmra.mrb[52].mxu0 %vm2427_vm2, %v10550_v48  ;;  %18982 = vmatprep.mubr.msk.f32.mxu1 %vm23396_vm0, %v28148_v16  ;;  %v11016_v48 = vld [vmem:[#allocation2 + $0xa9] sm:$0xff] }
 0x7ac   : > { %20273 = vmatprep.mubr.msk.f32.mxu0 %vm23396_vm0, %v28148_v16 }
 0x7ae   : > { %18983 = vmatmul.mubr.msk.f32.gmra.mrb[120].mxu1 %vm2427_vm2, %v5764_v0  ;;  %v6230_v0 = vld [vmem:[#allocation2 + $0x55] sm:$0xff] }
 0x7af   : > { %20274 = vmatmul.mubr.msk.f32.gmra.mrb[54].mxu0 %vm2427_vm2, %v10551_v33  ;;  %18985 = vmatprep.mubr.msk.f32.mxu1 %vm23396_vm0, %v28148_v16  ;;  %v11017_v33 = vld [vmem:[#allocation2 + $0xb1] sm:$0xff] }
 0x7b0   : > { %20276 = vmatprep.mubr.msk.f32.mxu0 %vm23396_vm0, %v28148_v16 }
 0x7b2   : > { %18986 = vmatmul.mubr.msk.f32.gmra.mrb[122].mxu1 %vm2427_vm2, %v5765_v58  ;;  %v15744_v58 = vld [vmem:[%s28103_s4 + $0x90] sm:$0xff] }
 0x7b3   : > { %20277 = vmatmul.mubr.msk.f32.gmra.mrb[56].mxu0 %vm2427_vm2, %v10552_v32  ;;  %18988 = vmatprep.mubr.msk.f32.mxu1 %vm23396_vm0, %v28148_v16  ;;  %v15745_v32 = vld [vmem:[%s28103_s4 + $0x98] sm:$0xff] }
 0x7b4   : > { %20279 = vmatprep.mubr.msk.f32.mxu0 %vm23396_vm0, %v28148_v16 }
 0x7b6   : > { %18989 = vmatmul.mubr.msk.f32.gmra.mrb[124].mxu1 %vm2427_vm2, %v5766_v5  ;;  %v21267_v5 = vpack.c.bf16 %v15745_v32, %v15744_v58  ;;  %v11482_v58 = vld [vmem:[#allocation2 + $0x4a] sm:$0xff]  ;;  %v6259_v32 = vld [vmem:[#allocation2 + $0x13d] sm:$0xff] }
 0x7b7   : > { %20280 = vmatmul.mubr.msk.f32.gmra.mrb[58].mxu0 %vm2427_vm2, %v10553_v3  ;;  %18991 = vmatprep.mubr.msk.f32.mxu1 %vm23396_vm0, %v28148_v16  ;;  %v6231_v3 = vld [vmem:[#allocation2 + $0x5d] sm:$0xff] }
 0x7b8   : > { %20282 = vmatprep.mubr.msk.f32.mxu0 %vm23396_vm0, %v28148_v16 }
 0x7ba   : > { %18992 = vmatmul.mubr.msk.f32.gmra.mrb[126].mxu1 %vm2427_vm2, %v5767_v34  ;;  %v11018_v34 = vld [vmem:[#allocation2 + $0xb9] sm:$0xff] }
 0x7bb   : > { %20283 = vmatmul.mubr.msk.f32.gmra.mrb[60].mxu0 %vm2427_vm2, %v10554_v40  ;;  %18994 = vmatprep.mubr.msk.f32.mxu1 %vm23396_vm0, %v28148_v16  ;;  %v6232_v40 = vld [vmem:[#allocation2 + $0x65] sm:$0xff] }
 0x7bc   : > { %20285 = vmatprep.mubr.msk.f32.mxu0 %vm23396_vm0, %v28148_v16 }
 0x7be   : > { %18995 = vmatmul.mubr.msk.f32.gmra.mrb[128].mxu1 %vm2427_vm2, %v5768_v46  ;;  %v11019_v46 = vld [vmem:[#allocation2 + $0xc1] sm:$0xff] }
 0x7bf   : > { %20286 = vmatmul.mubr.msk.f32.gmra.mrb[62].mxu0 %vm2427_vm2, %v10555_v43  ;;  %18997 = vmatprep.mubr.msk.f32.mxu1 %vm23396_vm0, %v28148_v16  ;;  %v6233_v43 = vld [vmem:[#allocation2 + $0x6d] sm:$0xff] }
 0x7c0   : > { %20288 = vmatprep.mubr.msk.f32.mxu0 %vm23396_vm0, %v28148_v16 }
 0x7c2   : > { %18998 = vmatmul.mubr.msk.f32.gmra.mrb[130].mxu1 %vm2427_vm2, %v5769_v23  ;;  %v11020_v23 = vld [vmem:[#allocation2 + $0xc9] sm:$0xff] }
 0x7c3   : > { %20289 = vmatmul.mubr.msk.f32.gmra.mrb[64].mxu0 %vm2427_vm2, %v10556_v59  ;;  %19000 = vmatprep.mubr.msk.f32.mxu1 %vm23396_vm0, %v28148_v16  ;;  %v6234_v59 = vld [vmem:[#allocation2 + $0x75] sm:$0xff] }
 0x7c4   : > { %20291 = vmatprep.mubr.msk.f32.mxu0 %vm23396_vm0, %v28148_v16 }
 0x7c6   : > { %19001 = vmatmul.mubr.msk.f32.gmra.mrb[132].mxu1 %vm2427_vm2, %v5770_v1  ;;  %v11021_v1 = vld [vmem:[#allocation2 + $0xd1] sm:$0xff] }
 0x7c7   : > { %20292 = vmatmul.mubr.msk.f32.gmra.mrb[66].mxu0 %vm2427_vm2, %v10557_v60  ;;  %19003 = vmatprep.mubr.msk.f32.mxu1 %vm23396_vm0, %v28148_v16  ;;  %v6235_v60 = vld [vmem:[#allocation2 + $0x7d] sm:$0xff] }
 0x7c8   : > { %20294 = vmatprep.mubr.msk.f32.mxu0 %vm23396_vm0, %v28148_v16 }
 0x7ca   : > { %19004 = vmatmul.mubr.msk.f32.gmra.mrb[134].mxu1 %vm2427_vm2, %v5771_v25  ;;  %v11022_v25 = vld [vmem:[#allocation2 + $0xd9] sm:$0xff] }
 0x7cb   : > { %20295 = vmatmul.mubr.msk.f32.gmra.mrb[68].mxu0 %vm2427_vm2, %v10558_v9  ;;  %19006 = vmatprep.mubr.msk.f32.mxu1 %vm23396_vm0, %v28148_v16  ;;  %v6236_v9 = vld [vmem:[#allocation2 + $0x85] sm:$0xff] }
 0x7cc   : > { %20297 = vmatprep.mubr.msk.f32.mxu0 %vm23396_vm0, %v28148_v16 }
 0x7ce   : > { %19007 = vmatmul.mubr.msk.f32.gmra.mrb[136].mxu1 %vm2427_vm2, %v5772_v15  ;;  %v11023_v15 = vld [vmem:[#allocation2 + $0xe1] sm:$0xff] }
 0x7cf   : > { %20298 = vmatmul.mubr.msk.f32.gmra.mrb[70].mxu0 %vm2427_vm2, %v10559_v7  ;;  %19009 = vmatprep.mubr.msk.f32.mxu1 %vm23396_vm0, %v28148_v16  ;;  %v6237_v7 = vld [vmem:[#allocation2 + $0x8d] sm:$0xff] }
 0x7d0   : > { %20300 = vmatprep.mubr.msk.f32.mxu0 %vm23396_vm0, %v28148_v16 }
 0x7d2   : > { %19010 = vmatmul.mubr.msk.f32.gmra.mrb[138].mxu1 %vm2427_vm2, %v5773_v36  ;;  %v11024_v36 = vld [vmem:[#allocation2 + $0xe9] sm:$0xff] }
 0x7d3   : > { %20301 = vmatmul.mubr.msk.f32.gmra.mrb[72].mxu0 %vm2427_vm2, %v10560_v57  ;;  %19012 = vmatprep.mubr.msk.f32.mxu1 %vm23396_vm0, %v28148_v16  ;;  %v6238_v57 = vld [vmem:[#allocation2 + $0x95] sm:$0xff] }
 0x7d4   : > { %20303 = vmatprep.mubr.msk.f32.mxu0 %vm23396_vm0, %v28148_v16 }
 0x7d6   : > { %19013 = vmatmul.mubr.msk.f32.gmra.mrb[140].mxu1 %vm2427_vm2, %v5774_v37  ;;  %v11025_v37 = vld [vmem:[#allocation2 + $0xf1] sm:$0xff] }
 0x7d7   : > { %20304 = vmatmul.mubr.msk.f32.gmra.mrb[74].mxu0 %vm2427_vm2, %v10561_v2  ;;  %19015 = vmatprep.mubr.msk.f32.mxu1 %vm23396_vm0, %v28148_v16  ;;  %v6239_v2 = vld [vmem:[#allocation2 + $0x9d] sm:$0xff] }
 0x7d8   : > { %20306 = vmatprep.mubr.msk.f32.mxu0 %vm23396_vm0, %v28148_v16 }
 0x7da   : > { %19016 = vmatmul.mubr.msk.f32.gmra.mrb[142].mxu1 %vm2427_vm2, %v5775_v45  ;;  %v11026_v45 = vld [vmem:[#allocation2 + $0xf9] sm:$0xff] }
 0x7db   : > { %20307 = vmatmul.mubr.msk.f32.gmra.mrb[76].mxu0 %vm2427_vm2, %v10562_v12  ;;  %19018 = vmatprep.mubr.msk.f32.mxu1 %vm23396_vm0, %v28148_v16  ;;  %v6240_v12 = vld [vmem:[#allocation2 + $0xa5] sm:$0xff] }
 0x7dc   : > { %20309 = vmatprep.mubr.msk.f32.mxu0 %vm23396_vm0, %v28148_v16 }
 0x7de   : > { %19019 = vmatmul.mubr.msk.f32.gmra.mrb[144].mxu1 %vm2427_vm2, %v5776_v41  ;;  %v6241_v41 = vld [vmem:[#allocation2 + $0xad] sm:$0xff] }
 0x7df   : > { %20310 = vmatmul.mubr.msk.f32.gmra.mrb[78].mxu0 %vm2427_vm2, %v10563_v6  ;;  %19021 = vmatprep.mubr.msk.f32.mxu1 %vm23396_vm0, %v28148_v16  ;;  %v11027_v6 = vld [vmem:[#allocation2 + $0x101] sm:$0xff] }
 0x7e0   : > { %20312 = vmatprep.mubr.msk.f32.mxu0 %vm23396_vm0, %v28148_v16 }
 0x7e2   : > { %19022 = vmatmul.mubr.msk.f32.gmra.mrb[146].mxu1 %vm2427_vm2, %v5777_v63  ;;  %v6242_v63 = vld [vmem:[#allocation2 + $0xb5] sm:$0xff] }
 0x7e3   : > { %20313 = vmatmul.mubr.msk.f32.gmra.mrb[80].mxu0 %vm2427_vm2, %v10564_v31  ;;  %19024 = vmatprep.mubr.msk.f32.mxu1 %vm23396_vm0, %v28148_v16  ;;  %v11028_v31 = vld [vmem:[#allocation2 + $0x109] sm:$0xff] }
 0x7e4   : > { %20319 = vmatprep.mubr.msk.f32.mxu0 %vm23396_vm0, %v28148_v16 }
 0x7e6   : > { %19025 = vmatmul.mubr.msk.f32.gmra.mrb[148].mxu1 %vm2427_vm2, %v5778_v21  ;;  %v6244_v21 = vld [vmem:[#allocation2 + $0xc5] sm:$0xff] }
 0x7e7   : > { %20320 = vmatmul.mubr.msk.f32.vlgmr.msra.gmra.mrb[0].mxu0 %vm2427_vm2, %v11002_v49  ;;  %19027 = vmatprep.mubr.msk.f32.mxu1 %vm23396_vm0, %v28148_v16  ;;  %v11031_v49 = vld [vmem:[#allocation2 + $0x121] sm:$0xff] }
 0x7e8   : > { %20322 = vmatprep.mubr.msk.f32.mxu0 %vm23396_vm0, %v28148_v16  ;;  %21298 = vmatpush3.bf16.msra.mxu0 %v21297_v28  ;;  %v11030_v28 = vld [vmem:[#allocation2 + $0x119] sm:$0xff] }
 0x7e9   : > { %21299 = vmatprep.subr.bf16.mxu0 %v23398_v38 }
 0x7ea   : > { %19028 = vmatmul.mubr.msk.f32.gmra.mrb[150].mxu1 %vm2427_vm2, %v5779_v20  ;;  %v6245_v20 = vld [vmem:[#allocation2 + $0xcd] sm:$0xff] }
 0x7eb   : > { %20323 = vmatmul.mubr.msk.f32.gmra.mrb[2].mxu0 %vm2427_vm2, %v11003_v10  ;;  %19030 = vmatprep.mubr.msk.f32.mxu1 %vm23396_vm0, %v28148_v16  ;;  %v11032_v10 = vld [vmem:[#allocation2 + $0x129] sm:$0xff] }
 0x7ec   : > { %20325 = vmatprep.mubr.msk.f32.mxu0 %vm23396_vm0, %v28148_v16 }
 0x7ee   : > { %19031 = vmatmul.mubr.msk.f32.gmra.mrb[152].mxu1 %vm2427_vm2, %v5780_v17  ;;  %v6246_v17 = vld [vmem:[#allocation2 + $0xd5] sm:$0xff] }
 0x7ef   : > { %20326 = vmatmul.mubr.msk.f32.gmra.mrb[4].mxu0 %vm2427_vm2, %v11004_v54  ;;  %19033 = vmatprep.mubr.msk.f32.mxu1 %vm23396_vm0, %v28148_v16  ;;  %v11033_v54 = vld [vmem:[#allocation2 + $0x131] sm:$0xff] }
 0x7f0   : > { %20328 = vmatprep.mubr.msk.f32.mxu0 %vm23396_vm0, %v28148_v16 }
 0x7f2   : > { %19034 = vmatmul.mubr.msk.f32.gmra.mrb[154].mxu1 %vm2427_vm2, %v5781_v56  ;;  %v6247_v56 = vld [vmem:[#allocation2 + $0xdd] sm:$0xff] }
 0x7f3   : > { %20329 = vmatmul.mubr.msk.f32.gmra.mrb[6].mxu0 %vm2427_vm2, %v11005_v24  ;;  %19036 = vmatprep.mubr.msk.f32.mxu1 %vm23396_vm0, %v28148_v16  ;;  %v11034_v24 = vld [vmem:[#allocation2 + $0x139] sm:$0xff] }
 0x7f4   : > { %20331 = vmatprep.mubr.msk.f32.mxu0 %vm23396_vm0, %v28148_v16 }
 0x7f6   : > { %19037 = vmatmul.mubr.msk.f32.gmra.mrb[156].mxu1 %vm2427_vm2, %v5782_v50  ;;  %v6248_v50 = vld [vmem:[#allocation2 + $0xe5] sm:$0xff] }
 0x7f7   : > { %20332 = vmatmul.mubr.msk.f32.gmra.mrb[8].mxu0 %vm2427_vm2, %v11006_v27  ;;  %19039 = vmatprep.mubr.msk.f32.mxu1 %vm23396_vm0, %v28148_v16  ;;  %v11035_v27 = vld [vmem:[#allocation2 + $0x141] sm:$0xff] }
 0x7f8   : > { %20334 = vmatprep.mubr.msk.f32.mxu0 %vm23396_vm0, %v28148_v16 }
 0x7fa   : > { %19040 = vmatmul.mubr.msk.f32.gmra.mrb[158].mxu1 %vm2427_vm2, %v5783_v8  ;;  %v6249_v8 = vld [vmem:[#allocation2 + $0xed] sm:$0xff] }
 0x7fb   : > { %20335 = vmatmul.mubr.msk.f32.gmra.mrb[10].mxu0 %vm2427_vm2, %v11007_v26  ;;  %19042 = vmatprep.mubr.msk.f32.mxu1 %vm23396_vm0, %v28148_v16  ;;  %v11036_v26 = vld [vmem:[#allocation2 + $0x149] sm:$0xff] }
 0x7fc   : > { %20337 = vmatprep.mubr.msk.f32.mxu0 %vm23396_vm0, %v28148_v16 }
 0x7fe   : > { %19043 = vmatmul.mubr.msk.f32.gmra.mrb[160].mxu1 %vm2427_vm2, %v5784_v19  ;;  %v6250_v19 = vld [vmem:[#allocation2 + $0xf5] sm:$0xff] }
 0x7ff   : > { %20338 = vmatmul.mubr.msk.f32.gmra.mrb[12].mxu0 %vm2427_vm2, %v11008_v61  ;;  %19049 = vmatprep.mubr.msk.f32.mxu1 %vm23396_vm0, %v28148_v16  ;;  %v11037_v61 = vld [vmem:[#allocation2 + $0x151] sm:$0xff] }
 0x800   : > { %20340 = vmatprep.mubr.msk.f32.mxu0 %vm23396_vm0, %v28148_v16 }
 0x802   : > { %19050 = vmatmul.mubr.msk.f32.vlgmr.msra.gmra.mrb[80].mxu1 %vm2427_vm2, %v6222_v53  ;;  %v6251_v53 = vld [vmem:[#allocation2 + $0xfd] sm:$0xff] }
 0x803   : > { %20341 = vmatmul.mubr.msk.f32.gmra.mrb[14].mxu0 %vm2427_vm2, %v11009_v18  ;;  %19052 = vmatprep.mubr.msk.f32.mxu1 %vm23396_vm0, %v28148_v16  ;;  %v11038_v18 = vld [vmem:[#allocation2 + $0x159] sm:$0xff] }
 0x804   : > { %20343 = vmatprep.mubr.msk.f32.mxu0 %vm23396_vm0, %v28148_v16  ;;  %21268 = vmatpush3.bf16.msra.mxu1 %v21267_v5  ;;  %v11483_v5 = vld [vmem:[#allocation2 + $0x52] sm:$0xff] }
 0x805   : > { %21355 = vmatprep.subr.bf16.mxu1 %v23398_v38 }
 0x806   : > { %19053 = vmatmul.mubr.msk.f32.gmra.mrb[82].mxu1 %vm2427_vm2, %v6223_v55  ;;  %v6252_v55 = vld [vmem:[#allocation2 + $0x105] sm:$0xff] }
 0x807   : > { %20344 = vmatmul.mubr.msk.f32.gmra.mrb[16].mxu0 %vm2427_vm2, %v11010_v51  ;;  %19055 = vmatprep.mubr.msk.f32.mxu1 %vm23396_vm0, %v28148_v16  ;;  %v11039_v51 = vld [vmem:[#allocation2 + $0x161] sm:$0xff] }
 0x808   : > { %20346 = vmatprep.mubr.msk.f32.mxu0 %vm23396_vm0, %v28148_v16 }
 0x80a   : > { %19056 = vmatmul.mubr.msk.f32.gmra.mrb[84].mxu1 %vm2427_vm2, %v6224_v30  ;;  %v6253_v30 = vld [vmem:[#allocation2 + $0x10d] sm:$0xff] }
 0x80b   : > { %20347 = vmatmul.mubr.msk.f32.gmra.mrb[18].mxu0 %vm2427_vm2, %v11011_v52  ;;  %19058 = vmatprep.mubr.msk.f32.mxu1 %vm23396_vm0, %v28148_v16  ;;  %v11040_v52 = vld [vmem:[#allocation2 + $0x169] sm:$0xff] }
 0x80c   : > { %20349 = vmatprep.mubr.msk.f32.mxu0 %vm23396_vm0, %v28148_v16 }
 0x80e   : > { %19059 = vmatmul.mubr.msk.f32.gmra.mrb[86].mxu1 %vm2427_vm2, %v6225_v22  ;;  %v11041_v22 = vld [vmem:[#allocation2 + $0x171] sm:$0xff] }
 0x80f   : > { %20350 = vmatmul.mubr.msk.f32.gmra.mrb[20].mxu0 %vm2427_vm2, %v11012_v4  ;;  %19061 = vmatprep.mubr.msk.f32.mxu1 %vm23396_vm0, %v28148_v16  ;;  %v6254_v4 = vld [vmem:[#allocation2 + $0x115] sm:$0xff] }
 0x810   : > { %20352 = vmatprep.mubr.msk.f32.mxu0 %vm23396_vm0, %v28148_v16 }
 0x812   : > { %19062 = vmatmul.mubr.msk.f32.gmra.mrb[88].mxu1 %vm2427_vm2, %v6226_v11  ;;  %v11042_v11 = vld [vmem:[#allocation2 + $0x179] sm:$0xf] }
 0x813   : > { %20353 = vmatmul.mubr.msk.f32.gmra.mrb[22].mxu0 %vm2427_vm2, %v11013_v14  ;;  %19064 = vmatprep.mubr.msk.f32.mxu1 %vm23396_vm0, %v28148_v16  ;;  %v6255_v14 = vld [vmem:[#allocation2 + $0x11d] sm:$0xff] }
 0x814   : > { %20355 = vmatprep.mubr.msk.f32.mxu0 %vm23396_vm0, %v28148_v16 }
 0x816   : > { %19065 = vmatmul.mubr.msk.f32.gmra.mrb[90].mxu1 %vm2427_vm2, %v6227_v39  ;;  %v16217_v39 = vld [vmem:[%s28103_s4 + $0x140] sm:$0xff] }
 0x817   : > { %20356 = vmatmul.mubr.msk.f32.gmra.mrb[24].mxu0 %vm2427_vm2, %v11014_v62  ;;  %19067 = vmatprep.mubr.msk.f32.mxu1 %vm23396_vm0, %v28148_v16  ;;  %v16218_v62 = vld [vmem:[%s28103_s4 + $0x148] sm:$0xff] }
 0x818   : > { %20358 = vmatprep.mubr.msk.f32.mxu0 %vm23396_vm0, %v28148_v16 }
 0x81a   : > { %19068 = vmatmul.mubr.msk.f32.gmra.mrb[92].mxu1 %vm2427_vm2, %v6228_v47  ;;  %v21300_v47 = vpack.c.bf16 %v16218_v62, %v16217_v39  ;;  %v11509_v39 = vld [vmem:[#allocation2 + $0x122] sm:$0xff]  ;;  %v6723_v62 = vld [vmem:[#allocation2 + $0xce] sm:$0xff] }
 0x81b   : > { %20359 = vmatmul.mubr.msk.f32.gmra.mrb[26].mxu0 %vm2427_vm2, %v11015_v13  ;;  %19070 = vmatprep.mubr.msk.f32.mxu1 %vm23396_vm0, %v28148_v16  ;;  %v6256_v13 = vld [vmem:[#allocation2 + $0x125] sm:$0xff] }
 0x81c   : > { %20361 = vmatprep.mubr.msk.f32.mxu0 %vm23396_vm0, %v28148_v16 }
 0x81e   : > { %19071 = vmatmul.mubr.msk.f32.gmra.mrb[94].mxu1 %vm2427_vm2, %v6229_v29  ;;  %v11480_v29 = vld [vmem:[#allocation2 + $0x3a] sm:$0xff] }
 0x81f   : > { %20362 = vmatmul.mubr.msk.f32.gmra.mrb[28].mxu0 %vm2427_vm2, %v11016_v48  ;;  %19073 = vmatprep.mubr.msk.f32.mxu1 %vm23396_vm0, %v28148_v16  ;;  %v6257_v48 = vld [vmem:[#allocation2 + $0x12d] sm:$0xff] }
 0x820   : > { %20364 = vmatprep.mubr.msk.f32.mxu0 %vm23396_vm0, %v28148_v16 }
 0x822   : > { %19074 = vmatmul.mubr.msk.f32.gmra.mrb[96].mxu1 %vm2427_vm2, %v6230_v0  ;;  %v11481_v0 = vld [vmem:[#allocation2 + $0x42] sm:$0xff] }
 0x823   : > { %20365 = vmatmul.mubr.msk.f32.gmra.mrb[30].mxu0 %vm2427_vm2, %v11017_v33  ;;  %19076 = vmatprep.mubr.msk.f32.mxu1 %vm23396_vm0, %v28148_v16  ;;  %v6258_v33 = vld [vmem:[#allocation2 + $0x135] sm:$0xff] }
 0x824   : > { %20367 = vmatprep.mubr.msk.f32.mxu0 %vm23396_vm0, %v28148_v16 }
 0x826   : > { %19077 = vmatmul.mubr.msk.f32.gmra.mrb[98].mxu1 %vm2427_vm2, %v6231_v3  ;;  %v6260_v3 = vld [vmem:[#allocation2 + $0x145] sm:$0xff] }
 0x827   : > { %20368 = vmatmul.mubr.msk.f32.gmra.mrb[32].mxu0 %vm2427_vm2, %v11018_v34  ;;  %19079 = vmatprep.mubr.msk.f32.mxu1 %vm23396_vm0, %v28148_v16  ;;  %v11484_v34 = vld [vmem:[#allocation2 + $0x5a] sm:$0xff] }
 0x828   : > { %20370 = vmatprep.mubr.msk.f32.mxu0 %vm23396_vm0, %v28148_v16 }
 0x82a   : > { %19080 = vmatmul.mubr.msk.f32.gmra.mrb[100].mxu1 %vm2427_vm2, %v6232_v40  ;;  %v6261_v40 = vld [vmem:[#allocation2 + $0x14d] sm:$0xff] }
 0x82b   : > { %20371 = vmatmul.mubr.msk.f32.gmra.mrb[34].mxu0 %vm2427_vm2, %v11019_v46  ;;  %19082 = vmatprep.mubr.msk.f32.mxu1 %vm23396_vm0, %v28148_v16  ;;  %v11485_v46 = vld [vmem:[#allocation2 + $0x62] sm:$0xff] }
 0x82c   : > { %20373 = vmatprep.mubr.msk.f32.mxu0 %vm23396_vm0, %v28148_v16 }
 0x82e   : > { %19083 = vmatmul.mubr.msk.f32.gmra.mrb[102].mxu1 %vm2427_vm2, %v6233_v43  ;;  %v6262_v43 = vld [vmem:[#allocation2 + $0x155] sm:$0xf] }
 0x82f   : > { %20374 = vmatmul.mubr.msk.f32.gmra.mrb[36].mxu0 %vm2427_vm2, %v11020_v23  ;;  %19085 = vmatprep.mubr.msk.f32.mxu1 %vm23396_vm0, %v28148_v16  ;;  %v11486_v23 = vld [vmem:[#allocation2 + $0x6a] sm:$0xff] }
 0x830   : > { %20376 = vmatprep.mubr.msk.f32.mxu0 %vm23396_vm0, %v28148_v16 }
 0x832   : > { %19086 = vmatmul.mubr.msk.f32.gmra.mrb[104].mxu1 %vm2427_vm2, %v6234_v59  ;;  %v6700_v59 = vld [vmem:[#allocation2 + $0x16] sm:$0xff] }
 0x833   : > { %20377 = vmatmul.mubr.msk.f32.gmra.mrb[38].mxu0 %vm2427_vm2, %v11021_v1  ;;  %19088 = vmatprep.mubr.msk.f32.mxu1 %vm23396_vm0, %v28148_v16  ;;  %v11487_v1 = vld [vmem:[#allocation2 + $0x72] sm:$0xff] }
 0x834   : > { %20379 = vmatprep.mubr.msk.f32.mxu0 %vm23396_vm0, %v28148_v16 }
 0x836   : > { %19089 = vmatmul.mubr.msk.f32.gmra.mrb[106].mxu1 %vm2427_vm2, %v6235_v60  ;;  %v6701_v60 = vld [vmem:[#allocation2 + $0x1e] sm:$0xff] }
 0x837   : > { %20380 = vmatmul.mubr.msk.f32.gmra.mrb[40].mxu0 %vm2427_vm2, %v11022_v25  ;;  %19091 = vmatprep.mubr.msk.f32.mxu1 %vm23396_vm0, %v28148_v16  ;;  %v11488_v25 = vld [vmem:[#allocation2 + $0x7a] sm:$0xff] }
 0x838   : > { %20382 = vmatprep.mubr.msk.f32.mxu0 %vm23396_vm0, %v28148_v16 }
 0x83a   : > { %19092 = vmatmul.mubr.msk.f32.gmra.mrb[108].mxu1 %vm2427_vm2, %v6236_v9  ;;  %v6702_v9 = vld [vmem:[#allocation2 + $0x26] sm:$0xff] }
 0x83b   : > { %20383 = vmatmul.mubr.msk.f32.gmra.mrb[42].mxu0 %vm2427_vm2, %v11023_v15  ;;  %19094 = vmatprep.mubr.msk.f32.mxu1 %vm23396_vm0, %v28148_v16  ;;  %v11489_v15 = vld [vmem:[#allocation2 + $0x82] sm:$0xff] }
 0x83c   : > { %20385 = vmatprep.mubr.msk.f32.mxu0 %vm23396_vm0, %v28148_v16 }
 0x83e   : > { %19095 = vmatmul.mubr.msk.f32.gmra.mrb[110].mxu1 %vm2427_vm2, %v6237_v7  ;;  %v11490_v7 = vld [vmem:[#allocation2 + $0x8a] sm:$0xff] }
 0x83f   : > { %20386 = vmatmul.mubr.msk.f32.gmra.mrb[44].mxu0 %vm2427_vm2, %v11024_v36  ;;  %19097 = vmatprep.mubr.msk.f32.mxu1 %vm23396_vm0, %v28148_v16  ;;  %v6704_v36 = vld [vmem:[#allocation2 + $0x36] sm:$0xff] }
 0x840   : > { %20388 = vmatprep.mubr.msk.f32.mxu0 %vm23396_vm0, %v28148_v16 }
 0x842   : > { %19098 = vmatmul.mubr.msk.f32.gmra.mrb[112].mxu1 %vm2427_vm2, %v6238_v57  ;;  %v11491_v57 = vld [vmem:[#allocation2 + $0x92] sm:$0xff] }
 0x843   : > { %20389 = vmatmul.mubr.msk.f32.gmra.mrb[46].mxu0 %vm2427_vm2, %v11025_v37  ;;  %19100 = vmatprep.mubr.msk.f32.mxu1 %vm23396_vm0, %v28148_v16  ;;  %v6705_v37 = vld [vmem:[#allocation2 + $0x3e] sm:$0xff] }
 0x844   : > { %20391 = vmatprep.mubr.msk.f32.mxu0 %vm23396_vm0, %v28148_v16 }
 0x846   : > { %19101 = vmatmul.mubr.msk.f32.gmra.mrb[114].mxu1 %vm2427_vm2, %v6239_v2  ;;  %v11492_v2 = vld [vmem:[#allocation2 + $0x9a] sm:$0xff] }
 0x847   : > { %20392 = vmatmul.mubr.msk.f32.gmra.mrb[48].mxu0 %vm2427_vm2, %v11026_v45  ;;  %19103 = vmatprep.mubr.msk.f32.mxu1 %vm23396_vm0, %v28148_v16  ;;  %v6706_v45 = vld [vmem:[#allocation2 + $0x46] sm:$0xff] }
 0x848   : > { %20394 = vmatprep.mubr.msk.f32.mxu0 %vm23396_vm0, %v28148_v16 }
 0x84a   : > { %19104 = vmatmul.mubr.msk.f32.gmra.mrb[116].mxu1 %vm2427_vm2, %v6240_v12  ;;  %v11493_v12 = vld [vmem:[#allocation2 + $0xa2] sm:$0xff] }
 0x84b   : > { %20395 = vmatmul.mubr.msk.f32.gmra.mrb[50].mxu0 %vm2427_vm2, %v11027_v6  ;;  %19106 = vmatprep.mubr.msk.f32.mxu1 %vm23396_vm0, %v28148_v16  ;;  %v6707_v6 = vld [vmem:[#allocation2 + $0x4e] sm:$0xff] }
 0x84c   : > { %20397 = vmatprep.mubr.msk.f32.mxu0 %vm23396_vm0, %v28148_v16 }
 0x84e   : > { %19107 = vmatmul.mubr.msk.f32.gmra.mrb[118].mxu1 %vm2427_vm2, %v6241_v41  ;;  %v11494_v41 = vld [vmem:[#allocation2 + $0xaa] sm:$0xff] }
 0x84f   : > { %20398 = vmatmul.mubr.msk.f32.gmra.mrb[52].mxu0 %vm2427_vm2, %v11028_v31  ;;  %19109 = vmatprep.mubr.msk.f32.mxu1 %vm23396_vm0, %v28148_v16  ;;  %v6708_v31 = vld [vmem:[#allocation2 + $0x56] sm:$0xff] }
 0x850   : > { %20400 = vmatprep.mubr.msk.f32.mxu0 %vm23396_vm0, %v28148_v16 }
 0x852   : > { %19110 = vmatmul.mubr.msk.f32.gmra.mrb[120].mxu1 %vm2427_vm2, %v6242_v63  ;;  %v11495_v63 = vld [vmem:[#allocation2 + $0xb2] sm:$0xff] }
 0x853   : > { %20401 = vmatmul.mubr.msk.f32.gmra.mrb[54].mxu0 %vm2427_vm2, %v11029_v42  ;;  %19112 = vmatprep.mubr.msk.f32.mxu1 %vm23396_vm0, %v28148_v16  ;;  %v6709_v42 = vld [vmem:[#allocation2 + $0x5e] sm:$0xff] }
 0x854   : > { %20403 = vmatprep.mubr.msk.f32.mxu0 %vm23396_vm0, %v28148_v16 }
 0x856   : > { %19113 = vmatmul.mubr.msk.f32.gmra.mrb[122].mxu1 %vm2427_vm2, %v6243_v35  ;;  %v11496_v35 = vld [vmem:[#allocation2 + $0xba] sm:$0xff] }
 0x857   : > { %20404 = vmatmul.mubr.msk.f32.gmra.mrb[56].mxu0 %vm2427_vm2, %v11030_v28  ;;  %19115 = vmatprep.mubr.msk.f32.mxu1 %vm23396_vm0, %v28148_v16  ;;  %v6710_v28 = vld [vmem:[#allocation2 + $0x66] sm:$0xff] }
 0x858   : > { %20406 = vmatprep.mubr.msk.f32.mxu0 %vm23396_vm0, %v28148_v16 }
 0x85a   : > { %19116 = vmatmul.mubr.msk.f32.gmra.mrb[124].mxu1 %vm2427_vm2, %v6244_v21  ;;  %v11497_v21 = vld [vmem:[#allocation2 + $0xc2] sm:$0xff] }
 0x85b   : > { %20407 = vmatmul.mubr.msk.f32.gmra.mrb[58].mxu0 %vm2427_vm2, %v11031_v49  ;;  %19118 = vmatprep.mubr.msk.f32.mxu1 %vm23396_vm0, %v28148_v16  ;;  %v6711_v49 = vld [vmem:[#allocation2 + $0x6e] sm:$0xff] }
 0x85c   : > { %20409 = vmatprep.mubr.msk.f32.mxu0 %vm23396_vm0, %v28148_v16 }
 0x85e   : > { %19119 = vmatmul.mubr.msk.f32.gmra.mrb[126].mxu1 %vm2427_vm2, %v6245_v20  ;;  %v11498_v20 = vld [vmem:[#allocation2 + $0xca] sm:$0xff] }
 0x85f   : > { %20410 = vmatmul.mubr.msk.f32.gmra.mrb[60].mxu0 %vm2427_vm2, %v11032_v10  ;;  %19121 = vmatprep.mubr.msk.f32.mxu1 %vm23396_vm0, %v28148_v16  ;;  %v6712_v10 = vld [vmem:[#allocation2 + $0x76] sm:$0xff] }
 0x860   : > { %20412 = vmatprep.mubr.msk.f32.mxu0 %vm23396_vm0, %v28148_v16 }
 0x862   : > { %19122 = vmatmul.mubr.msk.f32.gmra.mrb[128].mxu1 %vm2427_vm2, %v6246_v17  ;;  %v11499_v17 = vld [vmem:[#allocation2 + $0xd2] sm:$0xff] }
 0x863   : > { %20413 = vmatmul.mubr.msk.f32.gmra.mrb[62].mxu0 %vm2427_vm2, %v11033_v54  ;;  %19124 = vmatprep.mubr.msk.f32.mxu1 %vm23396_vm0, %v28148_v16  ;;  %v6713_v54 = vld [vmem:[#allocation2 + $0x7e] sm:$0xff] }
 0x864   : > { %20415 = vmatprep.mubr.msk.f32.mxu0 %vm23396_vm0, %v28148_v16 }
 0x866   : > { %19125 = vmatmul.mubr.msk.f32.gmra.mrb[130].mxu1 %vm2427_vm2, %v6247_v56  ;;  %v11500_v56 = vld [vmem:[#allocation2 + $0xda] sm:$0xff] }
 0x867   : > { %20416 = vmatmul.mubr.msk.f32.gmra.mrb[64].mxu0 %vm2427_vm2, %v11034_v24  ;;  %19127 = vmatprep.mubr.msk.f32.mxu1 %vm23396_vm0, %v28148_v16  ;;  %v6714_v24 = vld [vmem:[#allocation2 + $0x86] sm:$0xff] }
 0x868   : > { %20418 = vmatprep.mubr.msk.f32.mxu0 %vm23396_vm0, %v28148_v16 }
 0x86a   : > { %19128 = vmatmul.mubr.msk.f32.gmra.mrb[132].mxu1 %vm2427_vm2, %v6248_v50  ;;  %v11501_v50 = vld [vmem:[#allocation2 + $0xe2] sm:$0xff] }
 0x86b   : > { %20419 = vmatmul.mubr.msk.f32.gmra.mrb[66].mxu0 %vm2427_vm2, %v11035_v27  ;;  %19130 = vmatprep.mubr.msk.f32.mxu1 %vm23396_vm0, %v28148_v16  ;;  %v6715_v27 = vld [vmem:[#allocation2 + $0x8e] sm:$0xff] }
 0x86c   : > { %20421 = vmatprep.mubr.msk.f32.mxu0 %vm23396_vm0, %v28148_v16 }
 0x86e   : > { %19131 = vmatmul.mubr.msk.f32.gmra.mrb[134].mxu1 %vm2427_vm2, %v6249_v8  ;;  %v11502_v8 = vld [vmem:[#allocation2 + $0xea] sm:$0xff] }
 0x86f   : > { %20422 = vmatmul.mubr.msk.f32.gmra.mrb[68].mxu0 %vm2427_vm2, %v11036_v26  ;;  %19133 = vmatprep.mubr.msk.f32.mxu1 %vm23396_vm0, %v28148_v16  ;;  %v6716_v26 = vld [vmem:[#allocation2 + $0x96] sm:$0xff] }
 0x870   : > { %20424 = vmatprep.mubr.msk.f32.mxu0 %vm23396_vm0, %v28148_v16 }
 0x872   : > { %19134 = vmatmul.mubr.msk.f32.gmra.mrb[136].mxu1 %vm2427_vm2, %v6250_v19  ;;  %v11503_v19 = vld [vmem:[#allocation2 + $0xf2] sm:$0xff] }
 0x873   : > { %20425 = vmatmul.mubr.msk.f32.gmra.mrb[70].mxu0 %vm2427_vm2, %v11037_v61  ;;  %19136 = vmatprep.mubr.msk.f32.mxu1 %vm23396_vm0, %v28148_v16  ;;  %v6717_v61 = vld [vmem:[#allocation2 + $0x9e] sm:$0xff] }
 0x874   : > { %20427 = vmatprep.mubr.msk.f32.mxu0 %vm23396_vm0, %v28148_v16 }
 0x876   : > { %19137 = vmatmul.mubr.msk.f32.gmra.mrb[138].mxu1 %vm2427_vm2, %v6251_v53  ;;  %v11504_v53 = vld [vmem:[#allocation2 + $0xfa] sm:$0xff] }
 0x877   : > { %20428 = vmatmul.mubr.msk.f32.gmra.mrb[72].mxu0 %vm2427_vm2, %v11038_v18  ;;  %19139 = vmatprep.mubr.msk.f32.mxu1 %vm23396_vm0, %v28148_v16  ;;  %v6718_v18 = vld [vmem:[#allocation2 + $0xa6] sm:$0xff] }
 0x878   : > { %20430 = vmatprep.mubr.msk.f32.mxu0 %vm23396_vm0, %v28148_v16 }
 0x87a   : > { %19140 = vmatmul.mubr.msk.f32.gmra.mrb[140].mxu1 %vm2427_vm2, %v6252_v55  ;;  %v11505_v55 = vld [vmem:[#allocation2 + $0x102] sm:$0xff] }
 0x87b   : > { %20431 = vmatmul.mubr.msk.f32.gmra.mrb[74].mxu0 %vm2427_vm2, %v11039_v51  ;;  %19142 = vmatprep.mubr.msk.f32.mxu1 %vm23396_vm0, %v28148_v16  ;;  %v6719_v51 = vld [vmem:[#allocation2 + $0xae] sm:$0xff] }
 0x87c   : > { %20433 = vmatprep.mubr.msk.f32.mxu0 %vm23396_vm0, %v28148_v16 }
 0x87e   : > { %19143 = vmatmul.mubr.msk.f32.gmra.mrb[142].mxu1 %vm2427_vm2, %v6253_v30  ;;  %v11506_v30 = vld [vmem:[#allocation2 + $0x10a] sm:$0xff] }
 0x87f   : > { %20434 = vmatmul.mubr.msk.f32.gmra.mrb[76].mxu0 %vm2427_vm2, %v11040_v52  ;;  %19145 = vmatprep.mubr.msk.f32.mxu1 %vm23396_vm0, %v28148_v16  ;;  %v6720_v52 = vld [vmem:[#allocation2 + $0xb6] sm:$0xff] }
 0x880   : > { %20436 = vmatprep.mubr.msk.f32.mxu0 %vm23396_vm0, %v28148_v16 }
 0x882   : > { %19146 = vmatmul.mubr.msk.f32.gmra.mrb[144].mxu1 %vm2427_vm2, %v6254_v4  ;;  %v6721_v4 = vld [vmem:[#allocation2 + $0xbe] sm:$0xff] }
 0x883   : > { %20437 = vmatmul.mubr.msk.f32.gmra.mrb[78].mxu0 %vm2427_vm2, %v11041_v22  ;;  %19148 = vmatprep.mubr.msk.f32.mxu1 %vm23396_vm0, %v28148_v16  ;;  %v11507_v22 = vld [vmem:[#allocation2 + $0x112] sm:$0xff] }
 0x884   : > { %20439 = vmatprep.mubr.msk.f32.mxu0 %vm23396_vm0, %v28148_v16 }
 0x886   : > { %19149 = vmatmul.mubr.msk.f32.gmra.mrb[146].mxu1 %vm2427_vm2, %v6255_v14  ;;  %v6722_v14 = vld [vmem:[#allocation2 + $0xc6] sm:$0xff] }
 0x887   : > { %20440 = vmatmul.mubr.msk.f32.gmra.mrb[80].mxu0 %vm2427_vm2, %v11042_v11  ;;  %19151 = vmatprep.mubr.msk.f32.mxu1 %vm23396_vm0, %v28148_v16  ;;  %v11508_v11 = vld [vmem:[#allocation2 + $0x11a] sm:$0xff] }
 0x888   : > { %20446 = vmatprep.mubr.msk.f32.mxu0 %vm23396_vm0, %v28148_v16 }
 0x88a   : > { %19152 = vmatmul.mubr.msk.f32.gmra.mrb[148].mxu1 %vm2427_vm2, %v6256_v13  ;;  %v6724_v13 = vld [vmem:[#allocation2 + $0xd6] sm:$0xff] }
 0x88b   : > { %20447 = vmatmul.mubr.msk.f32.vlgmr.msra.gmra.mrb[0].mxu0 %vm2427_vm2, %v11480_v29  ;;  %19154 = vmatprep.mubr.msk.f32.mxu1 %vm23396_vm0, %v28148_v16  ;;  %v11511_v29 = vld [vmem:[#allocation2 + $0x132] sm:$0xff] }
 0x88c   : > { %20449 = vmatprep.mubr.msk.f32.mxu0 %vm23396_vm0, %v28148_v16  ;;  %21301 = vmatpush3.bf16.msra.mxu0 %v21300_v47  ;;  %v11510_v47 = vld [vmem:[#allocation2 + $0x12a] sm:$0xff] }
 0x88d   : > { %21302 = vmatprep.subr.bf16.mxu0 %v23398_v38 }
 0x88e   : > { %19155 = vmatmul.mubr.msk.f32.gmra.mrb[150].mxu1 %vm2427_vm2, %v6257_v48  ;;  %v6725_v48 = vld [vmem:[#allocation2 + $0xde] sm:$0xff] }
 0x88f   : > { %20450 = vmatmul.mubr.msk.f32.gmra.mrb[2].mxu0 %vm2427_vm2, %v11481_v0  ;;  %19157 = vmatprep.mubr.msk.f32.mxu1 %vm23396_vm0, %v28148_v16  ;;  %v11512_v0 = vld [vmem:[#allocation2 + $0x13a] sm:$0xff] }
 0x890   : > { %20452 = vmatprep.mubr.msk.f32.mxu0 %vm23396_vm0, %v28148_v16 }
 0x892   : > { %19158 = vmatmul.mubr.msk.f32.gmra.mrb[152].mxu1 %vm2427_vm2, %v6258_v33  ;;  %v6726_v33 = vld [vmem:[#allocation2 + $0xe6] sm:$0xff] }
 0x893   : > { %20453 = vmatmul.mubr.msk.f32.gmra.mrb[4].mxu0 %vm2427_vm2, %v11482_v58  ;;  %19160 = vmatprep.mubr.msk.f32.mxu1 %vm23396_vm0, %v28148_v16  ;;  %v11513_v58 = vld [vmem:[#allocation2 + $0x142] sm:$0xff] }
 0x894   : > { %20455 = vmatprep.mubr.msk.f32.mxu0 %vm23396_vm0, %v28148_v16 }
 0x896   : > { %19161 = vmatmul.mubr.msk.f32.gmra.mrb[154].mxu1 %vm2427_vm2, %v6259_v32  ;;  %v6727_v32 = vld [vmem:[#allocation2 + $0xee] sm:$0xff] }
 0x897   : > { %20456 = vmatmul.mubr.msk.f32.gmra.mrb[6].mxu0 %vm2427_vm2, %v11483_v5  ;;  %19163 = vmatprep.mubr.msk.f32.mxu1 %vm23396_vm0, %v28148_v16  ;;  %v11514_v5 = vld [vmem:[#allocation2 + $0x14a] sm:$0xff] }
 0x898   : > { %20458 = vmatprep.mubr.msk.f32.mxu0 %vm23396_vm0, %v28148_v16 }
 0x89a   : > { %19164 = vmatmul.mubr.msk.f32.gmra.mrb[156].mxu1 %vm2427_vm2, %v6260_v3  ;;  %v6728_v3 = vld [vmem:[#allocation2 + $0xf6] sm:$0xff] }
 0x89b   : > { %20459 = vmatmul.mubr.msk.f32.gmra.mrb[8].mxu0 %vm2427_vm2, %v11484_v34  ;;  %19166 = vmatprep.mubr.msk.f32.mxu1 %vm23396_vm0, %v28148_v16  ;;  %v11515_v34 = vld [vmem:[#allocation2 + $0x152] sm:$0xff] }
 0x89c   : > { %20461 = vmatprep.mubr.msk.f32.mxu0 %vm23396_vm0, %v28148_v16 }
 0x89e   : > { %19167 = vmatmul.mubr.msk.f32.gmra.mrb[158].mxu1 %vm2427_vm2, %v6261_v40  ;;  %v6729_v40 = vld [vmem:[#allocation2 + $0xfe] sm:$0xff] }
 0x89f   : > { %20462 = vmatmul.mubr.msk.f32.gmra.mrb[10].mxu0 %vm2427_vm2, %v11485_v46  ;;  %19169 = vmatprep.mubr.msk.f32.mxu1 %vm23396_vm0, %v28148_v16  ;;  %v11516_v46 = vld [vmem:[#allocation2 + $0x15a] sm:$0xff] }
 0x8a0   : > { %20464 = vmatprep.mubr.msk.f32.mxu0 %vm23396_vm0, %v28148_v16 }
 0x8a2   : > { %19170 = vmatmul.mubr.msk.f32.gmra.mrb[160].mxu1 %vm2427_vm2, %v6262_v43  ;;  %v6730_v43 = vld [vmem:[#allocation2 + $0x106] sm:$0xff] }
 0x8a3   : > { %20465 = vmatmul.mubr.msk.f32.gmra.mrb[12].mxu0 %vm2427_vm2, %v11486_v23  ;;  %19176 = vmatprep.mubr.msk.f32.mxu1 %vm23396_vm0, %v28148_v16  ;;  %v11517_v23 = vld [vmem:[#allocation2 + $0x162] sm:$0xff] }
 0x8a4   : > { %20467 = vmatprep.mubr.msk.f32.mxu0 %vm23396_vm0, %v28148_v16 }
 0x8a6   : > { %19177 = vmatmul.mubr.msk.f32.vlgmr.msra.gmra.mrb[80].mxu1 %vm2427_vm2, %v6700_v59  ;;  %v11518_v59 = vld [vmem:[#allocation2 + $0x16a] sm:$0xff] }
 0x8a7   : > { %20468 = vmatmul.mubr.msk.f32.gmra.mrb[14].mxu0 %vm2427_vm2, %v11487_v1  ;;  %19179 = vmatprep.mubr.msk.f32.mxu1 %vm23396_vm0, %v28148_v16  ;;  %v6731_v1 = vld [vmem:[#allocation2 + $0x10e] sm:$0xff] }
 0x8a8   : > { %20470 = vmatprep.mubr.msk.f32.mxu0 %vm23396_vm0, %v28148_v16  ;;  %21356 = vmatpush3.bf16.msra.mxu1 %v24258_v44  ;;  %v6703_v44 = vld [vmem:[#allocation2 + $0x2e] sm:$0xff] }
 0x8aa   : > { %19180 = vmatmul.mubr.msk.f32.gmra.mrb[82].mxu1 %vm2427_vm2, %v6701_v60  ;;  %v11519_v60 = vld [vmem:[#allocation2 + $0x172] sm:$0xff] }
 0x8ab   : > { %20471 = vmatmul.mubr.msk.f32.gmra.mrb[16].mxu0 %vm2427_vm2, %v11488_v25  ;;  %19182 = vmatprep.mubr.msk.f32.mxu1 %vm23396_vm0, %v28148_v16  ;;  %v6732_v25 = vld [vmem:[#allocation2 + $0x116] sm:$0xff] }
 0x8ac   : > { %20473 = vmatprep.mubr.msk.f32.mxu0 %vm23396_vm0, %v28148_v16 }
 0x8ae   : > { %19183 = vmatmul.mubr.msk.f32.gmra.mrb[84].mxu1 %vm2427_vm2, %v6702_v9  ;;  %v11520_v9 = vld [vmem:[#allocation2 + $0x17a] sm:$0xf] }
 0x8af   : > { %20474 = vmatmul.mubr.msk.f32.gmra.mrb[18].mxu0 %vm2427_vm2, %v11489_v15  ;;  %19185 = vmatprep.mubr.msk.f32.mxu1 %vm23396_vm0, %v28148_v16  ;;  %v6733_v15 = vld [vmem:[#allocation2 + $0x11e] sm:$0xff] }
 0x8b0   : > { %20476 = vmatprep.mubr.msk.f32.mxu0 %vm23396_vm0, %v28148_v16 }
 0x8b2   : > { %19186 = vmatmul.mubr.msk.f32.gmra.mrb[86].mxu1 %vm2427_vm2, %v6703_v44  ;;  %v16260_v44 = vld [vmem:[%s28103_s4 + $0x150] sm:$0xff] }
 0x8b3   : > { %20477 = vmatmul.mubr.msk.f32.gmra.mrb[20].mxu0 %vm2427_vm2, %v11490_v7  ;;  %19188 = vmatprep.mubr.msk.f32.mxu1 %vm23396_vm0, %v28148_v16  ;;  %v16261_v7 = vld [vmem:[%s28103_s4 + $0x158] sm:$0xff] }
 0x8b4   : > { %20479 = vmatprep.mubr.msk.f32.mxu0 %vm23396_vm0, %v28148_v16 }
 0x8b6   : > { %19189 = vmatmul.mubr.msk.f32.gmra.mrb[88].mxu1 %vm2427_vm2, %v6704_v36  ;;  %v21303_v36 = vpack.c.bf16 %v16261_v7, %v16260_v44  ;;  %v11984_v44 = vld [vmem:[#allocation2 + $0x118] sm:$0xff] }
 0x8b7   : > { %20480 = vmatmul.mubr.msk.f32.gmra.mrb[22].mxu0 %vm2427_vm2, %v11491_v57  ;;  %19191 = vmatprep.mubr.msk.f32.mxu1 %vm23396_vm0, %v28148_v16  ;;  %v6734_v57 = vld [vmem:[#allocation2 + $0x126] sm:$0xff] }
 0x8b8   : > { %20482 = vmatprep.mubr.msk.f32.mxu0 %vm23396_vm0, %v28148_v16 }
 0x8ba   : > { %19192 = vmatmul.mubr.msk.f32.gmra.mrb[90].mxu1 %vm2427_vm2, %v6705_v37  ;;  %v11958_v37 = vld [vmem:[#allocation2 + $0x48] sm:$0xff] }
 0x8bb   : > { %20483 = vmatmul.mubr.msk.f32.gmra.mrb[24].mxu0 %vm2427_vm2, %v11492_v2  ;;  %19194 = vmatprep.mubr.msk.f32.mxu1 %vm23396_vm0, %v28148_v16  ;;  %v6735_v2 = vld [vmem:[#allocation2 + $0x12e] sm:$0xff] }
 0x8bc   : > { %20485 = vmatprep.mubr.msk.f32.mxu0 %vm23396_vm0, %v28148_v16 }
 0x8be   : > { %19195 = vmatmul.mubr.msk.f32.gmra.mrb[92].mxu1 %vm2427_vm2, %v6706_v45  ;;  %v11959_v45 = vld [vmem:[#allocation2 + $0x50] sm:$0xff] }
 0x8bf   : > { %20486 = vmatmul.mubr.msk.f32.gmra.mrb[26].mxu0 %vm2427_vm2, %v11493_v12  ;;  %19197 = vmatprep.mubr.msk.f32.mxu1 %vm23396_vm0, %v28148_v16  ;;  %v6736_v12 = vld [vmem:[#allocation2 + $0x136] sm:$0xff] }
 0x8c0   : > { %20488 = vmatprep.mubr.msk.f32.mxu0 %vm23396_vm0, %v28148_v16 }
 0x8c2   : > { %19198 = vmatmul.mubr.msk.f32.gmra.mrb[94].mxu1 %vm2427_vm2, %v6707_v6  ;;  %v11960_v6 = vld [vmem:[#allocation2 + $0x58] sm:$0xff] }
 0x8c3   : > { %20489 = vmatmul.mubr.msk.f32.gmra.mrb[28].mxu0 %vm2427_vm2, %v11494_v41  ;;  %19200 = vmatprep.mubr.msk.f32.mxu1 %vm23396_vm0, %v28148_v16  ;;  %v6737_v41 = vld [vmem:[#allocation2 + $0x13e] sm:$0xff] }
 0x8c4   : > { %20491 = vmatprep.mubr.msk.f32.mxu0 %vm23396_vm0, %v28148_v16 }
 0x8c6   : > { %19201 = vmatmul.mubr.msk.f32.gmra.mrb[96].mxu1 %vm2427_vm2, %v6708_v31  ;;  %v11961_v31 = vld [vmem:[#allocation2 + $0x60] sm:$0xff] }
 0x8c7   : > { %20492 = vmatmul.mubr.msk.f32.gmra.mrb[30].mxu0 %vm2427_vm2, %v11495_v63  ;;  %19203 = vmatprep.mubr.msk.f32.mxu1 %vm23396_vm0, %v28148_v16  ;;  %v6738_v63 = vld [vmem:[#allocation2 + $0x146] sm:$0xff] }
 0x8c8   : > { %20494 = vmatprep.mubr.msk.f32.mxu0 %vm23396_vm0, %v28148_v16 }
 0x8ca   : > { %19204 = vmatmul.mubr.msk.f32.gmra.mrb[98].mxu1 %vm2427_vm2, %v6709_v42  ;;  %v11962_v42 = vld [vmem:[#allocation2 + $0x68] sm:$0xff] }
 0x8cb   : > { %20495 = vmatmul.mubr.msk.f32.gmra.mrb[32].mxu0 %vm2427_vm2, %v11496_v35  ;;  %19206 = vmatprep.mubr.msk.f32.mxu1 %vm23396_vm0, %v28148_v16  ;;  %v6739_v35 = vld [vmem:[#allocation2 + $0x14e] sm:$0xff] }
 0x8cc   : > { %20497 = vmatprep.mubr.msk.f32.mxu0 %vm23396_vm0, %v28148_v16 }
 0x8ce   : > { %19207 = vmatmul.mubr.msk.f32.gmra.mrb[100].mxu1 %vm2427_vm2, %v6710_v28  ;;  %v11963_v28 = vld [vmem:[#allocation2 + $0x70] sm:$0xff] }
 0x8cf   : > { %20498 = vmatmul.mubr.msk.f32.gmra.mrb[34].mxu0 %vm2427_vm2, %v11497_v21  ;;  %19209 = vmatprep.mubr.msk.f32.mxu1 %vm23396_vm0, %v28148_v16  ;;  %v6740_v21 = vld [vmem:[#allocation2 + $0x156] sm:$0xf] }
 0x8d0   : > { %20500 = vmatprep.mubr.msk.f32.mxu0 %vm23396_vm0, %v28148_v16 }
 0x8d2   : > { %19210 = vmatmul.mubr.msk.f32.gmra.mrb[102].mxu1 %vm2427_vm2, %v6711_v49  ;;  %v11964_v49 = vld [vmem:[#allocation2 + $0x78] sm:$0xff] }
 0x8d3   : > { %20501 = vmatmul.mubr.msk.f32.gmra.mrb[36].mxu0 %vm2427_vm2, %v11498_v20  ;;  %19212 = vmatprep.mubr.msk.f32.mxu1 %vm23396_vm0, %v28148_v16  ;;  %v7208_v20 = vld [vmem:[#allocation2 + $0x114] sm:$0xff] }
 0x8d4   : > { %20503 = vmatprep.mubr.msk.f32.mxu0 %vm23396_vm0, %v28148_v16 }
 0x8d6   : > { %19213 = vmatmul.mubr.msk.f32.gmra.mrb[104].mxu1 %vm2427_vm2, %v6712_v10  ;;  %v11965_v10 = vld [vmem:[#allocation2 + $0x80] sm:$0xff] }
 0x8d7   : > { %20504 = vmatmul.mubr.msk.f32.gmra.mrb[38].mxu0 %vm2427_vm2, %v11499_v17  ;;  %19215 = vmatprep.mubr.msk.f32.mxu1 %vm23396_vm0, %v28148_v16  ;;  %v7209_v17 = vld [vmem:[#allocation2 + $0x11c] sm:$0xff] }
 0x8d8   : > { %20506 = vmatprep.mubr.msk.f32.mxu0 %vm23396_vm0, %v28148_v16 }
 0x8da   : > { %19216 = vmatmul.mubr.msk.f32.gmra.mrb[106].mxu1 %vm2427_vm2, %v6713_v54  ;;  %v11966_v54 = vld [vmem:[#allocation2 + $0x88] sm:$0xff] }
 0x8db   : > { %20507 = vmatmul.mubr.msk.f32.gmra.mrb[40].mxu0 %vm2427_vm2, %v11500_v56  ;;  %19218 = vmatprep.mubr.msk.f32.mxu1 %vm23396_vm0, %v28148_v16  ;;  %v7210_v56 = vld [vmem:[#allocation2 + $0x124] sm:$0xff] }
 0x8dc   : > { %20509 = vmatprep.mubr.msk.f32.mxu0 %vm23396_vm0, %v28148_v16 }
 0x8de   : > { %19219 = vmatmul.mubr.msk.f32.gmra.mrb[108].mxu1 %vm2427_vm2, %v6714_v24  ;;  %v11967_v24 = vld [vmem:[#allocation2 + $0x90] sm:$0xff] }
 0x8df   : > { %20510 = vmatmul.mubr.msk.f32.gmra.mrb[42].mxu0 %vm2427_vm2, %v11501_v50  ;;  %19221 = vmatprep.mubr.msk.f32.mxu1 %vm23396_vm0, %v28148_v16  ;;  %v7211_v50 = vld [vmem:[#allocation2 + $0x12c] sm:$0xff] }
 0x8e0   : > { %20512 = vmatprep.mubr.msk.f32.mxu0 %vm23396_vm0, %v28148_v16 }
 0x8e2   : > { %19222 = vmatmul.mubr.msk.f32.gmra.mrb[110].mxu1 %vm2427_vm2, %v6715_v27  ;;  %v11968_v27 = vld [vmem:[#allocation2 + $0x98] sm:$0xff] }
 0x8e3   : > { %20513 = vmatmul.mubr.msk.f32.gmra.mrb[44].mxu0 %vm2427_vm2, %v11502_v8  ;;  %19224 = vmatprep.mubr.msk.f32.mxu1 %vm23396_vm0, %v28148_v16  ;;  %v7212_v8 = vld [vmem:[#allocation2 + $0x134] sm:$0xff] }
 0x8e4   : > { %20515 = vmatprep.mubr.msk.f32.mxu0 %vm23396_vm0, %v28148_v16 }
 0x8e6   : > { %19225 = vmatmul.mubr.msk.f32.gmra.mrb[112].mxu1 %vm2427_vm2, %v6716_v26  ;;  %v11969_v26 = vld [vmem:[#allocation2 + $0xa0] sm:$0xff] }
 0x8e7   : > { %20516 = vmatmul.mubr.msk.f32.gmra.mrb[46].mxu0 %vm2427_vm2, %v11503_v19  ;;  %19227 = vmatprep.mubr.msk.f32.mxu1 %vm23396_vm0, %v28148_v16  ;;  %v7213_v19 = vld [vmem:[#allocation2 + $0x13c] sm:$0xff] }
 0x8e8   : > { %20518 = vmatprep.mubr.msk.f32.mxu0 %vm23396_vm0, %v28148_v16 }
 0x8ea   : > { %19228 = vmatmul.mubr.msk.f32.gmra.mrb[114].mxu1 %vm2427_vm2, %v6717_v61  ;;  %v11970_v61 = vld [vmem:[#allocation2 + $0xa8] sm:$0xff] }
 0x8eb   : > { %20519 = vmatmul.mubr.msk.f32.gmra.mrb[48].mxu0 %vm2427_vm2, %v11504_v53  ;;  %19230 = vmatprep.mubr.msk.f32.mxu1 %vm23396_vm0, %v28148_v16  ;;  %v7214_v53 = vld [vmem:[#allocation2 + $0x144] sm:$0xff] }
 0x8ec   : > { %20521 = vmatprep.mubr.msk.f32.mxu0 %vm23396_vm0, %v28148_v16 }
 0x8ee   : > { %19231 = vmatmul.mubr.msk.f32.gmra.mrb[116].mxu1 %vm2427_vm2, %v6718_v18  ;;  %v11971_v18 = vld [vmem:[#allocation2 + $0xb0] sm:$0xff] }
 0x8ef   : > { %20522 = vmatmul.mubr.msk.f32.gmra.mrb[50].mxu0 %vm2427_vm2, %v11505_v55  ;;  %19233 = vmatprep.mubr.msk.f32.mxu1 %vm23396_vm0, %v28148_v16  ;;  %v7215_v55 = vld [vmem:[#allocation2 + $0x14c] sm:$0xff] }
 0x8f0   : > { %20524 = vmatprep.mubr.msk.f32.mxu0 %vm23396_vm0, %v28148_v16 }
 0x8f2   : > { %19234 = vmatmul.mubr.msk.f32.gmra.mrb[118].mxu1 %vm2427_vm2, %v6719_v51  ;;  %v11972_v51 = vld [vmem:[#allocation2 + $0xb8] sm:$0xff] }
 0x8f3   : > { %20525 = vmatmul.mubr.msk.f32.gmra.mrb[52].mxu0 %vm2427_vm2, %v11506_v30  ;;  %19236 = vmatprep.mubr.msk.f32.mxu1 %vm23396_vm0, %v28148_v16  ;;  %v7216_v30 = vld [vmem:[#allocation2 + $0x154] sm:$0xff] }
 0x8f4   : > { %20527 = vmatprep.mubr.msk.f32.mxu0 %vm23396_vm0, %v28148_v16 }
 0x8f6   : > { %19237 = vmatmul.mubr.msk.f32.gmra.mrb[120].mxu1 %vm2427_vm2, %v6720_v52  ;;  %v11973_v52 = vld [vmem:[#allocation2 + $0xc0] sm:$0xff] }
 0x8f7   : > { %20528 = vmatmul.mubr.msk.f32.gmra.mrb[54].mxu0 %vm2427_vm2, %v11507_v22  ;;  %19239 = vmatprep.mubr.msk.f32.mxu1 %vm23396_vm0, %v28148_v16  ;;  %v7217_v22 = vld [vmem:[#allocation2 + $0x15c] sm:$0xff] }
 0x8f8   : > { %20530 = vmatprep.mubr.msk.f32.mxu0 %vm23396_vm0, %v28148_v16 }
 0x8fa   : > { %19240 = vmatmul.mubr.msk.f32.gmra.mrb[122].mxu1 %vm2427_vm2, %v6721_v4  ;;  %v11974_v4 = vld [vmem:[#allocation2 + $0xc8] sm:$0xff] }
 0x8fb   : > { %20531 = vmatmul.mubr.msk.f32.gmra.mrb[56].mxu0 %vm2427_vm2, %v11508_v11  ;;  %19242 = vmatprep.mubr.msk.f32.mxu1 %vm23396_vm0, %v28148_v16  ;;  %v7218_v11 = vld [vmem:[#allocation2 + $0x164] sm:$0xf] }
 0x8fc   : > { %20533 = vmatprep.mubr.msk.f32.mxu0 %vm23396_vm0, %v28148_v16 }
 0x8fe   : > { %19243 = vmatmul.mubr.msk.f32.gmra.mrb[124].mxu1 %vm2427_vm2, %v6722_v14  ;;  %v11975_v14 = vld [vmem:[#allocation2 + $0xd0] sm:$0xff] }
 0x8ff   : > { %20534 = vmatmul.mubr.msk.f32.gmra.mrb[58].mxu0 %vm2427_vm2, %v11509_v39  ;;  %19245 = vmatprep.mubr.msk.f32.mxu1 %vm23396_vm0, %v28148_v16  ;;  %v11976_v39 = vld [vmem:[#allocation2 + $0xd8] sm:$0xff] }
 0x900   : > { %20536 = vmatprep.mubr.msk.f32.mxu0 %vm23396_vm0, %v28148_v16 }
 0x902   : > { %19246 = vmatmul.mubr.msk.f32.gmra.mrb[126].mxu1 %vm2427_vm2, %v6723_v62 }
 0x903   : > { %20537 = vmatmul.mubr.msk.f32.gmra.mrb[60].mxu0 %vm2427_vm2, %v11510_v47  ;;  %19248 = vmatprep.mubr.msk.f32.mxu1 %vm23396_vm0, %v28148_v16  ;;  %v11977_v47 = vld [vmem:[#allocation2 + $0xe0] sm:$0xff] }
 0x904   : > { %20539 = vmatprep.mubr.msk.f32.mxu0 %vm23396_vm0, %v28148_v16 }
 0x906   : > { %19249 = vmatmul.mubr.msk.f32.gmra.mrb[128].mxu1 %vm2427_vm2, %v6724_v13 }
 0x907   : > { %20540 = vmatmul.mubr.msk.f32.gmra.mrb[62].mxu0 %vm2427_vm2, %v11511_v29  ;;  %19251 = vmatprep.mubr.msk.f32.mxu1 %vm23396_vm0, %v28148_v16 }
 0x908   : > { %20542 = vmatprep.mubr.msk.f32.mxu0 %vm23396_vm0, %v28148_v16 }
 0x90a   : > { %19252 = vmatmul.mubr.msk.f32.gmra.mrb[130].mxu1 %vm2427_vm2, %v6725_v48  ;;  %v11978_v48 = vld [vmem:[#allocation2 + $0xe8] sm:$0xff] }
 0x90b   : > { %20543 = vmatmul.mubr.msk.f32.gmra.mrb[64].mxu0 %vm2427_vm2, %v11512_v0  ;;  %19254 = vmatprep.mubr.msk.f32.mxu1 %vm23396_vm0, %v28148_v16 }
 0x90c   : > { %20545 = vmatprep.mubr.msk.f32.mxu0 %vm23396_vm0, %v28148_v16 }
 0x90e   : > { %19255 = vmatmul.mubr.msk.f32.gmra.mrb[132].mxu1 %vm2427_vm2, %v6726_v33 }
 0x90f   : > { %20546 = vmatmul.mubr.msk.f32.gmra.mrb[66].mxu0 %vm2427_vm2, %v11513_v58  ;;  %19257 = vmatprep.mubr.msk.f32.mxu1 %vm23396_vm0, %v28148_v16  ;;  %v11979_v58 = vld [vmem:[#allocation2 + $0xf0] sm:$0xff] }
 0x910   : > { %20548 = vmatprep.mubr.msk.f32.mxu0 %vm23396_vm0, %v28148_v16 }
 0x912   : > { %19258 = vmatmul.mubr.msk.f32.gmra.mrb[134].mxu1 %vm2427_vm2, %v6727_v32 }
 0x913   : > { %20549 = vmatmul.mubr.msk.f32.gmra.mrb[68].mxu0 %vm2427_vm2, %v11514_v5  ;;  %19260 = vmatprep.mubr.msk.f32.mxu1 %vm23396_vm0, %v28148_v16 }
 0x914   : > { %20551 = vmatprep.mubr.msk.f32.mxu0 %vm23396_vm0, %v28148_v16 }
 0x916   : > { %19261 = vmatmul.mubr.msk.f32.gmra.mrb[136].mxu1 %vm2427_vm2, %v6728_v3  ;;  %v11980_v3 = vld [vmem:[#allocation2 + $0xf8] sm:$0xff] }
 0x917   : > { %20552 = vmatmul.mubr.msk.f32.gmra.mrb[70].mxu0 %vm2427_vm2, %v11515_v34  ;;  %19263 = vmatprep.mubr.msk.f32.mxu1 %vm23396_vm0, %v28148_v16 }
 0x918   : > { %20554 = vmatprep.mubr.msk.f32.mxu0 %vm23396_vm0, %v28148_v16 }
 0x91a   : > { %19264 = vmatmul.mubr.msk.f32.gmra.mrb[138].mxu1 %vm2427_vm2, %v6729_v40 }
 0x91b   : > { %20555 = vmatmul.mubr.msk.f32.gmra.mrb[72].mxu0 %vm2427_vm2, %v11516_v46  ;;  %19266 = vmatprep.mubr.msk.f32.mxu1 %vm23396_vm0, %v28148_v16  ;;  %v11981_v46 = vld [vmem:[#allocation2 + $0x100] sm:$0xff] }
 0x91c   : > { %20557 = vmatprep.mubr.msk.f32.mxu0 %vm23396_vm0, %v28148_v16 }
 0x91e   : > { %19267 = vmatmul.mubr.msk.f32.gmra.mrb[140].mxu1 %vm2427_vm2, %v6730_v43 }
 0x91f   : > { %20558 = vmatmul.mubr.msk.f32.gmra.mrb[74].mxu0 %vm2427_vm2, %v11517_v23  ;;  %19269 = vmatprep.mubr.msk.f32.mxu1 %vm23396_vm0, %v28148_v16 }
 0x920   : > { %20560 = vmatprep.mubr.msk.f32.mxu0 %vm23396_vm0, %v28148_v16 }
 0x922   : > { %19270 = vmatmul.mubr.msk.f32.gmra.mrb[142].mxu1 %vm2427_vm2, %v6731_v1 }
 0x923   : > { %20561 = vmatmul.mubr.msk.f32.gmra.mrb[76].mxu0 %vm2427_vm2, %v11518_v59  ;;  %19272 = vmatprep.mubr.msk.f32.mxu1 %vm23396_vm0, %v28148_v16  ;;  %v11982_v59 = vld [vmem:[#allocation2 + $0x108] sm:$0xff] }
 0x924   : > { %20563 = vmatprep.mubr.msk.f32.mxu0 %vm23396_vm0, %v28148_v16 }
 0x926   : > { %19273 = vmatmul.mubr.msk.f32.gmra.mrb[144].mxu1 %vm2427_vm2, %v6732_v25  ;;  %v11983_v25 = vld [vmem:[#allocation2 + $0x110] sm:$0xff] }
 0x927   : > { %20564 = vmatmul.mubr.msk.f32.gmra.mrb[78].mxu0 %vm2427_vm2, %v11519_v60  ;;  %19275 = vmatprep.mubr.msk.f32.mxu1 %vm23396_vm0, %v28148_v16 }
 0x928   : > { %20566 = vmatprep.mubr.msk.f32.mxu0 %vm23396_vm0, %v28148_v16 }
 0x92a   : > { %19276 = vmatmul.mubr.msk.f32.gmra.mrb[146].mxu1 %vm2427_vm2, %v6733_v15 }
 0x92b   : > { %20567 = vmatmul.mubr.msk.f32.gmra.mrb[80].mxu0 %vm2427_vm2, %v11520_v9  ;;  %19278 = vmatprep.mubr.msk.f32.mxu1 %vm23396_vm0, %v28148_v16 }
 0x92c   : > { %20573 = vmatprep.mubr.msk.f32.mxu0 %vm23396_vm0, %v28148_v16 }
 0x92e   : > { %19279 = vmatmul.mubr.msk.f32.gmra.mrb[148].mxu1 %vm2427_vm2, %v6734_v57  ;;  %v11985_v57 = vld [vmem:[#allocation2 + $0x120] sm:$0xff] }
 0x92f   : > { %20574 = vmatmul.mubr.msk.f32.vlgmr.msra.gmra.mrb[0].mxu0 %vm2427_vm2, %v11958_v37  ;;  %19281 = vmatprep.mubr.msk.f32.mxu1 %vm23396_vm0, %v28148_v16 }
 0x930   : > { %20576 = vmatprep.mubr.msk.f32.mxu0 %vm23396_vm0, %v28148_v16  ;;  %21304 = vmatpush3.bf16.msra.mxu0 %v21303_v36 }
 0x931   : > { %21305 = vmatprep.subr.bf16.mxu0 %v23398_v38 }
 0x932   : > { %19282 = vmatmul.mubr.msk.f32.gmra.mrb[150].mxu1 %vm2427_vm2, %v6735_v2 }
 0x933   : > { %20577 = vmatmul.mubr.msk.f32.gmra.mrb[2].mxu0 %vm2427_vm2, %v11959_v45  ;;  %19284 = vmatprep.mubr.msk.f32.mxu1 %vm23396_vm0, %v28148_v16  ;;  %v11986_v45 = vld [vmem:[#allocation2 + $0x128] sm:$0xff] }
 0x934   : > { %20579 = vmatprep.mubr.msk.f32.mxu0 %vm23396_vm0, %v28148_v16 }
 0x936   : > { %19285 = vmatmul.mubr.msk.f32.gmra.mrb[152].mxu1 %vm2427_vm2, %v6736_v12 }
 0x937   : > { %20580 = vmatmul.mubr.msk.f32.gmra.mrb[4].mxu0 %vm2427_vm2, %v11960_v6  ;;  %19287 = vmatprep.mubr.msk.f32.mxu1 %vm23396_vm0, %v28148_v16 }
 0x938   : > { %20582 = vmatprep.mubr.msk.f32.mxu0 %vm23396_vm0, %v28148_v16 }
 0x93a   : > { %19288 = vmatmul.mubr.msk.f32.gmra.mrb[154].mxu1 %vm2427_vm2, %v6737_v41  ;;  %v11987_v41 = vld [vmem:[#allocation2 + $0x130] sm:$0xff] }
 0x93b   : > { %20583 = vmatmul.mubr.msk.f32.gmra.mrb[6].mxu0 %vm2427_vm2, %v11961_v31  ;;  %19290 = vmatprep.mubr.msk.f32.mxu1 %vm23396_vm0, %v28148_v16 }
 0x93c   : > { %20585 = vmatprep.mubr.msk.f32.mxu0 %vm23396_vm0, %v28148_v16 }
 0x93e   : > { %19291 = vmatmul.mubr.msk.f32.gmra.mrb[156].mxu1 %vm2427_vm2, %v6738_v63 }
 0x93f   : > { %20586 = vmatmul.mubr.msk.f32.gmra.mrb[8].mxu0 %vm2427_vm2, %v11962_v42  ;;  %19293 = vmatprep.mubr.msk.f32.mxu1 %vm23396_vm0, %v28148_v16  ;;  %v11988_v42 = vld [vmem:[#allocation2 + $0x138] sm:$0xff] }
 0x940   : > { %20588 = vmatprep.mubr.msk.f32.mxu0 %vm23396_vm0, %v28148_v16 }
 0x942   : > { %19294 = vmatmul.mubr.msk.f32.gmra.mrb[158].mxu1 %vm2427_vm2, %v6739_v35 }
 0x943   : > { %20589 = vmatmul.mubr.msk.f32.gmra.mrb[10].mxu0 %vm2427_vm2, %v11963_v28  ;;  %19296 = vmatprep.mubr.msk.f32.mxu1 %vm23396_vm0, %v28148_v16 }
 0x944   : > { %20591 = vmatprep.mubr.msk.f32.mxu0 %vm23396_vm0, %v28148_v16 }
 0x946   : > { %19297 = vmatmul.mubr.msk.f32.gmra.mrb[160].mxu1 %vm2427_vm2, %v6740_v21  ;;  %v11989_v21 = vld [vmem:[#allocation2 + $0x140] sm:$0xff] }
 0x947   : > { %20592 = vmatmul.mubr.msk.f32.gmra.mrb[12].mxu0 %vm2427_vm2, %v11964_v49  ;;  %19393 = vmatprep.mubr.msk.f32.mxu1 %vm23396_vm0, %v28148_v16 }
 0x948   : > { %20594 = vmatprep.mubr.msk.f32.mxu0 %vm23396_vm0, %v28148_v16 }
 0x94a   : > { %19394 = vmatmul.mubr.msk.f32.vlgmr.msra.gmra.mrb[140].mxu1 %vm2427_vm2, %v7208_v20 }
 0x94b   : > { %20595 = vmatmul.mubr.msk.f32.gmra.mrb[14].mxu0 %vm2427_vm2, %v11965_v10  ;;  %19396 = vmatprep.mubr.msk.f32.mxu1 %vm23396_vm0, %v28148_v16  ;;  %v11990_v10 = vld [vmem:[#allocation2 + $0x148] sm:$0xff] }
 0x94c   : > { %20597 = vmatprep.mubr.msk.f32.mxu0 %vm23396_vm0, %v28148_v16 }
 0x94e   : > { %19397 = vmatmul.mubr.msk.f32.gmra.mrb[142].mxu1 %vm2427_vm2, %v7209_v17 }
 0x94f   : > { %20598 = vmatmul.mubr.msk.f32.gmra.mrb[16].mxu0 %vm2427_vm2, %v11966_v54  ;;  %19399 = vmatprep.mubr.msk.f32.mxu1 %vm23396_vm0, %v28148_v16 }
 0x950   : > { %20600 = vmatprep.mubr.msk.f32.mxu0 %vm23396_vm0, %v28148_v16 }
 0x952   : > { %19400 = vmatmul.mubr.msk.f32.gmra.mrb[144].mxu1 %vm2427_vm2, %v7210_v56  ;;  %v11991_v56 = vld [vmem:[#allocation2 + $0x150] sm:$0xff] }
 0x953   : > { %20601 = vmatmul.mubr.msk.f32.gmra.mrb[18].mxu0 %vm2427_vm2, %v11967_v24  ;;  %19402 = vmatprep.mubr.msk.f32.mxu1 %vm23396_vm0, %v28148_v16 }
 0x954   : > { %20603 = vmatprep.mubr.msk.f32.mxu0 %vm23396_vm0, %v28148_v16 }
 0x956   : > { %19403 = vmatmul.mubr.msk.f32.gmra.mrb[146].mxu1 %vm2427_vm2, %v7211_v50 }
 0x957   : > { %20604 = vmatmul.mubr.msk.f32.gmra.mrb[20].mxu0 %vm2427_vm2, %v11968_v27  ;;  %19405 = vmatprep.mubr.msk.f32.mxu1 %vm23396_vm0, %v28148_v16  ;;  %v11992_v27 = vld [vmem:[#allocation2 + $0x158] sm:$0xff] }
 0x958   : > { %20606 = vmatprep.mubr.msk.f32.mxu0 %vm23396_vm0, %v28148_v16 }
 0x95a   : > { %19406 = vmatmul.mubr.msk.f32.gmra.mrb[148].mxu1 %vm2427_vm2, %v7212_v8 }
 0x95b   : > { %20607 = vmatmul.mubr.msk.f32.gmra.mrb[22].mxu0 %vm2427_vm2, %v11969_v26  ;;  %19408 = vmatprep.mubr.msk.f32.mxu1 %vm23396_vm0, %v28148_v16 }
 0x95c   : > { %20609 = vmatprep.mubr.msk.f32.mxu0 %vm23396_vm0, %v28148_v16 }
 0x95e   : > { %19409 = vmatmul.mubr.msk.f32.gmra.mrb[150].mxu1 %vm2427_vm2, %v7213_v19  ;;  %v11993_v19 = vld [vmem:[#allocation2 + $0x160] sm:$0xff] }
 0x95f   : > { %20610 = vmatmul.mubr.msk.f32.gmra.mrb[24].mxu0 %vm2427_vm2, %v11970_v61  ;;  %19411 = vmatprep.mubr.msk.f32.mxu1 %vm23396_vm0, %v28148_v16 }
 0x960   : > { %20612 = vmatprep.mubr.msk.f32.mxu0 %vm23396_vm0, %v28148_v16 }
 0x962   : > { %19412 = vmatmul.mubr.msk.f32.gmra.mrb[152].mxu1 %vm2427_vm2, %v7214_v53 }
 0x963   : > { %20613 = vmatmul.mubr.msk.f32.gmra.mrb[26].mxu0 %vm2427_vm2, %v11971_v18  ;;  %19414 = vmatprep.mubr.msk.f32.mxu1 %vm23396_vm0, %v28148_v16  ;;  %v11994_v18 = vld [vmem:[#allocation2 + $0x168] sm:$0xff] }
 0x964   : > { %20615 = vmatprep.mubr.msk.f32.mxu0 %vm23396_vm0, %v28148_v16 }
 0x966   : > { %19415 = vmatmul.mubr.msk.f32.gmra.mrb[154].mxu1 %vm2427_vm2, %v7215_v55 }
 0x967   : > { %20616 = vmatmul.mubr.msk.f32.gmra.mrb[28].mxu0 %vm2427_vm2, %v11972_v51  ;;  %19417 = vmatprep.mubr.msk.f32.mxu1 %vm23396_vm0, %v28148_v16  ;;  %v11995_v51 = vld [vmem:[#allocation2 + $0x170] sm:$0xff] }
 0x968   : > { %20618 = vmatprep.mubr.msk.f32.mxu0 %vm23396_vm0, %v28148_v16 }
 0x96a   : > { %19418 = vmatmul.mubr.msk.f32.gmra.mrb[156].mxu1 %vm2427_vm2, %v7216_v30 }
 0x96b   : > { %20619 = vmatmul.mubr.msk.f32.gmra.mrb[30].mxu0 %vm2427_vm2, %v11973_v52  ;;  %19420 = vmatprep.mubr.msk.f32.mxu1 %vm23396_vm0, %v28148_v16 }
 0x96c   : > { %20621 = vmatprep.mubr.msk.f32.mxu0 %vm23396_vm0, %v28148_v16 }
 0x96e   : > { %19421 = vmatmul.mubr.msk.f32.gmra.mrb[158].mxu1 %vm2427_vm2, %v7217_v22  ;;  %v11996_v22 = vld [vmem:[#allocation2 + $0x178] sm:$0xff] }
 0x96f   : > { %20622 = vmatmul.mubr.msk.f32.gmra.mrb[32].mxu0 %vm2427_vm2, %v11974_v4  ;;  %19423 = vmatprep.mubr.msk.f32.mxu1 %vm23396_vm0, %v28148_v16 }
 0x970   : > { %20624 = vmatprep.mubr.msk.f32.mxu0 %vm23396_vm0, %v28148_v16 }
 0x972   : > { %19424 = vmatmul.mubr.msk.f32.gmra.mrb[160].mxu1 %vm2427_vm2, %v7218_v11 }
 0x973   : > { %20625 = vmatmul.mubr.msk.f32.gmra.mrb[34].mxu0 %vm2427_vm2, %v11975_v14  ;;  %v11997_v14 = vld [vmem:[#allocation2 + $0x180] sm:$0xff] }
 0x974   : > { %20627 = vmatprep.mubr.msk.f32.mxu0 %vm23396_vm0, %v28148_v16 }
 0x977   : > { %20628 = vmatmul.mubr.msk.f32.gmra.mrb[36].mxu0 %vm2427_vm2, %v11976_v39 }
 0x978   : > { %20630 = vmatprep.mubr.msk.f32.mxu0 %vm23396_vm0, %v28148_v16 }
 0x979   : > { %v27215_v62 = vpop.f32.mrb[80].mxu1 }
 0x97a   : > { %v19178_v13 = vpop.f32.mrb[81].mxu1 }
 0x97b   : > { %20631 = vmatmul.mubr.msk.f32.gmra.mrb[38].mxu0 %vm2427_vm2, %v11977_v47  ;;  %v11998_v13 = vld [vmem:[#allocation2 + $0x188] sm:$0xf] }
 0x97c   : > { %20633 = vmatprep.mubr.msk.f32.mxu0 %vm23396_vm0, %v28148_v16 }
 0x97d   : > { %v27220_v29 = vpop.f32.mrb[82].mxu1 }
 0x97e   : > { %v19181_v0 = vpop.f32.mrb[83].mxu1 }
 0x97f   : > { %20634 = vmatmul.mubr.msk.f32.gmra.mrb[40].mxu0 %vm2427_vm2, %v11978_v48  ;;  %v16303_v48 = vld [vmem:[%s28103_s4 + $0x160] sm:$0xff]  ;;  %v16304_v0 = vld [vmem:[%s28103_s4 + $0x168] sm:$0xff] }
 0x980   : > { %20636 = vmatprep.mubr.msk.f32.mxu0 %vm23396_vm0, %v28148_v16 }
 0x981   : > { %v27225_v33 = vpop.f32.mrb[84].mxu1 }
 0x982   : > { %v19184_v32 = vpop.f32.mrb[85].mxu1 }
 0x983   : > { %20637 = vmatmul.mubr.msk.f32.gmra.mrb[42].mxu0 %vm2427_vm2, %v11979_v58 }
 0x984   : > { %20639 = vmatprep.mubr.msk.f32.mxu0 %vm23396_vm0, %v28148_v16 }
 0x985   : > { %v27230_v5 = vpop.f32.mrb[86].mxu1 }
 0x986   : > { %v19187_v34 = vpop.f32.mrb[87].mxu1 }
 0x987   : > { %20640 = vmatmul.mubr.msk.f32.gmra.mrb[44].mxu0 %vm2427_vm2, %v11980_v3  ;;  %v21306_v3 = vpack.c.bf16 %v16304_v0, %v16303_v48  ;;  %v12455_v48 = vld [vmem:[#allocation2 + $0xe1] sm:$0xff] }
 0x988   : > { %20642 = vmatprep.mubr.msk.f32.mxu0 %vm23396_vm0, %v28148_v16 }
 0x989   : > { %v27235_v40 = vpop.f32.mrb[88].mxu1 }
 0x98a   : > { %v19190_v43 = vpop.f32.mrb[89].mxu1 }
 0x98b   : > { %20643 = vmatmul.mubr.msk.f32.gmra.mrb[46].mxu0 %vm2427_vm2, %v11981_v46  ;;  %v12436_v46 = vld [vmem:[#allocation2 + $0x49] sm:$0xff] }
 0x98c   : > { %20645 = vmatprep.mubr.msk.f32.mxu0 %vm23396_vm0, %v28148_v16 }
 0x98d   : > { %v27240_v23 = vpop.f32.mrb[90].mxu1 }
 0x98e   : > { %v19193_v1 = vpop.f32.mrb[91].mxu1 }
 0x98f   : > { %20646 = vmatmul.mubr.msk.f32.gmra.mrb[48].mxu0 %vm2427_vm2, %v11982_v59  ;;  %v12437_v1 = vld [vmem:[#allocation2 + $0x51] sm:$0xff] }
 0x990   : > { %20648 = vmatprep.mubr.msk.f32.mxu0 %vm23396_vm0, %v28148_v16 }
 0x991   : > { %v27245_v60 = vpop.f32.mrb[92].mxu1 }
 0x992   : > { %v19196_v9 = vpop.f32.mrb[93].mxu1 }
 0x993   : > { %20649 = vmatmul.mubr.msk.f32.gmra.mrb[50].mxu0 %vm2427_vm2, %v11983_v25 }
 0x994   : > { %20651 = vmatprep.mubr.msk.f32.mxu0 %vm23396_vm0, %v28148_v16 }
 0x995   : > { %v27250_v15 = vpop.f32.mrb[94].mxu1 }
 0x996   : > { %v19199_v7 = vpop.f32.mrb[95].mxu1 }
 0x997   : > { %20652 = vmatmul.mubr.msk.f32.gmra.mrb[52].mxu0 %vm2427_vm2, %v11984_v44  ;;  %v12438_v44 = vld [vmem:[#allocation2 + $0x59] sm:$0xff] }
 0x998   : > { %20654 = vmatprep.mubr.msk.f32.mxu0 %vm23396_vm0, %v28148_v16 }
 0x999   : > { %v27255_v36 = vpop.f32.mrb[96].mxu1 }
 0x99a   : > { %v19202_v37 = vpop.f32.mrb[97].mxu1 }
 0x99b   : > { %20655 = vmatmul.mubr.msk.f32.gmra.mrb[54].mxu0 %vm2427_vm2, %v11985_v57  ;;  %v12439_v37 = vld [vmem:[#allocation2 + $0x61] sm:$0xff] }
 0x99c   : > { %20657 = vmatprep.mubr.msk.f32.mxu0 %vm23396_vm0, %v28148_v16 }
 0x99d   : > { %v27260_v2 = vpop.f32.mrb[98].mxu1 }
 0x99e   : > { %v19205_v12 = vpop.f32.mrb[99].mxu1 }
 0x99f   : > { %20658 = vmatmul.mubr.msk.f32.gmra.mrb[56].mxu0 %vm2427_vm2, %v11986_v45 }
 0x9a0   : > { %20660 = vmatprep.mubr.msk.f32.mxu0 %vm23396_vm0, %v28148_v16 }
 0x9a1   : > { %v27265_v6 = vpop.f32.mrb[100].mxu1 }
 0x9a2   : > { %v19208_v31 = vpop.f32.mrb[101].mxu1 }
 0x9a3   : > { %20661 = vmatmul.mubr.msk.f32.gmra.mrb[58].mxu0 %vm2427_vm2, %v11987_v41  ;;  %v12440_v41 = vld [vmem:[#allocation2 + $0x69] sm:$0xff] }
 0x9a4   : > { %20663 = vmatprep.mubr.msk.f32.mxu0 %vm23396_vm0, %v28148_v16 }
 0x9a5   : > { %v27270_v63 = vpop.f32.mrb[102].mxu1 }
 0x9a6   : > { %v19211_v35 = vpop.f32.mrb[103].mxu1 }
 0x9a7   : > { %20664 = vmatmul.mubr.msk.f32.gmra.mrb[60].mxu0 %vm2427_vm2, %v11988_v42  ;;  %v12441_v35 = vld [vmem:[#allocation2 + $0x71] sm:$0xff] }
 0x9a8   : > { %20666 = vmatprep.mubr.msk.f32.mxu0 %vm23396_vm0, %v28148_v16 }
 0x9a9   : > { %v27275_v28 = vpop.f32.mrb[104].mxu1 }
 0x9aa   : > { %v19214_v49 = vpop.f32.mrb[105].mxu1 }
 0x9ab   : > { %20667 = vmatmul.mubr.msk.f32.gmra.mrb[62].mxu0 %vm2427_vm2, %v11989_v21 }
 0x9ac   : > { %20669 = vmatprep.mubr.msk.f32.mxu0 %vm23396_vm0, %v28148_v16 }
 0x9ad   : > { %v27280_v20 = vpop.f32.mrb[106].mxu1 }
 0x9ae   : > { %v19217_v17 = vpop.f32.mrb[107].mxu1 }
 0x9af   : > { %20670 = vmatmul.mubr.msk.f32.gmra.mrb[64].mxu0 %vm2427_vm2, %v11990_v10  ;;  %v12442_v10 = vld [vmem:[#allocation2 + $0x79] sm:$0xff] }
 0x9b0   : > { %20672 = vmatprep.mubr.msk.f32.mxu0 %vm23396_vm0, %v28148_v16 }
 0x9b1   : > { %v27285_v54 = vpop.f32.mrb[108].mxu1 }
 0x9b2   : > { %v19220_v24 = vpop.f32.mrb[109].mxu1 }
 0x9b3   : > { %20673 = vmatmul.mubr.msk.f32.gmra.mrb[66].mxu0 %vm2427_vm2, %v11991_v56  ;;  %v12443_v24 = vld [vmem:[#allocation2 + $0x81] sm:$0xff] }
 0x9b4   : > { %20675 = vmatprep.mubr.msk.f32.mxu0 %vm23396_vm0, %v28148_v16 }
 0x9b5   : > { %v27290_v50 = vpop.f32.mrb[110].mxu1 }
 0x9b6   : > { %v19223_v8 = vpop.f32.mrb[111].mxu1 }
 0x9b7   : > { %20676 = vmatmul.mubr.msk.f32.gmra.mrb[68].mxu0 %vm2427_vm2, %v11992_v27  ;;  %v12444_v8 = vld [vmem:[#allocation2 + $0x89] sm:$0xff] }
 0x9b8   : > { %20678 = vmatprep.mubr.msk.f32.mxu0 %vm23396_vm0, %v28148_v16 }
 0x9b9   : > { %v27295_v26 = vpop.f32.mrb[112].mxu1 }
 0x9ba   : > { %v19226_v61 = vpop.f32.mrb[113].mxu1 }
 0x9bb   : > { %20679 = vmatmul.mubr.msk.f32.gmra.mrb[70].mxu0 %vm2427_vm2, %v11993_v19  ;;  %v12445_v19 = vld [vmem:[#allocation2 + $0x91] sm:$0xff]  ;;  %v12446_v61 = vld [vmem:[#allocation2 + $0x99] sm:$0xff] }
 0x9bc   : > { %20681 = vmatprep.mubr.msk.f32.mxu0 %vm23396_vm0, %v28148_v16 }
 0x9bd   : > { %v27300_v53 = vpop.f32.mrb[114].mxu1 }
 0x9be   : > { %v19229_v55 = vpop.f32.mrb[115].mxu1 }
 0x9bf   : > { %20682 = vmatmul.mubr.msk.f32.gmra.mrb[72].mxu0 %vm2427_vm2, %v11994_v18  ;;  %v12447_v18 = vld [vmem:[#allocation2 + $0xa1] sm:$0xff]  ;;  %v12448_v55 = vld [vmem:[#allocation2 + $0xa9] sm:$0xff] }
 0x9c0   : > { %20684 = vmatprep.mubr.msk.f32.mxu0 %vm23396_vm0, %v28148_v16 }
 0x9c1   : > { %v27305_v30 = vpop.f32.mrb[116].mxu1 }
 0x9c2   : > { %v19232_v52 = vpop.f32.mrb[117].mxu1 }
 0x9c3   : > { %20685 = vmatmul.mubr.msk.f32.gmra.mrb[74].mxu0 %vm2427_vm2, %v11995_v51  ;;  %v12449_v51 = vld [vmem:[#allocation2 + $0xb1] sm:$0xff]  ;;  %v12450_v52 = vld [vmem:[#allocation2 + $0xb9] sm:$0xff] }
 0x9c4   : > { %20687 = vmatprep.mubr.msk.f32.mxu0 %vm23396_vm0, %v28148_v16 }
 0x9c5   : > { %v27310_v4 = vpop.f32.mrb[118].mxu1 }
 0x9c6   : > { %v19235_v11 = vpop.f32.mrb[119].mxu1 }
 0x9c7   : > { %20688 = vmatmul.mubr.msk.f32.gmra.mrb[76].mxu0 %vm2427_vm2, %v11996_v22  ;;  %v12451_v22 = vld [vmem:[#allocation2 + $0xc1] sm:$0xff]  ;;  %v12452_v11 = vld [vmem:[#allocation2 + $0xc9] sm:$0xff] }
 0x9c8   : > { %20690 = vmatprep.mubr.msk.f32.mxu0 %vm23396_vm0, %v28148_v16 }
 0x9c9   : > { %v27315_v39 = vpop.f32.mrb[120].mxu1 }
 0x9ca   : > { %v19238_v47 = vpop.f32.mrb[121].mxu1 }
 0x9cb   : > { %20691 = vmatmul.mubr.msk.f32.gmra.mrb[78].mxu0 %vm2427_vm2, %v11997_v14  ;;  %v12453_v14 = vld [vmem:[#allocation2 + $0xd1] sm:$0xff]  ;;  %v12454_v47 = vld [vmem:[#allocation2 + $0xd9] sm:$0xff] }
 0x9cc   : > { %20693 = vmatprep.mubr.msk.f32.mxu0 %vm23396_vm0, %v28148_v16 }
 0x9cd   : > { %v27326_v58 = vpop.f32.mrb[122].mxu1 }
 0x9ce   : > { %v19241_v32 = vpop.f32.mrb[123].mxu1 }
 0x9cf   : > { %20694 = vmatmul.mubr.msk.f32.gmra.mrb[80].mxu0 %vm2427_vm2, %v11998_v13 }
 0x9d0   : > { %20700 = vmatprep.mubr.msk.f32.mxu0 %vm23396_vm0, %v28148_v16 }
 0x9d1   : > { %v27331_v34 = vpop.f32.mrb[124].mxu1 }
 0x9d2   : > { %v19244_v43 = vpop.f32.mrb[125].mxu1 }
 0x9d3   : > { %20701 = vmatmul.mubr.msk.f32.vlgmr.msra.gmra.mrb[0].mxu0 %vm2427_vm2, %v12436_v46 }
 0x9d4   : > { %20703 = vmatprep.mubr.msk.f32.mxu0 %vm23396_vm0, %v28148_v16  ;;  %21307 = vmatpush3.bf16.msra.mxu0 %v21306_v3  ;;  %v12456_v3 = vld [vmem:[#allocation2 + $0xe9] sm:$0xff] }
 0x9d5   : > { %21308 = vmatprep.subr.bf16.mxu0 %v23398_v38  ;;  %v27337_v59 = vpop.f32.mrb[126].mxu1 }
 0x9d6   : > { %v19247_v25 = vpop.f32.mrb[127].mxu1 }
 0x9d7   : > { %20704 = vmatmul.mubr.msk.f32.gmra.mrb[2].mxu0 %vm2427_vm2, %v12437_v1  ;;  %v12457_v1 = vld [vmem:[#allocation2 + $0xf1] sm:$0xff] }
 0x9d8   : > { %20706 = vmatprep.mubr.msk.f32.mxu0 %vm23396_vm0, %v28148_v16 }
 0x9d9   : > { %v27342_v9 = vpop.f32.mrb[128].mxu1 }
 0x9da   : > { %v19250_v7 = vpop.f32.mrb[129].mxu1 }
 0x9db   : > { %20707 = vmatmul.mubr.msk.f32.gmra.mrb[4].mxu0 %vm2427_vm2, %v12438_v44  ;;  %v12458_v7 = vld [vmem:[#allocation2 + $0xf9] sm:$0xff] }
 0x9dc   : > { %20709 = vmatprep.mubr.msk.f32.mxu0 %vm23396_vm0, %v28148_v16 }
 0x9dd   : > { %v27347_v57 = vpop.f32.mrb[130].mxu1 }
 0x9de   : > { %v19253_v45 = vpop.f32.mrb[131].mxu1 }
 0x9df   : > { %20710 = vmatmul.mubr.msk.f32.gmra.mrb[6].mxu0 %vm2427_vm2, %v12439_v37 }
 0x9e0   : > { %20712 = vmatprep.mubr.msk.f32.mxu0 %vm23396_vm0, %v28148_v16 }
 0x9e1   : > { %v27352_v12 = vpop.f32.mrb[132].mxu1 }
 0x9e2   : > { %v19256_v31 = vpop.f32.mrb[133].mxu1 }
 0x9e3   : > { %20713 = vmatmul.mubr.msk.f32.gmra.mrb[8].mxu0 %vm2427_vm2, %v12440_v41  ;;  %v12459_v41 = vld [vmem:[#allocation2 + $0x101] sm:$0xff] }
 0x9e4   : > { %20715 = vmatprep.mubr.msk.f32.mxu0 %vm23396_vm0, %v28148_v16 }
 0x9e5   : > { %v27357_v42 = vpop.f32.mrb[134].mxu1 }
 0x9e6   : > { %v19259_v21 = vpop.f32.mrb[135].mxu1 }
 0x9e7   : > { %20716 = vmatmul.mubr.msk.f32.gmra.mrb[10].mxu0 %vm2427_vm2, %v12441_v35  ;;  %v12460_v21 = vld [vmem:[#allocation2 + $0x109] sm:$0xff] }
 0x9e8   : > { %20718 = vmatprep.mubr.msk.f32.mxu0 %vm23396_vm0, %v28148_v16 }
 0x9e9   : > { %v27362_v49 = vpop.f32.mrb[136].mxu1 }
 0x9ea   : > { %v19262_v17 = vpop.f32.mrb[137].mxu1 }
 0x9eb   : > { %20719 = vmatmul.mubr.msk.f32.gmra.mrb[12].mxu0 %vm2427_vm2, %v12442_v10 }
 0x9ec   : > { %20721 = vmatprep.mubr.msk.f32.mxu0 %vm23396_vm0, %v28148_v16 }
 0x9ed   : > { %v27367_v56 = vpop.f32.mrb[138].mxu1 }
 0x9ee   : > { %v19265_v27 = vpop.f32.mrb[139].mxu1 }
 0x9ef   : > { %20722 = vmatmul.mubr.msk.f32.gmra.mrb[14].mxu0 %vm2427_vm2, %v12443_v24  ;;  %v12461_v24 = vld [vmem:[#allocation2 + $0x111] sm:$0xff] }
 0x9f0   : > { %20724 = vmatprep.mubr.msk.f32.mxu0 %vm23396_vm0, %v28148_v16 }
 0x9f3   : > { %20725 = vmatmul.mubr.msk.f32.gmra.mrb[16].mxu0 %vm2427_vm2, %v12444_v8 }
 0x9f4   : > { %20727 = vmatprep.mubr.msk.f32.mxu0 %vm23396_vm0, %v28148_v16 }
 0x9f7   : > { %20728 = vmatmul.mubr.msk.f32.gmra.mrb[18].mxu0 %vm2427_vm2, %v12445_v19  ;;  %v12462_v19 = vld [vmem:[#allocation2 + $0x119] sm:$0xff] }
 0x9f8   : > { %20730 = vmatprep.mubr.msk.f32.mxu0 %vm23396_vm0, %v28148_v16 }
 0x9fb   : > { %20731 = vmatmul.mubr.msk.f32.gmra.mrb[20].mxu0 %vm2427_vm2, %v12446_v61 }
 0x9fc   : > { %20733 = vmatprep.mubr.msk.f32.mxu0 %vm23396_vm0, %v28148_v16 }
 0x9ff   : > { %20734 = vmatmul.mubr.msk.f32.gmra.mrb[22].mxu0 %vm2427_vm2, %v12447_v18 }
 0xa00   : > { %20736 = vmatprep.mubr.msk.f32.mxu0 %vm23396_vm0, %v28148_v16 }
 0xa03   : > { %20737 = vmatmul.mubr.msk.f32.gmra.mrb[24].mxu0 %vm2427_vm2, %v12448_v55  ;;  %v12463_v55 = vld [vmem:[#allocation2 + $0x121] sm:$0xff] }
 0xa04   : > { %20739 = vmatprep.mubr.msk.f32.mxu0 %vm23396_vm0, %v28148_v16 }
 0xa07   : > { %20740 = vmatmul.mubr.msk.f32.gmra.mrb[26].mxu0 %vm2427_vm2, %v12449_v51 }
 0xa08   : > { %20742 = vmatprep.mubr.msk.f32.mxu0 %vm23396_vm0, %v28148_v16 }
 0xa0b   : > { %20743 = vmatmul.mubr.msk.f32.gmra.mrb[28].mxu0 %vm2427_vm2, %v12450_v52 }
 0xa0c   : > { %20745 = vmatprep.mubr.msk.f32.mxu0 %vm23396_vm0, %v28148_v16 }
 0xa0f   : > { %20746 = vmatmul.mubr.msk.f32.gmra.mrb[30].mxu0 %vm2427_vm2, %v12451_v22  ;;  %v12464_v22 = vld [vmem:[#allocation2 + $0x129] sm:$0xff] }
 0xa10   : > { %20748 = vmatprep.mubr.msk.f32.mxu0 %vm23396_vm0, %v28148_v16 }
 0xa13   : > { %20749 = vmatmul.mubr.msk.f32.gmra.mrb[32].mxu0 %vm2427_vm2, %v12452_v11 }
 0xa14   : > { %20751 = vmatprep.mubr.msk.f32.mxu0 %vm23396_vm0, %v28148_v16 }
 0xa17   : > { %20752 = vmatmul.mubr.msk.f32.gmra.mrb[34].mxu0 %vm2427_vm2, %v12453_v14 }
 0xa18   : > { %20754 = vmatprep.mubr.msk.f32.mxu0 %vm23396_vm0, %v28148_v16 }
 0xa1b   : > { %20755 = vmatmul.mubr.msk.f32.gmra.mrb[36].mxu0 %vm2427_vm2, %v12454_v47  ;;  %v12465_v47 = vld [vmem:[#allocation2 + $0x131] sm:$0xff] }
 0xa1c   : > { %20757 = vmatprep.mubr.msk.f32.mxu0 %vm23396_vm0, %v28148_v16 }
 0xa1d   : > { %v27405_v13 = vpop.f32.mrb[140].mxu1 }
 0xa1e   : > { %v19395_v0 = vpop.f32.mrb[141].mxu1 }
 0xa1f   : > { %20758 = vmatmul.mubr.msk.f32.gmra.mrb[38].mxu0 %vm2427_vm2, %v12455_v48  ;;  %v12466_v0 = vld [vmem:[#allocation2 + $0x139] sm:$0xff] }
 0xa20   : > { %20760 = vmatprep.mubr.msk.f32.mxu0 %vm23396_vm0, %v28148_v16 }
 0xa21   : > { %v27410_v32 = vpop.f32.mrb[142].mxu1 }
 0xa22   : > { %v19398_v46 = vpop.f32.mrb[143].mxu1 }
 0xa23   : > { %20761 = vmatmul.mubr.msk.f32.gmra.mrb[40].mxu0 %vm2427_vm2, %v12456_v3  ;;  %v12467_v3 = vld [vmem:[#allocation2 + $0x141] sm:$0xff]  ;;  %v12468_v46 = vld [vmem:[#allocation2 + $0x149] sm:$0xff] }
 0xa24   : > { %20763 = vmatprep.mubr.msk.f32.mxu0 %vm23396_vm0, %v28148_v16 }
 0xa25   : > { %v27415_v43 = vpop.f32.mrb[144].mxu1 }
 0xa26   : > { %v19401_v25 = vpop.f32.mrb[145].mxu1 }
 0xa27   : > { %20764 = vmatmul.mubr.msk.f32.gmra.mrb[42].mxu0 %vm2427_vm2, %v12457_v1  ;;  %v12469_v1 = vld [vmem:[#allocation2 + $0x151] sm:$0xff]  ;;  %v12470_v25 = vld [vmem:[#allocation2 + $0x159] sm:$0xff] }
 0xa28   : > { %20766 = vmatprep.mubr.msk.f32.mxu0 %vm23396_vm0, %v28148_v16 }
 0xa29   : > { %v27420_v44 = vpop.f32.mrb[146].mxu1 }
 0xa2a   : > { %v19404_v37 = vpop.f32.mrb[147].mxu1 }
 0xa2b   : > { %20767 = vmatmul.mubr.msk.f32.gmra.mrb[44].mxu0 %vm2427_vm2, %v12458_v7  ;;  %v12471_v7 = vld [vmem:[#allocation2 + $0x161] sm:$0xff]  ;;  %v12472_v37 = vld [vmem:[#allocation2 + $0x169] sm:$0xff] }
 0xa2c   : > { %20769 = vmatprep.mubr.msk.f32.mxu0 %vm23396_vm0, %v28148_v16 }
 0xa2d   : > { %v27425_v45 = vpop.f32.mrb[148].mxu1 }
 0xa2e   : > { %v19407_v31 = vpop.f32.mrb[149].mxu1 }
 0xa2f   : > { %20770 = vmatmul.mubr.msk.f32.gmra.mrb[46].mxu0 %vm2427_vm2, %v12459_v41  ;;  %v12473_v41 = vld [vmem:[#allocation2 + $0x171] sm:$0xff]  ;;  %v12474_v31 = vld [vmem:[#allocation2 + $0x179] sm:$0xff] }
 0xa30   : > { %20772 = vmatprep.mubr.msk.f32.mxu0 %vm23396_vm0, %v28148_v16 }
 0xa31   : > { %v27430_v35 = vpop.f32.mrb[150].mxu1 }
 0xa32   : > { %v19410_v10 = vpop.f32.mrb[151].mxu1 }
 0xa33   : > { %20773 = vmatmul.mubr.msk.f32.gmra.mrb[48].mxu0 %vm2427_vm2, %v12460_v21  ;;  %v12475_v21 = vld [vmem:[#allocation2 + $0x181] sm:$0xff]  ;;  %v12476_v10 = vld [vmem:[#allocation2 + $0x189] sm:$0xf] }
 0xa34   : > { %20775 = vmatprep.mubr.msk.f32.mxu0 %vm23396_vm0, %v28148_v16 }
 0xa35   : > { %v27435_v17 = vpop.f32.mrb[152].mxu1 }
 0xa36   : > { %v19413_v27 = vpop.f32.mrb[153].mxu1 }
 0xa37   : > { %20776 = vmatmul.mubr.msk.f32.gmra.mrb[50].mxu0 %vm2427_vm2, %v12461_v24  ;;  %v16346_v24 = vld [vmem:[%s28103_s4 + $0x170] sm:$0xff]  ;;  %v16347_v27 = vld [vmem:[%s28103_s4 + $0x178] sm:$0xff] }
 0xa38   : > { %20778 = vmatprep.mubr.msk.f32.mxu0 %vm23396_vm0, %v28148_v16 }
 0xa39   : > { %v27440_v8 = vpop.f32.mrb[154].mxu1 }
 0xa3a   : > { %v19416_v61 = vpop.f32.mrb[155].mxu1 }
 0xa3b   : > { %20779 = vmatmul.mubr.msk.f32.gmra.mrb[52].mxu0 %vm2427_vm2, %v12462_v19  ;;  %v21309_v19 = vpack.c.bf16 %v16347_v27, %v16346_v24  ;;  %v12914_v61 = vld [vmem:[#allocation2 + $0x4a] sm:$0xff]  ;;  %v12932_v24 = vld [vmem:[#allocation2 + $0xda] sm:$0xff]  ;;  %v12933_v27 = vld [vmem:[#allocation2 + $0xe2] sm:$0xff] }
 0xa3c   : > { %20781 = vmatprep.mubr.msk.f32.mxu0 %vm23396_vm0, %v28148_v16 }
 0xa3d   : > { %v27445_v18 = vpop.f32.mrb[156].mxu1 }
 0xa3e   : > { %v19419_v51 = vpop.f32.mrb[157].mxu1 }
 0xa3f   : > { %20782 = vmatmul.mubr.msk.f32.gmra.mrb[54].mxu0 %vm2427_vm2, %v12463_v55  ;;  %v12915_v55 = vld [vmem:[#allocation2 + $0x52] sm:$0xff]  ;;  %v12916_v51 = vld [vmem:[#allocation2 + $0x5a] sm:$0xff] }
 0xa40   : > { %20784 = vmatprep.mubr.msk.f32.mxu0 %vm23396_vm0, %v28148_v16 }
 0xa41   : > { %v27450_v52 = vpop.f32.mrb[158].mxu1 }
 0xa42   : > { %v19422_v11 = vpop.f32.mrb[159].mxu1 }
 0xa43   : > { %20785 = vmatmul.mubr.msk.f32.gmra.mrb[56].mxu0 %vm2427_vm2, %v12464_v22  ;;  %v12917_v22 = vld [vmem:[#allocation2 + $0x62] sm:$0xff]  ;;  %v12918_v11 = vld [vmem:[#allocation2 + $0x6a] sm:$0xff] }
 0xa44   : > { %20787 = vmatprep.mubr.msk.f32.mxu0 %vm23396_vm0, %v28148_v16 }
 0xa45   : > { %v27455_v14 = vpop.f32.mrb[160].mxu1 }
 0xa46   : > { %v19425_v48 = vpop.f32.mrb[161].mxu1 }
 0xa47   : > { %20788 = vmatmul.mubr.msk.f32.gmra.mrb[58].mxu0 %vm2427_vm2, %v12465_v47  ;;  %v12919_v47 = vld [vmem:[#allocation2 + $0x72] sm:$0xff]  ;;  %v12920_v48 = vld [vmem:[#allocation2 + $0x7a] sm:$0xff] }
 0xa48   : > { %20790 = vmatprep.mubr.msk.f32.mxu0 %vm23396_vm0, %v28148_v16 }
 0xa4b   : > { %20791 = vmatmul.mubr.msk.f32.gmra.mrb[60].mxu0 %vm2427_vm2, %v12466_v0  ;;  %v12921_v0 = vld [vmem:[#allocation2 + $0x82] sm:$0xff] }
 0xa4c   : > { %20793 = vmatprep.mubr.msk.f32.mxu0 %vm23396_vm0, %v28148_v16 }
 0xa4f   : > { %20794 = vmatmul.mubr.msk.f32.gmra.mrb[62].mxu0 %vm2427_vm2, %v12467_v3  ;;  %v12922_v3 = vld [vmem:[#allocation2 + $0x8a] sm:$0xff] }
 0xa50   : > { %20796 = vmatprep.mubr.msk.f32.mxu0 %vm23396_vm0, %v28148_v16 }
 0xa53   : > { %20797 = vmatmul.mubr.msk.f32.gmra.mrb[64].mxu0 %vm2427_vm2, %v12468_v46  ;;  %v12923_v46 = vld [vmem:[#allocation2 + $0x92] sm:$0xff] }
 0xa54   : > { %20799 = vmatprep.mubr.msk.f32.mxu0 %vm23396_vm0, %v28148_v16 }
 0xa57   : > { %20800 = vmatmul.mubr.msk.f32.gmra.mrb[66].mxu0 %vm2427_vm2, %v12469_v1  ;;  %v12924_v1 = vld [vmem:[#allocation2 + $0x9a] sm:$0xff] }
 0xa58   : > { %20802 = vmatprep.mubr.msk.f32.mxu0 %vm23396_vm0, %v28148_v16 }
 0xa5b   : > { %20803 = vmatmul.mubr.msk.f32.gmra.mrb[68].mxu0 %vm2427_vm2, %v12470_v25  ;;  %v12925_v25 = vld [vmem:[#allocation2 + $0xa2] sm:$0xff] }
 0xa5c   : > { %20805 = vmatprep.mubr.msk.f32.mxu0 %vm23396_vm0, %v28148_v16 }
 0xa5f   : > { %20806 = vmatmul.mubr.msk.f32.gmra.mrb[70].mxu0 %vm2427_vm2, %v12471_v7  ;;  %v12926_v7 = vld [vmem:[#allocation2 + $0xaa] sm:$0xff] }
 0xa60   : > { %20808 = vmatprep.mubr.msk.f32.mxu0 %vm23396_vm0, %v28148_v16 }
 0xa63   : > { %20809 = vmatmul.mubr.msk.f32.gmra.mrb[72].mxu0 %vm2427_vm2, %v12472_v37  ;;  %v12927_v37 = vld [vmem:[#allocation2 + $0xb2] sm:$0xff] }
 0xa64   : > { %20811 = vmatprep.mubr.msk.f32.mxu0 %vm23396_vm0, %v28148_v16 }
 0xa67   : > { %20812 = vmatmul.mubr.msk.f32.gmra.mrb[74].mxu0 %vm2427_vm2, %v12473_v41  ;;  %v12928_v41 = vld [vmem:[#allocation2 + $0xba] sm:$0xff] }
 0xa68   : > { %20814 = vmatprep.mubr.msk.f32.mxu0 %vm23396_vm0, %v28148_v16 }
 0xa6b   : > { %20815 = vmatmul.mubr.msk.f32.gmra.mrb[76].mxu0 %vm2427_vm2, %v12474_v31  ;;  %v12929_v31 = vld [vmem:[#allocation2 + $0xc2] sm:$0xff] }
 0xa6c   : > { %20817 = vmatprep.mubr.msk.f32.mxu0 %vm23396_vm0, %v28148_v16 }
 0xa6f   : > { %20818 = vmatmul.mubr.msk.f32.gmra.mrb[78].mxu0 %vm2427_vm2, %v12475_v21  ;;  %v12930_v21 = vld [vmem:[#allocation2 + $0xca] sm:$0xff] }
 0xa70   : > { %20820 = vmatprep.mubr.msk.f32.mxu0 %vm23396_vm0, %v28148_v16 }
 0xa73   : > { %20821 = vmatmul.mubr.msk.f32.gmra.mrb[80].mxu0 %vm2427_vm2, %v12476_v10  ;;  %v12931_v10 = vld [vmem:[#allocation2 + $0xd2] sm:$0xff] }
 0xa74   : > { %20827 = vmatprep.mubr.msk.f32.mxu0 %vm23396_vm0, %v28148_v16 }
 0xa77   : > { %20828 = vmatmul.mubr.msk.f32.vlgmr.msra.gmra.mrb[0].mxu0 %vm2427_vm2, %v12914_v61  ;;  %v12935_v61 = vld [vmem:[#allocation2 + $0xf2] sm:$0xff] }
 0xa78   : > { %20830 = vmatprep.mubr.msk.f32.mxu0 %vm23396_vm0, %v28148_v16  ;;  %21310 = vmatpush3.bf16.msra.mxu0 %v21309_v19  ;;  %v12934_v19 = vld [vmem:[#allocation2 + $0xea] sm:$0xff] }
 0xa79   : > { %21311 = vmatprep.subr.bf16.mxu0 %v23398_v38 }
 0xa7b   : > { %20831 = vmatmul.mubr.msk.f32.gmra.mrb[2].mxu0 %vm2427_vm2, %v12915_v55  ;;  %v12936_v55 = vld [vmem:[#allocation2 + $0xfa] sm:$0xff] }
 0xa7c   : > { %20833 = vmatprep.mubr.msk.f32.mxu0 %vm23396_vm0, %v28148_v16 }
 0xa7f   : > { %20834 = vmatmul.mubr.msk.f32.gmra.mrb[4].mxu0 %vm2427_vm2, %v12916_v51  ;;  %v12937_v51 = vld [vmem:[#allocation2 + $0x102] sm:$0xff] }
 0xa80   : > { %20836 = vmatprep.mubr.msk.f32.mxu0 %vm23396_vm0, %v28148_v16 }
 0xa83   : > { %20837 = vmatmul.mubr.msk.f32.gmra.mrb[6].mxu0 %vm2427_vm2, %v12917_v22  ;;  %v12938_v22 = vld [vmem:[#allocation2 + $0x10a] sm:$0xff] }
 0xa84   : > { %20839 = vmatprep.mubr.msk.f32.mxu0 %vm23396_vm0, %v28148_v16 }
 0xa87   : > { %20840 = vmatmul.mubr.msk.f32.gmra.mrb[8].mxu0 %vm2427_vm2, %v12918_v11  ;;  %v12939_v11 = vld [vmem:[#allocation2 + $0x112] sm:$0xff] }
 0xa88   : > { %20842 = vmatprep.mubr.msk.f32.mxu0 %vm23396_vm0, %v28148_v16 }
 0xa8b   : > { %20843 = vmatmul.mubr.msk.f32.gmra.mrb[10].mxu0 %vm2427_vm2, %v12919_v47  ;;  %v12940_v47 = vld [vmem:[#allocation2 + $0x11a] sm:$0xff] }
 0xa8c   : > { %20845 = vmatprep.mubr.msk.f32.mxu0 %vm23396_vm0, %v28148_v16 }
 0xa8f   : > { %20846 = vmatmul.mubr.msk.f32.gmra.mrb[12].mxu0 %vm2427_vm2, %v12920_v48  ;;  %v12941_v48 = vld [vmem:[#allocation2 + $0x122] sm:$0xff] }
 0xa90   : > { %20848 = vmatprep.mubr.msk.f32.mxu0 %vm23396_vm0, %v28148_v16 }
 0xa93   : > { %20849 = vmatmul.mubr.msk.f32.gmra.mrb[14].mxu0 %vm2427_vm2, %v12921_v0  ;;  %v12942_v0 = vld [vmem:[#allocation2 + $0x12a] sm:$0xff] }
 0xa94   : > { %20851 = vmatprep.mubr.msk.f32.mxu0 %vm23396_vm0, %v28148_v16 }
 0xa97   : > { %20852 = vmatmul.mubr.msk.f32.gmra.mrb[16].mxu0 %vm2427_vm2, %v12922_v3  ;;  %v12943_v3 = vld [vmem:[#allocation2 + $0x132] sm:$0xff] }
 0xa98   : > { %20854 = vmatprep.mubr.msk.f32.mxu0 %vm23396_vm0, %v28148_v16 }
 0xa9b   : > { %20855 = vmatmul.mubr.msk.f32.gmra.mrb[18].mxu0 %vm2427_vm2, %v12923_v46  ;;  %v12944_v46 = vld [vmem:[#allocation2 + $0x13a] sm:$0xff] }
 0xa9c   : > { %20857 = vmatprep.mubr.msk.f32.mxu0 %vm23396_vm0, %v28148_v16 }
 0xa9f   : > { %20858 = vmatmul.mubr.msk.f32.gmra.mrb[20].mxu0 %vm2427_vm2, %v12924_v1  ;;  %v12945_v1 = vld [vmem:[#allocation2 + $0x142] sm:$0xff] }
 0xaa0   : > { %20860 = vmatprep.mubr.msk.f32.mxu0 %vm23396_vm0, %v28148_v16 }
 0xaa3   : > { %20861 = vmatmul.mubr.msk.f32.gmra.mrb[22].mxu0 %vm2427_vm2, %v12925_v25  ;;  %v12946_v25 = vld [vmem:[#allocation2 + $0x14a] sm:$0xff] }
 0xaa4   : > { %20863 = vmatprep.mubr.msk.f32.mxu0 %vm23396_vm0, %v28148_v16 }
 0xaa7   : > { %20864 = vmatmul.mubr.msk.f32.gmra.mrb[24].mxu0 %vm2427_vm2, %v12926_v7  ;;  %v12947_v7 = vld [vmem:[#allocation2 + $0x152] sm:$0xff] }
 0xaa8   : > { %20866 = vmatprep.mubr.msk.f32.mxu0 %vm23396_vm0, %v28148_v16 }
 0xaab   : > { %20867 = vmatmul.mubr.msk.f32.gmra.mrb[26].mxu0 %vm2427_vm2, %v12927_v37  ;;  %v12948_v37 = vld [vmem:[#allocation2 + $0x15a] sm:$0xff] }
 0xaac   : > { %20869 = vmatprep.mubr.msk.f32.mxu0 %vm23396_vm0, %v28148_v16 }
 0xaaf   : > { %20870 = vmatmul.mubr.msk.f32.gmra.mrb[28].mxu0 %vm2427_vm2, %v12928_v41  ;;  %v12949_v41 = vld [vmem:[#allocation2 + $0x162] sm:$0xff] }
 0xab0   : > { %20872 = vmatprep.mubr.msk.f32.mxu0 %vm23396_vm0, %v28148_v16 }
 0xab3   : > { %20873 = vmatmul.mubr.msk.f32.gmra.mrb[30].mxu0 %vm2427_vm2, %v12929_v31  ;;  %v12950_v31 = vld [vmem:[#allocation2 + $0x16a] sm:$0xff] }
 0xab4   : > { %20875 = vmatprep.mubr.msk.f32.mxu0 %vm23396_vm0, %v28148_v16 }
 0xab7   : > { %20876 = vmatmul.mubr.msk.f32.gmra.mrb[32].mxu0 %vm2427_vm2, %v12930_v21  ;;  %v12951_v21 = vld [vmem:[#allocation2 + $0x172] sm:$0xff] }
 0xab8   : > { %20878 = vmatprep.mubr.msk.f32.mxu0 %vm23396_vm0, %v28148_v16 }
 0xabb   : > { %20879 = vmatmul.mubr.msk.f32.gmra.mrb[34].mxu0 %vm2427_vm2, %v12931_v10  ;;  %v12952_v10 = vld [vmem:[#allocation2 + $0x17a] sm:$0xff] }
 0xabc   : > { %20881 = vmatprep.mubr.msk.f32.mxu0 %vm23396_vm0, %v28148_v16 }
 0xabf   : > { %20882 = vmatmul.mubr.msk.f32.gmra.mrb[36].mxu0 %vm2427_vm2, %v12932_v24  ;;  %v12953_v24 = vld [vmem:[#allocation2 + $0x182] sm:$0xff] }
 0xac0   : > { %20884 = vmatprep.mubr.msk.f32.mxu0 %vm23396_vm0, %v28148_v16 }
 0xac3   : > { %20885 = vmatmul.mubr.msk.f32.gmra.mrb[38].mxu0 %vm2427_vm2, %v12933_v27  ;;  %v12954_v27 = vld [vmem:[#allocation2 + $0x18a] sm:$0xf] }
 0xac4   : > { %20887 = vmatprep.mubr.msk.f32.mxu0 %vm23396_vm0, %v28148_v16 }
 0xac7   : > { %20888 = vmatmul.mubr.msk.f32.gmra.mrb[40].mxu0 %vm2427_vm2, %v12934_v19  ;;  %v16389_v19 = vld [vmem:[%s28103_s4 + $0x180] sm:$0xff] }
 0xac8   : > { %20890 = vmatprep.mubr.msk.f32.mxu0 %vm23396_vm0, %v28148_v16 }
 0xacb   : > { %20891 = vmatmul.mubr.msk.f32.gmra.mrb[42].mxu0 %vm2427_vm2, %v12935_v61  ;;  %v16390_v61 = vld [vmem:[%s28103_s4 + $0x188] sm:$0xff] }
 0xacc   : > { %20893 = vmatprep.mubr.msk.f32.mxu0 %vm23396_vm0, %v28148_v16 }
 0xacf   : > { %20894 = vmatmul.mubr.msk.f32.gmra.mrb[44].mxu0 %vm2427_vm2, %v12936_v55  ;;  %v21312_v55 = vpack.c.bf16 %v16390_v61, %v16389_v19  ;;  %v13410_v19 = vld [vmem:[#allocation2 + $0xdb] sm:$0xff]  ;;  %v13411_v61 = vld [vmem:[#allocation2 + $0xe3] sm:$0xff] }
 0xad0   : > { %20896 = vmatprep.mubr.msk.f32.mxu0 %vm23396_vm0, %v28148_v16 }
 0xad3   : > { %20897 = vmatmul.mubr.msk.f32.gmra.mrb[46].mxu0 %vm2427_vm2, %v12937_v51  ;;  %v13392_v51 = vld [vmem:[#allocation2 + $0x4b] sm:$0xff] }
 0xad4   : > { %20899 = vmatprep.mubr.msk.f32.mxu0 %vm23396_vm0, %v28148_v16 }
 0xad7   : > { %20900 = vmatmul.mubr.msk.f32.gmra.mrb[48].mxu0 %vm2427_vm2, %v12938_v22  ;;  %v13393_v22 = vld [vmem:[#allocation2 + $0x53] sm:$0xff] }
 0xad8   : > { %20902 = vmatprep.mubr.msk.f32.mxu0 %vm23396_vm0, %v28148_v16 }
 0xadb   : > { %20903 = vmatmul.mubr.msk.f32.gmra.mrb[50].mxu0 %vm2427_vm2, %v12939_v11  ;;  %v13394_v11 = vld [vmem:[#allocation2 + $0x5b] sm:$0xff] }
 0xadc   : > { %20905 = vmatprep.mubr.msk.f32.mxu0 %vm23396_vm0, %v28148_v16 }
 0xadf   : > { %20906 = vmatmul.mubr.msk.f32.gmra.mrb[52].mxu0 %vm2427_vm2, %v12940_v47  ;;  %v13395_v47 = vld [vmem:[#allocation2 + $0x63] sm:$0xff] }
 0xae0   : > { %20908 = vmatprep.mubr.msk.f32.mxu0 %vm23396_vm0, %v28148_v16 }
 0xae3   : > { %20909 = vmatmul.mubr.msk.f32.gmra.mrb[54].mxu0 %vm2427_vm2, %v12941_v48  ;;  %v13396_v48 = vld [vmem:[#allocation2 + $0x6b] sm:$0xff] }
 0xae4   : > { %20911 = vmatprep.mubr.msk.f32.mxu0 %vm23396_vm0, %v28148_v16 }
 0xae7   : > { %20912 = vmatmul.mubr.msk.f32.gmra.mrb[56].mxu0 %vm2427_vm2, %v12942_v0  ;;  %v13397_v0 = vld [vmem:[#allocation2 + $0x73] sm:$0xff] }
 0xae8   : > { %20914 = vmatprep.mubr.msk.f32.mxu0 %vm23396_vm0, %v28148_v16 }
 0xaeb   : > { %20915 = vmatmul.mubr.msk.f32.gmra.mrb[58].mxu0 %vm2427_vm2, %v12943_v3  ;;  %v13398_v3 = vld [vmem:[#allocation2 + $0x7b] sm:$0xff] }
 0xaec   : > { %20917 = vmatprep.mubr.msk.f32.mxu0 %vm23396_vm0, %v28148_v16 }
 0xaef   : > { %20918 = vmatmul.mubr.msk.f32.gmra.mrb[60].mxu0 %vm2427_vm2, %v12944_v46  ;;  %v13399_v46 = vld [vmem:[#allocation2 + $0x83] sm:$0xff] }
 0xaf0   : > { %20920 = vmatprep.mubr.msk.f32.mxu0 %vm23396_vm0, %v28148_v16 }
 0xaf3   : > { %20921 = vmatmul.mubr.msk.f32.gmra.mrb[62].mxu0 %vm2427_vm2, %v12945_v1  ;;  %v13400_v1 = vld [vmem:[#allocation2 + $0x8b] sm:$0xff] }
 0xaf4   : > { %20923 = vmatprep.mubr.msk.f32.mxu0 %vm23396_vm0, %v28148_v16 }
 0xaf7   : > { %20924 = vmatmul.mubr.msk.f32.gmra.mrb[64].mxu0 %vm2427_vm2, %v12946_v25  ;;  %v13401_v25 = vld [vmem:[#allocation2 + $0x93] sm:$0xff] }
 0xaf8   : > { %20926 = vmatprep.mubr.msk.f32.mxu0 %vm23396_vm0, %v28148_v16 }
 0xafb   : > { %20927 = vmatmul.mubr.msk.f32.gmra.mrb[66].mxu0 %vm2427_vm2, %v12947_v7  ;;  %v13402_v7 = vld [vmem:[#allocation2 + $0x9b] sm:$0xff] }
 0xafc   : > { %20929 = vmatprep.mubr.msk.f32.mxu0 %vm23396_vm0, %v28148_v16 }
 0xaff   : > { %20930 = vmatmul.mubr.msk.f32.gmra.mrb[68].mxu0 %vm2427_vm2, %v12948_v37  ;;  %v13403_v37 = vld [vmem:[#allocation2 + $0xa3] sm:$0xff] }
 0xb00   : > { %20932 = vmatprep.mubr.msk.f32.mxu0 %vm23396_vm0, %v28148_v16 }
 0xb03   : > { %20933 = vmatmul.mubr.msk.f32.gmra.mrb[70].mxu0 %vm2427_vm2, %v12949_v41  ;;  %v13404_v41 = vld [vmem:[#allocation2 + $0xab] sm:$0xff] }
 0xb04   : > { %20935 = vmatprep.mubr.msk.f32.mxu0 %vm23396_vm0, %v28148_v16 }
 0xb07   : > { %20936 = vmatmul.mubr.msk.f32.gmra.mrb[72].mxu0 %vm2427_vm2, %v12950_v31  ;;  %v13405_v31 = vld [vmem:[#allocation2 + $0xb3] sm:$0xff] }
 0xb08   : > { %20938 = vmatprep.mubr.msk.f32.mxu0 %vm23396_vm0, %v28148_v16 }
 0xb0b   : > { %20939 = vmatmul.mubr.msk.f32.gmra.mrb[74].mxu0 %vm2427_vm2, %v12951_v21  ;;  %v13406_v21 = vld [vmem:[#allocation2 + $0xbb] sm:$0xff] }
 0xb0c   : > { %20941 = vmatprep.mubr.msk.f32.mxu0 %vm23396_vm0, %v28148_v16 }
 0xb0f   : > { %20942 = vmatmul.mubr.msk.f32.gmra.mrb[76].mxu0 %vm2427_vm2, %v12952_v10  ;;  %v13407_v10 = vld [vmem:[#allocation2 + $0xc3] sm:$0xff] }
 0xb10   : > { %20944 = vmatprep.mubr.msk.f32.mxu0 %vm23396_vm0, %v28148_v16 }
 0xb13   : > { %20945 = vmatmul.mubr.msk.f32.gmra.mrb[78].mxu0 %vm2427_vm2, %v12953_v24  ;;  %v13408_v24 = vld [vmem:[#allocation2 + $0xcb] sm:$0xff] }
 0xb14   : > { %20947 = vmatprep.mubr.msk.f32.mxu0 %vm23396_vm0, %v28148_v16 }
 0xb17   : > { %20948 = vmatmul.mubr.msk.f32.gmra.mrb[80].mxu0 %vm2427_vm2, %v12954_v27  ;;  %v13409_v27 = vld [vmem:[#allocation2 + $0xd3] sm:$0xff] }
 0xb18   : > { %20954 = vmatprep.mubr.msk.f32.mxu0 %vm23396_vm0, %v28148_v16 }
 0xb1b   : > { %20955 = vmatmul.mubr.msk.f32.vlgmr.msra.gmra.mrb[0].mxu0 %vm2427_vm2, %v13392_v51  ;;  %v13413_v51 = vld [vmem:[#allocation2 + $0xf3] sm:$0xff] }
 0xb1c   : > { %20957 = vmatprep.mubr.msk.f32.mxu0 %vm23396_vm0, %v28148_v16  ;;  %21313 = vmatpush3.bf16.msra.mxu0 %v21312_v55  ;;  %v13412_v55 = vld [vmem:[#allocation2 + $0xeb] sm:$0xff] }
 0xb1f   : > { %20958 = vmatmul.mubr.msk.f32.gmra.mrb[2].mxu0 %vm2427_vm2, %v13393_v22  ;;  %v13414_v22 = vld [vmem:[#allocation2 + $0xfb] sm:$0xff] }
 0xb20   : > { %20960 = vmatprep.mubr.msk.f32.mxu0 %vm23396_vm0, %v28148_v16 }
 0xb23   : > { %20961 = vmatmul.mubr.msk.f32.gmra.mrb[4].mxu0 %vm2427_vm2, %v13394_v11  ;;  %v13415_v11 = vld [vmem:[#allocation2 + $0x103] sm:$0xff] }
 0xb24   : > { %20963 = vmatprep.mubr.msk.f32.mxu0 %vm23396_vm0, %v28148_v16 }
 0xb27   : > { %20964 = vmatmul.mubr.msk.f32.gmra.mrb[6].mxu0 %vm2427_vm2, %v13395_v47  ;;  %v13416_v47 = vld [vmem:[#allocation2 + $0x10b] sm:$0xff] }
 0xb28   : > { %20966 = vmatprep.mubr.msk.f32.mxu0 %vm23396_vm0, %v28148_v16 }
 0xb2b   : > { %20967 = vmatmul.mubr.msk.f32.gmra.mrb[8].mxu0 %vm2427_vm2, %v13396_v48  ;;  %v13417_v48 = vld [vmem:[#allocation2 + $0x113] sm:$0xff] }
 0xb2c   : > { %20969 = vmatprep.mubr.msk.f32.mxu0 %vm23396_vm0, %v28148_v16 }
 0xb2f   : > { %20970 = vmatmul.mubr.msk.f32.gmra.mrb[10].mxu0 %vm2427_vm2, %v13397_v0  ;;  %v13418_v0 = vld [vmem:[#allocation2 + $0x11b] sm:$0xff] }
 0xb30   : > { %20972 = vmatprep.mubr.msk.f32.mxu0 %vm23396_vm0, %v28148_v16 }
 0xb33   : > { %20973 = vmatmul.mubr.msk.f32.gmra.mrb[12].mxu0 %vm2427_vm2, %v13398_v3  ;;  %v13419_v3 = vld [vmem:[#allocation2 + $0x123] sm:$0xff] }
 0xb34   : > { %20975 = vmatprep.mubr.msk.f32.mxu0 %vm23396_vm0, %v28148_v16 }
 0xb37   : > { %20976 = vmatmul.mubr.msk.f32.gmra.mrb[14].mxu0 %vm2427_vm2, %v13399_v46  ;;  %v13420_v46 = vld [vmem:[#allocation2 + $0x12b] sm:$0xff] }
 0xb38   : > { %20978 = vmatprep.mubr.msk.f32.mxu0 %vm23396_vm0, %v28148_v16 }
 0xb3b   : > { %20979 = vmatmul.mubr.msk.f32.gmra.mrb[16].mxu0 %vm2427_vm2, %v13400_v1  ;;  %v13421_v1 = vld [vmem:[#allocation2 + $0x133] sm:$0xff] }
 0xb3c   : > { %20981 = vmatprep.mubr.msk.f32.mxu0 %vm23396_vm0, %v28148_v16 }
 0xb3f   : > { %20982 = vmatmul.mubr.msk.f32.gmra.mrb[18].mxu0 %vm2427_vm2, %v13401_v25  ;;  %v13422_v25 = vld [vmem:[#allocation2 + $0x13b] sm:$0xff] }
 0xb40   : > { %20984 = vmatprep.mubr.msk.f32.mxu0 %vm23396_vm0, %v28148_v16 }
 0xb43   : > { %20985 = vmatmul.mubr.msk.f32.gmra.mrb[20].mxu0 %vm2427_vm2, %v13402_v7  ;;  %v13423_v7 = vld [vmem:[#allocation2 + $0x143] sm:$0xff] }
 0xb44   : > { %20987 = vmatprep.mubr.msk.f32.mxu0 %vm23396_vm0, %v28148_v16 }
 0xb47   : > { %20988 = vmatmul.mubr.msk.f32.gmra.mrb[22].mxu0 %vm2427_vm2, %v13403_v37  ;;  %v13424_v37 = vld [vmem:[#allocation2 + $0x14b] sm:$0xff] }
 0xb48   : > { %20990 = vmatprep.mubr.msk.f32.mxu0 %vm23396_vm0, %v28148_v16 }
 0xb4b   : > { %20991 = vmatmul.mubr.msk.f32.gmra.mrb[24].mxu0 %vm2427_vm2, %v13404_v41  ;;  %v13425_v41 = vld [vmem:[#allocation2 + $0x153] sm:$0xff] }
 0xb4c   : > { %20993 = vmatprep.mubr.msk.f32.mxu0 %vm23396_vm0, %v28148_v16 }
 0xb4f   : > { %20994 = vmatmul.mubr.msk.f32.gmra.mrb[26].mxu0 %vm2427_vm2, %v13405_v31  ;;  %v13426_v31 = vld [vmem:[#allocation2 + $0x15b] sm:$0xff] }
 0xb50   : > { %20996 = vmatprep.mubr.msk.f32.mxu0 %vm23396_vm0, %v28148_v16 }
 0xb53   : > { %20997 = vmatmul.mubr.msk.f32.gmra.mrb[28].mxu0 %vm2427_vm2, %v13406_v21  ;;  %v13427_v21 = vld [vmem:[#allocation2 + $0x163] sm:$0xff] }
 0xb54   : > { %20999 = vmatprep.mubr.msk.f32.mxu0 %vm23396_vm0, %v28148_v16 }
 0xb57   : > { %21000 = vmatmul.mubr.msk.f32.gmra.mrb[30].mxu0 %vm2427_vm2, %v13407_v10  ;;  %v13428_v10 = vld [vmem:[#allocation2 + $0x16b] sm:$0xff] }
 0xb58   : > { %21002 = vmatprep.mubr.msk.f32.mxu0 %vm23396_vm0, %v28148_v16 }
 0xb5b   : > { %21003 = vmatmul.mubr.msk.f32.gmra.mrb[32].mxu0 %vm2427_vm2, %v13408_v24  ;;  %v13429_v24 = vld [vmem:[#allocation2 + $0x173] sm:$0xff] }
 0xb5c   : > { %21005 = vmatprep.mubr.msk.f32.mxu0 %vm23396_vm0, %v28148_v16 }
 0xb5f   : > { %21006 = vmatmul.mubr.msk.f32.gmra.mrb[34].mxu0 %vm2427_vm2, %v13409_v27  ;;  %v13430_v27 = vld [vmem:[#allocation2 + $0x17b] sm:$0xff] }
 0xb60   : > { %21008 = vmatprep.mubr.msk.f32.mxu0 %vm23396_vm0, %v28148_v16 }
 0xb63   : > { %21009 = vmatmul.mubr.msk.f32.gmra.mrb[36].mxu0 %vm2427_vm2, %v13410_v19  ;;  %v13431_v19 = vld [vmem:[#allocation2 + $0x183] sm:$0xff] }
 0xb64   : > { %21011 = vmatprep.mubr.msk.f32.mxu0 %vm23396_vm0, %v28148_v16 }
 0xb67   : > { %21012 = vmatmul.mubr.msk.f32.gmra.mrb[38].mxu0 %vm2427_vm2, %v13411_v61  ;;  %v13432_v61 = vld [vmem:[#allocation2 + $0x18b] sm:$0xf] }
 0xb68   : > { %21014 = vmatprep.mubr.msk.f32.mxu0 %vm23396_vm0, %v28148_v16 }
 0xb6b   : > { %21015 = vmatmul.mubr.msk.f32.gmra.mrb[40].mxu0 %vm2427_vm2, %v13412_v55  ;;  %v13870_v55 = vld [vmem:[#allocation2 + $0x4c] sm:$0xff] }
 0xb6c   : > { %21017 = vmatprep.mubr.msk.f32.mxu0 %vm23396_vm0, %v28148_v16 }
 0xb6f   : > { %21018 = vmatmul.mubr.msk.f32.gmra.mrb[42].mxu0 %vm2427_vm2, %v13413_v51  ;;  %v13871_v51 = vld [vmem:[#allocation2 + $0x54] sm:$0xff] }
 0xb70   : > { %21020 = vmatprep.mubr.msk.f32.mxu0 %vm23396_vm0, %v28148_v16 }
 0xb73   : > { %21021 = vmatmul.mubr.msk.f32.gmra.mrb[44].mxu0 %vm2427_vm2, %v13414_v22  ;;  %v13872_v22 = vld [vmem:[#allocation2 + $0x5c] sm:$0xff] }
 0xb74   : > { %21023 = vmatprep.mubr.msk.f32.mxu0 %vm23396_vm0, %v28148_v16 }
 0xb77   : > { %21024 = vmatmul.mubr.msk.f32.gmra.mrb[46].mxu0 %vm2427_vm2, %v13415_v11  ;;  %v13873_v11 = vld [vmem:[#allocation2 + $0x64] sm:$0xff] }
 0xb78   : > { %21026 = vmatprep.mubr.msk.f32.mxu0 %vm23396_vm0, %v28148_v16 }
 0xb7b   : > { %21027 = vmatmul.mubr.msk.f32.gmra.mrb[48].mxu0 %vm2427_vm2, %v13416_v47  ;;  %v13874_v47 = vld [vmem:[#allocation2 + $0x6c] sm:$0xff] }
 0xb7c   : > { %21029 = vmatprep.mubr.msk.f32.mxu0 %vm23396_vm0, %v28148_v16 }
 0xb7f   : > { %21030 = vmatmul.mubr.msk.f32.gmra.mrb[50].mxu0 %vm2427_vm2, %v13417_v48  ;;  %v13875_v48 = vld [vmem:[#allocation2 + $0x74] sm:$0xff] }
 0xb80   : > { %21032 = vmatprep.mubr.msk.f32.mxu0 %vm23396_vm0, %v28148_v16 }
 0xb83   : > { %21033 = vmatmul.mubr.msk.f32.gmra.mrb[52].mxu0 %vm2427_vm2, %v13418_v0  ;;  %v13876_v0 = vld [vmem:[#allocation2 + $0x7c] sm:$0xff] }
 0xb84   : > { %21035 = vmatprep.mubr.msk.f32.mxu0 %vm23396_vm0, %v28148_v16 }
 0xb87   : > { %21036 = vmatmul.mubr.msk.f32.gmra.mrb[54].mxu0 %vm2427_vm2, %v13419_v3  ;;  %v13877_v3 = vld [vmem:[#allocation2 + $0x84] sm:$0xff] }
 0xb88   : > { %21038 = vmatprep.mubr.msk.f32.mxu0 %vm23396_vm0, %v28148_v16 }
 0xb8b   : > { %21039 = vmatmul.mubr.msk.f32.gmra.mrb[56].mxu0 %vm2427_vm2, %v13420_v46  ;;  %v13878_v46 = vld [vmem:[#allocation2 + $0x8c] sm:$0xff] }
 0xb8c   : > { %21041 = vmatprep.mubr.msk.f32.mxu0 %vm23396_vm0, %v28148_v16 }
 0xb8f   : > { %21042 = vmatmul.mubr.msk.f32.gmra.mrb[58].mxu0 %vm2427_vm2, %v13421_v1  ;;  %v13879_v1 = vld [vmem:[#allocation2 + $0x94] sm:$0xff] }
 0xb90   : > { %21044 = vmatprep.mubr.msk.f32.mxu0 %vm23396_vm0, %v28148_v16 }
 0xb93   : > { %21045 = vmatmul.mubr.msk.f32.gmra.mrb[60].mxu0 %vm2427_vm2, %v13422_v25  ;;  %v13880_v25 = vld [vmem:[#allocation2 + $0x9c] sm:$0xff] }
 0xb94   : > { %21047 = vmatprep.mubr.msk.f32.mxu0 %vm23396_vm0, %v28148_v16 }
 0xb97   : > { %21048 = vmatmul.mubr.msk.f32.gmra.mrb[62].mxu0 %vm2427_vm2, %v13423_v7  ;;  %v13881_v7 = vld [vmem:[#allocation2 + $0xa4] sm:$0xff] }
 0xb98   : > { %21050 = vmatprep.mubr.msk.f32.mxu0 %vm23396_vm0, %v28148_v16 }
 0xb9b   : > { %21051 = vmatmul.mubr.msk.f32.gmra.mrb[64].mxu0 %vm2427_vm2, %v13424_v37  ;;  %v13882_v37 = vld [vmem:[#allocation2 + $0xac] sm:$0xff] }
 0xb9c   : > { %21053 = vmatprep.mubr.msk.f32.mxu0 %vm23396_vm0, %v28148_v16 }
 0xb9f   : > { %21054 = vmatmul.mubr.msk.f32.gmra.mrb[66].mxu0 %vm2427_vm2, %v13425_v41  ;;  %v13883_v41 = vld [vmem:[#allocation2 + $0xb4] sm:$0xff] }
 0xba0   : > { %21056 = vmatprep.mubr.msk.f32.mxu0 %vm23396_vm0, %v28148_v16 }
 0xba3   : > { %21057 = vmatmul.mubr.msk.f32.gmra.mrb[68].mxu0 %vm2427_vm2, %v13426_v31  ;;  %v13884_v31 = vld [vmem:[#allocation2 + $0xbc] sm:$0xff] }
 0xba4   : > { %21059 = vmatprep.mubr.msk.f32.mxu0 %vm23396_vm0, %v28148_v16 }
 0xba7   : > { %21060 = vmatmul.mubr.msk.f32.gmra.mrb[70].mxu0 %vm2427_vm2, %v13427_v21  ;;  %v13885_v21 = vld [vmem:[#allocation2 + $0xc4] sm:$0xff] }
 0xba8   : > { %21062 = vmatprep.mubr.msk.f32.mxu0 %vm23396_vm0, %v28148_v16 }
 0xbab   : > { %21063 = vmatmul.mubr.msk.f32.gmra.mrb[72].mxu0 %vm2427_vm2, %v13428_v10  ;;  %v13886_v10 = vld [vmem:[#allocation2 + $0xcc] sm:$0xff] }
 0xbac   : > { %21065 = vmatprep.mubr.msk.f32.mxu0 %vm23396_vm0, %v28148_v16 }
 0xbaf   : > { %21066 = vmatmul.mubr.msk.f32.gmra.mrb[74].mxu0 %vm2427_vm2, %v13429_v24  ;;  %v13887_v24 = vld [vmem:[#allocation2 + $0xd4] sm:$0xff] }
 0xbb0   : > { %21068 = vmatprep.mubr.msk.f32.mxu0 %vm23396_vm0, %v28148_v16 }
 0xbb3   : > { %21069 = vmatmul.mubr.msk.f32.gmra.mrb[76].mxu0 %vm2427_vm2, %v13430_v27  ;;  %v13888_v27 = vld [vmem:[#allocation2 + $0xdc] sm:$0xff] }
 0xbb4   : > { %21071 = vmatprep.mubr.msk.f32.mxu0 %vm23396_vm0, %v28148_v16 }
 0xbb7   : > { %21072 = vmatmul.mubr.msk.f32.gmra.mrb[78].mxu0 %vm2427_vm2, %v13431_v19  ;;  %v13889_v19 = vld [vmem:[#allocation2 + $0xe4] sm:$0xff] }
 0xbb8   : > { %21074 = vmatprep.mubr.msk.f32.mxu0 %vm23396_vm0, %v28148_v16 }
 0xbbb   : > { %21075 = vmatmul.mubr.msk.f32.gmra.mrb[80].mxu0 %vm2427_vm2, %v13432_v61  ;;  %v13890_v61 = vld [vmem:[#allocation2 + $0xec] sm:$0xff] }
 0xbbc   : > { %21081 = vmatprep.mubr.msk.f32.mxu0 %vm23396_vm0, %v28148_v16 }
 0xbbf   : > { %21082 = vmatmul.mubr.msk.f32.vlgmr.msra.gmra.mrb[0].mxu0 %vm2427_vm2, %v13870_v55  ;;  %v13891_v55 = vld [vmem:[#allocation2 + $0xf4] sm:$0xff] }
 0xbc0   : > { %21084 = vmatprep.mubr.msk.f32.mxu0 %vm23396_vm0, %v28148_v16 }
 0xbc3   : > { %21085 = vmatmul.mubr.msk.f32.gmra.mrb[2].mxu0 %vm2427_vm2, %v13871_v51  ;;  %v13892_v51 = vld [vmem:[#allocation2 + $0xfc] sm:$0xff] }
 0xbc4   : > { %21087 = vmatprep.mubr.msk.f32.mxu0 %vm23396_vm0, %v28148_v16 }
 0xbc7   : > { %21088 = vmatmul.mubr.msk.f32.gmra.mrb[4].mxu0 %vm2427_vm2, %v13872_v22  ;;  %v13893_v22 = vld [vmem:[#allocation2 + $0x104] sm:$0xff] }
 0xbc8   : > { %21090 = vmatprep.mubr.msk.f32.mxu0 %vm23396_vm0, %v28148_v16 }
 0xbcb   : > { %21091 = vmatmul.mubr.msk.f32.gmra.mrb[6].mxu0 %vm2427_vm2, %v13873_v11  ;;  %v13894_v11 = vld [vmem:[#allocation2 + $0x10c] sm:$0xff] }
 0xbcc   : > { %21093 = vmatprep.mubr.msk.f32.mxu0 %vm23396_vm0, %v28148_v16 }
 0xbcf   : > { %21094 = vmatmul.mubr.msk.f32.gmra.mrb[8].mxu0 %vm2427_vm2, %v13874_v47  ;;  %v13895_v47 = vld [vmem:[#allocation2 + $0x114] sm:$0xff] }
 0xbd0   : > { %21096 = vmatprep.mubr.msk.f32.mxu0 %vm23396_vm0, %v28148_v16 }
 0xbd3   : > { %21097 = vmatmul.mubr.msk.f32.gmra.mrb[10].mxu0 %vm2427_vm2, %v13875_v48  ;;  %v13896_v48 = vld [vmem:[#allocation2 + $0x11c] sm:$0xff] }
 0xbd4   : > { %21099 = vmatprep.mubr.msk.f32.mxu0 %vm23396_vm0, %v28148_v16 }
 0xbd7   : > { %21100 = vmatmul.mubr.msk.f32.gmra.mrb[12].mxu0 %vm2427_vm2, %v13876_v0  ;;  %v13897_v0 = vld [vmem:[#allocation2 + $0x124] sm:$0xff] }
 0xbd8   : > { %21102 = vmatprep.mubr.msk.f32.mxu0 %vm23396_vm0, %v28148_v16 }
 0xbdb   : > { %21103 = vmatmul.mubr.msk.f32.gmra.mrb[14].mxu0 %vm2427_vm2, %v13877_v3  ;;  %v13898_v3 = vld [vmem:[#allocation2 + $0x12c] sm:$0xff] }
 0xbdc   : > { %21105 = vmatprep.mubr.msk.f32.mxu0 %vm23396_vm0, %v28148_v16 }
 0xbdf   : > { %21106 = vmatmul.mubr.msk.f32.gmra.mrb[16].mxu0 %vm2427_vm2, %v13878_v46  ;;  %v13899_v46 = vld [vmem:[#allocation2 + $0x134] sm:$0xff] }
 0xbe0   : > { %21108 = vmatprep.mubr.msk.f32.mxu0 %vm23396_vm0, %v28148_v16 }
 0xbe3   : > { %21109 = vmatmul.mubr.msk.f32.gmra.mrb[18].mxu0 %vm2427_vm2, %v13879_v1  ;;  %v13900_v1 = vld [vmem:[#allocation2 + $0x13c] sm:$0xff] }
 0xbe4   : > { %21111 = vmatprep.mubr.msk.f32.mxu0 %vm23396_vm0, %v28148_v16 }
 0xbe7   : > { %21112 = vmatmul.mubr.msk.f32.gmra.mrb[20].mxu0 %vm2427_vm2, %v13880_v25  ;;  %v13901_v25 = vld [vmem:[#allocation2 + $0x144] sm:$0xff] }
 0xbe8   : > { %21114 = vmatprep.mubr.msk.f32.mxu0 %vm23396_vm0, %v28148_v16 }
 0xbeb   : > { %21115 = vmatmul.mubr.msk.f32.gmra.mrb[22].mxu0 %vm2427_vm2, %v13881_v7  ;;  %v13902_v7 = vld [vmem:[#allocation2 + $0x14c] sm:$0xff] }
 0xbec   : > { %21117 = vmatprep.mubr.msk.f32.mxu0 %vm23396_vm0, %v28148_v16 }
 0xbef   : > { %21118 = vmatmul.mubr.msk.f32.gmra.mrb[24].mxu0 %vm2427_vm2, %v13882_v37  ;;  %v13903_v37 = vld [vmem:[#allocation2 + $0x154] sm:$0xff] }
 0xbf0   : > { %21120 = vmatprep.mubr.msk.f32.mxu0 %vm23396_vm0, %v28148_v16 }
 0xbf3   : > { %21121 = vmatmul.mubr.msk.f32.gmra.mrb[26].mxu0 %vm2427_vm2, %v13883_v41  ;;  %v13904_v41 = vld [vmem:[#allocation2 + $0x15c] sm:$0xff] }
 0xbf4   : > { %21123 = vmatprep.mubr.msk.f32.mxu0 %vm23396_vm0, %v28148_v16 }
 0xbf7   : > { %21124 = vmatmul.mubr.msk.f32.gmra.mrb[28].mxu0 %vm2427_vm2, %v13884_v31  ;;  %v13905_v31 = vld [vmem:[#allocation2 + $0x164] sm:$0xff] }
 0xbf8   : > { %21126 = vmatprep.mubr.msk.f32.mxu0 %vm23396_vm0, %v28148_v16 }
 0xbfb   : > { %21127 = vmatmul.mubr.msk.f32.gmra.mrb[30].mxu0 %vm2427_vm2, %v13885_v21  ;;  %v13906_v21 = vld [vmem:[#allocation2 + $0x16c] sm:$0xff] }
 0xbfc   : > { %21129 = vmatprep.mubr.msk.f32.mxu0 %vm23396_vm0, %v28148_v16 }
 0xbff   : > { %21130 = vmatmul.mubr.msk.f32.gmra.mrb[32].mxu0 %vm2427_vm2, %v13886_v10  ;;  %v13907_v10 = vld [vmem:[#allocation2 + $0x174] sm:$0xff] }
 0xc00   : > { %21132 = vmatprep.mubr.msk.f32.mxu0 %vm23396_vm0, %v28148_v16 }
 0xc03   : > { %21133 = vmatmul.mubr.msk.f32.gmra.mrb[34].mxu0 %vm2427_vm2, %v13887_v24  ;;  %v13908_v24 = vld [vmem:[#allocation2 + $0x17c] sm:$0xff] }
 0xc04   : > { %21135 = vmatprep.mubr.msk.f32.mxu0 %vm23396_vm0, %v28148_v16 }
 0xc07   : > { %21136 = vmatmul.mubr.msk.f32.gmra.mrb[36].mxu0 %vm2427_vm2, %v13888_v27  ;;  %v13909_v27 = vld [vmem:[#allocation2 + $0x184] sm:$0xff] }
 0xc08   : > { %21138 = vmatprep.mubr.msk.f32.mxu0 %vm23396_vm0, %v28148_v16 }
 0xc0b   : > { %21139 = vmatmul.mubr.msk.f32.gmra.mrb[38].mxu0 %vm2427_vm2, %v13889_v19  ;;  %v13910_v19 = vld [vmem:[#allocation2 + $0x18c] sm:$0xf] }
 0xc0c   : > { %21141 = vmatprep.mubr.msk.f32.mxu0 %vm23396_vm0, %v28148_v16 }
 0xc0f   : > { %21142 = vmatmul.mubr.msk.f32.gmra.mrb[40].mxu0 %vm2427_vm2, %v13890_v61 }
 0xc10   : > { %21144 = vmatprep.mubr.msk.f32.mxu0 %vm23396_vm0, %v28148_v16 }
 0xc13   : > { %21145 = vmatmul.mubr.msk.f32.gmra.mrb[42].mxu0 %vm2427_vm2, %v13891_v55 }
 0xc14   : > { %21147 = vmatprep.mubr.msk.f32.mxu0 %vm23396_vm0, %v28148_v16 }
 0xc17   : > { %21148 = vmatmul.mubr.msk.f32.gmra.mrb[44].mxu0 %vm2427_vm2, %v13892_v51 }
 0xc18   : > { %21150 = vmatprep.mubr.msk.f32.mxu0 %vm23396_vm0, %v28148_v16 }
 0xc1b   : > { %21151 = vmatmul.mubr.msk.f32.gmra.mrb[46].mxu0 %vm2427_vm2, %v13893_v22 }
 0xc1c   : > { %21153 = vmatprep.mubr.msk.f32.mxu0 %vm23396_vm0, %v28148_v16 }
 0xc1f   : > { %21154 = vmatmul.mubr.msk.f32.gmra.mrb[48].mxu0 %vm2427_vm2, %v13894_v11 }
 0xc20   : > { %21156 = vmatprep.mubr.msk.f32.mxu0 %vm23396_vm0, %v28148_v16 }
 0xc23   : > { %21157 = vmatmul.mubr.msk.f32.gmra.mrb[50].mxu0 %vm2427_vm2, %v13895_v47 }
 0xc24   : > { %21159 = vmatprep.mubr.msk.f32.mxu0 %vm23396_vm0, %v28148_v16 }
 0xc27   : > { %21160 = vmatmul.mubr.msk.f32.gmra.mrb[52].mxu0 %vm2427_vm2, %v13896_v48 }
 0xc28   : > { %21162 = vmatprep.mubr.msk.f32.mxu0 %vm23396_vm0, %v28148_v16 }
 0xc2b   : > { %21163 = vmatmul.mubr.msk.f32.gmra.mrb[54].mxu0 %vm2427_vm2, %v13897_v0 }
 0xc2c   : > { %21165 = vmatprep.mubr.msk.f32.mxu0 %vm23396_vm0, %v28148_v16 }
 0xc2f   : > { %21166 = vmatmul.mubr.msk.f32.gmra.mrb[56].mxu0 %vm2427_vm2, %v13898_v3 }
 0xc30   : > { %21168 = vmatprep.mubr.msk.f32.mxu0 %vm23396_vm0, %v28148_v16 }
 0xc33   : > { %21169 = vmatmul.mubr.msk.f32.gmra.mrb[58].mxu0 %vm2427_vm2, %v13899_v46 }
 0xc34   : > { %21171 = vmatprep.mubr.msk.f32.mxu0 %vm23396_vm0, %v28148_v16 }
 0xc37   : > { %21172 = vmatmul.mubr.msk.f32.gmra.mrb[60].mxu0 %vm2427_vm2, %v13900_v1 }
 0xc38   : > { %21174 = vmatprep.mubr.msk.f32.mxu0 %vm23396_vm0, %v28148_v16 }
 0xc3b   : > { %21175 = vmatmul.mubr.msk.f32.gmra.mrb[62].mxu0 %vm2427_vm2, %v13901_v25 }
 0xc3c   : > { %21177 = vmatprep.mubr.msk.f32.mxu0 %vm23396_vm0, %v28148_v16 }
 0xc3f   : > { %21178 = vmatmul.mubr.msk.f32.gmra.mrb[64].mxu0 %vm2427_vm2, %v13902_v7 }
 0xc40   : > { %21180 = vmatprep.mubr.msk.f32.mxu0 %vm23396_vm0, %v28148_v16 }
 0xc43   : > { %21181 = vmatmul.mubr.msk.f32.gmra.mrb[66].mxu0 %vm2427_vm2, %v13903_v37 }
 0xc44   : > { %21183 = vmatprep.mubr.msk.f32.mxu0 %vm23396_vm0, %v28148_v16 }
 0xc47   : > { %21184 = vmatmul.mubr.msk.f32.gmra.mrb[68].mxu0 %vm2427_vm2, %v13904_v41 }
 0xc48   : > { %21186 = vmatprep.mubr.msk.f32.mxu0 %vm23396_vm0, %v28148_v16 }
 0xc4b   : > { %21187 = vmatmul.mubr.msk.f32.gmra.mrb[70].mxu0 %vm2427_vm2, %v13905_v31 }
 0xc4c   : > { %21189 = vmatprep.mubr.msk.f32.mxu0 %vm23396_vm0, %v28148_v16 }
 0xc4f   : > { %21190 = vmatmul.mubr.msk.f32.gmra.mrb[72].mxu0 %vm2427_vm2, %v13906_v21 }
 0xc50   : > { %21192 = vmatprep.mubr.msk.f32.mxu0 %vm23396_vm0, %v28148_v16 }
 0xc53   : > { %21193 = vmatmul.mubr.msk.f32.gmra.mrb[74].mxu0 %vm2427_vm2, %v13907_v10 }
 0xc54   : > { %21195 = vmatprep.mubr.msk.f32.mxu0 %vm23396_vm0, %v28148_v16 }
 0xc57   : > { %21196 = vmatmul.mubr.msk.f32.gmra.mrb[76].mxu0 %vm2427_vm2, %v13908_v24 }
 0xc58   : > { %21198 = vmatprep.mubr.msk.f32.mxu0 %vm23396_vm0, %v28148_v16 }
 0xc5b   : > { %21199 = vmatmul.mubr.msk.f32.gmra.mrb[78].mxu0 %vm2427_vm2, %v13909_v27 }
 0xc5c   : > { %21201 = vmatprep.mubr.msk.f32.mxu0 %vm23396_vm0, %v28148_v16 }
 0xc5f   : > { %21202 = vmatmul.mubr.msk.f32.gmra.mrb[80].mxu0 %vm2427_vm2, %v13910_v19 }
 0xc92   : > { %v14103_v61 = vpop.f32.mrb[0].mxu0 }
 0xc93   : > { %v21357_v55 = vadd.f32 %v14103_v61, %v27215_v62  ;;  %v21083_v51 = vpop.f32.mrb[1].mxu0 }
 0xc95   : > { %14348 = vst.msk [vmem:[#allocation3] sm:$0xff] %vm440_vm1, %v21357_v55 }
 0xc96   : > { %v14108_v22 = vpop.f32.mrb[2].mxu0 }
 0xc97   : > { %v21358_v11 = vadd.f32 %v14108_v22, %v27220_v29  ;;  %v21086_v47 = vpop.f32.mrb[3].mxu0 }
 0xc99   : > { %14349 = vst.msk [vmem:[#allocation3 + $0x8] sm:$0xff] %vm440_vm1, %v21358_v11 }
 0xc9a   : > { %v14113_v48 = vpop.f32.mrb[4].mxu0 }
 0xc9b   : > { %v21359_v0 = vadd.f32 %v14113_v48, %v27225_v33  ;;  %v21089_v3 = vpop.f32.mrb[5].mxu0 }
 0xc9d   : > { %14350 = vst.msk [vmem:[#allocation3 + $0x10] sm:$0xff] %vm440_vm1, %v21359_v0 }
 0xc9e   : > { %v14118_v46 = vpop.f32.mrb[6].mxu0 }
 0xc9f   : > { %v21360_v1 = vadd.f32 %v14118_v46, %v27230_v5  ;;  %v21092_v25 = vpop.f32.mrb[7].mxu0 }
 0xca1   : > { %14351 = vst.msk [vmem:[#allocation3 + $0x18] sm:$0xff] %vm440_vm1, %v21360_v1 }
 0xca2   : > { %v14123_v62 = vpop.f32.mrb[8].mxu0 }
 0xca3   : > { %v21361_v7 = vadd.f32 %v14123_v62, %v27235_v40  ;;  %v21095_v37 = vpop.f32.mrb[9].mxu0 }
 0xca5   : > { %14352 = vst.msk [vmem:[#allocation3 + $0x20] sm:$0xff] %vm440_vm1, %v21361_v7 }
 0xca6   : > { %v14128_v29 = vpop.f32.mrb[10].mxu0 }
 0xca7   : > { %v21362_v41 = vadd.f32 %v14128_v29, %v27240_v23  ;;  %v21098_v31 = vpop.f32.mrb[11].mxu0  ;;  %v14749_v23 = vld [vmem:[%s28105_s6 + $0x8] sm:$0xff] }
 0xca8   : > { %14859 = vmatprep.mubr.f32.mxu1 %v14749_v23  ;;  %v14430_v23 = vld [vmem:[#allocation3 + $0x9] sm:$0xff] }
 0xca9   : > { %14353 = vst.msk [vmem:[#allocation3 + $0x28] sm:$0xff] %vm440_vm1, %v21362_v41 }
 0xcaa   : > { %v14133_v33 = vpop.f32.mrb[12].mxu0 }
 0xcab   : > { %v21363_v21 = vadd.f32 %v14133_v33, %v27245_v60  ;;  %v21101_v10 = vpop.f32.mrb[13].mxu0 }
 0xcad   : > { %14354 = vst.msk [vmem:[#allocation3 + $0x30] sm:$0xff] %vm440_vm1, %v21363_v21 }
 0xcae   : > { %v14138_v5 = vpop.f32.mrb[14].mxu0 }
 0xcaf   : > { %v21364_v24 = vadd.f32 %v14138_v5, %v27250_v15  ;;  %v21104_v27 = vpop.f32.mrb[15].mxu0 }
 0xcb1   : > { %14355 = vst.msk [vmem:[#allocation3 + $0x38] sm:$0xff] %vm440_vm1, %v21364_v24 }
 0xcb2   : > { %v14143_v40 = vpop.f32.mrb[16].mxu0 }
 0xcb3   : > { %v21365_v19 = vadd.f32 %v14143_v40, %v27255_v36  ;;  %v21107_v61 = vpop.f32.mrb[17].mxu0 }
 0xcb4   : > { %v14547_v61 = vld [vmem:[#allocation3 + $0x1b] sm:$0xff] }
 0xcb5   : > { %14356 = vst.msk [vmem:[#allocation3 + $0x40] sm:$0xff] %vm440_vm1, %v21365_v19 }
 0xcb6   : > { %v14148_v60 = vpop.f32.mrb[18].mxu0 }
 0xcb7   : > { %v21366_v55 = vadd.f32 %v14148_v60, %v27260_v2  ;;  %v21110_v51 = vpop.f32.mrb[19].mxu0  ;;  %v14507_v60 = vld [vmem:[#allocation3 + $0x12] sm:$0xff] }
 0xcb9   : > { %14357 = vst.msk [vmem:[#allocation3 + $0x48] sm:$0xff] %vm440_vm1, %v21366_v55 }
 0xcba   : > { %v14153_v15 = vpop.f32.mrb[20].mxu0 }
 0xcbb   : > { %v21367_v22 = vadd.f32 %v14153_v15, %v27265_v6  ;;  %v21113_v11 = vpop.f32.mrb[21].mxu0 }
 0xcbc   : > { %v14391_v11 = vld [vmem:[#allocation3 + $0x8] sm:$0xff] }
 0xcbd   : > { %14358 = vst.msk [vmem:[#allocation3 + $0x50] sm:$0xff] %vm440_vm1, %v21367_v22 }
 0xcbe   : > { %v14158_v36 = vpop.f32.mrb[22].mxu0 }
 0xcbf   : > { %v21368_v47 = vadd.f32 %v14158_v36, %v27270_v63  ;;  %v21116_v48 = vpop.f32.mrb[23].mxu0  ;;  %v14429_v36 = vld [vmem:[#allocation3 + $0x1] sm:$0xff] }
 0xcc1   : > { %14359 = vst.msk [vmem:[#allocation3 + $0x58] sm:$0xff] %vm440_vm1, %v21368_v47 }
 0xcc2   : > { %v14163_v0 = vpop.f32.mrb[24].mxu0 }
 0xcc3   : > { %v21369_v3 = vadd.f32 %v14163_v0, %v27275_v28  ;;  %v21119_v46 = vpop.f32.mrb[25].mxu0 }
 0xcc5   : > { %14360 = vst.msk [vmem:[#allocation3 + $0x60] sm:$0xff] %vm440_vm1, %v21369_v3 }
 0xcc6   : > { %v14168_v2 = vpop.f32.mrb[26].mxu0 }
 0xcc7   : > { %v21370_v1 = vadd.f32 %v14168_v2, %v27280_v20  ;;  %v21122_v25 = vpop.f32.mrb[27].mxu0 }
 0xcc9   : > { %14361 = vst.msk [vmem:[#allocation3 + $0x68] sm:$0xff] %vm440_vm1, %v21370_v1  ;;  %v14390_v1 = vld [vmem:[#allocation3] sm:$0xff] }
 0xcca   : > { %v14173_v6 = vpop.f32.mrb[28].mxu0 }
 0xccb   : > { %v21371_v62 = vadd.f32 %v14173_v6, %v27285_v54  ;;  %v21125_v7 = vpop.f32.mrb[29].mxu0 }
 0xccd   : > { %14362 = vst.msk [vmem:[#allocation3 + $0x70] sm:$0xff] %vm440_vm1, %v21371_v62  ;;  %v14468_v62 = vmax.f32 %v14390_v1, %v14429_v36 }
 0xcce   : > { %v14178_v63 = vpop.f32.mrb[30].mxu0 }
 0xccf   : > { %v21372_v37 = vadd.f32 %v14178_v63, %v27290_v50  ;;  %v21128_v29 = vpop.f32.mrb[31].mxu0 }
 0xcd0   : > { %v27924_v29 = vld [vmem:[%s28104_s5] ss:$0 sm:$0xff] }
 0xcd1   : > { %14363 = vst.msk [vmem:[#allocation3 + $0x78] sm:$0xff] %vm440_vm1, %v21372_v37 }
 0xcd2   : > { %v14183_v28 = vpop.f32.mrb[32].mxu0 }
 0xcd3   : > { %v21373_v41 = vadd.f32 %v14183_v28, %v27295_v26  ;;  %v21131_v31 = vpop.f32.mrb[33].mxu0  ;;  %v14510_v28 = vld [vmem:[#allocation3 + $0x2a] sm:$0xff] }
 0xcd5   : > { %14364 = vst.msk [vmem:[#allocation3 + $0x80] sm:$0xff] %vm440_vm1, %v21373_v41  ;;  %v14549_v41 = vld [vmem:[#allocation3 + $0x2b] sm:$0xff] }
 0xcd6   : > { %v14188_v20 = vpop.f32.mrb[34].mxu0 }
 0xcd7   : > { %v21374_v33 = vadd.f32 %v14188_v20, %v27300_v53  ;;  %v21134_v21 = vpop.f32.mrb[35].mxu0  ;;  %v14508_v53 = vld [vmem:[#allocation3 + $0x1a] sm:$0xff] }
 0xcd8   : > { %v14586_v15 = vmax.f32 %v14508_v53, %v14547_v61 }
 0xcd9   : > { %14365 = vst.msk [vmem:[#allocation3 + $0x88] sm:$0xff] %vm440_vm1, %v21374_v33 }
 0xcda   : > { %v14193_v54 = vpop.f32.mrb[36].mxu0 }
 0xcdb   : > { %v21375_v10 = vadd.f32 %v14193_v54, %v27305_v30  ;;  %v21137_v5 = vpop.f32.mrb[37].mxu0  ;;  %v14546_v30 = vld [vmem:[#allocation3 + $0x13] sm:$0xff] }
 0xcdc   : > { %v14406_v47 = vld [vmem:[#allocation3 + $0x80] sm:$0xff]  ;;  %v14585_v3 = vmax.f32 %v14507_v60, %v14546_v30  ;;  %v14393_v60 = vld [vmem:[#allocation3 + $0x18] sm:$0xff] }
 0xcdd   : > { %14366 = vst.msk [vmem:[#allocation3 + $0x90] sm:$0xff] %vm440_vm1, %v21375_v10  ;;  %v14432_v5 = vld [vmem:[#allocation3 + $0x19] sm:$0xff]  ;;  %v14431_v30 = vld [vmem:[#allocation3 + $0x11] sm:$0xff] }
 0xcde   : > { %v14198_v50 = vpop.f32.mrb[38].mxu0  ;;  %v14624_v21 = vmax.f32 %v14468_v62, %v14585_v3 }
 0xcdf   : > { %v21376_v24 = vadd.f32 %v14198_v50, %v27310_v4  ;;  %v21140_v27 = vpop.f32.mrb[39].mxu0  ;;  %v14509_v50 = vld [vmem:[#allocation3 + $0x22] sm:$0xff] }
 0xce0   : > { %v14445_v51 = vld [vmem:[#allocation3 + $0x81] sm:$0xff] }
 0xce1   : > { %14367 = vst.msk [vmem:[#allocation3 + $0x98] sm:$0xff] %vm440_vm1, %v21376_v24  ;;  %v14484_v46 = vmax.f32 %v14406_v47, %v14445_v51  ;;  %v14407_v31 = vld [vmem:[#allocation3 + $0x88] sm:$0xff] }
 0xce2   : > { %v14203_v26 = vpop.f32.mrb[40].mxu0 }
 0xce3   : > { %v21377_v40 = vadd.f32 %v14203_v26, %v27315_v39  ;;  %v21143_v19 = vpop.f32.mrb[41].mxu0  ;;  %v14469_v39 = vmax.f32 %v14391_v11, %v14430_v23 }
 0xce4   : > { %v14446_v6 = vld [vmem:[#allocation3 + $0x89] sm:$0xff] }
 0xce5   : > { %14368 = vst.msk [vmem:[#allocation3 + $0xa0] sm:$0xff] %vm440_vm1, %v21377_v40  ;;  %v14625_v7 = vmax.f32 %v14469_v39, %v14586_v15  ;;  %v14485_v54 = vmax.f32 %v14407_v31, %v14446_v6  ;;  %v14588_v40 = vmax.f32 %v14510_v28, %v14549_v41  ;;  %v14408_v51 = vld [vmem:[#allocation3 + $0x90] sm:$0xff] }
 0xce6   : > { %v14208_v55 = vpop.f32.mrb[42].mxu0 }
 0xce7   : > { %v21378_v22 = vadd.f32 %v14208_v55, %v27326_v58  ;;  %v21146_v4 = vpop.f32.mrb[43].mxu0  ;;  %v14671_v27 = vadd.f32 %v27924_v29, %v14625_v7  ;;  %v14670_v55 = vadd.f32 %v27924_v29, %v14624_v21 }
 0xce8   : > { %v14523_v48 = vld [vmem:[#allocation3 + $0x92] sm:$0xff]  ;;  %v14471_v4 = vmax.f32 %v14393_v60, %v14432_v5  ;;  %v14433_v60 = vld [vmem:[#allocation3 + $0x21] sm:$0xff] }
 0xce9   : > { %v14562_v0 = vld [vmem:[#allocation3 + $0x93] sm:$0xff]  ;;  %14369 = vst.msk [vmem:[#allocation3 + $0xa8] sm:$0xff] %vm440_vm1, %v21378_v22  ;;  %v14710_v39 = vmax.f32 %v14671_v27, 0.0 }
 0xcea   : > { %v14601_v2 = vmax.f32 %v14523_v48, %v14562_v0  ;;  %v14213_v25 = vpop.f32.mrb[44].mxu0  ;;  %v14447_v26 = vld [vmem:[#allocation3 + $0x91] sm:$0xff] }
 0xceb   : > { %v21379_v63 = vadd.f32 %v14213_v25, %v27331_v34  ;;  %v21149_v58 = vpop.f32.mrb[45].mxu0  ;;  %v14548_v34 = vld [vmem:[#allocation3 + $0x23] sm:$0xff]  ;;  %v14486_v47 = vmax.f32 %v14408_v51, %v14447_v26  ;;  %v14409_v28 = vld [vmem:[#allocation3 + $0x98] sm:$0xff] }
 0xcec   : > { %v14640_v37 = vmax.f32 %v14484_v46, %v14601_v2  ;;  %v14524_v20 = vld [vmem:[#allocation3 + $0x9a] sm:$0xff]  ;;  %v14587_v11 = vmax.f32 %v14509_v50, %v14548_v34  ;;  %v14627_v2 = vmax.f32 %v14471_v4, %v14588_v40  ;;  %v14511_v5 = vld [vmem:[#allocation3 + $0x32] sm:$0xff] }
 0xced   : > { %v14563_v33 = vld [vmem:[#allocation3 + $0x9b] sm:$0xff]  ;;  %14370 = vst.msk [vmem:[#allocation3 + $0xb0] sm:$0xff] %vm440_vm1, %v21379_v63  ;;  %v14550_v50 = vld [vmem:[#allocation3 + $0x33] sm:$0xff] }
 0xcee   : > { %v14602_v10 = vmax.f32 %v14524_v20, %v14563_v33  ;;  %v14218_v24 = vpop.f32.mrb[46].mxu0  ;;  %v14686_v23 = vadd.f32 %v27924_v29, %v14640_v37  ;;  %v14448_v3 = vld [vmem:[#allocation3 + $0x99] sm:$0xff]  ;;  %v14709_v37 = vmax.f32 %v14670_v55, 0.0  ;;  %v14589_v4 = vmax.f32 %v14511_v5, %v14550_v50 }
 0xcef   : > { %v21380_v19 = vadd.f32 %v14218_v24, %v27337_v59  ;;  %v21152_v53 = vpop.f32.mrb[47].mxu0  ;;  %v14392_v59 = vld [vmem:[#allocation3 + $0x10] sm:$0xff]  ;;  %v14512_v63 = vld [vmem:[#allocation3 + $0x3a] sm:$0xff]  ;;  %v14487_v21 = vmax.f32 %v14409_v28, %v14448_v3  ;;  %v14673_v24 = vadd.f32 %v27924_v29, %v14627_v2 }
 0xcf0   : > { %v14641_v61 = vmax.f32 %v14485_v54, %v14602_v10  ;;  %v14525_v15 = vld [vmem:[#allocation3 + $0xa2] sm:$0xff]  ;;  %v14470_v46 = vmax.f32 %v14392_v59, %v14431_v30  ;;  %v14725_v6 = vmax.f32 %v14686_v23, 0.0  ;;  %v21316_v34 = vpack.c.bf16 %v14710_v39, %v14709_v37 }
 0xcf1   : > { %v14564_v22 = vld [vmem:[#allocation3 + $0xa3] sm:$0xff]  ;;  %14371 = vst.msk [vmem:[#allocation3 + $0xb8] sm:$0xff] %vm440_vm1, %v21380_v19  ;;  %v14551_v58 = vld [vmem:[#allocation3 + $0x3b] sm:$0xff]  ;;  %v14712_v59 = vmax.f32 %v14673_v24, 0.0 }
 0xcf2   : > { %v14687_v36 = vadd.f32 %v27924_v29, %v14641_v61  ;;  %v14603_v48 = vmax.f32 %v14525_v15, %v14564_v22  ;;  %v14223_v0 = vpop.f32.mrb[48].mxu0  ;;  %v14626_v20 = vmax.f32 %v14470_v46, %v14587_v11  ;;  %v14434_v10 = vld [vmem:[#allocation3 + $0x29] sm:$0xff]  ;;  %v14449_v27 = vld [vmem:[#allocation3 + $0xa1] sm:$0xff]  ;;  %v14590_v26 = vmax.f32 %v14512_v63, %v14551_v58 }
 0xcf3   : > { %v21381_v1 = vadd.f32 %v14223_v0, %v27342_v9  ;;  %v21155_v25 = vpop.f32.mrb[49].mxu0  ;;  %v14395_v23 = vld [vmem:[#allocation3 + $0x28] sm:$0xff]  ;;  %v14410_v55 = vld [vmem:[#allocation3 + $0xa0] sm:$0xff] }
 0xcf4   : > { %v14726_v62 = vmax.f32 %v14687_v36, 0.0  ;;  %v14642_v7 = vmax.f32 %v14486_v47, %v14603_v48  ;;  %v14526_v41 = vld [vmem:[#allocation3 + $0xaa] sm:$0xff]  ;;  %v14672_v30 = vadd.f32 %v27924_v29, %v14626_v20  ;;  %v14473_v22 = vmax.f32 %v14395_v23, %v14434_v10  ;;  %v14394_v47 = vld [vmem:[#allocation3 + $0x20] sm:$0xff] }
 0xcf5   : > { %v14565_v31 = vld [vmem:[#allocation3 + $0xab] sm:$0xff]  ;;  %14372 = vst.msk [vmem:[#allocation3 + $0xc0] sm:$0xff] %vm440_vm1, %v21381_v1  ;;  %v14472_v39 = vmax.f32 %v14394_v47, %v14433_v60  ;;  %v14552_v10 = vld [vmem:[#allocation3 + $0x43] sm:$0xff] }
 0xcf6   : > { %v21314_v33 = vpack.c.bf16 %v14726_v62, %v14725_v6  ;;  %v14604_v54 = vmax.f32 %v14526_v41, %v14565_v31  ;;  %v14228_v9 = vpop.f32.mrb[50].mxu0  ;;  %v14688_v61 = vadd.f32 %v27924_v29, %v14642_v7  ;;  %v14450_v0 = vld [vmem:[#allocation3 + $0xa9] sm:$0xff]  ;;  %v14629_v3 = vmax.f32 %v14473_v22, %v14590_v26 }
 0xcf7   : > { %v21382_v40 = vadd.f32 %v14228_v9, %v27347_v57  ;;  %v21158_v19 = vpop.f32.mrb[51].mxu0  ;;  %v14488_v57 = vmax.f32 %v14410_v55, %v14449_v27  ;;  %v14514_v62 = vld [vmem:[#allocation3 + $0x4a] sm:$0xff]  ;;  %v14711_v63 = vmax.f32 %v14672_v30, 0.0  ;;  %v14628_v41 = vmax.f32 %v14472_v39, %v14589_v4 }
 0xcf8   : > { %21315 = vmatprep.subr.bf16.mxu1 %v21314_v33  ;;  %v14643_v53 = vmax.f32 %v14487_v21, %v14604_v54  ;;  %v14527_v51 = vld [vmem:[#allocation3 + $0xb2] sm:$0xff]  ;;  %v14727_v1 = vmax.f32 %v14688_v61, 0.0  ;;  %v14411_v58 = vld [vmem:[#allocation3 + $0xa8] sm:$0xff]  ;;  %v14675_v50 = vadd.f32 %v27924_v29, %v14629_v3 }
 0xcf9   : > { %21317 = vmatpush3.bf16.msra.mxu1 %v21316_v34  ;;  %v14566_v15 = vld [vmem:[#allocation3 + $0xb3] sm:$0xff]  ;;  %14373 = vst.msk [vmem:[#allocation3 + $0xc8] sm:$0xff] %vm440_vm1, %v21382_v40  ;;  %v14553_v7 = vld [vmem:[#allocation3 + $0x4b] sm:$0xff]  ;;  %v14489_v20 = vmax.f32 %v14411_v58, %v14450_v0  ;;  %v14513_v54 = vld [vmem:[#allocation3 + $0x42] sm:$0xff]  ;;  %v21320_v5 = vpack.c.bf16 %v14712_v59, %v14711_v63  ;;  %v14674_v61 = vadd.f32 %v27924_v29, %v14628_v41 }
 0xcfa   : > { %v14689_v11 = vadd.f32 %v27924_v29, %v14643_v53  ;;  %v14605_v36 = vmax.f32 %v14527_v51, %v14566_v15  ;;  %v14233_v48 = vpop.f32.mrb[52].mxu0  ;;  %v14436_v21 = vld [vmem:[#allocation3 + $0x39] sm:$0xff]  ;;  %v14451_v9 = vld [vmem:[#allocation3 + $0xb1] sm:$0xff]  ;;  %v14592_v34 = vmax.f32 %v14514_v62, %v14553_v7  ;;  %v14591_v51 = vmax.f32 %v14513_v54, %v14552_v10  ;;  %v14438_v41 = vld [vmem:[#allocation3 + $0x49] sm:$0xff] }
 0xcfb   : > { %v21383_v46 = vadd.f32 %v14233_v48, %v27352_v12  ;;  %v21161_v2 = vpop.f32.mrb[53].mxu0  ;;  %v14397_v19 = vld [vmem:[#allocation3 + $0x38] sm:$0xff]  ;;  %v14412_v23 = vld [vmem:[#allocation3 + $0xb0] sm:$0xff] }
 0xcfc   : > { %v14728_v25 = vmax.f32 %v14689_v11, 0.0  ;;  %v14644_v6 = vmax.f32 %v14488_v57, %v14605_v36  ;;  %v14528_v37 = vld [vmem:[#allocation3 + $0xba] sm:$0xff]  ;;  %v14435_v53 = vld [vmem:[#allocation3 + $0x31] sm:$0xff]  ;;  %v14475_v55 = vmax.f32 %v14397_v19, %v14436_v21  ;;  %v14714_v57 = vmax.f32 %v14675_v50, 0.0 }
 0xcfd   : > { %v14567_v28 = vld [vmem:[#allocation3 + $0xbb] sm:$0xff]  ;;  %14374 = vst.msk [vmem:[#allocation3 + $0xd0] sm:$0xff] %vm440_vm1, %v21383_v46  ;;  %v14396_v4 = vld [vmem:[#allocation3 + $0x30] sm:$0xff] }
 0xcfe   : > { %v21318_v31 = vpack.c.bf16 %v14728_v25, %v14727_v1  ;;  %v14606_v33 = vmax.f32 %v14528_v37, %v14567_v28  ;;  %v14238_v12 = vpop.f32.mrb[54].mxu0  ;;  %v14690_v40 = vadd.f32 %v27924_v29, %v14644_v6  ;;  %v14452_v36 = vld [vmem:[#allocation3 + $0xb9] sm:$0xff]  ;;  %v14474_v47 = vmax.f32 %v14396_v4, %v14435_v53 }
 0xcff   : > { %v21384_v24 = vadd.f32 %v14238_v12, %v27357_v42  ;;  %v21164_v27 = vpop.f32.mrb[55].mxu0  ;;  %v14490_v42 = vmax.f32 %v14412_v23, %v14451_v9  ;;  %v14631_v48 = vmax.f32 %v14475_v55, %v14592_v34  ;;  %v14516_v2 = vld [vmem:[#allocation3 + $0x5a] sm:$0xff]  ;;  %v14713_v25 = vmax.f32 %v14674_v61, 0.0  ;;  %v14399_v34 = vld [vmem:[#allocation3 + $0x48] sm:$0xff] }
 0xd00   : > { %21319 = vmatprep.subr.bf16.mxu1 %v21318_v31  ;;  %v14645_v26 = vmax.f32 %v14489_v20, %v14606_v33  ;;  %v14529_v60 = vld [vmem:[#allocation3 + $0xc2] sm:$0xff]  ;;  %v14729_v39 = vmax.f32 %v14690_v40, 0.0  ;;  %v14413_v6 = vld [vmem:[#allocation3 + $0xb8] sm:$0xff]  ;;  %v14630_v63 = vmax.f32 %v14474_v47, %v14591_v51  ;;  %v14477_v53 = vmax.f32 %v14399_v34, %v14438_v41 }
 0xd01   : > { %21321 = vmatpush3.bf16.msra.mxu1 %v21320_v5  ;;  %v14568_v30 = vld [vmem:[#allocation3 + $0xc3] sm:$0xff]  ;;  %14375 = vst.msk [vmem:[#allocation3 + $0xd8] sm:$0xff] %vm440_vm1, %v21384_v24  ;;  %v14555_v1 = vld [vmem:[#allocation3 + $0x5b] sm:$0xff]  ;;  %v14491_v37 = vmax.f32 %v14413_v6, %v14452_v36  ;;  %v14515_v31 = vld [vmem:[#allocation3 + $0x52] sm:$0xff]  ;;  %v21324_v33 = vpack.c.bf16 %v14714_v57, %v14713_v25  ;;  %v14677_v21 = vadd.f32 %v27924_v29, %v14631_v48 }
 0xd02   : > { %v14691_v15 = vadd.f32 %v27924_v29, %v14645_v26  ;;  %v14607_v22 = vmax.f32 %v14529_v60, %v14568_v30  ;;  %v14243_v11 = vpop.f32.mrb[56].mxu0  ;;  %v14554_v20 = vld [vmem:[#allocation3 + $0x53] sm:$0xff]  ;;  %v14453_v54 = vld [vmem:[#allocation3 + $0xc1] sm:$0xff]  ;;  %v14594_v10 = vmax.f32 %v14516_v2, %v14555_v1  ;;  %v14676_v27 = vadd.f32 %v27924_v29, %v14630_v63  ;;  %v14518_v48 = vld [vmem:[#allocation3 + $0x6a] sm:$0xff] }
 0xd03   : > { %v21385_v59 = vadd.f32 %v14243_v11, %v27362_v49  ;;  %v21167_v0 = vpop.f32.mrb[57].mxu0  ;;  %v14437_v24 = vld [vmem:[#allocation3 + $0x41] sm:$0xff]  ;;  %v14593_v61 = vmax.f32 %v14515_v31, %v14554_v20  ;;  %v14716_v51 = vmax.f32 %v14677_v21, 0.0  ;;  %v14401_v21 = vld [vmem:[#allocation3 + $0x58] sm:$0xff] }
 0xd04   : > { %v14730_v3 = vmax.f32 %v14691_v15, 0.0  ;;  %v14646_v46 = vmax.f32 %v14490_v42, %v14607_v22  ;;  %v14530_v62 = vld [vmem:[#allocation3 + $0xca] sm:$0xff]  ;;  %v14414_v26 = vld [vmem:[#allocation3 + $0xc0] sm:$0xff]  ;;  %v14633_v22 = vmax.f32 %v14477_v53, %v14594_v10  ;;  %v14715_v0 = vmax.f32 %v14676_v27, 0.0 }
 0xd05   : > { %v14569_v7 = vld [vmem:[#allocation3 + $0xcb] sm:$0xff]  ;;  %14376 = vst.msk [vmem:[#allocation3 + $0xe0] sm:$0xff] %vm440_vm1, %v21385_v59  ;;  %v14398_v30 = vld [vmem:[#allocation3 + $0x40] sm:$0xff] }
 0xd06   : > { %v21322_v58 = vpack.c.bf16 %v14730_v3, %v14729_v39  ;;  %v14608_v28 = vmax.f32 %v14530_v62, %v14569_v7  ;;  %v14248_v49 = vpop.f32.mrb[58].mxu0  ;;  %v14692_v9 = vadd.f32 %v27924_v29, %v14646_v46  ;;  %v14454_v15 = vld [vmem:[#allocation3 + $0xc9] sm:$0xff]  ;;  %v14476_v42 = vmax.f32 %v14398_v30, %v14437_v24  ;;  %v14440_v62 = vld [vmem:[#allocation3 + $0x59] sm:$0xff] }
 0xd07   : > { %v21386_v12 = vadd.f32 %v14248_v49, %v27367_v56  ;;  %v21170_v5 = vpop.f32.mrb[59].mxu0  ;;  %v14492_v56 = vmax.f32 %v14414_v26, %v14453_v54  ;;  %v14557_v59 = vld [vmem:[#allocation3 + $0x6b] sm:$0xff]  ;;  %v14517_v7 = vld [vmem:[#allocation3 + $0x62] sm:$0xff] }
 0xd08   : > { %21323 = vmatprep.subr.bf16.mxu1 %v21322_v58  ;;  %v14647_v50 = vmax.f32 %v14491_v37, %v14608_v28  ;;  %v14531_v40 = vld [vmem:[#allocation3 + $0xd2] sm:$0xff]  ;;  %v14731_v57 = vmax.f32 %v14692_v9, 0.0  ;;  %v14415_v39 = vld [vmem:[#allocation3 + $0xc8] sm:$0xff]  ;;  %v14632_v2 = vmax.f32 %v14476_v42, %v14593_v61  ;;  %v21328_v58 = vpack.c.bf16 %v14716_v51, %v14715_v0  ;;  %v14559_v42 = vld [vmem:[#allocation3 + $0x7b] sm:$0xff] }
 0xd09   : > { %21325 = vmatpush3.bf16.msra.mxu1 %v21324_v33  ;;  %v14570_v19 = vld [vmem:[#allocation3 + $0xd3] sm:$0xff]  ;;  %14377 = vst.msk [vmem:[#allocation3 + $0xe8] sm:$0xff] %vm440_vm1, %v21386_v12  ;;  %v14493_v25 = vmax.f32 %v14415_v39, %v14454_v15  ;;  %v14556_v63 = vld [vmem:[#allocation3 + $0x63] sm:$0xff]  ;;  %v14679_v37 = vadd.f32 %v27924_v29, %v14633_v22  ;;  %v14596_v41 = vmax.f32 %v14518_v48, %v14557_v59 }
 0xd0a   : > { %v14693_v23 = vadd.f32 %v27924_v29, %v14647_v50  ;;  %v14609_v60 = vmax.f32 %v14531_v40, %v14570_v19  ;;  %v14253_v55 = vpop.f32.mrb[60].mxu0  ;;  %v14455_v28 = vld [vmem:[#allocation3 + $0xd1] sm:$0xff]  ;;  %v14678_v10 = vadd.f32 %v27924_v29, %v14632_v2  ;;  %v14479_v9 = vmax.f32 %v14401_v21, %v14440_v62  ;;  %v14520_v15 = vld [vmem:[#allocation3 + $0x7a] sm:$0xff]  ;;  %v14442_v0 = vld [vmem:[#allocation3 + $0x69] sm:$0xff] }
 0xd0b   : > { %v21387_v4 = vadd.f32 %v14253_v55, %v27405_v13  ;;  %v21173_v11 = vpop.f32.mrb[61].mxu0  ;;  %v14439_v54 = vld [vmem:[#allocation3 + $0x51] sm:$0xff]  ;;  %v14595_v34 = vmax.f32 %v14517_v7, %v14556_v63  ;;  %v14718_v19 = vmax.f32 %v14679_v37, 0.0 }
 0xd0c   : > { %v14732_v36 = vmax.f32 %v14693_v23, 0.0  ;;  %v14648_v47 = vmax.f32 %v14492_v56, %v14609_v60  ;;  %v14532_v3 = vld [vmem:[#allocation3 + $0xda] sm:$0xff]  ;;  %v14416_v12 = vld [vmem:[#allocation3 + $0xd0] sm:$0xff]  ;;  %v14635_v23 = vmax.f32 %v14479_v9, %v14596_v41  ;;  %v14717_v22 = vmax.f32 %v14678_v10, 0.0 }
 0xd0d   : > { %v14571_v46 = vld [vmem:[#allocation3 + $0xdb] sm:$0xff]  ;;  %14378 = vst.msk [vmem:[#allocation3 + $0xf0] sm:$0xff] %vm440_vm1, %v21387_v4  ;;  %v14400_v26 = vld [vmem:[#allocation3 + $0x50] sm:$0xff] }
 0xd0e   : > { %v21326_v1 = vpack.c.bf16 %v14732_v36, %v14731_v57  ;;  %v14610_v6 = vmax.f32 %v14532_v3, %v14571_v46  ;;  %v14258_v13 = vpop.f32.mrb[62].mxu0  ;;  %v14694_v33 = vadd.f32 %v27924_v29, %v14648_v47  ;;  %v14456_v53 = vld [vmem:[#allocation3 + $0xd9] sm:$0xff]  ;;  %v14478_v61 = vmax.f32 %v14400_v26, %v14439_v54 }
 0xd0f   : > { %v21388_v31 = vadd.f32 %v14258_v13, %v27410_v32  ;;  %v21176_v20 = vpop.f32.mrb[63].mxu0  ;;  %v14494_v32 = vmax.f32 %v14416_v12, %v14455_v28  ;;  %v14417_v4 = vld [vmem:[#allocation3 + $0xd8] sm:$0xff]  ;;  %v21332_v46 = vpack.c.bf16 %v14718_v19, %v14717_v22  ;;  %v14681_v2 = vadd.f32 %v27924_v29, %v14635_v23  ;;  %v14403_v13 = vld [vmem:[#allocation3 + $0x68] sm:$0xff]  ;;  %v14418_v28 = vld [vmem:[#allocation3 + $0xe0] sm:$0xff] }
 0xd10   : > { %21327 = vmatprep.subr.bf16.mxu1 %v21326_v1  ;;  %v14649_v49 = vmax.f32 %v14493_v25, %v14610_v6  ;;  %v14533_v5 = vld [vmem:[#allocation3 + $0xe2] sm:$0xff]  ;;  %v14733_v30 = vmax.f32 %v14694_v33, 0.0  ;;  %v14634_v36 = vmax.f32 %v14478_v61, %v14595_v34  ;;  %v14495_v48 = vmax.f32 %v14417_v4, %v14456_v53  ;;  %v14519_v39 = vld [vmem:[#allocation3 + $0x72] sm:$0xff] }
 0xd11   : > { %21329 = vmatpush3.bf16.msra.mxu1 %v21328_v58  ;;  %v14572_v50 = vld [vmem:[#allocation3 + $0xe3] sm:$0xff]  ;;  %14379 = vst.msk [vmem:[#allocation3 + $0xf8] sm:$0xff] %vm440_vm1, %v21388_v31  ;;  %v14558_v3 = vld [vmem:[#allocation3 + $0x73] sm:$0xff]  ;;  %v14598_v25 = vmax.f32 %v14520_v15, %v14559_v42  ;;  %v14481_v20 = vmax.f32 %v14403_v13, %v14442_v0  ;;  %v14720_v12 = vmax.f32 %v14681_v2, 0.0  ;;  %v14561_v19 = vld [vmem:[#allocation3 + $0x8b] sm:$0xff] }
 0xd12   : > { %v14695_v24 = vadd.f32 %v27924_v29, %v14649_v49  ;;  %v14611_v27 = vmax.f32 %v14533_v5, %v14572_v50  ;;  %v14263_v40 = vpop.f32.mrb[64].mxu0  ;;  %v14457_v1 = vld [vmem:[#allocation3 + $0xe1] sm:$0xff]  ;;  %v14680_v37 = vadd.f32 %v27924_v29, %v14634_v36  ;;  %v14597_v49 = vmax.f32 %v14519_v39, %v14558_v3  ;;  %v14444_v15 = vld [vmem:[#allocation3 + $0x79] sm:$0xff]  ;;  %v14443_v3 = vld [vmem:[#allocation3 + $0x71] sm:$0xff] }
 0xd13   : > { %v21389_v56 = vadd.f32 %v14263_v40, %v27415_v43  ;;  %v21179_v60 = vpop.f32.mrb[65].mxu0  ;;  %v14441_v58 = vld [vmem:[#allocation3 + $0x61] sm:$0xff]  ;;  %v14637_v9 = vmax.f32 %v14481_v20, %v14598_v25  ;;  %v14522_v40 = vld [vmem:[#allocation3 + $0x8a] sm:$0xff]  ;;  %v14405_v39 = vld [vmem:[#allocation3 + $0x78] sm:$0xff] }
 0xd14   : > { %v14734_v55 = vmax.f32 %v14695_v24, 0.0  ;;  %v14650_v51 = vmax.f32 %v14494_v32, %v14611_v27  ;;  %v14534_v11 = vld [vmem:[#allocation3 + $0xea] sm:$0xff]  ;;  %v14402_v54 = vld [vmem:[#allocation3 + $0x60] sm:$0xff]  ;;  %v14719_v53 = vmax.f32 %v14680_v37, 0.0  ;;  %v14600_v36 = vmax.f32 %v14522_v40, %v14561_v19 }
 0xd15   : > { %v14573_v57 = vld [vmem:[#allocation3 + $0xeb] sm:$0xff]  ;;  %14380 = vst.msk [vmem:[#allocation3 + $0x100] sm:$0xff] %vm440_vm1, %v21389_v56  ;;  %v14480_v50 = vmax.f32 %v14402_v54, %v14441_v58  ;;  %v14521_v42 = vld [vmem:[#allocation3 + $0x82] sm:$0xff]  ;;  %v14483_v25 = vmax.f32 %v14405_v39, %v14444_v15 }
 0xd16   : > { %v21330_v47 = vpack.c.bf16 %v14734_v55, %v14733_v30  ;;  %v14612_v59 = vmax.f32 %v14534_v11, %v14573_v57  ;;  %v14268_v43 = vpop.f32.mrb[66].mxu0  ;;  %v14696_v63 = vadd.f32 %v27924_v29, %v14650_v51  ;;  %v14458_v5 = vld [vmem:[#allocation3 + $0xe9] sm:$0xff]  ;;  %v21336_v4 = vpack.c.bf16 %v14720_v12, %v14719_v53 }
 0xd17   : > { %v21390_v6 = vadd.f32 %v14268_v43, %v27420_v44  ;;  %v21182_v62 = vpop.f32.mrb[67].mxu0  ;;  %v14496_v44 = vmax.f32 %v14418_v28, %v14457_v1  ;;  %v14419_v61 = vld [vmem:[#allocation3 + $0xe8] sm:$0xff]  ;;  %v14636_v60 = vmax.f32 %v14480_v50, %v14597_v49  ;;  %v14683_v11 = vadd.f32 %v27924_v29, %v14637_v9 }
 0xd18   : > { %21331 = vmatprep.subr.bf16.mxu1 %v21330_v47  ;;  %v14651_v7 = vmax.f32 %v14495_v48, %v14612_v59  ;;  %v14535_v41 = vld [vmem:[#allocation3 + $0xf2] sm:$0xff]  ;;  %v14735_v32 = vmax.f32 %v14696_v63, 0.0  ;;  %v14497_v55 = vmax.f32 %v14419_v61, %v14458_v5  ;;  %v14560_v22 = vld [vmem:[#allocation3 + $0x83] sm:$0xff] }
 0xd19   : > { %21333 = vmatpush3.bf16.msra.mxu1 %v21332_v46  ;;  %v14574_v31 = vld [vmem:[#allocation3 + $0xf3] sm:$0xff]  ;;  %14381 = vst.msk [vmem:[#allocation3 + $0x108] sm:$0xff] %vm440_vm1, %v21390_v6  ;;  %v14682_v43 = vadd.f32 %v27924_v29, %v14636_v60  ;;  %v14599_v6 = vmax.f32 %v14521_v42, %v14560_v22  ;;  %v14722_v58 = vmax.f32 %v14683_v11, 0.0 }
 0xd1a   : > { %v14697_v33 = vadd.f32 %v27924_v29, %v14651_v7  ;;  %v14613_v21 = vmax.f32 %v14535_v41, %v14574_v31  ;;  %v14273_v10 = vpop.f32.mrb[68].mxu0  ;;  %v14459_v57 = vld [vmem:[#allocation3 + $0xf1] sm:$0xff]  ;;  %v14639_v41 = vmax.f32 %v14483_v25, %v14600_v36 }
 0xd1b   : > { %v21391_v34 = vadd.f32 %v14273_v10, %v27425_v45  ;;  %v21185_v24 = vpop.f32.mrb[69].mxu0  ;;  %v14420_v46 = vld [vmem:[#allocation3 + $0xf0] sm:$0xff]  ;;  %v14421_v54 = vld [vmem:[#allocation3 + $0xf8] sm:$0xff] }
 0xd1c   : > { %v14736_v27 = vmax.f32 %v14697_v33, 0.0  ;;  %v14652_v26 = vmax.f32 %v14496_v44, %v14613_v21  ;;  %v14536_v23 = vld [vmem:[#allocation3 + $0xfa] sm:$0xff]  ;;  %v14404_v63 = vld [vmem:[#allocation3 + $0x70] sm:$0xff]  ;;  %v14721_v21 = vmax.f32 %v14682_v43, 0.0 }
 0xd1d   : > { %v14575_v56 = vld [vmem:[#allocation3 + $0xfb] sm:$0xff]  ;;  %14382 = vst.msk [vmem:[#allocation3 + $0x110] sm:$0xff] %vm440_vm1, %v21391_v34  ;;  %v14482_v28 = vmax.f32 %v14404_v63, %v14443_v3 }
 0xd1e   : > { %v21334_v30 = vpack.c.bf16 %v14736_v27, %v14735_v32  ;;  %v14614_v51 = vmax.f32 %v14536_v23, %v14575_v56  ;;  %v14278_v45 = vpop.f32.mrb[70].mxu0  ;;  %v14698_v0 = vadd.f32 %v27924_v29, %v14652_v26  ;;  %v14460_v37 = vld [vmem:[#allocation3 + $0xf9] sm:$0xff]  ;;  %v21340_v32 = vpack.c.bf16 %v14722_v58, %v14721_v21 }
 0xd1f   : > { %v21392_v47 = vadd.f32 %v14278_v45, %v27430_v35  ;;  %v21188_v48 = vpop.f32.mrb[71].mxu0  ;;  %v14498_v35 = vmax.f32 %v14420_v46, %v14459_v57  ;;  %v14638_v5 = vmax.f32 %v14482_v28, %v14599_v6  ;;  %v14499_v9 = vmax.f32 %v14421_v54, %v14460_v37  ;;  %v14422_v23 = vld [vmem:[#allocation3 + $0x100] sm:$0xff] }
 0xd20   : > { %21335 = vmatprep.subr.bf16.mxu1 %v21334_v30  ;;  %v14653_v59 = vmax.f32 %v14497_v55, %v14614_v51  ;;  %v14537_v2 = vld [vmem:[#allocation3 + $0x102] sm:$0xff]  ;;  %v14737_v49 = vmax.f32 %v14698_v0, 0.0  ;;  %v14685_v27 = vadd.f32 %v27924_v29, %v14639_v41 }
 0xd21   : > { %21337 = vmatpush3.bf16.msra.mxu1 %v21336_v4  ;;  %v14576_v1 = vld [vmem:[#allocation3 + $0x103] sm:$0xff]  ;;  %14383 = vst.msk [vmem:[#allocation3 + $0x118] sm:$0xff] %vm440_vm1, %v21392_v47  ;;  %v14684_v61 = vadd.f32 %v27924_v29, %v14638_v5 }
 0xd22   : > { %v14699_v62 = vadd.f32 %v27924_v29, %v14653_v59  ;;  %v14615_v7 = vmax.f32 %v14537_v2, %v14576_v1  ;;  %v14283_v13 = vpop.f32.mrb[72].mxu0  ;;  %v14461_v26 = vld [vmem:[#allocation3 + $0x101] sm:$0xff]  ;;  %v14724_v42 = vmax.f32 %v14685_v27, 0.0 }
 0xd23   : > { %v21393_v31 = vadd.f32 %v14283_v13, %v27435_v17  ;;  %v21191_v20 = vpop.f32.mrb[73].mxu0  ;;  %v14500_v55 = vmax.f32 %v14422_v23, %v14461_v26  ;;  %v14723_v36 = vmax.f32 %v14684_v61, 0.0  ;;  %v14423_v47 = vld [vmem:[#allocation3 + $0x108] sm:$0xff]  ;;  %v14752_v13 = vld [vmem:[%s28105_s6 + $0x20] sm:$0xff] }
 0xd24   : > { %v14738_v33 = vmax.f32 %v14699_v62, 0.0  ;;  %v14654_v44 = vmax.f32 %v14498_v35, %v14615_v7  ;;  %v14538_v10 = vld [vmem:[#allocation3 + $0x10a] sm:$0xff] }
 0xd25   : > { %v14577_v12 = vld [vmem:[#allocation3 + $0x10b] sm:$0xff]  ;;  %14384 = vst.msk [vmem:[#allocation3 + $0x120] sm:$0xff] %vm440_vm1, %v21393_v31  ;;  %v21344_v46 = vpack.c.bf16 %v14724_v42, %v14723_v36 }
 0xd26   : > { %v21338_v50 = vpack.c.bf16 %v14738_v33, %v14737_v49  ;;  %v14616_v34 = vmax.f32 %v14538_v10, %v14577_v12  ;;  %v14288_v24 = vpop.f32.mrb[74].mxu0  ;;  %v14700_v53 = vadd.f32 %v27924_v29, %v14654_v44  ;;  %v14424_v35 = vld [vmem:[#allocation3 + $0x110] sm:$0xff]  ;;  %v14751_v49 = vld [vmem:[%s28105_s6 + $0x18] sm:$0xff] }
 0xd27   : > { %v21394_v17 = vadd.f32 %v14288_v24, %v27440_v8  ;;  %v21194_v40 = vpop.f32.mrb[75].mxu0  ;;  %v14462_v8 = vld [vmem:[#allocation3 + $0x109] sm:$0xff]  ;;  %v14754_v24 = vld [vmem:[%s28105_s6 + $0x30] sm:$0xff] }
 0xd28   : > { %21339 = vmatprep.subr.bf16.mxu1 %v21338_v50  ;;  %v14655_v19 = vmax.f32 %v14499_v9, %v14616_v34  ;;  %v14539_v56 = vld [vmem:[#allocation3 + $0x112] sm:$0xff]  ;;  %v14739_v4 = vmax.f32 %v14700_v53, 0.0  ;;  %v14501_v39 = vmax.f32 %v14423_v47, %v14462_v8  ;;  %v14755_v50 = vld [vmem:[%s28105_s6 + $0x38] sm:$0xff] }
 0xd29   : > { %21341 = vmatpush3.bf16.msra.mxu1 %v21340_v32  ;;  %v14578_v60 = vld [vmem:[#allocation3 + $0x113] sm:$0xff]  ;;  %14385 = vst.msk [vmem:[#allocation3 + $0x128] sm:$0xff] %vm440_vm1, %v21394_v17 }
 0xd2a   : > { %v14701_v30 = vadd.f32 %v27924_v29, %v14655_v19  ;;  %v14617_v51 = vmax.f32 %v14539_v56, %v14578_v60  ;;  %v14293_v15 = vpop.f32.mrb[76].mxu0  ;;  %v14463_v2 = vld [vmem:[#allocation3 + $0x111] sm:$0xff]  ;;  %v14758_v19 = vld [vmem:[%s28105_s6 + $0x50] sm:$0xff] }
 0xd2b   : > { %v21395_v22 = vadd.f32 %v14293_v15, %v27445_v18  ;;  %v21197_v45 = vpop.f32.mrb[77].mxu0  ;;  %v14748_v18 = vld [vmem:[%s28105_s6] sm:$0xff]  ;;  %v14502_v58 = vmax.f32 %v14424_v35, %v14463_v2  ;;  %v14425_v54 = vld [vmem:[#allocation3 + $0x118] sm:$0xff]  ;;  %v14767_v35 = vld [vmem:[%s28105_s6 + $0x98] sm:$0x1] }
 0xd2c   : > { %v14740_v11 = vmax.f32 %v14701_v30, 0.0  ;;  %v14656_v57 = vmax.f32 %v14500_v55, %v14617_v51  ;;  %v14540_v48 = vld [vmem:[#allocation3 + $0x11a] sm:$0xff] }
 0xd2d   : > { %v14579_v59 = vld [vmem:[#allocation3 + $0x11b] sm:$0xff]  ;;  %14386 = vst.msk [vmem:[#allocation3 + $0x130] sm:$0xff] %vm440_vm1, %v21395_v22 }
 0xd2e   : > { %v21342_v0 = vpack.c.bf16 %v14740_v11, %v14739_v4  ;;  %v14618_v3 = vmax.f32 %v14540_v48, %v14579_v59  ;;  %v14298_v43 = vpop.f32.mrb[78].mxu0  ;;  %v14702_v62 = vadd.f32 %v27924_v29, %v14656_v57  ;;  %v14464_v41 = vld [vmem:[#allocation3 + $0x119] sm:$0xff] }
 0xd2f   : > { %v21396_v1 = vadd.f32 %v14298_v43, %v27450_v52  ;;  %v21200_v25 = vpop.f32.mrb[79].mxu0  ;;  %v14426_v26 = vld [vmem:[#allocation3 + $0x120] sm:$0xff]  ;;  %v14757_v60 = vld [vmem:[%s28105_s6 + $0x48] sm:$0xff] }
 0xd30   : > { %21343 = vmatprep.subr.bf16.mxu1 %v21342_v0  ;;  %v14657_v6 = vmax.f32 %v14501_v39, %v14618_v3  ;;  %v14541_v7 = vld [vmem:[#allocation3 + $0x122] sm:$0xff]  ;;  %v14741_v33 = vmax.f32 %v14702_v62, 0.0  ;;  %v14761_v51 = vld [vmem:[%s28105_s6 + $0x68] sm:$0xff]  ;;  %v14760_v3 = vld [vmem:[%s28105_s6 + $0x60] sm:$0xff] }
 0xd31   : > { %21345 = vmatpush3.bf16.msra.mxu1 %v21344_v46  ;;  %v14580_v63 = vld [vmem:[#allocation3 + $0x123] sm:$0xff]  ;;  %14387 = vst.msk [vmem:[#allocation3 + $0x138] sm:$0xff] %vm440_vm1, %v21396_v1  ;;  %v14764_v46 = vld [vmem:[%s28105_s6 + $0x80] sm:$0xff] }
 0xd32   : > { %21346 = vmatprep.subr.bf16.mxu1 %v23398_v38  ;;  %v14703_v52 = vadd.f32 %v27924_v29, %v14657_v6  ;;  %v14619_v37 = vmax.f32 %v14541_v7, %v14580_v63  ;;  %v14303_v28 = vpop.f32.mrb[80].mxu0  ;;  %v14465_v34 = vld [vmem:[#allocation3 + $0x121] sm:$0xff] }
 0xd33   : > { %v21397_v31 = vadd.f32 %v14303_v28, %v27455_v14  ;;  %v21203_v20 = vpop.f32.mrb[81].mxu0  ;;  %v14503_v14 = vmax.f32 %v14425_v54, %v14464_v41  ;;  %v14504_v61 = vmax.f32 %v14426_v26, %v14465_v34  ;;  %v14427_v15 = vld [vmem:[#allocation3 + $0x128] sm:$0xff]  ;;  %v14765_v28 = vld [vmem:[%s28105_s6 + $0x88] sm:$0xff]  ;;  %v14768_v41 = vld [vmem:[%s28105_s6 + $0xa0] sm:$0x1] }
 0xd34   : > { %14860 = vmatmul.mubr.f32.vlgmr.msra.gmra.mrb[162].mxu1 %v14748_v18  ;;  %v14742_v44 = vmax.f32 %v14703_v52, 0.0  ;;  %v14658_v21 = vmax.f32 %v14502_v58, %v14619_v37  ;;  %v14542_v10 = vld [vmem:[#allocation3 + $0x12a] sm:$0xff]  ;;  %v14762_v37 = vld [vmem:[%s28105_s6 + $0x70] sm:$0xff] }
 0xd35   : > { %14864 = vmatprep.mubr.f32.mxu1 %v14752_v13  ;;  %v14581_v12 = vld [vmem:[#allocation3 + $0x12b] sm:$0xff]  ;;  %14389 = vst.msk [vmem:[#allocation3 + $0x140] sm:$0xf] %vm14388_vm5, %v21397_v31  ;;  %v14753_v13 = vld [vmem:[%s28105_s6 + $0x28] sm:$0xff] }
 0xd36   : > { %v21347_v5 = vpack.c.bf16 %v14742_v44, %v14741_v33  ;;  %v14620_v9 = vmax.f32 %v14542_v10, %v14581_v12  ;;  %v14704_v27 = vadd.f32 %v27924_v29, %v14658_v21  ;;  %v14466_v56 = vld [vmem:[#allocation3 + $0x129] sm:$0xff]  ;;  %v14467_v47 = vld [vmem:[#allocation3 + $0x131] sm:$0x1] }
 0xd37   : > { %v14505_v11 = vmax.f32 %v14427_v15, %v14466_v56  ;;  %v14428_v36 = vld [vmem:[#allocation3 + $0x130] sm:$0x1]  ;;  %v14763_v6 = vld [vmem:[%s28105_s6 + $0x78] sm:$0xff] }
 0xd38   : > { %14865 = vmatmul.mubr.f32.gmra.mrb[164].mxu1 %v14751_v49  ;;  %v14659_v32 = vmax.f32 %v14503_v14, %v14620_v9  ;;  %v14543_v17 = vld [vmem:[#allocation3 + $0x132] sm:$0xff]  ;;  %v14743_v30 = vmax.f32 %v14704_v27, 0.0  ;;  %v14506_v43 = vmax.f32 %v14428_v36, %v14467_v47  ;;  %v14759_v58 = vld [vmem:[%s28105_s6 + $0x58] sm:$0xff] }
 0xd39   : > { %21348 = vmatpush3.bf16.msra.mxu1 %v21347_v5  ;;  %14869 = vmatprep.mubr.f32.mxu1 %v14755_v50  ;;  %v14582_v40 = vld [vmem:[#allocation3 + $0x133] sm:$0xff] }
 0xd3a   : > { %21349 = vmatprep.subr.bf16.mxu1 %v23398_v38  ;;  %v14705_v53 = vadd.f32 %v27924_v29, %v14659_v32  ;;  %v14621_v23 = vmax.f32 %v14543_v17, %v14582_v40  ;;  %v14756_v52 = vld [vmem:[%s28105_s6 + $0x40] sm:$0xff] }
 0xd3c   : > { %14870 = vmatmul.mubr.f32.gmra.mrb[166].mxu1 %v14754_v24  ;;  %v14744_v55 = vmax.f32 %v14705_v53, 0.0  ;;  %v14660_v42 = vmax.f32 %v14504_v61, %v14621_v23  ;;  %v14544_v8 = vld [vmem:[#allocation3 + $0x13a] sm:$0xff]  ;;  %v14545_v45 = vld [vmem:[#allocation3 + $0x142] sm:$0x1]  ;;  %v14584_v48 = vld [vmem:[#allocation3 + $0x143] sm:$0x1] }
 0xd3d   : > { %14874 = vmatprep.mubr.f32.mxu1 %v14758_v19  ;;  %v14583_v22 = vld [vmem:[#allocation3 + $0x13b] sm:$0xff]  ;;  %v14623_v59 = vmax.f32 %v14545_v45, %v14584_v48 }
 0xd3e   : > { %v21350_v4 = vpack.c.bf16 %v14744_v55, %v14743_v30  ;;  %v14622_v57 = vmax.f32 %v14544_v8, %v14583_v22  ;;  %v14706_v39 = vadd.f32 %v27924_v29, %v14660_v42 }
 0xd3f   : > { %v14662_v1 = vmax.f32 %v14506_v43, %v14623_v59 }
 0xd40   : > { %14875 = vmatmul.mubr.f32.gmra.mrb[168].mxu1 %v14757_v60  ;;  %v14661_v0 = vmax.f32 %v14505_v11, %v14622_v57  ;;  %v14745_v25 = vmax.f32 %v14706_v39, 0.0 }
 0xd41   : > { %21351 = vmatpush3.bf16.msra.mxu1 %v21350_v4  ;;  %14879 = vmatprep.mubr.f32.mxu1 %v14761_v51  ;;  %v14708_v7 = vadd.f32 %v27924_v29, %v14662_v1 }
 0xd42   : > { %21352 = vmatprep.subr.bf16.mxu1 %v23398_v38  ;;  %v14707_v2 = vadd.f32 %v27924_v29, %v14661_v0  ;;  %v14766_v38 = vld [vmem:[%s28105_s6 + $0x90] sm:$0x1] }
 0xd43   : > { %v14747_v63 = vmax.f32 %v14708_v7, 0.0  ;;  %v14750_v29 = vld [vmem:[%s28105_s6 + $0x10] sm:$0xff] }
 0xd44   : > { %14880 = vmatmul.mubr.f32.gmra.mrb[170].mxu1 %v14760_v3  ;;  %v14746_v18 = vmax.f32 %v14707_v2, 0.0 }
 0xd45   : > { %14884 = vmatprep.mubr.f32.mxu1 %v14764_v46 }
 0xd46   : > { %v21353_v62 = vpack.c.bf16 %v14746_v18, %v14745_v25 }
 0xd48   : > { %14885 = vmatmul.mubr.f32.gmra.mrb[172].mxu1 %v14763_v6 }
 0xd49   : > { %21354 = vmatpush3.bf16.msra.mxu1 %v21353_v62  ;;  %14889 = vmatprep.mubr.f32.mxu1 %v14767_v35 }
 0xd4a   : > { %21216 = vmatprep.subr.mxu1 %v28148_v16 }
 0xd4c   : > { %14890 = vmatmul.mubr.f32.gmra.mrb[174].mxu1 %v14766_v38 }
 0xd4d   : > { %21217 = vmatpush3.msk.msra.mxu1 %vm14791_vm6, %v14747_v63  ;;  %21218 = vmatprep.mubr.msk.f32.mxu1 %vm23396_vm0, %v28148_v16 }
 0xd50   : > { %21219 = vmatmul.mubr.msk.f32.vlgmr.msra.gmra.mrb[176].mxu1 %vm14769_vm7, %v14750_v29 }
 0xd51   : > { %21221 = vmatprep.mubr.msk.f32.mxu1 %vm23396_vm0, %v28148_v16 }
 0xd54   : > { %21222 = vmatmul.mubr.msk.f32.gmra.mrb[178].mxu1 %vm14769_vm7, %v14753_v13 }
 0xd55   : > { %21224 = vmatprep.mubr.msk.f32.mxu1 %vm23396_vm0, %v28148_v16 }
 0xd58   : > { %21225 = vmatmul.mubr.msk.f32.gmra.mrb[180].mxu1 %vm14769_vm7, %v14756_v52 }
 0xd59   : > { %21227 = vmatprep.mubr.msk.f32.mxu1 %vm23396_vm0, %v28148_v16 }
 0xd5c   : > { %21228 = vmatmul.mubr.msk.f32.gmra.mrb[182].mxu1 %vm14769_vm7, %v14759_v58 }
 0xd5d   : > { %21230 = vmatprep.mubr.msk.f32.mxu1 %vm23396_vm0, %v28148_v16 }
 0xd60   : > { %21231 = vmatmul.mubr.msk.f32.gmra.mrb[184].mxu1 %vm14769_vm7, %v14762_v37 }
 0xd61   : > { %21233 = vmatprep.mubr.msk.f32.mxu1 %vm23396_vm0, %v28148_v16 }
 0xd64   : > { %21234 = vmatmul.mubr.msk.f32.gmra.mrb[186].mxu1 %vm14769_vm7, %v14765_v28 }
 0xd65   : > { %21236 = vmatprep.mubr.msk.f32.mxu1 %vm23396_vm0, %v28148_v16 }
 0xd68   : > { %21237 = vmatmul.mubr.msk.f32.gmra.mrb[188].mxu1 %vm14769_vm7, %v14768_v41 }
 0xe07   : > { %v17642_v31 = vpop.f32.mrb[162].mxu1 }
 0xe08   : > { %v17643_v20 = vpop.f32.mrb[163].mxu1 }
 0xe09   : > { %v17644_v49 = vadd.f32 %v17643_v20, %v17642_v31 }
 0xe0b   : > { %v17645_v33 = vpop.f32.mrb[164].mxu1 }
 0xe0c   : > { %v17646_v44 = vpop.f32.mrb[165].mxu1 }
 0xe0d   : > { %v17647_v21 = vadd.f32 %v17646_v44, %v17645_v33 }
 0xe0f   : > { %v17648_v54 = vpop.f32.mrb[166].mxu1 }
 0xe10   : > { %v17649_v10 = vpop.f32.mrb[167].mxu1 }
 0xe11   : > { %v17650_v12 = vadd.f32 %v17649_v10, %v17648_v54 }
 0xe13   : > { %v17651_v5 = vpop.f32.mrb[168].mxu1 }
 0xe14   : > { %v17652_v50 = vpop.f32.mrb[169].mxu1 }
 0xe15   : > { %v17653_v14 = vadd.f32 %v17652_v50, %v17651_v5 }
 0xe17   : > { %v17654_v16 = vpop.f32.mrb[170].mxu1 }
 0xe18   : > { %v17655_v9 = vpop.f32.mrb[171].mxu1 }
 0xe19   : > { %v17656_v34 = vadd.f32 %v17655_v9, %v17654_v16 }
 0xe1b   : > { %v17657_v24 = vpop.f32.mrb[172].mxu1 }
 0xe1c   : > { %v17658_v32 = vpop.f32.mrb[173].mxu1 }
 0xe1d   : > { %v17659_v27 = vadd.f32 %v17658_v32, %v17657_v24 }
 0xe1f   : > { %v17660_v26 = vpop.f32.mrb[174].mxu1 }
 0xe20   : > { %v17661_v17 = vpop.f32.mrb[175].mxu1 }
 0xe21   : > { %v17662_v40 = vadd.f32 %v17661_v17, %v17660_v26 }
 0xe23   : > { %v14961_v19 = vpop.f32.mrb[176].mxu1 }
 0xe24   : > { %v14962_v53 = vadd.f32 %v17644_v49, %v14961_v19  ;;  %v21220_v61 = vpop.f32.mrb[177].mxu1 }
 0xe26   : > { %14995 = vst.msk [vmem:[%s278_s17] sm:$0xff] %vm440_vm1, %v14962_v53 }
 0xe27   : > { %v14966_v23 = vpop.f32.mrb[178].mxu1 }
 0xe28   : > { %v14967_v56 = vadd.f32 %v17647_v21, %v14966_v23  ;;  %v21223_v60 = vpop.f32.mrb[179].mxu1 }
 0xe2a   : > { %14996 = vst.msk [vmem:[%s278_s17 + $0x8] sm:$0xff] %vm440_vm1, %v14967_v56 }
 0xe2b   : > { %v14971_v30 = vpop.f32.mrb[180].mxu1 }
 0xe2c   : > { %v14972_v55 = vadd.f32 %v17650_v12, %v14971_v30  ;;  %v21226_v51 = vpop.f32.mrb[181].mxu1 }
 0xe2e   : > { %14997 = vst.msk [vmem:[%s278_s17 + $0x10] sm:$0xff] %vm440_vm1, %v14972_v55 }
 0xe2f   : > { %v14976_v15 = vpop.f32.mrb[182].mxu1 }
 0xe30   : > { %v14977_v42 = vadd.f32 %v17653_v14, %v14976_v15  ;;  %v21229_v8 = vpop.f32.mrb[183].mxu1 }
 0xe32   : > { %14998 = vst.msk [vmem:[%s278_s17 + $0x18] sm:$0xff] %vm440_vm1, %v14977_v42 }
 0xe33   : > { %v14981_v22 = vpop.f32.mrb[184].mxu1 }
 0xe34   : > { %v14982_v45 = vadd.f32 %v17656_v34, %v14981_v22  ;;  %v21232_v4 = vpop.f32.mrb[185].mxu1 }
 0xe36   : > { %14999 = vst.msk [vmem:[%s278_s17 + $0x20] sm:$0xff] %vm440_vm1, %v14982_v45 }
 0xe37   : > { %v14986_v11 = vpop.f32.mrb[186].mxu1 }
 0xe38   : > { %v14987_v57 = vadd.f32 %v17659_v27, %v14986_v11  ;;  %v21235_v36 = vpop.f32.mrb[187].mxu1 }
 0xe3a   : > { %15000 = vst.msk [vmem:[%s278_s17 + $0x28] sm:$0xff] %vm440_vm1, %v14987_v57 }
 0xe3b   : > { %v14991_v47 = vpop.f32.mrb[188].mxu1 }
 0xe3c   : > { %v14992_v48 = vadd.f32 %v17662_v40, %v14991_v47  ;;  %v21238_v59 = vpop.f32.mrb[189].mxu1 }
 0xe3e   : > { %15002 = vst.msk [vmem:[%s278_s17 + $0x30] sm:$0x1] %vm15001_vm8, %v14992_v48 }
 0xe3f PF: > { %s17_s24 = sadd.s32 1, %s23393_s24  }
 0xe40   : > { %p14_p4 = scmp.ge.s32.totalorder %s17_s24, 4  }
 0xe42   :  { %16 = sbr.rel (!%p14_p4) target bundleno = 1 (0x1), region = 105 }

</bundles_post_ra>
